<compile_context>
chip_gen: v5e
topology: v5e:2x2
jax: 0.10.0
libtpu: 0.0.40
codegen_flags: <defaults>
</compile_context>

<pallas_src>
import functools

import jax
import jax.numpy as jnp
from jax import lax
from jax.experimental import pallas as pl
from jax.experimental.pallas import tpu as pltpu

NEG_SLOPE = 0.01  # nn.LeakyReLU() default
BN_EPS = 1e-5


def _leaky(v):
    return jnp.where(v >= 0, v, NEG_SLOPE * v)


def inception_kernel(x_ref, wf_ref, w35_ref, w4_ref, sc_ref, bc_ref,
                     out_ref, pad_ref, padx_ref, *, H, W, C4):
    """One batch element per grid step.

    x_ref   : (1, H*W, Cin)           flattened-spatial input block
    wf_ref  : (Cin, 3*C4 + out_nc)    fused [conv1x1 | conv1x1_2 | conv1x1_3 | conv1x1_5]
    w35_ref : (25*2*C4, 2*C4)         block-diagonal im2col weight for [3x3 | 5x5]
    w4_ref  : (Cin, C4)               conv1x1_4 (after maxpool)
    sc/bc   : (1, out_nc)             concatenated folded-BN scale / bias [s1|s3|s5|s5]
    pad_ref : (H+4, W+4, 2*C4)        zero-padded [t2|t5] scratch  (pad = 2)
    padx_ref: (H+2, W+2, Cin)         -inf-padded input scratch for maxpool (pad = 1)
    """
    HW = x_ref.shape[1]
    Cin = x_ref.shape[2]
    C2 = 2 * C4

    xf = x_ref[0]                                   # (H*W, Cin)

    # ---- fused 1x1 convs: one MXU pass, then lane slices ---------------------
    z = jnp.dot(xf, wf_ref[...], preferred_element_type=jnp.float32)  # (HW, 3*C4+out_nc)
    y1 = z[:, 0:C4]                      # branch-1 pre-BN
    t25 = _leaky(z[:, C4:C4 + C2])       # [t2 | t5] -> inputs to 3x3 / 5x5 convs
    res = z[:, C4 + C2:]                 # conv1x1_5 residual, (HW, out_nc)

    # ---- branches 2+3: combined 3x3/5x5 conv as a single im2col matmul -------
    # Refresh only the zero halo strips + interior (halo rewritten every step so
    # this stays correct when the grid is split across cores).
    zero_tb = jnp.zeros((2, W + 4, C2), pad_ref.dtype)
    zero_lr = jnp.zeros((H, 2, C2), pad_ref.dtype)
    pad_ref[0:2, :, :] = zero_tb
    pad_ref[H + 2:H + 4, :, :] = zero_tb
    pad_ref[2:2 + H, 0:2, :] = zero_lr
    pad_ref[2:2 + H, W + 2:W + 4, :] = zero_lr
    pad_ref[2:2 + H, 2:2 + W, :] = t25.reshape(H, W, C2)

    cols = [pad_ref[dy:dy + H, dx:dx + W, :].reshape(HW, C2)
            for dy in range(5) for dx in range(5)]
    cols = jnp.concatenate(cols, axis=1)            # (HW, 25*2*C4)
    acc35 = jnp.dot(cols, w35_ref[...],
                    preferred_element_type=jnp.float32)  # (HW, 2*C4) = [acc3 | acc5]

    # ---- branch 4: maxpool 3x3 s1 p1 -> 1x1 conv ------------------------------
    ninf_tb = jnp.full((1, W + 2, Cin), -jnp.inf, padx_ref.dtype)
    ninf_lr = jnp.full((H, 1, Cin), -jnp.inf, padx_ref.dtype)
    padx_ref[0:1, :, :] = ninf_tb
    padx_ref[H + 1:H + 2, :, :] = ninf_tb
    padx_ref[1:1 + H, 0:1, :] = ninf_lr
    padx_ref[1:1 + H, W + 1:W + 2, :] = ninf_lr
    padx_ref[1:1 + H, 1:1 + W, :] = xf.reshape(H, W, Cin).astype(padx_ref.dtype)

    mp = padx_ref[0:H, 0:W, :]
    for dy in range(3):
        for dx in range(3):
            if dy == 0 and dx == 0:
                continue
            mp = jnp.maximum(mp, padx_ref[dy:dy + H, dx:dx + W, :])
    y4 = jnp.dot(mp.reshape(HW, Cin).astype(jnp.float32), w4_ref[...],
                 preferred_element_type=jnp.float32)          # (HW, C4)

    # ---- fused epilogue: BN scale/bias + LeakyReLU + residual in one pass -----
    cc = jnp.concatenate([y1, acc35, y4], axis=1)   # (HW, out_nc) = [y1|acc3|acc5|y4]
    out = _leaky(cc * sc_ref[...] + bc_ref[...]) + res
    out_ref[0] = out.astype(out_ref.dtype)


def inception_forward(x_nhwc, p):
    """x_nhwc: (N, H, W, Cin) float32.  p: dict of parameters (see init_params)."""
    N, H, W, Cin = x_nhwc.shape
    C4 = p["w1"].shape[1]
    out_nc = p["wres"].shape[1]
    C2 = 2 * C4

    # ---- fold weights (host/XLA side, done once per call) --------------------
    # fused 1x1 weight: [conv1x1 | conv1x1_2 | conv1x1_3 | conv1x1_5]
    wf = jnp.concatenate([p["w1"], p["w2a"], p["w5a"], p["wres"]], axis=1)
    # block-diagonal 5x5 weight holding both the 3x3 (embedded, pad-consistent)
    # and the 5x5 conv:  in-channels [t2|t5] -> out-channels [acc3|acc5]
    w35 = jnp.zeros((5, 5, C2, C2), jnp.float32)
    w35 = w35.at[1:4, 1:4, :C4, :C4].set(p["w3"])
    w35 = w35.at[:, :, C4:, C4:].set(p["w5"])
    w35 = w35.reshape(25 * C2, C2)
    # concatenated folded-BN scale / bias (branch4 reuses norm5x5, as in torch)
    sc = jnp.concatenate([p["s1"], p["s3"], p["s5"], p["s5"]], axis=1)
    bc = jnp.concatenate([p["b1"], p["b3"], p["b5"], p["b5"]], axis=1)

    x_flat = x_nhwc.reshape(N, H * W, Cin)

    kernel = functools.partial(inception_kernel, H=H, W=W, C4=C4)

    out_flat = pl.pallas_call(
        kernel,
        out_shape=jax.ShapeDtypeStruct((N, H * W, out_nc), jnp.float32),
        grid=(N,),
        in_specs=[
            pl.BlockSpec((1, H * W, Cin), lambda n: (n, 0, 0)),
            pl.BlockSpec(wf.shape, lambda n: (0, 0)),
            pl.BlockSpec(w35.shape, lambda n: (0, 0)),
            pl.BlockSpec(p["w4"].shape, lambda n: (0, 0)),
            pl.BlockSpec(sc.shape, lambda n: (0, 0)),
            pl.BlockSpec(bc.shape, lambda n: (0, 0)),
        ],
        out_specs=pl.BlockSpec((1, H * W, out_nc), lambda n: (n, 0, 0)),
        scratch_shapes=[
            pltpu.VMEM((H + 4, W + 4, C2), jnp.float32),       # zero-padded [t2|t5]
            pltpu.VMEM((H + 2, W + 2, Cin), x_nhwc.dtype),     # -inf padded x (maxpool)
        ],
        compiler_params=pltpu.CompilerParams(
            dimension_semantics=("parallel",)),
    )(x_flat, wf, w35, p["w4"], sc, bc)

    return out_flat.reshape(N, H, W, out_nc)


def init_params(key, in_nc, out_nc):
    """Deterministic synthetic parameters. Conv weights stored channels-last:
    1x1 -> (Cin, Cout); kxk -> (kH, kW, Cin, Cout). BN folded into scale/bias."""
    c4 = out_nc // 4
    ks = jax.random.split(key, 20)
    scale = 0.2

    def w(k, shape):
        return (scale * jax.random.normal(k, shape)).astype(jnp.float32)

    def bn(k, c):
        k1, k2, k3, k4 = jax.random.split(k, 4)
        gamma = 1.0 + 0.1 * jax.random.normal(k1, (c,))
        beta = 0.1 * jax.random.normal(k2, (c,))
        mean = 0.1 * jax.random.normal(k3, (c,))
        var = 1.0 + 0.1 * jax.random.uniform(k4, (c,))
        s = gamma / jnp.sqrt(var + BN_EPS)
        b = beta - mean * s
        return s.reshape(1, c).astype(jnp.float32), b.reshape(1, c).astype(jnp.float32)

    p = {
        "w1":   w(ks[0], (in_nc, c4)),          # conv1x1
        "w2a":  w(ks[1], (in_nc, c4)),          # conv1x1_2
        "w3":   w(ks[2], (3, 3, c4, c4)),       # conv3x3
        "w5a":  w(ks[3], (in_nc, c4)),          # conv1x1_3
        "w5":   w(ks[4], (5, 5, c4, c4)),       # conv5x5
        "w4":   w(ks[5], (in_nc, c4)),          # conv1x1_4
        "wres": w(ks[6], (in_nc, out_nc)),      # conv1x1_5
    }
    p["s1"], p["b1"] = bn(ks[7], c4)            # norm1x1
    p["s3"], p["b3"] = bn(ks[8], c4)            # norm3x3
    p["s5"], p["b5"] = bn(ks[9], c4)            # norm5x5 (also used by pooling branch)
    return p


def reference_forward(x_nhwc, p):
    """Pure-JAX reference (NHWC) mirroring the PyTorch forward."""
    dn = ("NHWC", "HWIO", "NHWC")

    def conv(x, w, pad):
        if w.ndim == 2:
            w = w.reshape(1, 1, *w.shape)
        return lax.conv_general_dilated(x, w, (1, 1), pad, dimension_numbers=dn)

    def bnorm(x, s, b):
        return x * s.reshape(1, 1, 1, -1) + b.reshape(1, 1, 1, -1)

    out1 = _leaky(bnorm(conv(x_nhwc, p["w1"], "VALID"), p["s1"], p["b1"]))

    t2 = _leaky(conv(x_nhwc, p["w2a"], "VALID"))
    out3 = _leaky(bnorm(conv(t2, p["w3"], [(1, 1), (1, 1)]), p["s3"], p["b3"]))

    t5 = _leaky(conv(x_nhwc, p["w5a"], "VALID"))
    out5 = _leaky(bnorm(conv(t5, p["w5"], [(2, 2), (2, 2)]), p["s5"], p["b5"]))

    mp = lax.reduce_window(x_nhwc, -jnp.inf, lax.max, (1, 3, 3, 1), (1, 1, 1, 1),
                           [(0, 0), (1, 1), (1, 1), (0, 0)])
    outp = _leaky(bnorm(conv(mp, p["w4"], "VALID"), p["s5"], p["b5"]))  # norm5x5, as in torch code

    res = conv(x_nhwc, p["wres"], "VALID")
    return jnp.concatenate([out1, out3, out5, outp], axis=-1) + res


if __name__ == "__main__":
    N, in_nc, H, W = 2, 4, 16, 16
    out_nc = 8

    key = jax.random.PRNGKey(0)
    kx, kp = jax.random.split(key)
    x_nchw = jax.random.normal(kx, (N, in_nc, H, W), dtype=jnp.float32)  # PyTorch NCHW input
    x_nhwc = jnp.transpose(x_nchw, (0, 2, 3, 1))                         # kernel layout: NHWC

    params = init_params(kp, in_nc, out_nc)

    out = inception_forward(x_nhwc, params)
    out = jax.block_until_ready(out)

    ref = jax.block_until_ready(reference_forward(x_nhwc, params))
    if not jnp.allclose(out, ref, atol=1e-3, rtol=1e-3):
        max_err = jnp.max(jnp.abs(out - ref))
        raise AssertionError(f"Pallas output mismatch vs reference, max_err={max_err}")

    print("KERNEL_OK")
</pallas_src>

<mosaic_0001>
module attributes {stable_mosaic.version = 11 : i64} {
  func.func @inception_kernel(%arg0: i32, %arg1: memref<1x256x4xf32, #tpu.memory_space<vmem>>, %arg2: memref<4x14xf32, #tpu.memory_space<vmem>>, %arg3: memref<100x4xf32, #tpu.memory_space<vmem>>, %arg4: memref<4x2xf32, #tpu.memory_space<vmem>>, %arg5: memref<1x8xf32, #tpu.memory_space<vmem>>, %arg6: memref<1x8xf32, #tpu.memory_space<vmem>>, %arg7: memref<1x256x8xf32, #tpu.memory_space<vmem>>, %arg8: memref<20x20x4xf32, #tpu.memory_space<vmem>>, %arg9: memref<18x18x4xf32, #tpu.memory_space<vmem>>) attributes {dimension_semantics = [#tpu.dimension_semantics<parallel>], iteration_bounds = array<i64: 2>, scalar_prefetch = 0 : i64, scratch_operands = 2 : i64, tpu.core_type = #tpu.core_type<tc>, window_params = [{transform_indices = @transform_0, window_bounds = array<i64: 1, 256, 4>}, {pipeline_mode = #tpu.pipeline_mode<synchronous>, transform_indices = @transform_1, window_bounds = array<i64: 4, 14>}, {pipeline_mode = #tpu.pipeline_mode<synchronous>, transform_indices = @transform_2, window_bounds = array<i64: 100, 4>}, {pipeline_mode = #tpu.pipeline_mode<synchronous>, transform_indices = @transform_3, window_bounds = array<i64: 4, 2>}, {pipeline_mode = #tpu.pipeline_mode<synchronous>, transform_indices = @transform_4, window_bounds = array<i64: 1, 8>}, {pipeline_mode = #tpu.pipeline_mode<synchronous>, transform_indices = @transform_5, window_bounds = array<i64: 1, 8>}, {transform_indices = @transform_6, window_bounds = array<i64: 1, 256, 8>}]} {
    %c0 = arith.constant 0 : index
    %c0_0 = arith.constant 0 : index
    %c0_1 = arith.constant 0 : index
    %0 = vector.load %arg1[%c0, %c0_0, %c0_1] : memref<1x256x4xf32, #tpu.memory_space<vmem>>, vector<1x256x4xf32>
    %1 = vector.shape_cast %0 : vector<1x256x4xf32> to vector<256x4xf32>
    %c0_2 = arith.constant 0 : index
    %c0_3 = arith.constant 0 : index
    %2 = vector.load %arg2[%c0_2, %c0_3] : memref<4x14xf32, #tpu.memory_space<vmem>>, vector<4x14xf32>
    %cst = arith.constant dense<0.000000e+00> : vector<256x14xf32>
    %3 = tpu.matmul %1, %2, %cst {dimension_numbers = #tpu.dot_dimension_numbers<[1], [0], [0], [1], [0, 0, 1, 1], [], []>} : vector<256x4xf32>, vector<4x14xf32>, vector<256x14xf32> -> vector<256x14xf32>
    %4 = vector.extract_strided_slice %3 {offsets = [0, 0], sizes = [256, 2], strides = [1, 1]} : vector<256x14xf32> to vector<256x2xf32>
    %5 = vector.extract_strided_slice %3 {offsets = [0, 2], sizes = [256, 4], strides = [1, 1]} : vector<256x14xf32> to vector<256x4xf32>
    %cst_4 = arith.constant 0.000000e+00 : f32
    %6 = vector.broadcast %cst_4 : f32 to vector<256x4xf32>
    %7 = arith.cmpf oge, %5, %6 : vector<256x4xf32>
    %cst_5 = arith.constant 0.00999999977 : f32
    %8 = vector.broadcast %cst_5 : f32 to vector<256x4xf32>
    %9 = arith.mulf %8, %5 : vector<256x4xf32>
    %10 = arith.select %7, %5, %9 : vector<256x4xi1>, vector<256x4xf32>
    %11 = vector.extract_strided_slice %3 {offsets = [0, 6], sizes = [256, 8], strides = [1, 1]} : vector<256x14xf32> to vector<256x8xf32>
    %cst_6 = arith.constant 0.000000e+00 : f32
    %12 = vector.broadcast %cst_6 : f32 to vector<2x20x4xf32>
    %cst_7 = arith.constant 0.000000e+00 : f32
    %13 = vector.broadcast %cst_7 : f32 to vector<16x2x4xf32>
    %c0_8 = arith.constant 0 : index
    %c0_9 = arith.constant 0 : index
    %c0_10 = arith.constant 0 : index
    %14 = vector.load %arg8[%c0_8, %c0_9, %c0_10] : memref<20x20x4xf32, #tpu.memory_space<vmem>>, vector<2x20x4xf32>
    tpu.vector_store %arg8[%c0_8, %c0_9, %c0_10], %12 {strides = array<i32>} : memref<20x20x4xf32, #tpu.memory_space<vmem>>, vector<2x20x4xf32>,
    %c18 = arith.constant 18 : index
    %c0_11 = arith.constant 0 : index
    %c0_12 = arith.constant 0 : index
    %15 = vector.load %arg8[%c18, %c0_11, %c0_12] : memref<20x20x4xf32, #tpu.memory_space<vmem>>, vector<2x20x4xf32>
    tpu.vector_store %arg8[%c18, %c0_11, %c0_12], %12 {strides = array<i32>} : memref<20x20x4xf32, #tpu.memory_space<vmem>>, vector<2x20x4xf32>,
    %c2 = arith.constant 2 : index
    %c0_13 = arith.constant 0 : index
    %c0_14 = arith.constant 0 : index
    %16 = vector.load %arg8[%c2, %c0_13, %c0_14] : memref<20x20x4xf32, #tpu.memory_space<vmem>>, vector<16x2x4xf32>
    tpu.vector_store %arg8[%c2, %c0_13, %c0_14], %13 {strides = array<i32>} : memref<20x20x4xf32, #tpu.memory_space<vmem>>, vector<16x2x4xf32>,
    %c2_15 = arith.constant 2 : index
    %c18_16 = arith.constant 18 : index
    %c0_17 = arith.constant 0 : index
    %17 = vector.load %arg8[%c2_15, %c18_16, %c0_17] : memref<20x20x4xf32, #tpu.memory_space<vmem>>, vector<16x2x4xf32>
    tpu.vector_store %arg8[%c2_15, %c18_16, %c0_17], %13 {strides = array<i32>} : memref<20x20x4xf32, #tpu.memory_space<vmem>>, vector<16x2x4xf32>,
    %18 = vector.shape_cast %10 : vector<256x4xf32> to vector<16x16x4xf32>
    %c2_18 = arith.constant 2 : index
    %c2_19 = arith.constant 2 : index
    %c0_20 = arith.constant 0 : index
    %19 = vector.load %arg8[%c2_18, %c2_19, %c0_20] : memref<20x20x4xf32, #tpu.memory_space<vmem>>, vector<16x16x4xf32>
    tpu.vector_store %arg8[%c2_18, %c2_19, %c0_20], %18 {strides = array<i32>} : memref<20x20x4xf32, #tpu.memory_space<vmem>>, vector<16x16x4xf32>,
    %c0_21 = arith.constant 0 : index
    %c0_22 = arith.constant 0 : index
    %c0_23 = arith.constant 0 : index
    %20 = vector.load %arg8[%c0_21, %c0_22, %c0_23] : memref<20x20x4xf32, #tpu.memory_space<vmem>>, vector<16x16x4xf32>
    %21 = vector.shape_cast %20 : vector<16x16x4xf32> to vector<256x4xf32>
    %c0_24 = arith.constant 0 : index
    %c1 = arith.constant 1 : index
    %c0_25 = arith.constant 0 : index
    %22 = vector.load %arg8[%c0_24, %c1, %c0_25] : memref<20x20x4xf32, #tpu.memory_space<vmem>>, vector<16x16x4xf32>
    %23 = vector.shape_cast %22 : vector<16x16x4xf32> to vector<256x4xf32>
    %c0_26 = arith.constant 0 : index
    %c2_27 = arith.constant 2 : index
    %c0_28 = arith.constant 0 : index
    %24 = vector.load %arg8[%c0_26, %c2_27, %c0_28] : memref<20x20x4xf32, #tpu.memory_space<vmem>>, vector<16x16x4xf32>
    %25 = vector.shape_cast %24 : vector<16x16x4xf32> to vector<256x4xf32>
    %c0_29 = arith.constant 0 : index
    %c3 = arith.constant 3 : index
    %c0_30 = arith.constant 0 : index
    %26 = vector.load %arg8[%c0_29, %c3, %c0_30] : memref<20x20x4xf32, #tpu.memory_space<vmem>>, vector<16x16x4xf32>
    %27 = vector.shape_cast %26 : vector<16x16x4xf32> to vector<256x4xf32>
    %c0_31 = arith.constant 0 : index
    %c4 = arith.constant 4 : index
    %c0_32 = arith.constant 0 : index
    %28 = vector.load %arg8[%c0_31, %c4, %c0_32] : memref<20x20x4xf32, #tpu.memory_space<vmem>>, vector<16x16x4xf32>
    %29 = vector.shape_cast %28 : vector<16x16x4xf32> to vector<256x4xf32>
    %c1_33 = arith.constant 1 : index
    %c0_34 = arith.constant 0 : index
    %c0_35 = arith.constant 0 : index
    %30 = vector.load %arg8[%c1_33, %c0_34, %c0_35] : memref<20x20x4xf32, #tpu.memory_space<vmem>>, vector<16x16x4xf32>
    %31 = vector.shape_cast %30 : vector<16x16x4xf32> to vector<256x4xf32>
    %c1_36 = arith.constant 1 : index
    %c1_37 = arith.constant 1 : index
    %c0_38 = arith.constant 0 : index
    %32 = vector.load %arg8[%c1_36, %c1_37, %c0_38] : memref<20x20x4xf32, #tpu.memory_space<vmem>>, vector<16x16x4xf32>
    %33 = vector.shape_cast %32 : vector<16x16x4xf32> to vector<256x4xf32>
    %c1_39 = arith.constant 1 : index
    %c2_40 = arith.constant 2 : index
    %c0_41 = arith.constant 0 : index
    %34 = vector.load %arg8[%c1_39, %c2_40, %c0_41] : memref<20x20x4xf32, #tpu.memory_space<vmem>>, vector<16x16x4xf32>
    %35 = vector.shape_cast %34 : vector<16x16x4xf32> to vector<256x4xf32>
    %c1_42 = arith.constant 1 : index
    %c3_43 = arith.constant 3 : index
    %c0_44 = arith.constant 0 : index
    %36 = vector.load %arg8[%c1_42, %c3_43, %c0_44] : memref<20x20x4xf32, #tpu.memory_space<vmem>>, vector<16x16x4xf32>
    %37 = vector.shape_cast %36 : vector<16x16x4xf32> to vector<256x4xf32>
    %c1_45 = arith.constant 1 : index
    %c4_46 = arith.constant 4 : index
    %c0_47 = arith.constant 0 : index
    %38 = vector.load %arg8[%c1_45, %c4_46, %c0_47] : memref<20x20x4xf32, #tpu.memory_space<vmem>>, vector<16x16x4xf32>
    %39 = vector.shape_cast %38 : vector<16x16x4xf32> to vector<256x4xf32>
    %c2_48 = arith.constant 2 : index
    %c0_49 = arith.constant 0 : index
    %c0_50 = arith.constant 0 : index
    %40 = vector.load %arg8[%c2_48, %c0_49, %c0_50] : memref<20x20x4xf32, #tpu.memory_space<vmem>>, vector<16x16x4xf32>
    %41 = vector.shape_cast %40 : vector<16x16x4xf32> to vector<256x4xf32>
    %c2_51 = arith.constant 2 : index
    %c1_52 = arith.constant 1 : index
    %c0_53 = arith.constant 0 : index
    %42 = vector.load %arg8[%c2_51, %c1_52, %c0_53] : memref<20x20x4xf32, #tpu.memory_space<vmem>>, vector<16x16x4xf32>
    %43 = vector.shape_cast %42 : vector<16x16x4xf32> to vector<256x4xf32>
    %c2_54 = arith.constant 2 : index
    %c2_55 = arith.constant 2 : index
    %c0_56 = arith.constant 0 : index
    %44 = vector.load %arg8[%c2_54, %c2_55, %c0_56] : memref<20x20x4xf32, #tpu.memory_space<vmem>>, vector<16x16x4xf32>
    %45 = vector.shape_cast %44 : vector<16x16x4xf32> to vector<256x4xf32>
    %c2_57 = arith.constant 2 : index
    %c3_58 = arith.constant 3 : index
    %c0_59 = arith.constant 0 : index
    %46 = vector.load %arg8[%c2_57, %c3_58, %c0_59] : memref<20x20x4xf32, #tpu.memory_space<vmem>>, vector<16x16x4xf32>
    %47 = vector.shape_cast %46 : vector<16x16x4xf32> to vector<256x4xf32>
    %c2_60 = arith.constant 2 : index
    %c4_61 = arith.constant 4 : index
    %c0_62 = arith.constant 0 : index
    %48 = vector.load %arg8[%c2_60, %c4_61, %c0_62] : memref<20x20x4xf32, #tpu.memory_space<vmem>>, vector<16x16x4xf32>
    %49 = vector.shape_cast %48 : vector<16x16x4xf32> to vector<256x4xf32>
    %c3_63 = arith.constant 3 : index
    %c0_64 = arith.constant 0 : index
    %c0_65 = arith.constant 0 : index
    %50 = vector.load %arg8[%c3_63, %c0_64, %c0_65] : memref<20x20x4xf32, #tpu.memory_space<vmem>>, vector<16x16x4xf32>
    %51 = vector.shape_cast %50 : vector<16x16x4xf32> to vector<256x4xf32>
    %c3_66 = arith.constant 3 : index
    %c1_67 = arith.constant 1 : index
    %c0_68 = arith.constant 0 : index
    %52 = vector.load %arg8[%c3_66, %c1_67, %c0_68] : memref<20x20x4xf32, #tpu.memory_space<vmem>>, vector<16x16x4xf32>
    %53 = vector.shape_cast %52 : vector<16x16x4xf32> to vector<256x4xf32>
    %c3_69 = arith.constant 3 : index
    %c2_70 = arith.constant 2 : index
    %c0_71 = arith.constant 0 : index
    %54 = vector.load %arg8[%c3_69, %c2_70, %c0_71] : memref<20x20x4xf32, #tpu.memory_space<vmem>>, vector<16x16x4xf32>
    %55 = vector.shape_cast %54 : vector<16x16x4xf32> to vector<256x4xf32>
    %c3_72 = arith.constant 3 : index
    %c3_73 = arith.constant 3 : index
    %c0_74 = arith.constant 0 : index
    %56 = vector.load %arg8[%c3_72, %c3_73, %c0_74] : memref<20x20x4xf32, #tpu.memory_space<vmem>>, vector<16x16x4xf32>
    %57 = vector.shape_cast %56 : vector<16x16x4xf32> to vector<256x4xf32>
    %c3_75 = arith.constant 3 : index
    %c4_76 = arith.constant 4 : index
    %c0_77 = arith.constant 0 : index
    %58 = vector.load %arg8[%c3_75, %c4_76, %c0_77] : memref<20x20x4xf32, #tpu.memory_space<vmem>>, vector<16x16x4xf32>
    %59 = vector.shape_cast %58 : vector<16x16x4xf32> to vector<256x4xf32>
    %c4_78 = arith.constant 4 : index
    %c0_79 = arith.constant 0 : index
    %c0_80 = arith.constant 0 : index
    %60 = vector.load %arg8[%c4_78, %c0_79, %c0_80] : memref<20x20x4xf32, #tpu.memory_space<vmem>>, vector<16x16x4xf32>
    %61 = vector.shape_cast %60 : vector<16x16x4xf32> to vector<256x4xf32>
    %c4_81 = arith.constant 4 : index
    %c1_82 = arith.constant 1 : index
    %c0_83 = arith.constant 0 : index
    %62 = vector.load %arg8[%c4_81, %c1_82, %c0_83] : memref<20x20x4xf32, #tpu.memory_space<vmem>>, vector<16x16x4xf32>
    %63 = vector.shape_cast %62 : vector<16x16x4xf32> to vector<256x4xf32>
    %c4_84 = arith.constant 4 : index
    %c2_85 = arith.constant 2 : index
    %c0_86 = arith.constant 0 : index
    %64 = vector.load %arg8[%c4_84, %c2_85, %c0_86] : memref<20x20x4xf32, #tpu.memory_space<vmem>>, vector<16x16x4xf32>
    %65 = vector.shape_cast %64 : vector<16x16x4xf32> to vector<256x4xf32>
    %c4_87 = arith.constant 4 : index
    %c3_88 = arith.constant 3 : index
    %c0_89 = arith.constant 0 : index
    %66 = vector.load %arg8[%c4_87, %c3_88, %c0_89] : memref<20x20x4xf32, #tpu.memory_space<vmem>>, vector<16x16x4xf32>
    %67 = vector.shape_cast %66 : vector<16x16x4xf32> to vector<256x4xf32>
    %c4_90 = arith.constant 4 : index
    %c4_91 = arith.constant 4 : index
    %c0_92 = arith.constant 0 : index
    %68 = vector.load %arg8[%c4_90, %c4_91, %c0_92] : memref<20x20x4xf32, #tpu.memory_space<vmem>>, vector<16x16x4xf32>
    %69 = vector.shape_cast %68 : vector<16x16x4xf32> to vector<256x4xf32>
    %70 = tpu.concatenate %21, %23, %25, %27, %29, %31, %33, %35, %37, %39, %41, %43, %45, %47, %49, %51 in 1 : vector<256x4xf32>, vector<256x4xf32>, vector<256x4xf32>, vector<256x4xf32>, vector<256x4xf32>, vector<256x4xf32>, vector<256x4xf32>, vector<256x4xf32>, vector<256x4xf32>, vector<256x4xf32>, vector<256x4xf32>, vector<256x4xf32>, vector<256x4xf32>, vector<256x4xf32>, vector<256x4xf32>, vector<256x4xf32> -> vector<256x64xf32>
    %71 = tpu.concatenate %53, %55, %57, %59, %61, %63, %65, %67, %69 in 1 : vector<256x4xf32>, vector<256x4xf32>, vector<256x4xf32>, vector<256x4xf32>, vector<256x4xf32>, vector<256x4xf32>, vector<256x4xf32>, vector<256x4xf32>, vector<256x4xf32> -> vector<256x36xf32>
    %72 = tpu.concatenate %70, %71 in 1 : vector<256x64xf32>, vector<256x36xf32> -> vector<256x100xf32>
    %c0_93 = arith.constant 0 : index
    %c0_94 = arith.constant 0 : index
    %73 = vector.load %arg3[%c0_93, %c0_94] : memref<100x4xf32, #tpu.memory_space<vmem>>, vector<100x4xf32>
    %cst_95 = arith.constant dense<0.000000e+00> : vector<256x4xf32>
    %74 = tpu.matmul %72, %73, %cst_95 {dimension_numbers = #tpu.dot_dimension_numbers<[1], [0], [0], [1], [0, 0, 1, 1], [], []>} : vector<256x100xf32>, vector<100x4xf32>, vector<256x4xf32> -> vector<256x4xf32>
    %cst_96 = arith.constant 0xFF800000 : f32
    %75 = vector.broadcast %cst_96 : f32 to vector<1x18x4xf32>
    %cst_97 = arith.constant 0xFF800000 : f32
    %76 = vector.broadcast %cst_97 : f32 to vector<16x1x4xf32>
    %c0_98 = arith.constant 0 : index
    %c0_99 = arith.constant 0 : index
    %c0_100 = arith.constant 0 : index
    %77 = vector.load %arg9[%c0_98, %c0_99, %c0_100] : memref<18x18x4xf32, #tpu.memory_space<vmem>>, vector<1x18x4xf32>
    tpu.vector_store %arg9[%c0_98, %c0_99, %c0_100], %75 {strides = array<i32>} : memref<18x18x4xf32, #tpu.memory_space<vmem>>, vector<1x18x4xf32>,
    %c17 = arith.constant 17 : index
    %c0_101 = arith.constant 0 : index
    %c0_102 = arith.constant 0 : index
    %78 = vector.load %arg9[%c17, %c0_101, %c0_102] : memref<18x18x4xf32, #tpu.memory_space<vmem>>, vector<1x18x4xf32>
    tpu.vector_store %arg9[%c17, %c0_101, %c0_102], %75 {strides = array<i32>} : memref<18x18x4xf32, #tpu.memory_space<vmem>>, vector<1x18x4xf32>,
    %c1_103 = arith.constant 1 : index
    %c0_104 = arith.constant 0 : index
    %c0_105 = arith.constant 0 : index
    %79 = vector.load %arg9[%c1_103, %c0_104, %c0_105] : memref<18x18x4xf32, #tpu.memory_space<vmem>>, vector<16x1x4xf32>
    tpu.vector_store %arg9[%c1_103, %c0_104, %c0_105], %76 {strides = array<i32>} : memref<18x18x4xf32, #tpu.memory_space<vmem>>, vector<16x1x4xf32>,
    %c1_106 = arith.constant 1 : index
    %c17_107 = arith.constant 17 : index
    %c0_108 = arith.constant 0 : index
    %80 = vector.load %arg9[%c1_106, %c17_107, %c0_108] : memref<18x18x4xf32, #tpu.memory_space<vmem>>, vector<16x1x4xf32>
    tpu.vector_store %arg9[%c1_106, %c17_107, %c0_108], %76 {strides = array<i32>} : memref<18x18x4xf32, #tpu.memory_space<vmem>>, vector<16x1x4xf32>,
    %81 = vector.shape_cast %1 : vector<256x4xf32> to vector<16x16x4xf32>
    %c1_109 = arith.constant 1 : index
    %c1_110 = arith.constant 1 : index
    %c0_111 = arith.constant 0 : index
    %82 = vector.load %arg9[%c1_109, %c1_110, %c0_111] : memref<18x18x4xf32, #tpu.memory_space<vmem>>, vector<16x16x4xf32>
    tpu.vector_store %arg9[%c1_109, %c1_110, %c0_111], %81 {strides = array<i32>} : memref<18x18x4xf32, #tpu.memory_space<vmem>>, vector<16x16x4xf32>,
    %c0_112 = arith.constant 0 : index
    %c0_113 = arith.constant 0 : index
    %c0_114 = arith.constant 0 : index
    %83 = vector.load %arg9[%c0_112, %c0_113, %c0_114] : memref<18x18x4xf32, #tpu.memory_space<vmem>>, vector<16x16x4xf32>
    %c0_115 = arith.constant 0 : index
    %c1_116 = arith.constant 1 : index
    %c0_117 = arith.constant 0 : index
    %84 = vector.load %arg9[%c0_115, %c1_116, %c0_117] : memref<18x18x4xf32, #tpu.memory_space<vmem>>, vector<16x16x4xf32>
    %85 = arith.maximumf %83, %84 : vector<16x16x4xf32>
    %c0_118 = arith.constant 0 : index
    %c2_119 = arith.constant 2 : index
    %c0_120 = arith.constant 0 : index
    %86 = vector.load %arg9[%c0_118, %c2_119, %c0_120] : memref<18x18x4xf32, #tpu.memory_space<vmem>>, vector<16x16x4xf32>
    %87 = arith.maximumf %85, %86 : vector<16x16x4xf32>
    %c1_121 = arith.constant 1 : index
    %c0_122 = arith.constant 0 : index
    %c0_123 = arith.constant 0 : index
    %88 = vector.load %arg9[%c1_121, %c0_122, %c0_123] : memref<18x18x4xf32, #tpu.memory_space<vmem>>, vector<16x16x4xf32>
    %89 = arith.maximumf %87, %88 : vector<16x16x4xf32>
    %c1_124 = arith.constant 1 : index
    %c1_125 = arith.constant 1 : index
    %c0_126 = arith.constant 0 : index
    %90 = vector.load %arg9[%c1_124, %c1_125, %c0_126] : memref<18x18x4xf32, #tpu.memory_space<vmem>>, vector<16x16x4xf32>
    %91 = arith.maximumf %89, %90 : vector<16x16x4xf32>
    %c1_127 = arith.constant 1 : index
    %c2_128 = arith.constant 2 : index
    %c0_129 = arith.constant 0 : index
    %92 = vector.load %arg9[%c1_127, %c2_128, %c0_129] : memref<18x18x4xf32, #tpu.memory_space<vmem>>, vector<16x16x4xf32>
    %93 = arith.maximumf %91, %92 : vector<16x16x4xf32>
    %c2_130 = arith.constant 2 : index
    %c0_131 = arith.constant 0 : index
    %c0_132 = arith.constant 0 : index
    %94 = vector.load %arg9[%c2_130, %c0_131, %c0_132] : memref<18x18x4xf32, #tpu.memory_space<vmem>>, vector<16x16x4xf32>
    %95 = arith.maximumf %93, %94 : vector<16x16x4xf32>
    %c2_133 = arith.constant 2 : index
    %c1_134 = arith.constant 1 : index
    %c0_135 = arith.constant 0 : index
    %96 = vector.load %arg9[%c2_133, %c1_134, %c0_135] : memref<18x18x4xf32, #tpu.memory_space<vmem>>, vector<16x16x4xf32>
    %97 = arith.maximumf %95, %96 : vector<16x16x4xf32>
    %c2_136 = arith.constant 2 : index
    %c2_137 = arith.constant 2 : index
    %c0_138 = arith.constant 0 : index
    %98 = vector.load %arg9[%c2_136, %c2_137, %c0_138] : memref<18x18x4xf32, #tpu.memory_space<vmem>>, vector<16x16x4xf32>
    %99 = arith.maximumf %97, %98 : vector<16x16x4xf32>
    %100 = vector.shape_cast %99 : vector<16x16x4xf32> to vector<256x4xf32>
    %c0_139 = arith.constant 0 : index
    %c0_140 = arith.constant 0 : index
    %101 = vector.load %arg4[%c0_139, %c0_140] : memref<4x2xf32, #tpu.memory_space<vmem>>, vector<4x2xf32>
    %cst_141 = arith.constant dense<0.000000e+00> : vector<256x2xf32>
    %102 = tpu.matmul %100, %101, %cst_141 {dimension_numbers = #tpu.dot_dimension_numbers<[1], [0], [0], [1], [0, 0, 1, 1], [], []>} : vector<256x4xf32>, vector<4x2xf32>, vector<256x2xf32> -> vector<256x2xf32>
    %103 = tpu.concatenate %4, %74, %102 in 1 : vector<256x2xf32>, vector<256x4xf32>, vector<256x2xf32> -> vector<256x8xf32>
    %c0_142 = arith.constant 0 : index
    %c0_143 = arith.constant 0 : index
    %104 = vector.load %arg5[%c0_142, %c0_143] : memref<1x8xf32, #tpu.memory_space<vmem>>, vector<1x8xf32>
    %105 = vector.broadcast %104 : vector<1x8xf32> to vector<256x8xf32>
    %106 = arith.mulf %103, %105 : vector<256x8xf32>
    %c0_144 = arith.constant 0 : index
    %c0_145 = arith.constant 0 : index
    %107 = vector.load %arg6[%c0_144, %c0_145] : memref<1x8xf32, #tpu.memory_space<vmem>>, vector<1x8xf32>
    %108 = vector.broadcast %107 : vector<1x8xf32> to vector<256x8xf32>
    %109 = arith.addf %106, %108 : vector<256x8xf32>
    %cst_146 = arith.constant 0.000000e+00 : f32
    %110 = vector.broadcast %cst_146 : f32 to vector<256x8xf32>
    %111 = arith.cmpf oge, %109, %110 : vector<256x8xf32>
    %cst_147 = arith.constant 0.00999999977 : f32
    %112 = vector.broadcast %cst_147 : f32 to vector<256x8xf32>
    %113 = arith.mulf %112, %109 : vector<256x8xf32>
    %114 = arith.select %111, %109, %113 : vector<256x8xi1>, vector<256x8xf32>
    %115 = arith.addf %114, %11 : vector<256x8xf32>
    %c0_148 = arith.constant 0 : index
    %c0_149 = arith.constant 0 : index
    %c0_150 = arith.constant 0 : index
    %116 = vector.load %arg7[%c0_148, %c0_149, %c0_150] : memref<1x256x8xf32, #tpu.memory_space<vmem>>, vector<1x256x8xf32>
    %117 = vector.shape_cast %116 : vector<1x256x8xf32> to vector<256x8xf32>
    %118 = vector.shape_cast %115 : vector<256x8xf32> to vector<1x256x8xf32>
    tpu.vector_store %arg7[%c0_148, %c0_149, %c0_150], %118 {strides = array<i32>} : memref<1x256x8xf32, #tpu.memory_space<vmem>>, vector<1x256x8xf32>,
    return
  }
  func.func @transform_0(%arg0: i32) -> (i32, i32, i32) {
    %c0_i32 = arith.constant 0 : i32
    %c0_i32_0 = arith.constant 0 : i32
    %c0_i32_1 = arith.constant 0 : i32
    return %arg0, %c0_i32, %c0_i32_0 : i32, i32, i32
  }
  func.func @transform_1(%arg0: i32) -> (i32, i32) {
    %c0_i32 = arith.constant 0 : i32
    %c0_i32_0 = arith.constant 0 : i32
    %c0_i32_1 = arith.constant 0 : i32
    return %c0_i32, %c0_i32_0 : i32, i32
  }
  func.func @transform_2(%arg0: i32) -> (i32, i32) {
    %c0_i32 = arith.constant 0 : i32
    %c0_i32_0 = arith.constant 0 : i32
    %c0_i32_1 = arith.constant 0 : i32
    return %c0_i32, %c0_i32_0 : i32, i32
  }
  func.func @transform_3(%arg0: i32) -> (i32, i32) {
    %c0_i32 = arith.constant 0 : i32
    %c0_i32_0 = arith.constant 0 : i32
    %c0_i32_1 = arith.constant 0 : i32
    return %c0_i32, %c0_i32_0 : i32, i32
  }
  func.func @transform_4(%arg0: i32) -> (i32, i32) {
    %c0_i32 = arith.constant 0 : i32
    %c0_i32_0 = arith.constant 0 : i32
    %c0_i32_1 = arith.constant 0 : i32
    return %c0_i32, %c0_i32_0 : i32, i32
  }
  func.func @transform_5(%arg0: i32) -> (i32, i32) {
    %c0_i32 = arith.constant 0 : i32
    %c0_i32_0 = arith.constant 0 : i32
    %c0_i32_1 = arith.constant 0 : i32
    return %c0_i32, %c0_i32_0 : i32, i32
  }
  func.func @transform_6(%arg0: i32) -> (i32, i32, i32) {
    %c0_i32 = arith.constant 0 : i32
    %c0_i32_0 = arith.constant 0 : i32
    %c0_i32_1 = arith.constant 0 : i32
    return %arg0, %c0_i32, %c0_i32_0 : i32, i32, i32
  }
}

</mosaic_0001>

<bundles_post_ra>
// kernel: tpu_custom_call.1
= control target key start
LH: loop header
LB: loop body
LE: loop exit
PB: predicated region body
PF: predicated region fallthrough
CT: control target
= control target key end

     0   :  { %s7524_s21 = smov 0   ;;  %s13153_s0 = inlined_call_operand.vmem [shape: f32[2,256,4], index: 0, kind: input, shape index: {}]   ;;  %s13154_s1 = inlined_call_operand.vmem [shape: f32[4,14], index: 1, kind: input, shape index: {}]   ;;  %s13155_s2 = inlined_call_operand.vmem [shape: f32[100,4], index: 2, kind: input, shape index: {}]   ;;  %s13156_s3 = inlined_call_operand.vmem [shape: f32[4,2], index: 3, kind: input, shape index: {}]   ;;  %s13157_s4 = inlined_call_operand.vmem [shape: f32[1,8], index: 4, kind: input, shape index: {}]   ;;  %s13158_s5 = inlined_call_operand.vmem [shape: f32[1,8], index: 5, kind: input, shape index: {}]   ;;  %s13159_s6 = inlined_call_operand.vmem [shape: f32[2,256,8], index: 6, kind: output, shape index: {}]  }
   0x1 LB: > { %s7255_s22 = sadd.s32 4294967295, %s7465_s21   ;;  %p7259_p0 = scmp.ge.s32.totalorder %s7465_s21, 1  ;;  %s7465_s21 = sphi %s7524_s21, %s16_s21  }
   0x2   : > { %p212_p1 = scmp.lt.s32.totalorder %s7465_s21, 3 }
   0x4   : > { %p213_p2 = pnand %p7259_p0, %p212_p1 }
   0x6   : > { %216 = sbr.rel (%p213_p2) target bundleno = 2990 (0xbae), region = 44 }
   0xb   : > { %v284_v0 = vld [vmem:[%s13154_s1] sm:$0xf]  ;;  %vm13234_vm0 = vcmask 1043456   ;;  %p242_p3 = scmp.lt.s32.totalorder %s7255_s22, 1  ;;  %vm285_vm1 = vcmask 31744   ;;  %v7467_v17 = vmov 0.0  }
   0xc   : > { %7264 = vmatpush.msk.msra.mxu0 %vm13234_vm0, %v284_v0  ;;  %7367 = vmatpush.msk.msra.mxu3 %vm13234_vm0, %v284_v0  ;;  %599 = vst.msk [vmem:[#allocation2 + $0x18] sm:$0xff] %vm285_vm1, %v7467_v17  ;;  %vm597_vm2 = vcmask 27648   ;;  %s7468_s29 = smov 4   ;;  %s7469_s30 = smov 8  }
   0xd   : > { %s14811_s22 = smov (!%p242_p3, %s7255_s22), 1  ;;  %600 = vst.msk [vmem:[#allocation2 + $0x20] sm:$0xff] %vm285_vm1, %v7467_v17  ;;  %s7470_s7 = smov 12  }
   0xe   : > { %s7365_s25 = sshll.u32 %s14811_s22, 8  ;;  %595 = vst.msk [vmem:[#allocation2] sm:$0xff] %vm285_vm1, %v7467_v17  ;;  %s7471_s8 = smov 16  }
   0xf   : > { %s7545_s28 = scalar_lea.vmem %s13153_s0, %s7365_s25  ;;  %596 = vst.msk [vmem:[#allocation2 + $0x8] sm:$0xff] %vm285_vm1, %v7467_v17  ;;  %s7472_s9 = smov 20  }
  0x10   : > { %v252_v1 = vld [vmem:[%s7545_s28] sm:$0xff]  ;;  %v277_v2 = vld [vmem:[%s7545_s28 + $0xc8] sm:$0xff]  ;;  %v278_v4 = vld [vmem:[%s7545_s28 + $0xd0] sm:$0xff]  ;;  %603 = vst.msk [vmem:[#allocation2 + $0x1b0] sm:$0xff] %vm285_vm1, %v7467_v17  ;;  %s7473_s10 = smov 126   ;;  %s7474_s11 = smov 24  }
  0x11   : > { %7265 = vmatmul.msk.f32.vlgmr.msra.gmra.mxu0 %vm285_vm1, %v252_v1  ;;  %5728 = vst.msk [vmem:[#allocation3 + $0x19] sm:$0xff] %vm285_vm1, %v252_v1  ;;  %7290 = vmatmul.msk.f32.vlgmr.msra.gmra.mxu3 %vm285_vm1, %v277_v2  ;;  %v253_v3 = vld [vmem:[%s7545_s28 + $0x8] sm:$0xff]  ;;  %v254_v5 = vld [vmem:[%s7545_s28 + $0x10] sm:$0xff]  ;;  %v279_v6 = vld [vmem:[%s7545_s28 + $0xd8] sm:$0xff]  ;;  %s7475_s12 = smov 28   ;;  %s7476_s13 = smov 32  }
  0x12   : > { %5753 = vst.msk [vmem:[#allocation3 + $0x141] sm:$0xff] %vm285_vm1, %v277_v2  ;;  %v255_v7 = vld [vmem:[%s7545_s28 + $0x18] sm:$0xff]  ;;  %v280_v8 = vld [vmem:[%s7545_s28 + $0xe0] sm:$0xff]  ;;  %v281_v10 = vld [vmem:[%s7545_s28 + $0xe8] sm:$0xff]  ;;  %s7477_s14 = smov 36   ;;  %s7478_s15 = smov 40  }
  0x13   : > { %5729 = vst.msk [vmem:[#allocation3 + $0x21] sm:$0xff] %vm285_vm1, %v253_v3  ;;  %v256_v9 = vld [vmem:[%s7545_s28 + $0x20] sm:$0xff]  ;;  %v257_v11 = vld [vmem:[%s7545_s28 + $0x28] sm:$0xff]  ;;  %v282_v12 = vld [vmem:[%s7545_s28 + $0xf0] sm:$0xff]  ;;  %s7479_s16 = smov 44   ;;  %s7480_s17 = smov 48  }
  0x14   : > { %5754 = vst.msk [vmem:[#allocation3 + $0x151] sm:$0xff] %vm285_vm1, %v278_v4  ;;  %v258_v13 = vld [vmem:[%s7545_s28 + $0x30] sm:$0xff]  ;;  %v283_v14 = vld [vmem:[%s7545_s28 + $0xf8] sm:$0xff]  ;;  %v260_v16 = vld [vmem:[%s7545_s28 + $0x40] sm:$0xff]  ;;  %s7481_s18 = smov 52   ;;  %s7482_s19 = smov 56  }
  0x15   : > { %5730 = vst.msk [vmem:[#allocation3 + $0x31] sm:$0xff] %vm285_vm1, %v254_v5  ;;  %v259_v15 = vld [vmem:[%s7545_s28 + $0x38] sm:$0xff]  ;;  %v261_v18 = vld [vmem:[%s7545_s28 + $0x48] sm:$0xff]  ;;  %v262_v21 = vld [vmem:[%s7545_s28 + $0x50] sm:$0xff]  ;;  %s7483_s20 = smov 60   ;;  %s7484_s23 = smov 64  }
  0x16   : > { %5755 = vst.msk [vmem:[#allocation3 + $0x159] sm:$0xff] %vm285_vm1, %v279_v6  ;;  %v837_v19 = vld [vmem:[#allocation2 + $0x19] sm:$0xff]  ;;  %v867_v20 = vld [vmem:[#allocation2 + $0x2] sm:$0xff]  ;;  %v266_v38 = vld [vmem:[%s7545_s28 + $0x70] sm:$0xff] }
  0x17   : > { %5731 = vst.msk [vmem:[#allocation3 + $0x39] sm:$0xff] %vm285_vm1, %v255_v7  ;;  %1642 = vrot.lane.b32.xlu1 %v837_v19, %s7468_s29  ;;  %v869_v23 = vld [vmem:[#allocation2 + $0x1a] sm:$0xff]  ;;  %v899_v27 = vld [vmem:[#allocation2 + $0x3] sm:$0xff]  ;;  %v270_v51 = vld [vmem:[%s7545_s28 + $0x90] sm:$0xff] }
  0x18   : > { %5756 = vst.msk [vmem:[#allocation3 + $0x169] sm:$0xff] %vm285_vm1, %v280_v8  ;;  %v835_v25 = vld [vmem:[#allocation2 + $0x1] sm:$0xff]  ;;  %v263_v26 = vld [vmem:[%s7545_s28 + $0x58] sm:$0xff] }
  0x19   : > { %7266 = vmatmul.msk.f32.gmra.mxu0 %vm285_vm1, %v253_v3  ;;  %7291 = vmatmul.msk.f32.gmra.mxu3 %vm285_vm1, %v278_v4  ;;  %5732 = vst.msk [vmem:[#allocation3 + $0x49] sm:$0xff] %vm285_vm1, %v256_v9  ;;  %v264_v30 = vld [vmem:[%s7545_s28 + $0x60] sm:$0xff]  ;;  %v265_v34 = vld [vmem:[%s7545_s28 + $0x68] sm:$0xff]  ;;  %v964_v36 = vld [vmem:[#allocation2 + $0x18] sm:$0xff] }
  0x1a   : > { %5757 = vst.msk [vmem:[#allocation3 + $0x171] sm:$0xff] %vm285_vm1, %v281_v10  ;;  %1638 = vrot.lane.b32.xlu2 %v835_v25, %s7468_s29  ;;  %v933_v32 = vld [vmem:[#allocation2 + $0x1c] sm:$0xff]  ;;  %v931_v39 = vld [vmem:[#allocation2 + $0x4] sm:$0xff] }
  0x1b   : > { %5733 = vst.msk [vmem:[#allocation3 + $0x51] sm:$0xff] %vm285_vm1, %v257_v11  ;;  %v901_v37 = vld [vmem:[#allocation2 + $0x1b] sm:$0xff]  ;;  %v269_v44 = vld [vmem:[%s7545_s28 + $0x88] sm:$0xff] }
  0x1c   : > { %5758 = vst.msk [vmem:[#allocation3 + $0x181] sm:$0xff] %vm285_vm1, %v282_v12  ;;  %v267_v40 = vld [vmem:[%s7545_s28 + $0x78] sm:$0xff]  ;;  %v268_v42 = vld [vmem:[%s7545_s28 + $0x80] sm:$0xff] }
  0x1d   : > { %5734 = vst.msk [vmem:[#allocation3 + $0x61] sm:$0xff] %vm285_vm1, %v258_v13  ;;  %v965_v43 = vld [vmem:[#allocation2 + $0x20] sm:$0xff] }
  0x1e   : > { %5759 = vst.msk [vmem:[#allocation3 + $0x189] sm:$0xff] %vm285_vm1, %v283_v14 }
  0x1f   : > { %5735 = vst.msk [vmem:[#allocation3 + $0x69] sm:$0xff] %vm285_vm1, %v259_v15  ;;  %1766 = vrot.lane.b32.xlu1 %v867_v20, %s7469_s30 }
  0x20   : > { %5736 = vst.msk [vmem:[#allocation3 + $0x79] sm:$0xff] %vm285_vm1, %v260_v16 }
  0x21   : > { %7267 = vmatmul.msk.f32.gmra.mxu0 %vm285_vm1, %v254_v5  ;;  %7292 = vmatmul.msk.f32.gmra.mxu3 %vm285_vm1, %v279_v6  ;;  %604 = vst.msk [vmem:[#allocation2 + $0x1b8] sm:$0xff] %vm285_vm1, %v7467_v17 }
  0x22   : > { %606 = vst.msk [vmem:[#allocation2 + $0x1c8] sm:$0xff] %vm285_vm1, %v7467_v17 }
  0x23   : > { %607 = vst.msk [vmem:[#allocation2 + $0x1d0] sm:$0xff] %vm285_vm1, %v7467_v17 }
  0x24   : > { %5737 = vst.msk [vmem:[#allocation3 + $0x81] sm:$0xff] %vm285_vm1, %v261_v18 }
  0x25   : > { %598 = vst.msk [vmem:[#allocation2 + $0x10] sm:$0xf] %vm597_vm2, %v7467_v17 }
  0x26   : > { %601 = vst.msk [vmem:[#allocation2 + $0x28] sm:$0xf] %vm597_vm2, %v7467_v17 }
  0x27   : > { %605 = vst.msk [vmem:[#allocation2 + $0x1c0] sm:$0xf] %vm597_vm2, %v7467_v17 }
  0x28   : > { %608 = vst.msk [vmem:[#allocation2 + $0x1d8] sm:$0xf] %vm597_vm2, %v7467_v17 }
  0x29   : > { %7268 = vmatmul.msk.f32.gmra.mxu0 %vm285_vm1, %v255_v7  ;;  %7293 = vmatmul.msk.f32.gmra.mxu3 %vm285_vm1, %v280_v8  ;;  %5738 = vst.msk [vmem:[#allocation3 + $0x91] sm:$0xff] %vm285_vm1, %v262_v21 }
  0x2a   : > { %5739 = vst.msk [vmem:[#allocation3 + $0x99] sm:$0xff] %vm285_vm1, %v263_v26 }
  0x2b   : > { %5740 = vst.msk [vmem:[#allocation3 + $0xa9] sm:$0xff] %vm285_vm1, %v264_v30 }
  0x2c   : > { %v836_v22 = vld [vmem:[#allocation2 + $0x9] sm:$0xff]  ;;  %5741 = vst.msk [vmem:[#allocation3 + $0xb1] sm:$0xff] %vm285_vm1, %v265_v34 }
  0x2d   : > { %1640 = vrot.lane.b32.xlu0 %v836_v22, %s7468_s29  ;;  %v870_v24 = vld [vmem:[#allocation2 + $0x22] sm:$0xff]  ;;  %v900_v28 = vld [vmem:[#allocation2 + $0xb] sm:$0xff]  ;;  %5742 = vst.msk [vmem:[#allocation3 + $0xc1] sm:$0xff] %vm285_vm1, %v266_v38 }
  0x2e   : > { %1772 = vrot.lane.b32.xlu1 %v870_v24, %s7469_s30  ;;  %v838_v29 = vld [vmem:[#allocation2 + $0x21] sm:$0xff]  ;;  %v868_v33 = vld [vmem:[#allocation2 + $0xa] sm:$0xff]  ;;  %5743 = vst.msk [vmem:[#allocation3 + $0xc9] sm:$0xff] %vm285_vm1, %v267_v40 }
  0x2f   : > { %1644 = vrot.lane.b32.xlu2 %v838_v29, %s7468_s29  ;;  %v902_v31 = vld [vmem:[#allocation2 + $0x23] sm:$0xff]  ;;  %v932_v35 = vld [vmem:[#allocation2 + $0xc] sm:$0xff]  ;;  %5744 = vst.msk [vmem:[#allocation3 + $0xd9] sm:$0xff] %vm285_vm1, %v268_v42 }
  0x30   : > { %v934_v41 = vld [vmem:[#allocation2 + $0x24] sm:$0xff]  ;;  %5745 = vst.msk [vmem:[#allocation3 + $0xe1] sm:$0xff] %vm285_vm1, %v269_v44 }
  0x31   : > { %7269 = vmatmul.msk.f32.gmra.mxu0 %vm285_vm1, %v256_v9  ;;  %7294 = vmatmul.msk.f32.gmra.mxu3 %vm285_vm1, %v281_v10  ;;  %5746 = vst.msk [vmem:[#allocation3 + $0xf1] sm:$0xff] %vm285_vm1, %v270_v51 }
  0x35   : > { %1770 = vrot.lane.b32.xlu0 %v869_v23, %s7469_s30  ;;  %v272_v23 = vld [vmem:[%s7545_s28 + $0xa0] sm:$0xff] }
  0x36   : > { %1896 = vrot.lane.b32.xlu1 %v900_v28, %s7470_s7  ;;  %5748 = vst.msk [vmem:[#allocation3 + $0x109] sm:$0xff] %vm285_vm1, %v272_v23 }
  0x37   : > { %1768 = vrot.lane.b32.xlu2 %v868_v33, %s7469_s30 }
  0x39   : > { %7270 = vmatmul.msk.f32.gmra.mxu0 %vm285_vm1, %v257_v11  ;;  %7295 = vmatmul.msk.f32.gmra.mxu3 %vm285_vm1, %v282_v12 }
  0x3d   : > { %1894 = vrot.lane.b32.xlu0 %v899_v27, %s7470_s7 }
  0x3e   : > { %2026 = vrot.lane.b32.xlu1 %v933_v32, %s7471_s8 }
  0x3f   : > { %1898 = vrot.lane.b32.xlu2 %v901_v37, %s7470_s7 }
  0x41   : > { %7271 = vmatmul.msk.f32.gmra.mxu0 %vm285_vm1, %v258_v13  ;;  %7296 = vmatmul.msk.f32.gmra.mxu3 %vm285_vm1, %v283_v14  ;;  %v271_v14 = vld [vmem:[%s7545_s28 + $0x98] sm:$0xff] }
  0x42   : > { %5747 = vst.msk [vmem:[#allocation3 + $0xf9] sm:$0xff] %vm285_vm1, %v271_v14 }
  0x45   : > { %1900 = vrot.lane.b32.xlu0 %v902_v31, %s7470_s7 }
  0x46   : > { %2150 = vrot.lane.b32.xlu1 %v964_v36, %s7472_s9 }
  0x47   : > { %2022 = vrot.lane.b32.xlu2 %v931_v39, %s7471_s8 }
  0x49   : > { %7272 = vmatmul.msk.f32.gmra.mxu0 %vm285_vm1, %v259_v15 }
  0x4d   : > { %2024 = vrot.lane.b32.xlu0 %v932_v35, %s7471_s8 }
  0x4f   : > { %2028 = vrot.lane.b32.xlu2 %v934_v41, %s7471_s8 }
  0x51   : > { %7273 = vmatmul.msk.f32.gmra.mxu0 %vm285_vm1, %v260_v16 }
  0x57   : > { %2152 = vrot.lane.b32.xlu2 %v965_v43, %s7472_s9 }
  0x59   : > { %7274 = vmatmul.msk.f32.gmra.mxu0 %vm285_vm1, %v261_v18 }
  0x61   : > { %7275 = vmatmul.msk.f32.gmra.mxu0 %vm285_vm1, %v262_v21 }
  0x69   : > { %7276 = vmatmul.msk.f32.gmra.mxu0 %vm285_vm1, %v263_v26 }
  0x71   : > { %7277 = vmatmul.msk.f32.gmra.mxu0 %vm285_vm1, %v264_v30 }
  0x74   : > { %v7723_v12 = vpop.permute.xlu2 %1638 }
  0x75   : > { %13254 = vst [vmem:[#allocation15_spill] sm:$0xff] %v7723_v12 }
  0x79   : > { %7278 = vmatmul.msk.f32.gmra.mxu0 %vm285_vm1, %v265_v34 }
  0x81   : > { %7279 = vmatmul.msk.f32.gmra.mxu0 %vm285_vm1, %v266_v38 }
  0x89   : > { %7280 = vmatmul.msk.f32.gmra.mxu0 %vm285_vm1, %v267_v40  ;;  %v7740_v21 = vpop.permute.xlu2 %1644  ;;  %v7768_v35 = vpop.permute.xlu1 %1642 }
  0x8a   : > { %13257 = vst [vmem:[#allocation18_spill] sm:$0xff] %v7740_v21 }
  0x8b   : > { %13262 = vst [vmem:[#allocation23_spill] sm:$0xff] %v7768_v35 }
  0x8e   : > { %v7658_v45 = vpop.f32.mrf.mxu0 }
  0x8f   : > { %13243 = vst [vmem:[#allocation4_spill] sm:$0xff] %v7658_v45  ;;  %vm499_vm3 = vcmp.ge.f32.partialorder %v7658_v45, 0.0  ;;  %v531_v46 = vmul.f32 0.01, %v7658_v45 }
  0x91   : > { %7281 = vmatmul.msk.f32.gmra.mxu0 %vm285_vm1, %v268_v42  ;;  %v563_v47 = vsel %vm499_vm3, %v7658_v45, %v531_v46  ;;  %v7759_v30 = vpop.permute.xlu2 %1768  ;;  %v7782_v42 = vpop.permute.xlu1 %1766 }
  0x92   : > { %675 = vrot.lane.b32.xlu0 %v563_v47, %s7473_s10  ;;  %13260 = vst [vmem:[#allocation21_spill] sm:$0xff] %v7759_v30  ;;  %v273_v47 = vld [vmem:[%s7545_s28 + $0xa8] sm:$0xff]  ;;  %v1444_v30 = vld [vmem:[#allocation2 + $0x1bc] sm:$0xff] }
  0x93   : > { %13266 = vst [vmem:[#allocation27_spill] sm:$0xff] %v7782_v42 }
  0x94   : > { %v7665_v48 = vpop.f32.mrf.mxu3  ;;  %5749 = vst.msk [vmem:[#allocation3 + $0x111] sm:$0xff] %vm285_vm1, %v273_v47 }
  0x95   : > { %13244 = vst [vmem:[#allocation5_spill] sm:$0xff] %v7665_v48  ;;  %vm524_vm4 = vcmp.ge.f32.partialorder %v7665_v48, 0.0  ;;  %v556_v49 = vmul.f32 0.01, %v7665_v48 }
  0x96   : > { %v7669_v50 = vpop.f32.mrf.mxu0 }
  0x97   : > { %13245 = vst [vmem:[#allocation6_spill] sm:$0xff] %v7669_v50  ;;  %v588_v52 = vsel %vm524_vm4, %v7665_v48, %v556_v49  ;;  %vm500_vm5 = vcmp.ge.f32.partialorder %v7669_v50, 0.0  ;;  %v532_v53 = vmul.f32 0.01, %v7669_v50 }
  0x98   : > { %725 = vrot.lane.b32.xlu1 %v588_v52, %s7473_s10 }
  0x99   : > { %v564_v54 = vsel %vm500_vm5, %v7669_v50, %v532_v53  ;;  %7282 = vmatmul.msk.f32.gmra.mxu0 %vm285_vm1, %v269_v44  ;;  %v7775_v38 = vpop.permute.xlu2 %1898 }
  0x9a   : > { %677 = vrot.lane.b32.xlu0 %v564_v54, %s7473_s10  ;;  %13264 = vst [vmem:[#allocation25_spill] sm:$0xff] %v7775_v38  ;;  %v274_v54 = vld [vmem:[%s7545_s28 + $0xb0] sm:$0xff] }
  0x9b   : > { %5750 = vst.msk [vmem:[#allocation3 + $0x121] sm:$0xff] %vm285_vm1, %v274_v54 }
  0x9c   : > { %v7680_v55 = vpop.f32.mrf.mxu3 }
  0x9d   : > { %13246 = vst [vmem:[#allocation7_spill] sm:$0xff] %v7680_v55  ;;  %vm525_vm6 = vcmp.ge.f32.partialorder %v7680_v55, 0.0  ;;  %v557_v56 = vmul.f32 0.01, %v7680_v55 }
  0x9e   : > { %v7684_v57 = vpop.f32.mrf.mxu0 }
  0x9f   : > { %13247 = vst [vmem:[#allocation8_spill] sm:$0xff] %v7684_v57  ;;  %vm501_vm7 = vcmp.ge.f32.partialorder %v7684_v57, 0.0  ;;  %v533_v58 = vmul.f32 0.01, %v7684_v57  ;;  %v589_v59 = vsel %vm525_vm6, %v7680_v55, %v557_v56  ;;  %v7773_v37 = vpop.permute.xlu0 %1640 }
  0xa0   : > { %727 = vrot.lane.b32.xlu2 %v589_v59, %s7473_s10  ;;  %13263 = vst [vmem:[#allocation24_spill] sm:$0xff] %v7773_v37  ;;  %v7798_v52 = vpop.permute.xlu1 %1772 }
  0xa1   : > { %v565_v60 = vsel %vm501_vm7, %v7684_v57, %v533_v58  ;;  %7283 = vmatmul.msk.f32.gmra.mxu0 %vm285_vm1, %v270_v51  ;;  %v7787_v44 = vpop.permute.xlu2 %2022  ;;  %13270 = vst [vmem:[#allocation31_spill] sm:$0xff] %v7798_v52  ;;  %vm13233_vm7 = vcmask 25600  }
  0xa2   : > { %679 = vrot.lane.b32.xlu1 %v565_v60, %s7473_s10  ;;  %13268 = vst [vmem:[#allocation29_spill] sm:$0xff] %v7787_v44 }
  0xa3   : > { %611 = vst.msk [vmem:[#allocation2 + $0x30] sm:$0x3] %vm13233_vm7, %v7467_v17 }
  0xa4   : > { %v7693_v61 = vpop.f32.mrf.mxu3  ;;  %612 = vst.msk [vmem:[#allocation2 + $0x48] sm:$0x3] %vm13233_vm7, %v7467_v17 }
  0xa5   : > { %13248 = vst [vmem:[#allocation9_spill] sm:$0xff] %v7693_v61  ;;  %vm526_vm8 = vcmp.ge.f32.partialorder %v7693_v61, 0.0  ;;  %v558_v62 = vmul.f32 0.01, %v7693_v61 }
  0xa6   : > { %v7697_v63 = vpop.f32.mrf.mxu0  ;;  %613 = vst.msk [vmem:[#allocation2 + $0x60] sm:$0x3] %vm13233_vm7, %v7467_v17 }
  0xa7   : > { %13249 = vst [vmem:[#allocation10_spill] sm:$0xff] %v7697_v63  ;;  %vm502_vm9 = vcmp.ge.f32.partialorder %v7697_v63, 0.0  ;;  %v534_v0 = vmul.f32 0.01, %v7697_v63  ;;  %v590_v1 = vsel %vm526_vm8, %v7693_v61, %v558_v62  ;;  %v7785_v43 = vpop.permute.xlu0 %1770 }
  0xa8   : > { %729 = vrot.lane.b32.xlu0 %v590_v1, %s7473_s10  ;;  %13267 = vst [vmem:[#allocation28_spill] sm:$0xff] %v7785_v43  ;;  %v7827_v62 = vpop.permute.xlu1 %1896 }
  0xa9   : > { %v566_v2 = vsel %vm502_vm9, %v7697_v63, %v534_v0  ;;  %7284 = vmatmul.msk.f32.gmra.mxu0 %vm285_vm1, %v271_v14  ;;  %v7811_v59 = vpop.permute.xlu2 %2028  ;;  %614 = vst.msk [vmem:[#allocation2 + $0x78] sm:$0x3] %vm13233_vm7, %v7467_v17 }
  0xaa   : > { %681 = vrot.lane.b32.xlu1 %v566_v2, %s7473_s10  ;;  %13273 = vst [vmem:[#allocation34_spill] sm:$0xff] %v7811_v59 }
  0xab   : > { %615 = vst.msk [vmem:[#allocation2 + $0x90] sm:$0x3] %vm13233_vm7, %v7467_v17 }
  0xac   : > { %v7705_v3 = vpop.f32.mrf.mxu3  ;;  %616 = vst.msk [vmem:[#allocation2 + $0xa8] sm:$0x3] %vm13233_vm7, %v7467_v17 }
  0xad   : > { %13250 = vst [vmem:[#allocation11_spill] sm:$0xff] %v7705_v3  ;;  %vm527_vm10 = vcmp.ge.f32.partialorder %v7705_v3, 0.0  ;;  %v559_v4 = vmul.f32 0.01, %v7705_v3 }
  0xae   : > { %v7709_v5 = vpop.f32.mrf.mxu0  ;;  %617 = vst.msk [vmem:[#allocation2 + $0xc0] sm:$0x3] %vm13233_vm7, %v7467_v17 }
  0xaf   : > { %13251 = vst [vmem:[#allocation12_spill] sm:$0xff] %v7709_v5  ;;  %vm503_vm11 = vcmp.ge.f32.partialorder %v7709_v5, 0.0  ;;  %v535_v6 = vmul.f32 0.01, %v7709_v5  ;;  %v591_v7 = vsel %vm527_vm10, %v7705_v3, %v559_v4  ;;  %v7809_v58 = vpop.permute.xlu0 %1894 }
  0xb0   : > { %13272 = vst [vmem:[#allocation33_spill] sm:$0xff] %v7809_v58  ;;  %v1443_v58 = vld [vmem:[#allocation2 + $0x1b4] sm:$0xff] }
  0xb1   : > { %v567_v8 = vsel %vm503_vm11, %v7709_v5, %v535_v6  ;;  %7285 = vmatmul.msk.f32.gmra.mxu0 %vm285_vm1, %v272_v23  ;;  %13274 = vst [vmem:[#allocation35_spill] sm:$0xff] %v7827_v62  ;;  %v7844_v6 = vpop.permute.xlu2 %2152 }
  0xb2   : > { %683 = vrot.lane.b32.xlu2 %v567_v8, %s7473_s10  ;;  %731 = vrot.lane.b32.xlu1 %v591_v7, %s7473_s10  ;;  %618 = vst.msk [vmem:[#allocation2 + $0xd8] sm:$0x3] %vm13233_vm7, %v7467_v17 }
  0xb3   : > { %619 = vst.msk [vmem:[#allocation2 + $0xf0] sm:$0x3] %vm13233_vm7, %v7467_v17 }
  0xb4   : > { %v7717_v9 = vpop.f32.mrf.mxu3  ;;  %620 = vst.msk [vmem:[#allocation2 + $0x108] sm:$0x3] %vm13233_vm7, %v7467_v17 }
  0xb5   : > { %13252 = vst [vmem:[#allocation13_spill] sm:$0xff] %v7717_v9  ;;  %vm528_vm12 = vcmp.ge.f32.partialorder %v7717_v9, 0.0  ;;  %v560_v10 = vmul.f32 0.01, %v7717_v9 }
  0xb6   : > { %v7721_v11 = vpop.f32.mrf.mxu0  ;;  %621 = vst.msk [vmem:[#allocation2 + $0x120] sm:$0x3] %vm13233_vm7, %v7467_v17 }
  0xb7   : > { %13253 = vst [vmem:[#allocation14_spill] sm:$0xff] %v7721_v11  ;;  %v592_v13 = vsel %vm528_vm12, %v7717_v9, %v560_v10  ;;  %v536_v18 = vmul.f32 0.01, %v7721_v11  ;;  %vm504_vm14 = vcmp.ge.f32.partialorder %v7721_v11, 0.0  ;;  %v7842_v4 = vpop.permute.xlu0 %1900  ;;  %v7863_v10 = vpop.permute.xlu1 %2026 }
  0xb8   : > { %13276 = vst [vmem:[#allocation37_spill] sm:$0xff] %v7842_v4 }
  0xb9   : > { %v568_v22 = vsel %vm504_vm14, %v7721_v11, %v536_v18  ;;  %7286 = vmatmul.msk.f32.gmra.mxu0 %vm285_vm1, %v273_v47  ;;  %13277 = vst [vmem:[#allocation38_spill] sm:$0xff] %v7844_v6 }
  0xba   : > { %733 = vrot.lane.b32.xlu2 %v592_v13, %s7473_s10  ;;  %622 = vst.msk [vmem:[#allocation2 + $0x138] sm:$0x3] %vm13233_vm7, %v7467_v17 }
  0xbb   : > { %623 = vst.msk [vmem:[#allocation2 + $0x150] sm:$0x3] %vm13233_vm7, %v7467_v17 }
  0xbc   : > { %v7730_v15 = vpop.f32.mrf.mxu3  ;;  %624 = vst.msk [vmem:[#allocation2 + $0x168] sm:$0x3] %vm13233_vm7, %v7467_v17 }
  0xbd   : > { %13255 = vst [vmem:[#allocation16_spill] sm:$0xff] %v7730_v15  ;;  %vm529_vm13 = vcmp.ge.f32.partialorder %v7730_v15, 0.0  ;;  %v561_v16 = vmul.f32 0.01, %v7730_v15 }
  0xbe   : > { %v7735_v19 = vpop.f32.mrf.mxu0  ;;  %625 = vst.msk [vmem:[#allocation2 + $0x180] sm:$0x3] %vm13233_vm7, %v7467_v17 }
  0xbf   : > { %13256 = vst [vmem:[#allocation17_spill] sm:$0xff] %v7735_v19  ;;  %v593_v20 = vsel %vm529_vm13, %v7730_v15, %v561_v16  ;;  %v537_v24 = vmul.f32 0.01, %v7735_v19  ;;  %vm505_vm15 = vcmp.ge.f32.partialorder %v7735_v19, 0.0  ;;  %v275_v16 = vld [vmem:[%s7545_s28 + $0xb8] sm:$0xff]  ;;  %v7876_v18 = vpop.permute.xlu0 %2024 }
  0xc0   : > { %735 = vrot.lane.b32.xlu0 %v593_v20, %s7473_s10  ;;  %626 = vst.msk [vmem:[#allocation2 + $0x198] sm:$0x3] %vm13233_vm7, %v7467_v17 }
  0xc1   : > { %v569_v29 = vsel %vm505_vm15, %v7735_v19, %v537_v24  ;;  %7287 = vmatmul.msk.f32.gmra.mxu0 %vm285_vm1, %v274_v54  ;;  %627 = vst.msk [vmem:[#allocation2 + $0x42] sm:$0x3] %vm13233_vm7, %v7467_v17  ;;  %v7895_v24 = vpop.permute.xlu1 %2150 }
  0xc2   : > { %685 = vrot.lane.b32.xlu2 %v568_v22, %s7473_s10  ;;  %13279 = vst [vmem:[#allocation40_spill] sm:$0xff] %v7863_v10 }
  0xc3   : > { %628 = vst.msk [vmem:[#allocation2 + $0x5a] sm:$0x3] %vm13233_vm7, %v7467_v17 }
  0xc4   : > { %v7748_v25 = vpop.f32.mrf.mxu3  ;;  %629 = vst.msk [vmem:[#allocation2 + $0x72] sm:$0x3] %vm13233_vm7, %v7467_v17 }
  0xc5   : > { %13258 = vst [vmem:[#allocation19_spill] sm:$0xff] %v7748_v25  ;;  %vm530_vm2 = vcmp.ge.f32.partialorder %v7748_v25, 0.0  ;;  %v562_v26 = vmul.f32 0.01, %v7748_v25 }
  0xc6   : > { %v7753_v27 = vpop.f32.mrf.mxu0  ;;  %630 = vst.msk [vmem:[#allocation2 + $0x8a] sm:$0x3] %vm13233_vm7, %v7467_v17 }
  0xc7   : > { %13259 = vst [vmem:[#allocation20_spill] sm:$0xff] %v7753_v27  ;;  %v594_v28 = vsel %vm530_vm2, %v7748_v25, %v562_v26  ;;  %v538_v31 = vmul.f32 0.01, %v7753_v27  ;;  %vm506_vm3 = vcmp.ge.f32.partialorder %v7753_v27, 0.0 }
  0xc8   : > { %737 = vrot.lane.b32.xlu1 %v594_v28, %s7473_s10  ;;  %687 = vrot.lane.b32.xlu0 %v569_v29, %s7473_s10  ;;  %13280 = vst [vmem:[#allocation41_spill] sm:$0xff] %v7876_v18 }
  0xc9   : > { %v570_v33 = vsel %vm506_vm3, %v7753_v27, %v538_v31  ;;  %7288 = vmatmul.msk.f32.gmra.mxu0 %vm285_vm1, %v275_v16  ;;  %631 = vst.msk [vmem:[#allocation2 + $0xa2] sm:$0x3] %vm13233_vm7, %v7467_v17 }
  0xca   : > { %632 = vst.msk [vmem:[#allocation2 + $0xba] sm:$0x3] %vm13233_vm7, %v7467_v17 }
  0xcb   : > { %633 = vst.msk [vmem:[#allocation2 + $0xd2] sm:$0x3] %vm13233_vm7, %v7467_v17 }
  0xcc   : > { %634 = vst.msk [vmem:[#allocation2 + $0xea] sm:$0x3] %vm13233_vm7, %v7467_v17 }
  0xcd   : > { %635 = vst.msk [vmem:[#allocation2 + $0x102] sm:$0x3] %vm13233_vm7, %v7467_v17 }
  0xce   : > { %v7763_v32 = vpop.f32.mrf.mxu0  ;;  %636 = vst.msk [vmem:[#allocation2 + $0x11a] sm:$0x3] %vm13233_vm7, %v7467_v17 }
  0xcf   : > { %13261 = vst [vmem:[#allocation22_spill] sm:$0xff] %v7763_v32  ;;  %vm507_vm4 = vcmp.ge.f32.partialorder %v7763_v32, 0.0  ;;  %v539_v34 = vmul.f32 0.01, %v7763_v32 }
  0xd0   : > { %689 = vrot.lane.b32.xlu1 %v570_v33, %s7473_s10  ;;  %13282 = vst [vmem:[#allocation43_spill] sm:$0xff] %v7895_v24 }
  0xd1   : > { %v571_v36 = vsel %vm507_vm4, %v7763_v32, %v539_v34  ;;  %637 = vst.msk [vmem:[#allocation2 + $0x132] sm:$0x3] %vm13233_vm7, %v7467_v17 }
  0xd2   : > { %691 = vrot.lane.b32.xlu2 %v571_v36, %s7473_s10  ;;  %638 = vst.msk [vmem:[#allocation2 + $0x14a] sm:$0x3] %vm13233_vm7, %v7467_v17 }
  0xd3   : > { %639 = vst.msk [vmem:[#allocation2 + $0x162] sm:$0x3] %vm13233_vm7, %v7467_v17 }
  0xd4   : > { %640 = vst.msk [vmem:[#allocation2 + $0x17a] sm:$0x3] %vm13233_vm7, %v7467_v17 }
  0xd5   : > { %641 = vst.msk [vmem:[#allocation2 + $0x192] sm:$0x3] %vm13233_vm7, %v7467_v17 }
  0xd6   : > { %v7777_v39 = vpop.f32.mrf.mxu0  ;;  %642 = vst.msk [vmem:[#allocation2 + $0x1aa] sm:$0x3] %vm13233_vm7, %v7467_v17  ;;  %vm3987_vm7 = vcmask 490496  }
  0xd7   : > { %13265 = vst [vmem:[#allocation26_spill] sm:$0xff] %v7777_v39  ;;  %vm508_vm5 = vcmp.ge.f32.partialorder %v7777_v39, 0.0  ;;  %v540_v40 = vmul.f32 0.01, %v7777_v39 }
  0xd8   : > { %5751 = vst.msk [vmem:[#allocation3 + $0x129] sm:$0xff] %vm285_vm1, %v275_v16 }
  0xd9   : > { %v572_v41 = vsel %vm508_vm5, %v7777_v39, %v540_v40 }
  0xda   : > { %693 = vrot.lane.b32.xlu0 %v572_v41, %s7473_s10  ;;  %v276_v41 = vld [vmem:[%s7545_s28 + $0xc0] sm:$0xff] }
  0xdb   : > { %7289 = vmatmul.msk.f32.gmra.mxu0 %vm285_vm1, %v276_v41  ;;  %5752 = vst.msk [vmem:[#allocation3 + $0x139] sm:$0xff] %vm285_vm1, %v276_v41 }
  0xde   : > { %v7789_v46 = vpop.f32.mrf.mxu0 }
  0xdf   : > { %13269 = vst [vmem:[#allocation30_spill] sm:$0xff] %v7789_v46  ;;  %vm509_vm6 = vcmp.ge.f32.partialorder %v7789_v46, 0.0  ;;  %v541_v49 = vmul.f32 0.01, %v7789_v46 }
  0xe1   : > { %v573_v51 = vsel %vm509_vm6, %v7789_v46, %v541_v49 }
  0xe2   : > { %695 = vrot.lane.b32.xlu1 %v573_v51, %s7473_s10 }
  0xe6   : > { %v7800_v53 = vpop.f32.mrf.mxu0 }
  0xe7   : > { %13271 = vst [vmem:[#allocation32_spill] sm:$0xff] %v7800_v53  ;;  %vm510_vm8 = vcmp.ge.f32.partialorder %v7800_v53, 0.0  ;;  %v542_v56 = vmul.f32 0.01, %v7800_v53 }
  0xe9   : > { %v574_v60 = vsel %vm510_vm8, %v7800_v53, %v542_v56 }
  0xea   : > { %697 = vrot.lane.b32.xlu2 %v574_v60, %s7473_s10 }
  0xee   : > { %v7829_v0 = vpop.f32.mrf.mxu0 }
  0xef   : > { %13275 = vst [vmem:[#allocation36_spill] sm:$0xff] %v7829_v0  ;;  %vm511_vm9 = vcmp.ge.f32.partialorder %v7829_v0, 0.0  ;;  %v543_v1 = vmul.f32 0.01, %v7829_v0 }
  0xf1   : > { %v575_v2 = vsel %vm511_vm9, %v7829_v0, %v543_v1  ;;  %vm3558_vm9 = vcmask 64512  }
  0xf2   : > { %699 = vrot.lane.b32.xlu0 %v575_v2, %s7473_s10 }
  0xf6   : > { %v7855_v7 = vpop.f32.mrf.mxu0 }
  0xf7   : > { %13278 = vst [vmem:[#allocation39_spill] sm:$0xff] %v7855_v7  ;;  %vm512_vm10 = vcmp.ge.f32.partialorder %v7855_v7, 0.0  ;;  %v544_v8 = vmul.f32 0.01, %v7855_v7 }
  0xf9   : > { %v576_v13 = vsel %vm512_vm10, %v7855_v7, %v544_v8  ;;  %vm3591_vm10 = vcmask 97280  }
  0xfa   : > { %701 = vrot.lane.b32.xlu1 %v576_v13, %s7473_s10  ;;  %v728_v14 = vpop.permute.xlu2 %727 }
  0xfb   : > { %797 = vst.msk [vmem:[#allocation2 + $0x16a] sm:$0xff] %vm285_vm1, %v728_v14 }
  0xfe   : > { %v7882_v20 = vpop.f32.mrf.mxu0 }
  0xff   : > { %13281 = vst [vmem:[#allocation42_spill] sm:$0xff] %v7882_v20  ;;  %vm513_vm11 = vcmp.ge.f32.partialorder %v7882_v20, 0.0  ;;  %v545_v22 = vmul.f32 0.01, %v7882_v20 }
 0x101   : > { %v577_v23 = vsel %vm513_vm11, %v7882_v20, %v545_v22  ;;  %vm13238_vm11 = vcmask 130048  }
 0x102   : > { %703 = vrot.lane.b32.xlu2 %v577_v23, %s7473_s10  ;;  %v865_v41 = vld [vmem:[#allocation2 + $0x169] sm:$0xff] }
 0x104   : > { %v676_v26 = vpop.permute.xlu0 %675 }
 0x105   : > { %771 = vst.msk [vmem:[#allocation2 + $0x32] sm:$0xff] %vm285_vm1, %v676_v26 }
 0x106   : > { %v7905_v28 = vpop.f32.mrf.mxu0 }
 0x107   : > { %13283 = vst [vmem:[#allocation44_spill] sm:$0xff] %v7905_v28  ;;  %vm514_vm12 = vcmp.ge.f32.partialorder %v7905_v28, 0.0  ;;  %v546_v29 = vmul.f32 0.01, %v7905_v28 }
 0x109   : > { %v578_v31 = vsel %vm514_vm12, %v7905_v28, %v546_v29  ;;  %vm13237_vm12 = vcmask 162816  }
 0x10a   : > { %705 = vrot.lane.b32.xlu0 %v578_v31, %s7473_s10  ;;  %v726_v33 = vpop.permute.xlu1 %725 }
 0x10b   : > { %796 = vst.msk [vmem:[#allocation2 + $0x15a] sm:$0xff] %vm285_vm1, %v726_v33 }
 0x10c   : > { %v678_v34 = vpop.permute.xlu0 %677  ;;  %v684_v36 = vpop.permute.xlu2 %683  ;;  %v871_v40 = vld [vmem:[#allocation2 + $0x32] sm:$0xff] }
 0x10d   : > { %772 = vst.msk [vmem:[#allocation2 + $0x3a] sm:$0xff] %vm285_vm1, %v678_v34  ;;  %1774 = vrot.lane.b32.xlu2 %v871_v40, %s7469_s30  ;;  %v839_v49 = vld [vmem:[#allocation2 + $0x31] sm:$0xff] }
 0x10e   : > { %775 = vst.msk [vmem:[#allocation2 + $0x62] sm:$0xff] %vm285_vm1, %v684_v36  ;;  %v7923_v17 = vpop.f32.mrf.mxu0  ;;  %v966_v1 = vld [vmem:[#allocation2 + $0x30] sm:$0xff] }
 0x10f   : > { %13284 = vst [vmem:[#allocation45_spill] sm:$0xff] %v7923_v17  ;;  %vm515_vm13 = vcmp.ge.f32.partialorder %v7923_v17, 0.0  ;;  %v547_v47 = vmul.f32 0.01, %v7923_v17 }
 0x111   : > { %v579_v51 = vsel %vm515_vm13, %v7923_v17, %v547_v47  ;;  %vm3690_vm13 = vcmask 195584  }
 0x112   : > { %1646 = vrot.lane.b32.xlu0 %v839_v49, %s7468_s29  ;;  %707 = vrot.lane.b32.xlu1 %v579_v51, %s7473_s10  ;;  %v928_v54 = vld [vmem:[#allocation2 + $0x15b] sm:$0xff] }
 0x113   : > { %v960_v2 = vld [vmem:[#allocation2 + $0x15c] sm:$0xff] }
 0x114   : > { %v680_v56 = vpop.permute.xlu1 %679  ;;  %v734_v60 = vpop.permute.xlu2 %733  ;;  %v904_v22 = vld [vmem:[#allocation2 + $0x3b] sm:$0xff]  ;;  %v903_v36 = vld [vmem:[#allocation2 + $0x33] sm:$0xff] }
 0x115   : > { %773 = vst.msk [vmem:[#allocation2 + $0x4a] sm:$0xff] %vm285_vm1, %v680_v56  ;;  %1952 = vrot.lane.b32.xlu2 %v928_v54, %s7470_s7  ;;  %v896_v26 = vld [vmem:[#allocation2 + $0x15a] sm:$0xff] }
 0x116   : > { %800 = vst.msk [vmem:[#allocation2 + $0x18a] sm:$0xff] %vm285_vm1, %v734_v60  ;;  %v7937_v13 = vpop.f32.mrf.mxu0  ;;  %v840_v29 = vld [vmem:[#allocation2 + $0x39] sm:$0xff] }
 0x117   : > { %13285 = vst [vmem:[#allocation46_spill] sm:$0xff] %v7937_v13  ;;  %v548_v23 = vmul.f32 0.01, %v7937_v13  ;;  %vm516_vm14 = vcmp.ge.f32.partialorder %v7937_v13, 0.0  ;;  %v872_v34 = vld [vmem:[#allocation2 + $0x3a] sm:$0xff] }
 0x118   : > { %v935_v49 = vld [vmem:[#allocation2 + $0x34] sm:$0xff]  ;;  %v936_v51 = vld [vmem:[#allocation2 + $0x3c] sm:$0xff] }
 0x119   : > { %v580_v31 = vsel %vm516_vm14, %v7937_v13, %v548_v23  ;;  %vm3723_vm14 = vcmask 228352  }
 0x11a   : > { %2154 = vrot.lane.b32.xlu0 %v966_v1, %s7472_s9  ;;  %2080 = vrot.lane.b32.xlu1 %v960_v2, %s7471_s8  ;;  %v730_v8 = vpop.permute.xlu0 %729  ;;  %v967_v2 = vld [vmem:[#allocation2 + $0x38] sm:$0xff] }
 0x11b   : > { %798 = vst.msk [vmem:[#allocation2 + $0x172] sm:$0xff] %vm285_vm1, %v730_v8 }
 0x11c   : > { %v682_v14 = vpop.permute.xlu1 %681  ;;  %v686_v16 = vpop.permute.xlu2 %685  ;;  %v841_v60 = vld [vmem:[#allocation2 + $0x49] sm:$0xff] }
 0x11d   : > { %774 = vst.msk [vmem:[#allocation2 + $0x52] sm:$0xff] %vm285_vm1, %v682_v14  ;;  %1904 = vrot.lane.b32.xlu2 %v904_v22, %s7470_s7  ;;  %v897_v22 = vld [vmem:[#allocation2 + $0x16a] sm:$0xff] }
 0x11e   : > { %776 = vst.msk [vmem:[#allocation2 + $0x6a] sm:$0xff] %vm285_vm1, %v686_v16  ;;  %v7954_v47 = vpop.f32.mrf.mxu0  ;;  %v968_v16 = vld [vmem:[#allocation2 + $0x48] sm:$0xff] }
 0x11f   : > { %13286 = vst [vmem:[#allocation47_spill] sm:$0xff] %v7954_v47  ;;  %v549_v56 = vmul.f32 0.01, %v7954_v47  ;;  %vm517_vm15 = vcmp.ge.f32.partialorder %v7954_v47, 0.0  ;;  %v1440_v44 = vld [vmem:[#allocation2 + $0x18c] sm:$0xff] }
 0x121   : > { %v581_v1 = vsel %vm517_vm15, %v7954_v47, %v549_v56  ;;  %vm13242_vm15 = vcmask 261120  }
 0x122   : > { %1824 = vrot.lane.b32.xlu0 %v896_v26, %s7469_s30  ;;  %1648 = vrot.lane.b32.xlu1 %v840_v29, %s7468_s29  ;;  %v866_v23 = vld [vmem:[#allocation2 + $0x171] sm:$0xff] }
 0x123   : > { %v898_v29 = vld [vmem:[#allocation2 + $0x172] sm:$0xff] }
 0x124   : > { %v732_v33 = vpop.permute.xlu1 %731  ;;  %v874_v56 = vld [vmem:[#allocation2 + $0x52] sm:$0xff] }
 0x125   : > { %709 = vrot.lane.b32.xlu2 %v580_v31, %s7473_s10  ;;  %799 = vst.msk [vmem:[#allocation2 + $0x182] sm:$0xff] %vm285_vm1, %v732_v33  ;;  %v873_v33 = vld [vmem:[#allocation2 + $0x4a] sm:$0xff] }
 0x126   : > { %v1437_v24 = vld [vmem:[#allocation2 + $0x16c] sm:$0xff] }
 0x127   : > { %v1447_v12 = vld [vmem:[#allocation2 + $0x68] sm:$0xff] }
 0x12a   : > { %1776 = vrot.lane.b32.xlu0 %v872_v34, %s7469_s30  ;;  %1902 = vrot.lane.b32.xlu1 %v903_v36, %s7470_s7  ;;  %v929_v34 = vld [vmem:[#allocation2 + $0x16b] sm:$0xff] }
 0x12c   : > { %v692_v40 = vpop.permute.xlu2 %691 }
 0x12d   : > { %779 = vst.msk [vmem:[#allocation2 + $0x92] sm:$0xff] %vm285_vm1, %v692_v40  ;;  %1698 = vrot.lane.b32.xlu2 %v865_v41, %s7468_s29  ;;  %v961_v40 = vld [vmem:[#allocation2 + $0x16c] sm:$0xff] }
 0x12e   : > { %v930_v41 = vld [vmem:[#allocation2 + $0x173] sm:$0xff] }
 0x132   : > { %v736_v54 = vpop.permute.xlu0 %735  ;;  %2030 = vrot.lane.b32.xlu0 %v935_v49, %s7471_s8  ;;  %2032 = vrot.lane.b32.xlu1 %v936_v51, %s7471_s8  ;;  %v962_v49 = vld [vmem:[#allocation2 + $0x174] sm:$0xff]  ;;  %v7977_v51 = vpop.f32.mrf.mxu0 }
 0x133   : > { %801 = vst.msk [vmem:[#allocation2 + $0x19a] sm:$0xff] %vm285_vm1, %v736_v54  ;;  %vm518_vm2 = vcmp.ge.f32.partialorder %v7977_v51, 0.0 }
 0x134   : > { %13287 = vst [vmem:[#allocation48_spill] sm:$0xff] %v7977_v51  ;;  %v974_v20 = vld [vmem:[#allocation2 + $0x90] sm:$0xff] }
 0x135   : > { %1650 = vrot.lane.b32.xlu2 %v841_v60, %s7468_s29  ;;  %v906_v60 = vld [vmem:[#allocation2 + $0x53] sm:$0xff] }
 0x136   : > { %v879_v53 = vld [vmem:[#allocation2 + $0x92] sm:$0xff] }
 0x13a   : > { %v738_v8 = vpop.permute.xlu1 %737  ;;  %v688_v14 = vpop.permute.xlu0 %687  ;;  %2156 = vrot.lane.b32.xlu1 %v967_v2, %s7472_s9  ;;  %711 = vrot.lane.b32.xlu0 %v581_v1, %s7473_s10  ;;  %v7983_v1 = vld [vmem:[#allocation2 + $0x51] sm:$0xff] }
 0x13b   : > { %802 = vst.msk [vmem:[#allocation2 + $0x1a2] sm:$0xff] %vm285_vm1, %v738_v8  ;;  %v7988_v2 = vpop.f32.mrf.mxu0 }
 0x13c   : > { %777 = vst.msk [vmem:[#allocation2 + $0x7a] sm:$0xff] %vm285_vm1, %v688_v14  ;;  %v937_v14 = vld [vmem:[#allocation2 + $0x4c] sm:$0xff]  ;;  %vm519_vm3 = vcmp.ge.f32.partialorder %v7988_v2, 0.0 }
 0x13d   : > { %2158 = vrot.lane.b32.xlu2 %v968_v16, %s7472_s9  ;;  %13288 = vst [vmem:[#allocation49_spill] sm:$0xff] %v7988_v2  ;;  %v550_v16 = vmul.f32 0.01, %v7977_v51 }
 0x142   : > { %v690_v26 = vpop.permute.xlu1 %689  ;;  %1826 = vrot.lane.b32.xlu1 %v897_v22, %s7469_s30  ;;  %1700 = vrot.lane.b32.xlu0 %v866_v23, %s7468_s29  ;;  %v551_v22 = vmul.f32 0.01, %v7988_v2  ;;  %v905_v23 = vld [vmem:[#allocation2 + $0x4b] sm:$0xff]  ;;  %v1441_v21 = vld [vmem:[#allocation2 + $0x19c] sm:$0xff] }
 0x143   : > { %778 = vst.msk [vmem:[#allocation2 + $0x82] sm:$0xff] %vm285_vm1, %v690_v26  ;;  %v582_v26 = vsel %vm518_vm2, %v7977_v51, %v550_v16  ;;  %v875_v16 = vld [vmem:[#allocation2 + $0x62] sm:$0xff]  ;;  %v972_v55 = vld [vmem:[#allocation2 + $0x78] sm:$0xff]  ;;  %vm13240_vm2 = vcmask 326656  }
 0x144   : > { %v698_v31 = vpop.permute.xlu2 %697 }
 0x145   : > { %782 = vst.msk [vmem:[#allocation2 + $0xb2] sm:$0xff] %vm285_vm1, %v698_v31  ;;  %1828 = vrot.lane.b32.xlu2 %v898_v29, %s7469_s30  ;;  %v583_v29 = vsel %vm519_vm3, %v7988_v2, %v551_v22  ;;  %v876_v22 = vld [vmem:[#allocation2 + $0x6a] sm:$0xff]  ;;  %vm3789_vm3 = vcmask 293888  }
 0x14a   : > { %1778 = vrot.lane.b32.xlu1 %v873_v33, %s7469_s30  ;;  %1954 = vrot.lane.b32.xlu0 %v929_v34, %s7470_s7  ;;  %v938_v34 = vld [vmem:[#allocation2 + $0x54] sm:$0xff]  ;;  %v8052_v9 = vld [vmem:[#allocation2 + $0x81] sm:$0xff] }
 0x14b   : > { %v909_v3 = vld [vmem:[#allocation2 + $0x7b] sm:$0xff] }
 0x14c   : > { %v694_v36 = vpop.permute.xlu0 %693  ;;  %v878_v2 = vld [vmem:[#allocation2 + $0x82] sm:$0xff]  ;;  %v946_v50 = vld [vmem:[#allocation2 + $0xb4] sm:$0xff] }
 0x14d   : > { %780 = vst.msk [vmem:[#allocation2 + $0x9a] sm:$0xff] %vm285_vm1, %v694_v36  ;;  %2082 = vrot.lane.b32.xlu2 %v961_v40, %s7471_s8  ;;  %v843_v36 = vld [vmem:[#allocation2 + $0x61] sm:$0xff]  ;;  %v914_v45 = vld [vmem:[#allocation2 + $0xb3] sm:$0xff] }
 0x14e   : > { %v973_v51 = vld [vmem:[#allocation2 + $0x80] sm:$0xff] }
 0x152   : > { %1956 = vrot.lane.b32.xlu1 %v930_v41, %s7470_s7  ;;  %2084 = vrot.lane.b32.xlu0 %v962_v49, %s7471_s8  ;;  %v8006_v41 = vld [vmem:[#allocation2 + $0x69] sm:$0xff] }
 0x154   : > { %v696_v54 = vpop.permute.xlu1 %695  ;;  %v880_v7 = vld [vmem:[#allocation2 + $0x9a] sm:$0xff] }
 0x155   : > { %781 = vst.msk [vmem:[#allocation2 + $0xaa] sm:$0xff] %vm285_vm1, %v696_v54  ;;  %1780 = vrot.lane.b32.xlu2 %v874_v56, %s7469_s30  ;;  %v969_v54 = vld [vmem:[#allocation2 + $0x50] sm:$0xff]  ;;  %v970_v56 = vld [vmem:[#allocation2 + $0x60] sm:$0xff]  ;;  %v1451_v42 = vld [vmem:[#allocation2 + $0x98] sm:$0xff] }
 0x156   : > { %v911_v32 = vld [vmem:[#allocation2 + $0x93] sm:$0xff]  ;;  %v944_v11 = vld [vmem:[#allocation2 + $0x9c] sm:$0xff] }
 0x15a   : > { %1908 = vrot.lane.b32.xlu1 %v906_v60, %s7470_s7  ;;  %1652 = vrot.lane.b32.xlu0 %v7983_v1, %s7468_s29  ;;  %v907_v60 = vld [vmem:[#allocation2 + $0x63] sm:$0xff] }
 0x15c   : > { %v704_v8 = vpop.permute.xlu2 %703  ;;  %v8133_v0 = vld [vmem:[#allocation2 + $0xb1] sm:$0xff] }
 0x15d   : > { %785 = vst.msk [vmem:[#allocation2 + $0xda] sm:$0xff] %vm285_vm1, %v704_v8  ;;  %2034 = vrot.lane.b32.xlu2 %v937_v14, %s7471_s8  ;;  %v8018_v14 = vpop.f32.mrf.mxu0  ;;  %v913_v39 = vld [vmem:[#allocation2 + $0xab] sm:$0xff] }
 0x15e   : > { %13292 = vst [vmem:[#allocation53_spill] sm:$0xff] %v8018_v14  ;;  %vm520_vm4 = vcmp.ge.f32.partialorder %v8018_v14, 0.0  ;;  %v945_v5 = vld [vmem:[#allocation2 + $0xac] sm:$0xff] }
 0x15f   : > { %v8148_v19 = vld [vmem:[#allocation2 + $0xaa] sm:$0xff] }
 0x162   : > { %1906 = vrot.lane.b32.xlu0 %v905_v23, %s7470_s7  ;;  %713 = vrot.lane.b32.xlu1 %v582_v26, %s7473_s10  ;;  %v940_v26 = vld [vmem:[#allocation2 + $0x6c] sm:$0xff] }
 0x164   : > { %v700_v31 = vpop.permute.xlu0 %699 }
 0x165   : > { %783 = vst.msk [vmem:[#allocation2 + $0xc2] sm:$0xff] %vm285_vm1, %v700_v31  ;;  %715 = vrot.lane.b32.xlu2 %v583_v29, %s7473_s10  ;;  %v908_v31 = vld [vmem:[#allocation2 + $0x6b] sm:$0xff] }
 0x167   : > { %v8002_v33 = vpop.permute.xlu2 %1774 }
 0x168   : > { %13289 = vst [vmem:[#allocation50_spill] sm:$0xff] %v8002_v33 }
 0x16a   : > { %2036 = vrot.lane.b32.xlu0 %v938_v34, %s7471_s8  ;;  %1654 = vrot.lane.b32.xlu1 %v843_v36, %s7468_s29  ;;  %v939_v34 = vld [vmem:[#allocation2 + $0x64] sm:$0xff]  ;;  %v8027_v36 = vpop.f32.mrf.mxu0 }
 0x16b   : > { %13293 = vst [vmem:[#allocation54_spill] sm:$0xff] %v8027_v36  ;;  %vm521_vm5 = vcmp.ge.f32.partialorder %v8027_v36, 0.0 }
 0x16c   : > { %v702_v40 = vpop.permute.xlu1 %701 }
 0x16d   : > { %784 = vst.msk [vmem:[#allocation2 + $0xca] sm:$0xff] %vm285_vm1, %v702_v40  ;;  %1656 = vrot.lane.b32.xlu2 %v8006_v41, %s7468_s29 }
 0x16f   : > { %v8011_v49 = vpop.permute.xlu2 %1952 }
 0x170   : > { %13290 = vst [vmem:[#allocation51_spill] sm:$0xff] %v8011_v49  ;;  %v8168_v49 = vld [vmem:[#allocation2 + $0xc2] sm:$0xff] }
 0x172   : > { %2160 = vrot.lane.b32.xlu0 %v969_v54, %s7472_s9  ;;  %2162 = vrot.lane.b32.xlu1 %v970_v56, %s7472_s9  ;;  %v971_v56 = vld [vmem:[#allocation2 + $0x68] sm:$0xff] }
 0x174   : > { %v820_v4 = vld [vmem:[#allocation2 + $0xc8] sm:$0xff] }
 0x175   : > { %1910 = vrot.lane.b32.xlu2 %v907_v60, %s7470_s7  ;;  %v552_v60 = vmul.f32 0.01, %v8018_v14 }
 0x177   : > { %v8016_v8 = vpop.permute.xlu2 %1904 }
 0x178   : > { %13291 = vst [vmem:[#allocation52_spill] sm:$0xff] %v8016_v8 }
 0x17a   : > { %1782 = vrot.lane.b32.xlu0 %v875_v16, %s7469_s30  ;;  %1784 = vrot.lane.b32.xlu1 %v876_v22, %s7469_s30  ;;  %v553_v16 = vmul.f32 0.01, %v8027_v36 }
 0x17c   : > { %v706_v23 = vpop.permute.xlu0 %705 }
 0x17d   : > { %786 = vst.msk [vmem:[#allocation2 + $0xe2] sm:$0xff] %vm285_vm1, %v706_v23  ;;  %2040 = vrot.lane.b32.xlu2 %v940_v26, %s7471_s8  ;;  %v584_v23 = vsel %vm520_vm4, %v8018_v14, %v552_v60  ;;  %v585_v26 = vsel %vm521_vm5, %v8027_v36, %v553_v16  ;;  %v8058_v60 = vpop.f32.mrf.mxu0  ;;  %v942_v36 = vld [vmem:[#allocation2 + $0x84] sm:$0xff]  ;;  %vm13236_vm4 = vcmask 359424   ;;  %vm13235_vm5 = vcmask 424960  }
 0x17e   : > { %13299 = vst [vmem:[#allocation60_spill] sm:$0xff] %v8058_v60  ;;  %vm522_vm6 = vcmp.ge.f32.partialorder %v8058_v60, 0.0 }
 0x17f   : > { %v710_v29 = vpop.permute.xlu2 %709 }
 0x180   : > { %788 = vst.msk [vmem:[#allocation2 + $0xfa] sm:$0xff] %vm285_vm1, %v710_v29 }
 0x182   : > { %1912 = vrot.lane.b32.xlu0 %v908_v31, %s7470_s7  ;;  %2038 = vrot.lane.b32.xlu1 %v939_v34, %s7471_s8  ;;  %v877_v34 = vld [vmem:[#allocation2 + $0x7a] sm:$0xff] }
 0x184   : > { %v8029_v40 = vpop.permute.xlu0 %1646  ;;  %v708_v54 = vpop.permute.xlu1 %707 }
 0x185   : > { %13294 = vst [vmem:[#allocation55_spill] sm:$0xff] %v8029_v40  ;;  %2164 = vrot.lane.b32.xlu2 %v971_v56, %s7472_s9  ;;  %v8050_v56 = vld [vmem:[#allocation2 + $0x79] sm:$0xff] }
 0x186   : > { %787 = vst.msk [vmem:[#allocation2 + $0xf2] sm:$0xff] %vm285_vm1, %v708_v54 }
 0x187   : > { %v8037_v22 = vpop.permute.xlu2 %1698  ;;  %v1428_v18 = vld [vmem:[#allocation2 + $0xfc] sm:$0xff] }
 0x188   : > { %13295 = vst [vmem:[#allocation56_spill] sm:$0xff] %v8037_v22 }
 0x18a   : > { %717 = vrot.lane.b32.xlu0 %v584_v23, %s7473_s10  ;;  %719 = vrot.lane.b32.xlu1 %v585_v26, %s7473_s10  ;;  %v910_v26 = vld [vmem:[#allocation2 + $0x83] sm:$0xff] }
 0x18c   : > { %v8043_v29 = vpop.permute.xlu0 %2154  ;;  %v8045_v31 = vpop.permute.xlu1 %2080 }
 0x18d   : > { %13296 = vst [vmem:[#allocation57_spill] sm:$0xff] %v8043_v29  ;;  %1786 = vrot.lane.b32.xlu2 %v877_v34, %s7469_s30  ;;  %v554_v34 = vmul.f32 0.01, %v8058_v60 }
 0x18e   : > { %13297 = vst [vmem:[#allocation58_spill] sm:$0xff] %v8045_v31 }
 0x18f   : > { %v8048_v54 = vpop.permute.xlu2 %1650  ;;  %v586_v15 = vsel %vm522_vm6, %v8058_v60, %v554_v34  ;;  %v941_v60 = vld [vmem:[#allocation2 + $0x7c] sm:$0xff]  ;;  %vm3888_vm6 = vcmask 392192  }
 0x190   : > { %13298 = vst [vmem:[#allocation59_spill] sm:$0xff] %v8048_v54 }
 0x192   : > { %1658 = vrot.lane.b32.xlu0 %v8050_v56, %s7468_s29  ;;  %1660 = vrot.lane.b32.xlu1 %v8052_v9, %s7468_s29 }
 0x194   : > { %v8060_v16 = vpop.permute.xlu0 %1824  ;;  %v8062_v23 = vpop.permute.xlu1 %1648 }
 0x195   : > { %13300 = vst [vmem:[#allocation61_spill] sm:$0xff] %v8060_v16  ;;  %1916 = vrot.lane.b32.xlu2 %v910_v26, %s7470_s7  ;;  %v8174_v16 = vld [vmem:[#allocation2 + $0xc1] sm:$0xff] }
 0x196   : > { %13301 = vst [vmem:[#allocation62_spill] sm:$0xff] %v8062_v23  ;;  %v821_v23 = vld [vmem:[#allocation2 + $0xd8] sm:$0xff] }
 0x197   : > { %v8066_v25 = vpop.permute.xlu2 %2158 }
 0x198   : > { %13302 = vst [vmem:[#allocation63_spill] sm:$0xff] %v8066_v25  ;;  %v917_v25 = vld [vmem:[#allocation2 + $0xdb] sm:$0xff] }
 0x19a   : > { %2166 = vrot.lane.b32.xlu0 %v972_v55, %s7472_s9  ;;  %1914 = vrot.lane.b32.xlu1 %v909_v3, %s7470_s7  ;;  %v8085_v3 = vld [vmem:[#allocation2 + $0x91] sm:$0xff] }
 0x19c   : > { %v8072_v48 = vpop.permute.xlu0 %1776  ;;  %v8074_v61 = vpop.permute.xlu1 %1902 }
 0x19d   : > { %13303 = vst [vmem:[#allocation64_spill] sm:$0xff] %v8072_v48  ;;  %721 = vrot.lane.b32.xlu2 %v586_v15, %s7473_s10  ;;  %v8091_v15 = vpop.f32.mrf.mxu0 }
 0x19e   : > { %13304 = vst [vmem:[#allocation65_spill] sm:$0xff] %v8074_v61  ;;  %vm523_vm8 = vcmp.ge.f32.partialorder %v8091_v15, 0.0 }
 0x19f   : > { %v8077_v26 = vpop.permute.xlu2 %1828  ;;  %13309 = vst [vmem:[#allocation70_spill] sm:$0xff] %v8091_v15 }
 0x1a0   : > { %13305 = vst [vmem:[#allocation66_spill] sm:$0xff] %v8077_v26 }
 0x1a2   : > { %1788 = vrot.lane.b32.xlu0 %v878_v2, %s7469_s30  ;;  %2044 = vrot.lane.b32.xlu1 %v942_v36, %s7471_s8  ;;  %v555_v2 = vmul.f32 0.01, %v8091_v15 }
 0x1a4   : > { %v8081_v13 = vpop.permute.xlu0 %2030  ;;  %v8083_v55 = vpop.permute.xlu1 %2032  ;;  %v587_v47 = vsel %vm523_vm8, %v8091_v15, %v555_v2  ;;  %v943_v2 = vld [vmem:[#allocation2 + $0x94] sm:$0xff]  ;;  %vm3954_vm8 = vcmask 457728  }
 0x1a5   : > { %13306 = vst [vmem:[#allocation67_spill] sm:$0xff] %v8081_v13  ;;  %1662 = vrot.lane.b32.xlu2 %v8085_v3, %s7468_s29 }
 0x1a6   : > { %13307 = vst [vmem:[#allocation68_spill] sm:$0xff] %v8083_v55  ;;  %v8252_v55 = vld [vmem:[#allocation2 + $0xf2] sm:$0xff] }
 0x1a7   : > { %v8089_v34 = vpop.permute.xlu2 %2082 }
 0x1a8   : > { %13308 = vst [vmem:[#allocation69_spill] sm:$0xff] %v8089_v34 }
 0x1aa   : > { %2042 = vrot.lane.b32.xlu0 %v941_v60, %s7471_s8  ;;  %2168 = vrot.lane.b32.xlu1 %v973_v51, %s7472_s9 }
 0x1ac   : > { %v8096_v36 = vpop.permute.xlu1 %2156  ;;  %v712_v14 = vpop.permute.xlu0 %711 }
 0x1ad   : > { %13310 = vst [vmem:[#allocation71_spill] sm:$0xff] %v8096_v36  ;;  %2170 = vrot.lane.b32.xlu2 %v974_v20, %s7472_s9  ;;  %v8113_v20 = vld [vmem:[#allocation2 + $0x99] sm:$0xff] }
 0x1ae   : > { %789 = vst.msk [vmem:[#allocation2 + $0x10a] sm:$0xff] %vm285_vm1, %v712_v14  ;;  %v912_v14 = vld [vmem:[#allocation2 + $0x9b] sm:$0xff] }
 0x1af   : > { %v8101_v17 = vpop.permute.xlu2 %1780  ;;  %v8234_v36 = vld [vmem:[#allocation2 + $0xf9] sm:$0xff] }
 0x1b0   : > { %13311 = vst [vmem:[#allocation72_spill] sm:$0xff] %v8101_v17 }
 0x1b2   : > { %1790 = vrot.lane.b32.xlu1 %v879_v53, %s7469_s30  ;;  %723 = vrot.lane.b32.xlu0 %v587_v47, %s7473_s10  ;;  %s7488_s10 = smov 122  }
 0x1b4   : > { %v8106_v51 = vpop.permute.xlu1 %1826  ;;  %v8108_v60 = vpop.permute.xlu0 %1700 }
 0x1b5   : > { %13312 = vst [vmem:[#allocation73_spill] sm:$0xff] %v8106_v51  ;;  %1792 = vrot.lane.b32.xlu2 %v880_v7, %s7469_s30  ;;  %v8124_v7 = vld [vmem:[#allocation2 + $0xa9] sm:$0xff] }
 0x1b6   : > { %13313 = vst [vmem:[#allocation74_spill] sm:$0xff] %v8108_v60 }
 0x1b7   : > { %v8111_v28 = vpop.permute.xlu2 %2034 }
 0x1b8   : > { %13314 = vst [vmem:[#allocation75_spill] sm:$0xff] %v8111_v28 }
 0x1ba   : > { %1920 = vrot.lane.b32.xlu1 %v912_v14, %s7470_s7  ;;  %1664 = vrot.lane.b32.xlu0 %v8113_v20, %s7468_s29 }
 0x1bc   : > { %v8118_v53 = vpop.permute.xlu1 %1778  ;;  %v8120_v47 = vpop.permute.xlu0 %1954 }
 0x1bd   : > { %13315 = vst [vmem:[#allocation76_spill] sm:$0xff] %v8118_v53  ;;  %2046 = vrot.lane.b32.xlu2 %v943_v2, %s7471_s8 }
 0x1be   : > { %13316 = vst [vmem:[#allocation77_spill] sm:$0xff] %v8120_v47 }
 0x1bf   : > { %v716_v15 = vpop.permute.xlu2 %715 }
 0x1c0   : > { %791 = vst.msk [vmem:[#allocation2 + $0x122] sm:$0xff] %vm285_vm1, %v716_v15  ;;  %v882_v15 = vld [vmem:[#allocation2 + $0xb2] sm:$0xff] }
 0x1c2   : > { %1666 = vrot.lane.b32.xlu1 %v8124_v7, %s7468_s29  ;;  %1918 = vrot.lane.b32.xlu0 %v911_v32, %s7470_s7 }
 0x1c4   : > { %v8129_v14 = vpop.permute.xlu1 %1956  ;;  %v8131_v46 = vpop.permute.xlu0 %2084 }
 0x1c5   : > { %13317 = vst [vmem:[#allocation78_spill] sm:$0xff] %v8129_v14  ;;  %1668 = vrot.lane.b32.xlu2 %v8133_v0, %s7468_s29 }
 0x1c6   : > { %13318 = vst [vmem:[#allocation79_spill] sm:$0xff] %v8131_v46  ;;  %v949_v46 = vld [vmem:[#allocation2 + $0xdc] sm:$0xff] }
 0x1c7   : > { %v8137_v2 = vpop.permute.xlu2 %1656 }
 0x1c8   : > { %13319 = vst [vmem:[#allocation80_spill] sm:$0xff] %v8137_v2  ;;  %v8215_v2 = vld [vmem:[#allocation2 + $0xe1] sm:$0xff] }
 0x1ca   : > { %1796 = vrot.lane.b32.xlu1 %v882_v15, %s7469_s30  ;;  %2048 = vrot.lane.b32.xlu0 %v944_v11, %s7471_s8 }
 0x1cc   : > { %v8141_v27 = vpop.permute.xlu1 %1908  ;;  %v8143_v32 = vpop.permute.xlu0 %1652 }
 0x1cd   : > { %13320 = vst [vmem:[#allocation81_spill] sm:$0xff] %v8141_v27  ;;  %1922 = vrot.lane.b32.xlu2 %v913_v39, %s7470_s7  ;;  %v8159_v39 = vld [vmem:[#allocation2 + $0xc9] sm:$0xff] }
 0x1ce   : > { %13321 = vst [vmem:[#allocation82_spill] sm:$0xff] %v8143_v32 }
 0x1cf   : > { %v8146_v57 = vpop.permute.xlu2 %1910 }
 0x1d0   : > { %13322 = vst [vmem:[#allocation83_spill] sm:$0xff] %v8146_v57  ;;  %v916_v57 = vld [vmem:[#allocation2 + $0xcb] sm:$0xff] }
 0x1d2   : > { %2050 = vrot.lane.b32.xlu1 %v945_v5, %s7471_s8  ;;  %1794 = vrot.lane.b32.xlu0 %v8148_v19, %s7469_s30 }
 0x1d4   : > { %v8153_v15 = vpop.permute.xlu0 %1906  ;;  %v714_v11 = vpop.permute.xlu1 %713 }
 0x1d5   : > { %13323 = vst [vmem:[#allocation84_spill] sm:$0xff] %v8153_v15  ;;  %2052 = vrot.lane.b32.xlu2 %v946_v50, %s7471_s8  ;;  %v951_v15 = vld [vmem:[#allocation2 + $0xf4] sm:$0xff] }
 0x1d6   : > { %790 = vst.msk [vmem:[#allocation2 + $0x112] sm:$0xff] %vm285_vm1, %v714_v11  ;;  %v915_v11 = vld [vmem:[#allocation2 + $0xc3] sm:$0xff] }
 0x1d7   : > { %v8157_v63 = vpop.permute.xlu2 %2040 }
 0x1d8   : > { %13324 = vst [vmem:[#allocation85_spill] sm:$0xff] %v8157_v63 }
 0x1da   : > { %1672 = vrot.lane.b32.xlu1 %v8159_v39, %s7468_s29  ;;  %1924 = vrot.lane.b32.xlu0 %v914_v45, %s7470_s7 }
 0x1dc   : > { %v8164_v5 = vpop.permute.xlu0 %2036  ;;  %v8166_v31 = vpop.permute.xlu1 %1654 }
 0x1dd   : > { %13325 = vst [vmem:[#allocation86_spill] sm:$0xff] %v8164_v5  ;;  %1798 = vrot.lane.b32.xlu2 %v8168_v49, %s7469_s30  ;;  %v8186_v5 = vld [vmem:[#allocation2 + $0xca] sm:$0xff]  ;;  %v922_v14 = vld [vmem:[#allocation2 + $0x113] sm:$0xff] }
 0x1de   : > { %13326 = vst [vmem:[#allocation87_spill] sm:$0xff] %v8166_v31  ;;  %v948_v31 = vld [vmem:[#allocation2 + $0xcc] sm:$0xff]  ;;  %v954_v47 = vld [vmem:[#allocation2 + $0x114] sm:$0xff] }
 0x1df   : > { %v8172_v50 = vpop.permute.xlu2 %2164 }
 0x1e0   : > { %13327 = vst [vmem:[#allocation88_spill] sm:$0xff] %v8172_v50 }
 0x1e2   : > { %1926 = vrot.lane.b32.xlu1 %v915_v11, %s7470_s7  ;;  %1670 = vrot.lane.b32.xlu0 %v8174_v16, %s7468_s29 }
 0x1e4   : > { %v8179_v45 = vpop.permute.xlu0 %2160  ;;  %v8181_v63 = vpop.permute.xlu1 %2162 }
 0x1e5   : > { %13328 = vst [vmem:[#allocation89_spill] sm:$0xff] %v8179_v45  ;;  %1928 = vrot.lane.b32.xlu2 %v916_v57, %s7470_s7  ;;  %v8195_v45 = vld [vmem:[#allocation2 + $0xd9] sm:$0xff] }
 0x1e6   : > { %13329 = vst [vmem:[#allocation90_spill] sm:$0xff] %v8181_v63  ;;  %v947_v63 = vld [vmem:[#allocation2 + $0xc4] sm:$0xff] }
 0x1e7   : > { %v8184_v28 = vpop.permute.xlu2 %1786 }
 0x1e8   : > { %13330 = vst [vmem:[#allocation91_spill] sm:$0xff] %v8184_v28  ;;  %v8201_v28 = vld [vmem:[#allocation2 + $0xda] sm:$0xff] }
 0x1ea   : > { %2056 = vrot.lane.b32.xlu1 %v948_v31, %s7471_s8  ;;  %1800 = vrot.lane.b32.xlu0 %v8186_v5, %s7469_s30 }
 0x1ec   : > { %v8191_v11 = vpop.permute.xlu0 %1782  ;;  %v8193_v50 = vpop.permute.xlu1 %1784 }
 0x1ed   : > { %13331 = vst [vmem:[#allocation92_spill] sm:$0xff] %v8191_v11  ;;  %1674 = vrot.lane.b32.xlu2 %v8195_v45, %s7468_s29 }
 0x1ee   : > { %13332 = vst [vmem:[#allocation93_spill] sm:$0xff] %v8193_v50  ;;  %v8210_v50 = vld [vmem:[#allocation2 + $0xe2] sm:$0xff] }
 0x1ef   : > { %v8199_v57 = vpop.permute.xlu2 %1916 }
 0x1f0   : > { %13333 = vst [vmem:[#allocation94_spill] sm:$0xff] %v8199_v57  ;;  %v918_v57 = vld [vmem:[#allocation2 + $0xe3] sm:$0xff] }
 0x1f2   : > { %1802 = vrot.lane.b32.xlu1 %v8201_v28, %s7469_s30  ;;  %2054 = vrot.lane.b32.xlu0 %v947_v63, %s7471_s8 }
 0x1f4   : > { %v8206_v31 = vpop.permute.xlu0 %1912  ;;  %v8208_v11 = vpop.permute.xlu1 %2038 }
 0x1f5   : > { %13334 = vst [vmem:[#allocation95_spill] sm:$0xff] %v8206_v31  ;;  %1804 = vrot.lane.b32.xlu2 %v8210_v50, %s7469_s30 }
 0x1f6   : > { %13335 = vst [vmem:[#allocation96_spill] sm:$0xff] %v8208_v11 }
 0x1f7   : > { %v722_v27 = vpop.permute.xlu2 %721 }
 0x1f8   : > { %794 = vst.msk [vmem:[#allocation2 + $0x142] sm:$0xff] %vm285_vm1, %v722_v27  ;;  %v8225_v27 = vld [vmem:[#allocation2 + $0xf1] sm:$0xff] }
 0x1fa   : > { %1932 = vrot.lane.b32.xlu1 %v918_v57, %s7470_s7  ;;  %1676 = vrot.lane.b32.xlu0 %v8215_v2, %s7468_s29 }
 0x1fc   : > { %v718_v63 = vpop.permute.xlu0 %717  ;;  %v720_v31 = vpop.permute.xlu1 %719 }
 0x1fd   : > { %792 = vst.msk [vmem:[#allocation2 + $0x12a] sm:$0xff] %vm285_vm1, %v718_v63  ;;  %2058 = vrot.lane.b32.xlu2 %v949_v46, %s7471_s8  ;;  %v950_v63 = vld [vmem:[#allocation2 + $0xe4] sm:$0xff] }
 0x1fe   : > { %793 = vst.msk [vmem:[#allocation2 + $0x13a] sm:$0xff] %vm285_vm1, %v720_v31  ;;  %v8240_v31 = vld [vmem:[#allocation2 + $0xfa] sm:$0xff] }
 0x1ff   : > { %v8223_v11 = vpop.permute.xlu2 %1662  ;;  %v8377_v60 = vld [vmem:[#allocation2 + $0x143] sm:$0xff] }
 0x200   : > { %13336 = vst [vmem:[#allocation97_spill] sm:$0xff] %v8223_v11 }
 0x202   : > { %1678 = vrot.lane.b32.xlu1 %v8225_v27, %s7468_s29  ;;  %1930 = vrot.lane.b32.xlu0 %v917_v25, %s7470_s7 }
 0x204   : > { %v8230_v57 = vpop.permute.xlu0 %1658  ;;  %v8232_v34 = vpop.permute.xlu1 %1660  ;;  %v8320_v51 = vld [vmem:[#allocation2 + $0x129] sm:$0xff] }
 0x205   : > { %13337 = vst [vmem:[#allocation98_spill] sm:$0xff] %v8230_v57  ;;  %1680 = vrot.lane.b32.xlu2 %v8234_v36, %s7468_s29  ;;  %v8332_v32 = vld [vmem:[#allocation2 + $0x139] sm:$0xff]  ;;  %v956_v8 = vld [vmem:[#allocation2 + $0x12c] sm:$0xff]  ;;  %v1431_v43 = vld [vmem:[#allocation2 + $0x124] sm:$0xff] }
 0x206   : > { %13338 = vst [vmem:[#allocation99_spill] sm:$0xff] %v8232_v34  ;;  %v919_v34 = vld [vmem:[#allocation2 + $0xf3] sm:$0xff] }
 0x207   : > { %v8238_v46 = vpop.permute.xlu2 %2170  ;;  %v8365_v29 = vld [vmem:[#allocation2 + $0x13a] sm:$0xff] }
 0x208   : > { %13339 = vst [vmem:[#allocation100_spill] sm:$0xff] %v8238_v46 }
 0x20a   : > { %1808 = vrot.lane.b32.xlu1 %v8240_v31, %s7469_s30  ;;  %2060 = vrot.lane.b32.xlu0 %v950_v63, %s7471_s8 }
 0x20c   : > { %v8245_v25 = vpop.permute.xlu0 %2166  ;;  %v8247_v11 = vpop.permute.xlu1 %1914 }
 0x20d   : > { %13340 = vst [vmem:[#allocation101_spill] sm:$0xff] %v8245_v25  ;;  %1934 = vrot.lane.b32.xlu2 %v919_v34, %s7470_s7  ;;  %v952_v25 = vld [vmem:[#allocation2 + $0xfc] sm:$0xff]  ;;  %v8264_v34 = vld [vmem:[#allocation2 + $0x111] sm:$0xff] }
 0x20e   : > { %13341 = vst [vmem:[#allocation102_spill] sm:$0xff] %v8247_v11 }
 0x20f   : > { %v8250_v57 = vpop.permute.xlu2 %1792 }
 0x210   : > { %13342 = vst [vmem:[#allocation103_spill] sm:$0xff] %v8250_v57  ;;  %v920_v57 = vld [vmem:[#allocation2 + $0xfb] sm:$0xff] }
 0x212   : > { %2062 = vrot.lane.b32.xlu1 %v951_v15, %s7471_s8  ;;  %1806 = vrot.lane.b32.xlu0 %v8252_v55, %s7469_s30 }
 0x214   : > { %v8257_v46 = vpop.permute.xlu0 %1788  ;;  %v8259_v63 = vpop.permute.xlu1 %2044 }
 0x215   : > { %13343 = vst [vmem:[#allocation104_spill] sm:$0xff] %v8257_v46  ;;  %2064 = vrot.lane.b32.xlu2 %v952_v25, %s7471_s8  ;;  %v8273_v46 = vld [vmem:[#allocation2 + $0x10a] sm:$0xff] }
 0x216   : > { %13344 = vst [vmem:[#allocation105_spill] sm:$0xff] %v8259_v63  ;;  %v8279_v63 = vld [vmem:[#allocation2 + $0x109] sm:$0xff] }
 0x217   : > { %v8262_v11 = vpop.permute.xlu2 %2046 }
 0x218   : > { %13345 = vst [vmem:[#allocation106_spill] sm:$0xff] %v8262_v11  ;;  %v921_v11 = vld [vmem:[#allocation2 + $0x10b] sm:$0xff] }
 0x21a   : > { %1684 = vrot.lane.b32.xlu1 %v8264_v34, %s7468_s29  ;;  %1936 = vrot.lane.b32.xlu0 %v920_v57, %s7470_s7 }
 0x21c   : > { %v8269_v15 = vpop.permute.xlu0 %2042  ;;  %v8271_v17 = vpop.permute.xlu1 %2168 }
 0x21d   : > { %13346 = vst [vmem:[#allocation107_spill] sm:$0xff] %v8269_v15  ;;  %1810 = vrot.lane.b32.xlu2 %v8273_v46, %s7469_s30 }
 0x21e   : > { %13347 = vst [vmem:[#allocation108_spill] sm:$0xff] %v8271_v17 }
 0x21f   : > { %v8277_v25 = vpop.permute.xlu2 %1668 }
 0x220   : > { %13348 = vst [vmem:[#allocation109_spill] sm:$0xff] %v8277_v25  ;;  %v8290_v25 = vld [vmem:[#allocation2 + $0x112] sm:$0xff] }
 0x222   : > { %1938 = vrot.lane.b32.xlu1 %v921_v11, %s7470_s7  ;;  %1682 = vrot.lane.b32.xlu0 %v8279_v63, %s7468_s29 }
 0x224   : > { %v8284_v57 = vpop.permute.xlu1 %1790  ;;  %v724_v15 = vpop.permute.xlu0 %723 }
 0x225   : > { %13349 = vst [vmem:[#allocation110_spill] sm:$0xff] %v8284_v57  ;;  %1940 = vrot.lane.b32.xlu2 %v922_v14, %s7470_s7  ;;  %v8299_v57 = vld [vmem:[#allocation2 + $0x121] sm:$0xff] }
 0x226   : > { %795 = vst.msk [vmem:[#allocation2 + $0x152] sm:$0xff] %vm285_vm1, %v724_v15  ;;  %v8305_v15 = vld [vmem:[#allocation2 + $0x122] sm:$0xff] }
 0x227   : > { %v8288_v17 = vpop.permute.xlu2 %1922 }
 0x228   : > { %13350 = vst [vmem:[#allocation111_spill] sm:$0xff] %v8288_v17  ;;  %v953_v17 = vld [vmem:[#allocation2 + $0x10c] sm:$0xff] }
 0x22a   : > { %2068 = vrot.lane.b32.xlu1 %v954_v47, %s7471_s8  ;;  %1812 = vrot.lane.b32.xlu0 %v8290_v25, %s7469_s30 }
 0x22c   : > { %v8295_v11 = vpop.permute.xlu1 %1920  ;;  %v8297_v53 = vpop.permute.xlu0 %1664 }
 0x22d   : > { %13351 = vst [vmem:[#allocation112_spill] sm:$0xff] %v8295_v11  ;;  %1686 = vrot.lane.b32.xlu2 %v8299_v57, %s7468_s29  ;;  %v8397_v33 = vld [vmem:[#allocation2 + $0x151] sm:$0xff] }
 0x22e   : > { %13352 = vst [vmem:[#allocation113_spill] sm:$0xff] %v8297_v53  ;;  %v8314_v53 = vld [vmem:[#allocation2 + $0x12a] sm:$0xff]  ;;  %v959_v10 = vld [vmem:[#allocation2 + $0x154] sm:$0xff] }
 0x22f   : > { %v8303_v14 = vpop.permute.xlu2 %2052 }
 0x230   : > { %13353 = vst [vmem:[#allocation114_spill] sm:$0xff] %v8303_v14  ;;  %v924_v14 = vld [vmem:[#allocation2 + $0x12b] sm:$0xff] }
 0x232   : > { %1814 = vrot.lane.b32.xlu1 %v8305_v15, %s7469_s30  ;;  %2066 = vrot.lane.b32.xlu0 %v953_v17, %s7471_s8 }
 0x234   : > { %v8310_v47 = vpop.permute.xlu1 %1666  ;;  %v8312_v11 = vpop.permute.xlu0 %1918 }
 0x235   : > { %13354 = vst [vmem:[#allocation115_spill] sm:$0xff] %v8310_v47  ;;  %1816 = vrot.lane.b32.xlu2 %v8314_v53, %s7469_s30 }
 0x236   : > { %13355 = vst [vmem:[#allocation116_spill] sm:$0xff] %v8312_v11  ;;  %v955_v11 = vld [vmem:[#allocation2 + $0x124] sm:$0xff] }
 0x237   : > { %v8318_v26 = vpop.permute.xlu2 %1798 }
 0x238   : > { %13356 = vst [vmem:[#allocation117_spill] sm:$0xff] %v8318_v26  ;;  %v8334_v26 = vld [vmem:[#allocation2 + $0x123] sm:$0xff] }
 0x23a   : > { %1944 = vrot.lane.b32.xlu1 %v924_v14, %s7470_s7  ;;  %1688 = vrot.lane.b32.xlu0 %v8320_v51, %s7468_s29 }
 0x23c   : > { %v8325_v17 = vpop.permute.xlu1 %1796  ;;  %v8327_v47 = vpop.permute.xlu0 %2048 }
 0x23d   : > { %13357 = vst [vmem:[#allocation118_spill] sm:$0xff] %v8325_v17  ;;  %2070 = vrot.lane.b32.xlu2 %v955_v11, %s7471_s8 }
 0x23e   : > { %13358 = vst [vmem:[#allocation119_spill] sm:$0xff] %v8327_v47  ;;  %v8344_v47 = vld [vmem:[#allocation2 + $0x141] sm:$0xff] }
 0x23f   : > { %v8330_v13 = vpop.permute.xlu2 %1928 }
 0x240   : > { %13359 = vst [vmem:[#allocation120_spill] sm:$0xff] %v8330_v13  ;;  %v8350_v13 = vld [vmem:[#allocation2 + $0x142] sm:$0xff] }
 0x242   : > { %1690 = vrot.lane.b32.xlu1 %v8332_v32, %s7468_s29  ;;  %1942 = vrot.lane.b32.xlu0 %v8334_v26, %s7470_s7 }
 0x244   : > { %v8340_v14 = vpop.permute.xlu1 %2050  ;;  %v8342_v17 = vpop.permute.xlu0 %1794 }
 0x245   : > { %13360 = vst [vmem:[#allocation121_spill] sm:$0xff] %v8340_v14  ;;  %1692 = vrot.lane.b32.xlu2 %v8344_v47, %s7468_s29 }
 0x246   : > { %13361 = vst [vmem:[#allocation122_spill] sm:$0xff] %v8342_v17  ;;  %v8359_v17 = vld [vmem:[#allocation2 + $0x13b] sm:$0xff] }
 0x247   : > { %v8348_v11 = vpop.permute.xlu2 %1674 }
 0x248   : > { %13362 = vst [vmem:[#allocation123_spill] sm:$0xff] %v8348_v11  ;;  %v957_v11 = vld [vmem:[#allocation2 + $0x13c] sm:$0xff] }
 0x24a   : > { %1820 = vrot.lane.b32.xlu1 %v8350_v13, %s7469_s30  ;;  %2072 = vrot.lane.b32.xlu0 %v956_v8, %s7471_s8 }
 0x24c   : > { %v8355_v61 = vpop.permute.xlu1 %1672  ;;  %v8357_v14 = vpop.permute.xlu0 %1924 }
 0x24d   : > { %13363 = vst [vmem:[#allocation124_spill] sm:$0xff] %v8355_v61  ;;  %1946 = vrot.lane.b32.xlu2 %v8359_v17, %s7470_s7 }
 0x24e   : > { %13364 = vst [vmem:[#allocation125_spill] sm:$0xff] %v8357_v14  ;;  %v958_v14 = vld [vmem:[#allocation2 + $0x144] sm:$0xff] }
 0x24f   : > { %v8363_v54 = vpop.permute.xlu2 %1804 }
 0x250   : > { %13365 = vst [vmem:[#allocation126_spill] sm:$0xff] %v8363_v54  ;;  %v8379_v54 = vld [vmem:[#allocation2 + $0x159] sm:$0xff] }
 0x252   : > { %2074 = vrot.lane.b32.xlu1 %v957_v11, %s7471_s8  ;;  %1818 = vrot.lane.b32.xlu0 %v8365_v29, %s7469_s30 }
 0x254   : > { %v8370_v8 = vpop.permute.xlu1 %1926  ;;  %v8372_v61 = vpop.permute.xlu0 %1670 }
 0x255   : > { %13366 = vst [vmem:[#allocation127_spill] sm:$0xff] %v8370_v8  ;;  %2076 = vrot.lane.b32.xlu2 %v958_v14, %s7471_s8 }
 0x256   : > { %13367 = vst [vmem:[#allocation128_spill] sm:$0xff] %v8372_v61  ;;  %v8389_v61 = vld [vmem:[#allocation2 + $0x152] sm:$0xff] }
 0x257   : > { %v8375_v22 = vpop.permute.xlu2 %2058 }
 0x258   : > { %13368 = vst [vmem:[#allocation129_spill] sm:$0xff] %v8375_v22  ;;  %v8395_v22 = vld [vmem:[#allocation2 + $0x153] sm:$0xff] }
 0x25a   : > { %1948 = vrot.lane.b32.xlu0 %v8377_v60, %s7470_s7  ;;  %1696 = vrot.lane.b32.xlu1 %v8379_v54, %s7468_s29 }
 0x25c   : > { %v8385_v11 = vpop.permute.xlu1 %2056  ;;  %v8387_v8 = vpop.permute.xlu0 %1800 }
 0x25d   : > { %13369 = vst [vmem:[#allocation130_spill] sm:$0xff] %v8385_v11  ;;  %1822 = vrot.lane.b32.xlu2 %v8389_v61, %s7469_s30  ;;  %v818_v11 = vld [vmem:[#allocation2 + $0xb0] sm:$0xff] }
 0x25e   : > { %13370 = vst [vmem:[#allocation131_spill] sm:$0xff] %v8387_v8 }
 0x25f   : > { %v8393_v14 = vpop.permute.xlu2 %1680 }
 0x260   : > { %13371 = vst [vmem:[#allocation132_spill] sm:$0xff] %v8393_v14  ;;  %v817_v14 = vld [vmem:[#allocation2 + $0xa8] sm:$0xff] }
 0x262   : > { %1950 = vrot.lane.b32.xlu1 %v8395_v22, %s7470_s7  ;;  %1694 = vrot.lane.b32.xlu0 %v8397_v33, %s7468_s29 }
 0x264   : > { %v8403_v59 = vpop.permute.xlu1 %1802  ;;  %v8405_v8 = vpop.permute.xlu0 %2054 }
 0x265   : > { %13372 = vst [vmem:[#allocation133_spill] sm:$0xff] %v8403_v59  ;;  %2176 = vrot.lane.b32.xlu2 %v818_v11, %s7472_s9  ;;  %v824_v11 = vld [vmem:[#allocation2 + $0xf8] sm:$0xff] }
 0x266   : > { %13373 = vst [vmem:[#allocation134_spill] sm:$0xff] %v8405_v8  ;;  %v816_v8 = vld [vmem:[#allocation2 + $0x98] sm:$0xff] }
 0x267   : > { %v8408_v48 = vpop.permute.xlu2 %1934 }
 0x268   : > { %13374 = vst [vmem:[#allocation135_spill] sm:$0xff] %v8408_v48 }
 0x26a   : > { %2174 = vrot.lane.b32.xlu1 %v817_v14, %s7472_s9  ;;  %2078 = vrot.lane.b32.xlu0 %v959_v10, %s7471_s8 }
 0x26c   : > { %v8412_v40 = vpop.permute.xlu1 %1932  ;;  %v8414_v6 = vpop.permute.xlu0 %1676 }
 0x26d   : > { %13375 = vst [vmem:[#allocation136_spill] sm:$0xff] %v8412_v40  ;;  %2182 = vrot.lane.b32.xlu2 %v821_v23, %s7472_s9  ;;  %v819_v40 = vld [vmem:[#allocation2 + $0xc0] sm:$0xff] }
 0x26e   : > { %13376 = vst [vmem:[#allocation137_spill] sm:$0xff] %v8414_v6  ;;  %v823_v6 = vld [vmem:[#allocation2 + $0xf0] sm:$0xff] }
 0x26f   : > { %v8417_v59 = vpop.permute.xlu2 %2064 }
 0x270   : > { %13377 = vst [vmem:[#allocation138_spill] sm:$0xff] %v8417_v59 }
 0x272   : > { %2180 = vrot.lane.b32.xlu1 %v820_v4, %s7472_s9  ;;  %2172 = vrot.lane.b32.xlu0 %v816_v8, %s7472_s9  ;;  %v986_v8 = vld [vmem:[#allocation2 + $0x120] sm:$0xff] }
 0x274   : > { %v8421_v48 = vpop.permute.xlu1 %1678  ;;  %v8423_v14 = vpop.permute.xlu0 %1930 }
 0x275   : > { %13378 = vst [vmem:[#allocation139_spill] sm:$0xff] %v8421_v48  ;;  %2188 = vrot.lane.b32.xlu2 %v824_v11, %s7472_s9  ;;  %v822_v48 = vld [vmem:[#allocation2 + $0xe0] sm:$0xff] }
 0x276   : > { %13379 = vst [vmem:[#allocation140_spill] sm:$0xff] %v8423_v14  ;;  %v985_v14 = vld [vmem:[#allocation2 + $0x110] sm:$0xff] }
 0x277   : > { %v8426_v10 = vpop.permute.xlu2 %1810 }
 0x278   : > { %13380 = vst [vmem:[#allocation141_spill] sm:$0xff] %v8426_v10  ;;  %v984_v10 = vld [vmem:[#allocation2 + $0x108] sm:$0xff] }
 0x27a   : > { %2186 = vrot.lane.b32.xlu1 %v823_v6, %s7472_s9  ;;  %2178 = vrot.lane.b32.xlu0 %v819_v40, %s7472_s9  ;;  %v989_v40 = vld [vmem:[#allocation2 + $0x140] sm:$0xff] }
 0x27c   : > { %v8430_v23 = vpop.permute.xlu1 %1808  ;;  %v8432_v4 = vpop.permute.xlu0 %2060 }
 0x27d   : > { %13381 = vst [vmem:[#allocation142_spill] sm:$0xff] %v8430_v23  ;;  %2194 = vrot.lane.b32.xlu2 %v986_v8, %s7472_s9  ;;  %v833_v8 = vld [vmem:[#allocation2 + $0x168] sm:$0xff] }
 0x27e   : > { %13382 = vst [vmem:[#allocation143_spill] sm:$0xff] %v8432_v4  ;;  %v988_v4 = vld [vmem:[#allocation2 + $0x138] sm:$0xff] }
 0x27f   : > { %v8435_v59 = vpop.permute.xlu2 %1940 }
 0x280   : > { %13383 = vst [vmem:[#allocation144_spill] sm:$0xff] %v8435_v59 }
 0x282   : > { %2192 = vrot.lane.b32.xlu1 %v985_v14, %s7472_s9  ;;  %2184 = vrot.lane.b32.xlu0 %v822_v48, %s7472_s9 }
 0x284   : > { %v8439_v11 = vpop.permute.xlu1 %2062  ;;  %v8441_v6 = vpop.permute.xlu0 %1806 }
 0x285   : > { %13384 = vst [vmem:[#allocation145_spill] sm:$0xff] %v8439_v11  ;;  %2200 = vrot.lane.b32.xlu2 %v989_v40, %s7472_s9  ;;  %v991_v11 = vld [vmem:[#allocation2 + $0x158] sm:$0xff] }
 0x286   : > { %13385 = vst [vmem:[#allocation146_spill] sm:$0xff] %v8441_v6  ;;  %v987_v6 = vld [vmem:[#allocation2 + $0x128] sm:$0xff] }
 0x287   : > { %v8444_v23 = vpop.permute.xlu2 %1686 }
 0x288   : > { %13386 = vst [vmem:[#allocation147_spill] sm:$0xff] %v8444_v23 }
 0x28a   : > { %2198 = vrot.lane.b32.xlu1 %v988_v4, %s7472_s9  ;;  %2190 = vrot.lane.b32.xlu0 %v984_v10, %s7472_s9  ;;  %v995_v10 = vld [vmem:[#allocation2 + $0x188] sm:$0xff] }
 0x28c   : > { %v8448_v59 = vpop.permute.xlu1 %1684  ;;  %v8450_v14 = vpop.permute.xlu0 %1936 }
 0x28d   : > { %13387 = vst [vmem:[#allocation148_spill] sm:$0xff] %v8448_v59  ;;  %2206 = vrot.lane.b32.xlu2 %v833_v8, %s7472_s9  ;;  %v990_v59 = vld [vmem:[#allocation2 + $0x150] sm:$0xff] }
 0x28e   : > { %13388 = vst [vmem:[#allocation149_spill] sm:$0xff] %v8450_v14  ;;  %v994_v14 = vld [vmem:[#allocation2 + $0x180] sm:$0xff] }
 0x28f   : > { %v8453_v48 = vpop.permute.xlu2 %1816 }
 0x290   : > { %13389 = vst [vmem:[#allocation150_spill] sm:$0xff] %v8453_v48 }
 0x292   : > { %2204 = vrot.lane.b32.xlu1 %v991_v11, %s7472_s9  ;;  %2196 = vrot.lane.b32.xlu0 %v987_v6, %s7472_s9  ;;  %v998_v6 = vld [vmem:[#allocation2 + $0x31] sm:$0xff] }
 0x294   : > { %v8457_v40 = vpop.permute.xlu1 %1938  ;;  %v8459_v4 = vpop.permute.xlu0 %1682 }
 0x295   : > { %13390 = vst [vmem:[#allocation151_spill] sm:$0xff] %v8457_v40  ;;  %2212 = vrot.lane.b32.xlu2 %v995_v10, %s7472_s9  ;;  %v997_v40 = vld [vmem:[#allocation2 + $0x21] sm:$0xff]  ;;  %v834_v10 = vld [vmem:[#allocation2 + $0x170] sm:$0xff] }
 0x296   : > { %13391 = vst [vmem:[#allocation152_spill] sm:$0xff] %v8459_v4 }
 0x297   : > { %v8462_v23 = vpop.permute.xlu2 %2070 }
 0x298   : > { %13392 = vst [vmem:[#allocation153_spill] sm:$0xff] %v8462_v23 }
 0x29a   : > { %2210 = vrot.lane.b32.xlu1 %v994_v14, %s7472_s9  ;;  %2202 = vrot.lane.b32.xlu0 %v990_v59, %s7472_s9 }
 0x29c   : > { %v8466_v8 = vpop.permute.xlu1 %2068  ;;  %v8468_v11 = vpop.permute.xlu0 %1812 }
 0x29d   : > { %13393 = vst [vmem:[#allocation154_spill] sm:$0xff] %v8466_v8  ;;  %2282 = vrot.lane.b32.xlu2 %v998_v6, %s7474_s11  ;;  %v996_v8 = vld [vmem:[#allocation2 + $0x19] sm:$0xff] }
 0x29e   : > { %13394 = vst [vmem:[#allocation155_spill] sm:$0xff] %v8468_v11  ;;  %v1000_v11 = vld [vmem:[#allocation2 + $0x49] sm:$0xff] }
 0x29f   : > { %v8471_v48 = vpop.permute.xlu2 %1692 }
 0x2a0   : > { %13395 = vst [vmem:[#allocation156_spill] sm:$0xff] %v8471_v48  ;;  %v1170_v48 = vld [vmem:[#allocation2 + $0xd9] sm:$0xff] }
 0x2a2   : > { %2280 = vrot.lane.b32.xlu1 %v997_v40, %s7474_s11  ;;  %2208 = vrot.lane.b32.xlu0 %v834_v10, %s7472_s9 }
 0x2a4   : > { %v8475_v23 = vpop.permute.xlu1 %1814  ;;  %v8477_v14 = vpop.permute.xlu0 %2066 }
 0x2a5   : > { %13396 = vst [vmem:[#allocation157_spill] sm:$0xff] %v8475_v23  ;;  %2288 = vrot.lane.b32.xlu2 %v7983_v1, %s7474_s11  ;;  %v999_v23 = vld [vmem:[#allocation2 + $0x39] sm:$0xff] }
 0x2a6   : > { %13397 = vst [vmem:[#allocation158_spill] sm:$0xff] %v8477_v14  ;;  %v9221_v14 = vld [vmem:[#allocation2 + $0x16a] sm:$0xff] }
 0x2a7   : > { %v8481_v59 = vpop.permute.xlu2 %1946 }
 0x2a8   : > { %13398 = vst [vmem:[#allocation159_spill] sm:$0xff] %v8481_v59  ;;  %v1002_v59 = vld [vmem:[#allocation2 + $0x61] sm:$0xff] }
 0x2aa   : > { %2286 = vrot.lane.b32.xlu1 %v1000_v11, %s7474_s11  ;;  %2278 = vrot.lane.b32.xlu0 %v996_v8, %s7474_s11 }
 0x2ac   : > { %v8485_v6 = vpop.permute.xlu1 %1944  ;;  %v8487_v40 = vpop.permute.xlu0 %1688 }
 0x2ad   : > { %13399 = vst [vmem:[#allocation160_spill] sm:$0xff] %v8485_v6  ;;  %2294 = vrot.lane.b32.xlu2 %v8050_v56, %s7474_s11  ;;  %v1140_v6 = vld [vmem:[#allocation2 + $0xf0] sm:$0xff] }
 0x2ae   : > { %13400 = vst [vmem:[#allocation161_spill] sm:$0xff] %v8487_v40  ;;  %v1173_v40 = vld [vmem:[#allocation2 + $0xf9] sm:$0xff] }
 0x2af   : > { %v8491_v10 = vpop.permute.xlu2 %2076 }
 0x2b0   : > { %13401 = vst [vmem:[#allocation162_spill] sm:$0xff] %v8491_v10  ;;  %v1074_v10 = vld [vmem:[#allocation2 + $0xc3] sm:$0xff] }
 0x2b2   : > { %2292 = vrot.lane.b32.xlu1 %v8006_v41, %s7474_s11  ;;  %2284 = vrot.lane.b32.xlu0 %v999_v23, %s7474_s11 }
 0x2b4   : > { %v8496_v1 = vpop.permute.xlu1 %1690  ;;  %v8498_v11 = vpop.permute.xlu0 %1942 }
 0x2b5   : > { %13402 = vst [vmem:[#allocation163_spill] sm:$0xff] %v8496_v1  ;;  %2300 = vrot.lane.b32.xlu2 %v8113_v20, %s7474_s11  ;;  %v1164_v1 = vld [vmem:[#allocation2 + $0x91] sm:$0xff] }
 0x2b6   : > { %13403 = vst [vmem:[#allocation164_spill] sm:$0xff] %v8498_v11  ;;  %v1161_v11 = vld [vmem:[#allocation2 + $0x69] sm:$0xff] }
 0x2b7   : > { %v8502_v8 = vpop.permute.xlu2 %1822 }
 0x2b8   : > { %13404 = vst [vmem:[#allocation165_spill] sm:$0xff] %v8502_v8  ;;  %v1083_v8 = vld [vmem:[#allocation2 + $0x12b] sm:$0xff] }
 0x2ba   : > { %2298 = vrot.lane.b32.xlu1 %v8085_v3, %s7474_s11  ;;  %2290 = vrot.lane.b32.xlu0 %v1002_v59, %s7474_s11 }
 0x2bc   : > { %v8507_v56 = vpop.permute.xlu1 %1820  ;;  %v8509_v41 = vpop.permute.xlu0 %2072 }
 0x2bd   : > { %13405 = vst [vmem:[#allocation166_spill] sm:$0xff] %v8507_v56  ;;  %2306 = vrot.lane.b32.xlu2 %v8174_v16, %s7474_s11  ;;  %v1144_v56 = vld [vmem:[#allocation2 + $0x120] sm:$0xff] }
 0x2be   : > { %13406 = vst [vmem:[#allocation167_spill] sm:$0xff] %v8509_v41  ;;  %v1128_v41 = vld [vmem:[#allocation2 + $0x60] sm:$0xff] }
 0x2bf   : > { %v8513_v23 = vpop.permute.xlu2 %2176 }
 0x2c0   : > { %13407 = vst [vmem:[#allocation168_spill] sm:$0xff] %v8513_v23  ;;  %v1116_v23 = vld [vmem:[#allocation2 + $0x13c] sm:$0xff] }
 0x2c2   : > { %2304 = vrot.lane.b32.xlu1 %v8133_v0, %s7474_s11  ;;  %2296 = vrot.lane.b32.xlu0 %v8052_v9, %s7474_s11 }
 0x2c4   : > { %v8519_v20 = vpop.permute.xlu1 %2074  ;;  %v8521_v3 = vpop.permute.xlu0 %1818 }
 0x2c5   : > { %13408 = vst [vmem:[#allocation169_spill] sm:$0xff] %v8519_v20  ;;  %2312 = vrot.lane.b32.xlu2 %v8215_v2, %s7474_s11  ;;  %v1114_v20 = vld [vmem:[#allocation2 + $0x124] sm:$0xff] }
 0x2c6   : > { %13409 = vst [vmem:[#allocation170_spill] sm:$0xff] %v8521_v3 }
 0x2c7   : > { %v8525_v59 = vpop.permute.xlu2 %2182 }
 0x2c8   : > { %13410 = vst [vmem:[#allocation171_spill] sm:$0xff] %v8525_v59  ;;  %v1110_v59 = vld [vmem:[#allocation2 + $0xf4] sm:$0xff] }
 0x2ca   : > { %2310 = vrot.lane.b32.xlu1 %v8195_v45, %s7474_s11  ;;  %2302 = vrot.lane.b32.xlu0 %v8124_v7, %s7474_s11 }
 0x2cc   : > { %v8531_v16 = vpop.permute.xlu1 %1696  ;;  %v8533_v0 = vpop.permute.xlu0 %1948 }
 0x2cd   : > { %13411 = vst [vmem:[#allocation172_spill] sm:$0xff] %v8531_v16  ;;  %2318 = vrot.lane.b32.xlu2 %v8279_v63, %s7474_s11  ;;  %v1137_v16 = vld [vmem:[#allocation2 + $0xc8] sm:$0xff] }
 0x2ce   : > { %13412 = vst [vmem:[#allocation173_spill] sm:$0xff] %v8533_v0  ;;  %v1107_v0 = vld [vmem:[#allocation2 + $0xcc] sm:$0xff] }
 0x2cf   : > { %v8537_v9 = vpop.permute.xlu2 %2188 }
 0x2d0   : > { %13413 = vst [vmem:[#allocation174_spill] sm:$0xff] %v8537_v9 }
 0x2d2   : > { %2316 = vrot.lane.b32.xlu1 %v8234_v36, %s7474_s11  ;;  %2308 = vrot.lane.b32.xlu0 %v8159_v39, %s7474_s11 }
 0x2d4   : > { %v8543_v2 = vpop.permute.xlu1 %1950  ;;  %v8545_v45 = vpop.permute.xlu0 %1694 }
 0x2d5   : > { %13414 = vst [vmem:[#allocation175_spill] sm:$0xff] %v8543_v2  ;;  %2324 = vrot.lane.b32.xlu2 %v8320_v51, %s7474_s11  ;;  %v1071_v2 = vld [vmem:[#allocation2 + $0x9b] sm:$0xff] }
 0x2d6   : > { %13415 = vst [vmem:[#allocation176_spill] sm:$0xff] %v8545_v45  ;;  %v1104_v45 = vld [vmem:[#allocation2 + $0xac] sm:$0xff] }
 0x2d7   : > { %v8549_v7 = vpop.permute.xlu2 %2194 }
 0x2d8   : > { %13416 = vst [vmem:[#allocation177_spill] sm:$0xff] %v8549_v7  ;;  %v9211_v7 = vld [vmem:[#allocation2 + $0x10a] sm:$0xff] }
 0x2da   : > { %2322 = vrot.lane.b32.xlu1 %v8299_v57, %s7474_s11  ;;  %2314 = vrot.lane.b32.xlu0 %v8225_v27, %s7474_s11  ;;  %v1025_v27 = vld [vmem:[#allocation2 + $0x171] sm:$0xff] }
 0x2dc   : > { %v8555_v63 = vpop.permute.xlu1 %2174  ;;  %v8557_v36 = vpop.permute.xlu0 %2078 }
 0x2dd   : > { %13417 = vst [vmem:[#allocation178_spill] sm:$0xff] %v8555_v63  ;;  %2330 = vrot.lane.b32.xlu2 %v8397_v33, %s7474_s11  ;;  %v1028_v33 = vld [vmem:[#allocation2 + $0x1a] sm:$0xff] }
 0x2de   : > { %13418 = vst [vmem:[#allocation179_spill] sm:$0xff] %v8557_v36  ;;  %v1024_v36 = vld [vmem:[#allocation2 + $0x169] sm:$0xff] }
 0x2df   : > { %v8561_v39 = vpop.permute.xlu2 %2200 }
 0x2e0   : > { %13419 = vst [vmem:[#allocation180_spill] sm:$0xff] %v8561_v39  ;;  %v1032_v39 = vld [vmem:[#allocation2 + $0x4a] sm:$0xff] }
 0x2e2   : > { %2328 = vrot.lane.b32.xlu1 %v8344_v47, %s7474_s11  ;;  %2320 = vrot.lane.b32.xlu0 %v8264_v34, %s7474_s11 }
 0x2e4   : > { %v8567_v51 = vpop.permute.xlu1 %2180  ;;  %v8569_v57 = vpop.permute.xlu0 %2172 }
 0x2e5   : > { %13420 = vst [vmem:[#allocation181_spill] sm:$0xff] %v8567_v51  ;;  %2336 = vrot.lane.b32.xlu2 %v1025_v27, %s7474_s11  ;;  %v1027_v51 = vld [vmem:[#allocation2 + $0x189] sm:$0xff] }
 0x2e6   : > { %13421 = vst [vmem:[#allocation182_spill] sm:$0xff] %v8569_v57 }
 0x2e7   : > { %v8572_v9 = vpop.permute.xlu2 %2206 }
 0x2e8   : > { %13422 = vst [vmem:[#allocation183_spill] sm:$0xff] %v8572_v9  ;;  %v1026_v9 = vld [vmem:[#allocation2 + $0x181] sm:$0xff] }
 0x2ea   : > { %2334 = vrot.lane.b32.xlu1 %v1024_v36, %s7474_s11  ;;  %2326 = vrot.lane.b32.xlu0 %v8332_v32, %s7474_s11  ;;  %v1031_v32 = vld [vmem:[#allocation2 + $0x3a] sm:$0xff] }
 0x2ec   : > { %v8577_v47 = vpop.permute.xlu1 %2186  ;;  %v8579_v63 = vpop.permute.xlu0 %2178 }
 0x2ed   : > { %13423 = vst [vmem:[#allocation184_spill] sm:$0xff] %v8577_v47  ;;  %2406 = vrot.lane.b32.xlu2 %v1028_v33, %s7475_s12 }
 0x2ee   : > { %13424 = vst [vmem:[#allocation185_spill] sm:$0xff] %v8579_v63  ;;  %v1030_v63 = vld [vmem:[#allocation2 + $0x32] sm:$0xff] }
 0x2ef   : > { %v8582_v34 = vpop.permute.xlu2 %2212 }
 0x2f0   : > { %13425 = vst [vmem:[#allocation186_spill] sm:$0xff] %v8582_v34  ;;  %v1033_v34 = vld [vmem:[#allocation2 + $0x52] sm:$0xff] }
 0x2f2   : > { %2340 = vrot.lane.b32.xlu1 %v1027_v51, %s7474_s11  ;;  %2332 = vrot.lane.b32.xlu0 %v8379_v54, %s7474_s11  ;;  %v1034_v54 = vld [vmem:[#allocation2 + $0x62] sm:$0xff] }
 0x2f4   : > { %v8587_v36 = vpop.permute.xlu1 %2192  ;;  %v8589_v27 = vpop.permute.xlu0 %2184 }
 0x2f5   : > { %13426 = vst [vmem:[#allocation187_spill] sm:$0xff] %v8587_v36  ;;  %2412 = vrot.lane.b32.xlu2 %v1031_v32, %s7475_s12 }
 0x2f6   : > { %13427 = vst [vmem:[#allocation188_spill] sm:$0xff] %v8589_v27  ;;  %v1029_v27 = vld [vmem:[#allocation2 + $0x22] sm:$0xff] }
 0x2f7   : > { %v8592_v47 = vpop.permute.xlu2 %2282 }
 0x2f8   : > { %13428 = vst [vmem:[#allocation189_spill] sm:$0xff] %v8592_v47  ;;  %v1221_v47 = vld [vmem:[#allocation2 + $0x3b] sm:$0xff] }
 0x2fa   : > { %2410 = vrot.lane.b32.xlu1 %v1030_v63, %s7475_s12  ;;  %2338 = vrot.lane.b32.xlu0 %v1026_v9, %s7474_s11  ;;  %v1037_v9 = vld [vmem:[#allocation2 + $0x82] sm:$0xff] }
 0x2fc   : > { %v8596_v33 = vpop.permute.xlu1 %2198  ;;  %v8598_v51 = vpop.permute.xlu0 %2190 }
 0x2fd   : > { %13429 = vst [vmem:[#allocation190_spill] sm:$0xff] %v8596_v33  ;;  %2418 = vrot.lane.b32.xlu2 %v1034_v54, %s7475_s12  ;;  %v1035_v33 = vld [vmem:[#allocation2 + $0x6a] sm:$0xff] }
 0x2fe   : > { %13430 = vst [vmem:[#allocation191_spill] sm:$0xff] %v8598_v51  ;;  %v1036_v51 = vld [vmem:[#allocation2 + $0x7a] sm:$0xff] }
 0x2ff   : > { %v8601_v36 = vpop.permute.xlu2 %2288 }
 0x300   : > { %13431 = vst [vmem:[#allocation192_spill] sm:$0xff] %v8601_v36  ;;  %v9157_v36 = vld [vmem:[#allocation2 + $0x9a] sm:$0xff] }
 0x302   : > { %2416 = vrot.lane.b32.xlu1 %v1033_v34, %s7475_s12  ;;  %2408 = vrot.lane.b32.xlu0 %v1029_v27, %s7475_s12 }
 0x304   : > { %v8605_v32 = vpop.permute.xlu1 %2204  ;;  %v8607_v63 = vpop.permute.xlu0 %2196 }
 0x305   : > { %13432 = vst [vmem:[#allocation193_spill] sm:$0xff] %v8605_v32  ;;  %2424 = vrot.lane.b32.xlu2 %v1037_v9, %s7475_s12  ;;  %v1039_v32 = vld [vmem:[#allocation2 + $0x9a] sm:$0xff] }
 0x306   : > { %13433 = vst [vmem:[#allocation194_spill] sm:$0xff] %v8607_v63  ;;  %v1101_v63 = vld [vmem:[#allocation2 + $0x84] sm:$0xff] }
 0x307   : > { %v8610_v57 = vpop.permute.xlu2 %2294 }
 0x308   : > { %13434 = vst [vmem:[#allocation195_spill] sm:$0xff] %v8610_v57  ;;  %v1131_v57 = vld [vmem:[#allocation2 + $0x80] sm:$0xff] }
 0x30a   : > { %2422 = vrot.lane.b32.xlu1 %v1036_v51, %s7475_s12  ;;  %2414 = vrot.lane.b32.xlu0 %v1032_v39, %s7475_s12 }
 0x30c   : > { %v8614_v54 = vpop.permute.xlu1 %2210  ;;  %v8616_v34 = vpop.permute.xlu0 %2202 }
 0x30d   : > { %13435 = vst [vmem:[#allocation196_spill] sm:$0xff] %v8614_v54  ;;  %2430 = vrot.lane.b32.xlu2 %v8148_v19, %s7475_s12  ;;  %v1038_v54 = vld [vmem:[#allocation2 + $0x92] sm:$0xff] }
 0x30e   : > { %13436 = vst [vmem:[#allocation197_spill] sm:$0xff] %v8616_v34  ;;  %v1062_v34 = vld [vmem:[#allocation2 + $0x33] sm:$0xff] }
 0x30f   : > { %v8620_v27 = vpop.permute.xlu2 %2300 }
 0x310   : > { %13437 = vst [vmem:[#allocation198_spill] sm:$0xff] %v8620_v27  ;;  %v1065_v27 = vld [vmem:[#allocation2 + $0x53] sm:$0xff] }
 0x312   : > { %2428 = vrot.lane.b32.xlu1 %v1039_v32, %s7475_s12  ;;  %2420 = vrot.lane.b32.xlu0 %v1035_v33, %s7475_s12 }
 0x314   : > { %v8624_v9 = vpop.permute.xlu1 %2280  ;;  %v8626_v51 = vpop.permute.xlu0 %2208 }
 0x315   : > { %13438 = vst [vmem:[#allocation199_spill] sm:$0xff] %v8624_v9  ;;  %2436 = vrot.lane.b32.xlu2 %v8186_v5, %s7475_s12 }
 0x316   : > { %13439 = vst [vmem:[#allocation200_spill] sm:$0xff] %v8626_v51  ;;  %v1041_v51 = vld [vmem:[#allocation2 + $0xb2] sm:$0xff] }
 0x317   : > { %v8630_v39 = vpop.permute.xlu2 %2306 }
 0x318   : > { %13440 = vst [vmem:[#allocation201_spill] sm:$0xff] %v8630_v39  ;;  %v1057_v39 = vld [vmem:[#allocation2 + $0x172] sm:$0xff] }
 0x31a   : > { %2434 = vrot.lane.b32.xlu1 %v8168_v49, %s7475_s12  ;;  %2426 = vrot.lane.b32.xlu0 %v1038_v54, %s7475_s12 }
 0x31c   : > { %v8635_v19 = vpop.permute.xlu1 %2286  ;;  %v8637_v32 = vpop.permute.xlu0 %2278 }
 0x31d   : > { %13441 = vst [vmem:[#allocation202_spill] sm:$0xff] %v8635_v19  ;;  %2442 = vrot.lane.b32.xlu2 %v8252_v55, %s7475_s12  ;;  %v9209_v19 = vld [vmem:[#allocation2 + $0x13a] sm:$0xff] }
 0x31e   : > { %13442 = vst [vmem:[#allocation203_spill] sm:$0xff] %v8637_v32  ;;  %v1434_v32 = vld [vmem:[#allocation2 + $0x144] sm:$0xff] }
 0x31f   : > { %v8641_v33 = vpop.permute.xlu2 %2312 }
 0x320   : > { %13443 = vst [vmem:[#allocation204_spill] sm:$0xff] %v8641_v33 }
 0x322   : > { %2440 = vrot.lane.b32.xlu1 %v8210_v50, %s7475_s12  ;;  %2432 = vrot.lane.b32.xlu0 %v1041_v51, %s7475_s12 }
 0x324   : > { %v8646_v5 = vpop.permute.xlu1 %2292  ;;  %v8648_v49 = vpop.permute.xlu0 %2284 }
 0x325   : > { %13444 = vst [vmem:[#allocation205_spill] sm:$0xff] %v8646_v5  ;;  %2448 = vrot.lane.b32.xlu2 %v8290_v25, %s7475_s12  ;;  %v1158_v5 = vld [vmem:[#allocation2 + $0x49] sm:$0xff] }
 0x326   : > { %13445 = vst [vmem:[#allocation206_spill] sm:$0xff] %v8648_v49  ;;  %v1220_v49 = vld [vmem:[#allocation2 + $0x33] sm:$0xff] }
 0x327   : > { %v8652_v54 = vpop.permute.xlu2 %2318 }
 0x328   : > { %13446 = vst [vmem:[#allocation207_spill] sm:$0xff] %v8652_v54 }
 0x32a   : > { %2446 = vrot.lane.b32.xlu1 %v8273_v46, %s7475_s12  ;;  %2438 = vrot.lane.b32.xlu0 %v8201_v28, %s7475_s12  ;;  %v1055_v28 = vld [vmem:[#allocation2 + $0x15a] sm:$0xff] }
 0x32c   : > { %v8658_v55 = vpop.permute.xlu1 %2298  ;;  %v8660_v50 = vpop.permute.xlu0 %2290 }
 0x32d   : > { %13447 = vst [vmem:[#allocation208_spill] sm:$0xff] %v8658_v55  ;;  %2454 = vrot.lane.b32.xlu2 %v8365_v29, %s7475_s12  ;;  %v1068_v55 = vld [vmem:[#allocation2 + $0x7b] sm:$0xff] }
 0x32e   : > { %13448 = vst [vmem:[#allocation209_spill] sm:$0xff] %v8660_v50  ;;  %v9131_v50 = vld [vmem:[#allocation2 + $0xb2] sm:$0xff] }
 0x32f   : > { %v8664_v51 = vpop.permute.xlu2 %2324 }
 0x330   : > { %13449 = vst [vmem:[#allocation210_spill] sm:$0xff] %v8664_v51  ;;  %v1098_v51 = vld [vmem:[#allocation2 + $0x64] sm:$0xff] }
 0x332   : > { %2452 = vrot.lane.b32.xlu1 %v8314_v53, %s7475_s12  ;;  %2444 = vrot.lane.b32.xlu0 %v8240_v31, %s7475_s12  ;;  %v1058_v31 = vld [vmem:[#allocation2 + $0x182] sm:$0xff] }
 0x334   : > { %v8670_v25 = vpop.permute.xlu1 %2304  ;;  %v8672_v46 = vpop.permute.xlu0 %2296 }
 0x335   : > { %13450 = vst [vmem:[#allocation211_spill] sm:$0xff] %v8670_v25  ;;  %2460 = vrot.lane.b32.xlu2 %v1055_v28, %s7475_s12  ;;  %v1061_v28 = vld [vmem:[#allocation2 + $0x23] sm:$0xff] }
 0x336   : > { %13451 = vst [vmem:[#allocation212_spill] sm:$0xff] %v8672_v46  ;;  %v1102_v46 = vld [vmem:[#allocation2 + $0x94] sm:$0xff] }
 0x337   : > { %v8675_v54 = vpop.permute.xlu2 %2330 }
 0x338   : > { %13452 = vst [vmem:[#allocation213_spill] sm:$0xff] %v8675_v54 }
 0x33a   : > { %2458 = vrot.lane.b32.xlu1 %v8389_v61, %s7475_s12  ;;  %2450 = vrot.lane.b32.xlu0 %v8305_v15, %s7475_s12 }
 0x33c   : > { %v8681_v29 = vpop.permute.xlu1 %2310  ;;  %v8683_v53 = vpop.permute.xlu0 %2302 }
 0x33d   : > { %13453 = vst [vmem:[#allocation214_spill] sm:$0xff] %v8681_v29  ;;  %2466 = vrot.lane.b32.xlu2 %v1058_v31, %s7475_s12  ;;  %v1060_v29 = vld [vmem:[#allocation2 + $0x1b] sm:$0xff]  ;;  %v1056_v31 = vld [vmem:[#allocation2 + $0x16a] sm:$0xff] }
 0x33e   : > { %13454 = vst [vmem:[#allocation215_spill] sm:$0xff] %v8683_v53  ;;  %v1059_v53 = vld [vmem:[#allocation2 + $0x18a] sm:$0xff] }
 0x33f   : > { %v8686_v33 = vpop.permute.xlu2 %2336 }
 0x340   : > { %13455 = vst [vmem:[#allocation216_spill] sm:$0xff] %v8686_v33 }
 0x342   : > { %2464 = vrot.lane.b32.xlu1 %v1057_v39, %s7475_s12  ;;  %2456 = vrot.lane.b32.xlu0 %v8350_v13, %s7475_s12  ;;  %v1064_v13 = vld [vmem:[#allocation2 + $0x4b] sm:$0xff] }
 0x344   : > { %v8691_v61 = vpop.permute.xlu1 %2316  ;;  %v8693_v25 = vpop.permute.xlu0 %2308 }
 0x345   : > { %13456 = vst [vmem:[#allocation217_spill] sm:$0xff] %v8691_v61  ;;  %2536 = vrot.lane.b32.xlu2 %v1061_v28, %s7476_s13 }
 0x346   : > { %13457 = vst [vmem:[#allocation218_spill] sm:$0xff] %v8693_v25  ;;  %v1063_v25 = vld [vmem:[#allocation2 + $0x3b] sm:$0xff] }
 0x347   : > { %v8696_v15 = vpop.permute.xlu2 %2406 }
 0x348   : > { %13458 = vst [vmem:[#allocation219_spill] sm:$0xff] %v8696_v15 }
 0x34a   : > { %2534 = vrot.lane.b32.xlu1 %v1060_v29, %s7476_s13  ;;  %2462 = vrot.lane.b32.xlu0 %v1056_v31, %s7475_s12  ;;  %v1067_v31 = vld [vmem:[#allocation2 + $0x6b] sm:$0xff] }
 0x34c   : > { %v8700_v39 = vpop.permute.xlu1 %2322  ;;  %v8702_v33 = vpop.permute.xlu0 %2314 }
 0x34d   : > { %13459 = vst [vmem:[#allocation220_spill] sm:$0xff] %v8700_v39  ;;  %2542 = vrot.lane.b32.xlu2 %v1064_v13, %s7476_s13  ;;  %v9203_v39 = vld [vmem:[#allocation2 + $0x142] sm:$0xff] }
 0x34e   : > { %13460 = vst [vmem:[#allocation221_spill] sm:$0xff] %v8702_v33  ;;  %v1066_v33 = vld [vmem:[#allocation2 + $0x63] sm:$0xff] }
 0x34f   : > { %v8705_v61 = vpop.permute.xlu2 %2412 }
 0x350   : > { %13461 = vst [vmem:[#allocation222_spill] sm:$0xff] %v8705_v61  ;;  %v9247_v61 = vld [vmem:[#allocation2 + $0x152] sm:$0xff] }
 0x352   : > { %2540 = vrot.lane.b32.xlu1 %v1063_v25, %s7476_s13  ;;  %2468 = vrot.lane.b32.xlu0 %v1059_v53, %s7475_s12  ;;  %v1070_v53 = vld [vmem:[#allocation2 + $0x93] sm:$0xff] }
 0x354   : > { %v8709_v28 = vpop.permute.xlu1 %2328  ;;  %v8711_v29 = vpop.permute.xlu0 %2320 }
 0x355   : > { %13462 = vst [vmem:[#allocation223_spill] sm:$0xff] %v8709_v28  ;;  %2548 = vrot.lane.b32.xlu2 %v1067_v31, %s7476_s13 }
 0x356   : > { %13463 = vst [vmem:[#allocation224_spill] sm:$0xff] %v8711_v29  ;;  %v1069_v29 = vld [vmem:[#allocation2 + $0x83] sm:$0xff] }
 0x357   : > { %v8714_v54 = vpop.permute.xlu2 %2418 }
 0x358   : > { %13464 = vst [vmem:[#allocation225_spill] sm:$0xff] %v8714_v54  ;;  %v9121_v54 = vld [vmem:[#allocation2 + $0x52] sm:$0xff] }
 0x35a   : > { %2546 = vrot.lane.b32.xlu1 %v1066_v33, %s7476_s13  ;;  %2538 = vrot.lane.b32.xlu0 %v1062_v34, %s7476_s13  ;;  %v1073_v34 = vld [vmem:[#allocation2 + $0xb3] sm:$0xff] }
 0x35c   : > { %v8718_v13 = vpop.permute.xlu1 %2334  ;;  %v8720_v25 = vpop.permute.xlu0 %2326 }
 0x35d   : > { %13465 = vst [vmem:[#allocation226_spill] sm:$0xff] %v8718_v13  ;;  %2554 = vrot.lane.b32.xlu2 %v1070_v53, %s7476_s13 }
 0x35e   : > { %13466 = vst [vmem:[#allocation227_spill] sm:$0xff] %v8720_v25  ;;  %v1072_v25 = vld [vmem:[#allocation2 + $0xab] sm:$0xff] }
 0x35f   : > { %v8723_v28 = vpop.permute.xlu2 %2424 }
 0x360   : > { %13467 = vst [vmem:[#allocation228_spill] sm:$0xff] %v8723_v28  ;;  %v1077_v28 = vld [vmem:[#allocation2 + $0xe3] sm:$0xff] }
 0x362   : > { %2552 = vrot.lane.b32.xlu1 %v1069_v29, %s7476_s13  ;;  %2544 = vrot.lane.b32.xlu0 %v1065_v27, %s7476_s13  ;;  %v1076_v27 = vld [vmem:[#allocation2 + $0xdb] sm:$0xff] }
 0x364   : > { %v8727_v31 = vpop.permute.xlu1 %2340  ;;  %v8729_v33 = vpop.permute.xlu0 %2332 }
 0x365   : > { %13468 = vst [vmem:[#allocation229_spill] sm:$0xff] %v8727_v31  ;;  %2560 = vrot.lane.b32.xlu2 %v1073_v34, %s7476_s13 }
 0x366   : > { %13469 = vst [vmem:[#allocation230_spill] sm:$0xff] %v8729_v33  ;;  %v1075_v33 = vld [vmem:[#allocation2 + $0xcb] sm:$0xff] }
 0x367   : > { %v8732_v13 = vpop.permute.xlu2 %2430 }
 0x368   : > { %13470 = vst [vmem:[#allocation231_spill] sm:$0xff] %v8732_v13 }
 0x36a   : > { %2558 = vrot.lane.b32.xlu1 %v1072_v25, %s7476_s13  ;;  %2550 = vrot.lane.b32.xlu0 %v1068_v55, %s7476_s13  ;;  %v1079_v55 = vld [vmem:[#allocation2 + $0xfb] sm:$0xff] }
 0x36c   : > { %v8736_v53 = vpop.permute.xlu1 %2410  ;;  %v8738_v29 = vpop.permute.xlu0 %2338 }
 0x36d   : > { %13471 = vst [vmem:[#allocation232_spill] sm:$0xff] %v8736_v53  ;;  %2566 = vrot.lane.b32.xlu2 %v1076_v27, %s7476_s13  ;;  %v9296_v53 = vld [vmem:[#allocation2 + $0x6b] sm:$0xff] }
 0x36e   : > { %13472 = vst [vmem:[#allocation233_spill] sm:$0xff] %v8738_v29  ;;  %v1078_v29 = vld [vmem:[#allocation2 + $0xf3] sm:$0xff] }
 0x36f   : > { %v8741_v31 = vpop.permute.xlu2 %2436 }
 0x370   : > { %13473 = vst [vmem:[#allocation234_spill] sm:$0xff] %v8741_v31  ;;  %v1081_v31 = vld [vmem:[#allocation2 + $0x113] sm:$0xff] }
 0x372   : > { %2564 = vrot.lane.b32.xlu1 %v1075_v33, %s7476_s13  ;;  %2556 = vrot.lane.b32.xlu0 %v1071_v2, %s7476_s13 }
 0x374   : > { %v8745_v34 = vpop.permute.xlu1 %2416  ;;  %v8747_v25 = vpop.permute.xlu0 %2408 }
 0x375   : > { %13474 = vst [vmem:[#allocation235_spill] sm:$0xff] %v8745_v34  ;;  %2572 = vrot.lane.b32.xlu2 %v1079_v55, %s7476_s13  ;;  %v9155_v34 = vld [vmem:[#allocation2 + $0xca] sm:$0xff] }
 0x376   : > { %13475 = vst [vmem:[#allocation236_spill] sm:$0xff] %v8747_v25  ;;  %v1227_v25 = vld [vmem:[#allocation2 + $0x83] sm:$0xff] }
 0x377   : > { %v8750_v13 = vpop.permute.xlu2 %2442 }
 0x378   : > { %13476 = vst [vmem:[#allocation237_spill] sm:$0xff] %v8750_v13  ;;  %v1080_v13 = vld [vmem:[#allocation2 + $0x10b] sm:$0xff] }
 0x37a   : > { %2570 = vrot.lane.b32.xlu1 %v1078_v29, %s7476_s13  ;;  %2562 = vrot.lane.b32.xlu0 %v1074_v10, %s7476_s13 }
 0x37c   : > { %v8754_v27 = vpop.permute.xlu1 %2422  ;;  %v8756_v33 = vpop.permute.xlu0 %2414 }
 0x37d   : > { %13477 = vst [vmem:[#allocation238_spill] sm:$0xff] %v8754_v27  ;;  %2578 = vrot.lane.b32.xlu2 %v8334_v26, %s7476_s13  ;;  %v1113_v27 = vld [vmem:[#allocation2 + $0x114] sm:$0xff] }
 0x37e   : > { %13478 = vst [vmem:[#allocation239_spill] sm:$0xff] %v8756_v33 }
 0x37f   : > { %v8760_v2 = vpop.permute.xlu2 %2448 }
 0x380   : > { %13479 = vst [vmem:[#allocation240_spill] sm:$0xff] %v8760_v2 }
 0x382   : > { %2576 = vrot.lane.b32.xlu1 %v1081_v31, %s7476_s13  ;;  %2568 = vrot.lane.b32.xlu0 %v1077_v28, %s7476_s13  ;;  %v1088_v28 = vld [vmem:[#allocation2 + $0x16b] sm:$0xff] }
 0x384   : > { %v8764_v55 = vpop.permute.xlu1 %2428  ;;  %v8766_v29 = vpop.permute.xlu0 %2420 }
 0x385   : > { %13480 = vst [vmem:[#allocation241_spill] sm:$0xff] %v8764_v55  ;;  %2584 = vrot.lane.b32.xlu2 %v8377_v60, %s7476_s13  ;;  %v1087_v55 = vld [vmem:[#allocation2 + $0x15b] sm:$0xff] }
 0x386   : > { %13481 = vst [vmem:[#allocation242_spill] sm:$0xff] %v8766_v29  ;;  %v1146_v29 = vld [vmem:[#allocation2 + $0x138] sm:$0xff] }
 0x387   : > { %v8770_v10 = vpop.permute.xlu2 %2454 }
 0x388   : > { %13482 = vst [vmem:[#allocation243_spill] sm:$0xff] %v8770_v10 }
 0x38a   : > { %2582 = vrot.lane.b32.xlu1 %v8359_v17, %s7476_s13  ;;  %2574 = vrot.lane.b32.xlu0 %v1080_v13, %s7476_s13  ;;  %v1091_v13 = vld [vmem:[#allocation2 + $0x18b] sm:$0xff] }
 0x38c   : > { %v8775_v26 = vpop.permute.xlu1 %2434  ;;  %v8777_v31 = vpop.permute.xlu0 %2426 }
 0x38d   : > { %13483 = vst [vmem:[#allocation244_spill] sm:$0xff] %v8775_v26  ;;  %2590 = vrot.lane.b32.xlu2 %v1088_v28, %s7476_s13 }
 0x38e   : > { %13484 = vst [vmem:[#allocation245_spill] sm:$0xff] %v8777_v31  ;;  %v1090_v31 = vld [vmem:[#allocation2 + $0x183] sm:$0xff] }
 0x38f   : > { %v8780_v2 = vpop.permute.xlu2 %2460 }
 0x390   : > { %13485 = vst [vmem:[#allocation246_spill] sm:$0xff] %v8780_v2  ;;  %v1096_v2 = vld [vmem:[#allocation2 + $0x4c] sm:$0xff] }
 0x392   : > { %2588 = vrot.lane.b32.xlu1 %v1087_v55, %s7476_s13  ;;  %2580 = vrot.lane.b32.xlu0 %v1083_v8, %s7476_s13  ;;  %v1094_v8 = vld [vmem:[#allocation2 + $0x34] sm:$0xff] }
 0x394   : > { %v8784_v60 = vpop.permute.xlu1 %2440  ;;  %v8786_v17 = vpop.permute.xlu0 %2432 }
 0x395   : > { %13486 = vst [vmem:[#allocation247_spill] sm:$0xff] %v8784_v60  ;;  %2596 = vrot.lane.b32.xlu2 %v1091_v13, %s7476_s13  ;;  %v1089_v13 = vld [vmem:[#allocation2 + $0x173] sm:$0xff] }
 0x396   : > { %13487 = vst [vmem:[#allocation248_spill] sm:$0xff] %v8786_v17  ;;  %v1093_v17 = vld [vmem:[#allocation2 + $0x24] sm:$0xff] }
 0x397   : > { %v8789_v26 = vpop.permute.xlu2 %2466 }
 0x398   : > { %13488 = vst [vmem:[#allocation249_spill] sm:$0xff] %v8789_v26 }
 0x39a   : > { %2594 = vrot.lane.b32.xlu1 %v1090_v31, %s7476_s13  ;;  %2586 = vrot.lane.b32.xlu0 %v8395_v22, %s7476_s13  ;;  %v1097_v22 = vld [vmem:[#allocation2 + $0x54] sm:$0xff] }
 0x39c   : > { %v8794_v28 = vpop.permute.xlu1 %2446  ;;  %v8796_v55 = vpop.permute.xlu0 %2438 }
 0x39d   : > { %13489 = vst [vmem:[#allocation250_spill] sm:$0xff] %v8794_v28  ;;  %2666 = vrot.lane.b32.xlu2 %v1094_v8, %s7477_s14 }
 0x39e   : > { %13490 = vst [vmem:[#allocation251_spill] sm:$0xff] %v8796_v55  ;;  %v1092_v55 = vld [vmem:[#allocation2 + $0x1c] sm:$0xff] }
 0x39f   : > { %v8799_v60 = vpop.permute.xlu2 %2536 }
 0x3a0   : > { %13491 = vst [vmem:[#allocation252_spill] sm:$0xff] %v8799_v60  ;;  %v1231_v60 = vld [vmem:[#allocation2 + $0xb3] sm:$0xff] }
 0x3a2   : > { %2664 = vrot.lane.b32.xlu1 %v1093_v17, %s7477_s14  ;;  %2592 = vrot.lane.b32.xlu0 %v1089_v13, %s7476_s13  ;;  %v1100_v13 = vld [vmem:[#allocation2 + $0x7c] sm:$0xff] }
 0x3a4   : > { %v8803_v31 = vpop.permute.xlu1 %2452  ;;  %v8805_v26 = vpop.permute.xlu0 %2444 }
 0x3a5   : > { %13492 = vst [vmem:[#allocation253_spill] sm:$0xff] %v8803_v31  ;;  %2672 = vrot.lane.b32.xlu2 %v1097_v22, %s7477_s14  ;;  %v1095_v31 = vld [vmem:[#allocation2 + $0x3c] sm:$0xff] }
 0x3a6   : > { %13493 = vst [vmem:[#allocation254_spill] sm:$0xff] %v8805_v26  ;;  %v1099_v26 = vld [vmem:[#allocation2 + $0x6c] sm:$0xff] }
 0x3a7   : > { %v8808_v28 = vpop.permute.xlu2 %2542 }
 0x3a8   : > { %13494 = vst [vmem:[#allocation255_spill] sm:$0xff] %v8808_v28  ;;  %v9191_v28 = vld [vmem:[#allocation2 + $0x112] sm:$0xff] }
 0x3aa   : > { %2670 = vrot.lane.b32.xlu1 %v1096_v2, %s7477_s14  ;;  %2662 = vrot.lane.b32.xlu0 %v1092_v55, %s7477_s14  ;;  %v1103_v55 = vld [vmem:[#allocation2 + $0x9c] sm:$0xff] }
 0x3ac   : > { %v8812_v8 = vpop.permute.xlu1 %2458  ;;  %v8814_v17 = vpop.permute.xlu0 %2450 }
 0x3ad   : > { %13495 = vst [vmem:[#allocation256_spill] sm:$0xff] %v8812_v8  ;;  %2678 = vrot.lane.b32.xlu2 %v1100_v13, %s7477_s14 }
 0x3ae   : > { %13496 = vst [vmem:[#allocation257_spill] sm:$0xff] %v8814_v17  ;;  %v9193_v17 = vld [vmem:[#allocation2 + $0xe2] sm:$0xff] }
 0x3af   : > { %v8817_v10 = vpop.permute.xlu2 %2548 }
 0x3b0   : > { %13497 = vst [vmem:[#allocation258_spill] sm:$0xff] %v8817_v10  ;;  %v1143_v10 = vld [vmem:[#allocation2 + $0x110] sm:$0xff] }
 0x3b2   : > { %2676 = vrot.lane.b32.xlu1 %v1099_v26, %s7477_s14  ;;  %2668 = vrot.lane.b32.xlu0 %v1095_v31, %s7477_s14  ;;  %v1106_v31 = vld [vmem:[#allocation2 + $0xc4] sm:$0xff] }
 0x3b4   : > { %v8821_v22 = vpop.permute.xlu1 %2464  ;;  %v8823_v2 = vpop.permute.xlu0 %2456 }
 0x3b5   : > { %13498 = vst [vmem:[#allocation259_spill] sm:$0xff] %v8821_v22  ;;  %2684 = vrot.lane.b32.xlu2 %v1103_v55, %s7477_s14 }
 0x3b6   : > { %13499 = vst [vmem:[#allocation260_spill] sm:$0xff] %v8823_v2  ;;  %v1105_v2 = vld [vmem:[#allocation2 + $0xb4] sm:$0xff] }
 0x3b7   : > { %v8826_v8 = vpop.permute.xlu2 %2554 }
 0x3b8   : > { %13500 = vst [vmem:[#allocation261_spill] sm:$0xff] %v8826_v8 }
 0x3ba   : > { %2682 = vrot.lane.b32.xlu1 %v1102_v46, %s7477_s14  ;;  %2674 = vrot.lane.b32.xlu0 %v1098_v51, %s7477_s14  ;;  %v1109_v51 = vld [vmem:[#allocation2 + $0xe4] sm:$0xff] }
 0x3bc   : > { %v8830_v13 = vpop.permute.xlu1 %2534  ;;  %v8832_v26 = vpop.permute.xlu0 %2462 }
 0x3bd   : > { %13501 = vst [vmem:[#allocation262_spill] sm:$0xff] %v8830_v13  ;;  %2690 = vrot.lane.b32.xlu2 %v1106_v31, %s7477_s14  ;;  %v1435_v13 = vld [vmem:[#allocation2 + $0x154] sm:$0xff] }
 0x3be   : > { %13502 = vst [vmem:[#allocation263_spill] sm:$0xff] %v8832_v26  ;;  %v1108_v26 = vld [vmem:[#allocation2 + $0xdc] sm:$0xff] }
 0x3bf   : > { %v8835_v22 = vpop.permute.xlu2 %2560 }
 0x3c0   : > { %13503 = vst [vmem:[#allocation264_spill] sm:$0xff] %v8835_v22 }
 0x3c2   : > { %2688 = vrot.lane.b32.xlu1 %v1105_v2, %s7477_s14  ;;  %2680 = vrot.lane.b32.xlu0 %v1101_v63, %s7477_s14  ;;  %v1112_v63 = vld [vmem:[#allocation2 + $0x10c] sm:$0xff] }
 0x3c4   : > { %v8839_v55 = vpop.permute.xlu1 %2540  ;;  %v8841_v46 = vpop.permute.xlu0 %2468 }
 0x3c5   : > { %13504 = vst [vmem:[#allocation265_spill] sm:$0xff] %v8839_v55  ;;  %2696 = vrot.lane.b32.xlu2 %v1109_v51, %s7477_s14  ;;  %v9245_v55 = vld [vmem:[#allocation2 + $0x182] sm:$0xff] }
 0x3c6   : > { %13505 = vst [vmem:[#allocation266_spill] sm:$0xff] %v8841_v46  ;;  %v1111_v46 = vld [vmem:[#allocation2 + $0xfc] sm:$0xff] }
 0x3c7   : > { %v8844_v8 = vpop.permute.xlu2 %2566 }
 0x3c8   : > { %13506 = vst [vmem:[#allocation267_spill] sm:$0xff] %v8844_v8 }
 0x3ca   : > { %2694 = vrot.lane.b32.xlu1 %v1108_v26, %s7477_s14  ;;  %2686 = vrot.lane.b32.xlu0 %v1104_v45, %s7477_s14  ;;  %v1115_v45 = vld [vmem:[#allocation2 + $0x12c] sm:$0xff] }
 0x3cc   : > { %v8848_v31 = vpop.permute.xlu1 %2546  ;;  %v8850_v2 = vpop.permute.xlu0 %2538 }
 0x3cd   : > { %13507 = vst [vmem:[#allocation268_spill] sm:$0xff] %v8848_v31  ;;  %2702 = vrot.lane.b32.xlu2 %v1112_v63, %s7477_s14  ;;  %v9119_v31 = vld [vmem:[#allocation2 + $0x82] sm:$0xff] }
 0x3ce   : > { %13508 = vst [vmem:[#allocation269_spill] sm:$0xff] %v8850_v2  ;;  %v9290_v2 = vld [vmem:[#allocation2 + $0x7b] sm:$0xff] }
 0x3cf   : > { %v8853_v22 = vpop.permute.xlu2 %2572 }
 0x3d0   : > { %13509 = vst [vmem:[#allocation270_spill] sm:$0xff] %v8853_v22 }
 0x3d2   : > { %2700 = vrot.lane.b32.xlu1 %v1111_v46, %s7477_s14  ;;  %2692 = vrot.lane.b32.xlu0 %v1107_v0, %s7477_s14  ;;  %v1118_v0 = vld [vmem:[#allocation2 + $0x154] sm:$0xff] }
 0x3d4   : > { %v8857_v51 = vpop.permute.xlu1 %2552  ;;  %v8859_v26 = vpop.permute.xlu0 %2544 }
 0x3d5   : > { %13510 = vst [vmem:[#allocation271_spill] sm:$0xff] %v8857_v51  ;;  %2708 = vrot.lane.b32.xlu2 %v1115_v45, %s7477_s14  ;;  %v1117_v51 = vld [vmem:[#allocation2 + $0x144] sm:$0xff] }
 0x3d6   : > { %13511 = vst [vmem:[#allocation272_spill] sm:$0xff] %v8859_v26  ;;  %v9149_v26 = vld [vmem:[#allocation2 + $0xda] sm:$0xff] }
 0x3d7   : > { %v8862_v8 = vpop.permute.xlu2 %2578 }
 0x3d8   : > { %13512 = vst [vmem:[#allocation273_spill] sm:$0xff] %v8862_v8  ;;  %v9185_v8 = vld [vmem:[#allocation2 + $0x122] sm:$0xff] }
 0x3da   : > { %2706 = vrot.lane.b32.xlu1 %v1114_v20, %s7477_s14  ;;  %2698 = vrot.lane.b32.xlu0 %v1110_v59, %s7477_s14  ;;  %v1121_v59 = vld [vmem:[#allocation2 + $0x174] sm:$0xff] }
 0x3dc   : > { %v8866_v63 = vpop.permute.xlu1 %2558  ;;  %v8868_v46 = vpop.permute.xlu0 %2550 }
 0x3dd   : > { %13513 = vst [vmem:[#allocation274_spill] sm:$0xff] %v8866_v63  ;;  %2714 = vrot.lane.b32.xlu2 %v1118_v0, %s7477_s14 }
 0x3de   : > { %13514 = vst [vmem:[#allocation275_spill] sm:$0xff] %v8868_v46  ;;  %v1120_v46 = vld [vmem:[#allocation2 + $0x16c] sm:$0xff] }
 0x3df   : > { %v8871_v22 = vpop.permute.xlu2 %2584 }
 0x3e0   : > { %13515 = vst [vmem:[#allocation276_spill] sm:$0xff] %v8871_v22  ;;  %v1122_v22 = vld [vmem:[#allocation2 + $0x184] sm:$0xff] }
 0x3e2   : > { %2712 = vrot.lane.b32.xlu1 %v1117_v51, %s7477_s14  ;;  %2704 = vrot.lane.b32.xlu0 %v1113_v27, %s7477_s14  ;;  %v1124_v27 = vld [vmem:[#allocation2 + $0x30] sm:$0xff] }
 0x3e4   : > { %v8875_v45 = vpop.permute.xlu1 %2564  ;;  %v8877_v20 = vpop.permute.xlu0 %2556 }
 0x3e5   : > { %13516 = vst [vmem:[#allocation277_spill] sm:$0xff] %v8875_v45  ;;  %2720 = vrot.lane.b32.xlu2 %v1121_v59, %s7477_s14  ;;  %v1119_v59 = vld [vmem:[#allocation2 + $0x15c] sm:$0xff] }
 0x3e6   : > { %13517 = vst [vmem:[#allocation278_spill] sm:$0xff] %v8877_v20  ;;  %v1123_v20 = vld [vmem:[#allocation2 + $0x18c] sm:$0xff] }
 0x3e7   : > { %v8880_v63 = vpop.permute.xlu2 %2590 }
 0x3e8   : > { %13518 = vst [vmem:[#allocation279_spill] sm:$0xff] %v8880_v63 }
 0x3ea   : > { %2718 = vrot.lane.b32.xlu1 %v1120_v46, %s7477_s14  ;;  %2710 = vrot.lane.b32.xlu0 %v1116_v23, %s7477_s14  ;;  %v1127_v23 = vld [vmem:[#allocation2 + $0x50] sm:$0xff] }
 0x3ec   : > { %v8884_v0 = vpop.permute.xlu1 %2570  ;;  %v8886_v51 = vpop.permute.xlu0 %2562 }
 0x3ed   : > { %13519 = vst [vmem:[#allocation280_spill] sm:$0xff] %v8884_v0  ;;  %2790 = vrot.lane.b32.xlu2 %v1124_v27, %s7478_s15 }
 0x3ee   : > { %13520 = vst [vmem:[#allocation281_spill] sm:$0xff] %v8886_v51  ;;  %v1126_v51 = vld [vmem:[#allocation2 + $0x48] sm:$0xff] }
 0x3ef   : > { %v8889_v45 = vpop.permute.xlu2 %2596 }
 0x3f0   : > { %13521 = vst [vmem:[#allocation282_spill] sm:$0xff] %v8889_v45  ;;  %v1125_v45 = vld [vmem:[#allocation2 + $0x38] sm:$0xff] }
 0x3f2   : > { %2724 = vrot.lane.b32.xlu1 %v1123_v20, %s7477_s14  ;;  %2716 = vrot.lane.b32.xlu0 %v1119_v59, %s7477_s14  ;;  %v1130_v59 = vld [vmem:[#allocation2 + $0x78] sm:$0xff] }
 0x3f4   : > { %v8893_v63 = vpop.permute.xlu1 %2576  ;;  %v8895_v46 = vpop.permute.xlu0 %2568 }
 0x3f5   : > { %13522 = vst [vmem:[#allocation283_spill] sm:$0xff] %v8893_v63  ;;  %2796 = vrot.lane.b32.xlu2 %v1127_v23, %s7478_s15 }
 0x3f6   : > { %13523 = vst [vmem:[#allocation284_spill] sm:$0xff] %v8895_v46  ;;  %v1129_v46 = vld [vmem:[#allocation2 + $0x68] sm:$0xff] }
 0x3f7   : > { %v8898_v0 = vpop.permute.xlu2 %2666 }
 0x3f8   : > { %13524 = vst [vmem:[#allocation285_spill] sm:$0xff] %v8898_v0  ;;  %v9280_v0 = vld [vmem:[#allocation2 + $0x19a] sm:$0xff] }
 0x3fa   : > { %2794 = vrot.lane.b32.xlu1 %v1126_v51, %s7478_s15  ;;  %2722 = vrot.lane.b32.xlu0 %v1122_v22, %s7477_s14  ;;  %v1133_v22 = vld [vmem:[#allocation2 + $0x98] sm:$0xff] }
 0x3fc   : > { %v8902_v27 = vpop.permute.xlu1 %2582  ;;  %v8904_v20 = vpop.permute.xlu0 %2574 }
 0x3fd   : > { %13525 = vst [vmem:[#allocation286_spill] sm:$0xff] %v8902_v27  ;;  %2802 = vrot.lane.b32.xlu2 %v1130_v59, %s7478_s15 }
 0x3fe   : > { %13526 = vst [vmem:[#allocation287_spill] sm:$0xff] %v8904_v20  ;;  %v1132_v20 = vld [vmem:[#allocation2 + $0x90] sm:$0xff] }
 0x3ff   : > { %v8907_v63 = vpop.permute.xlu2 %2672 }
 0x400   : > { %13527 = vst [vmem:[#allocation288_spill] sm:$0xff] %v8907_v63  ;;  %v9139_v63 = vld [vmem:[#allocation2 + $0x7a] sm:$0xff] }
 0x402   : > { %2800 = vrot.lane.b32.xlu1 %v1129_v46, %s7478_s15  ;;  %2792 = vrot.lane.b32.xlu0 %v1125_v45, %s7478_s15  ;;  %v1136_v45 = vld [vmem:[#allocation2 + $0xc0] sm:$0xff] }
 0x404   : > { %v8911_v23 = vpop.permute.xlu1 %2588  ;;  %v8913_v51 = vpop.permute.xlu0 %2580 }
 0x405   : > { %13528 = vst [vmem:[#allocation289_spill] sm:$0xff] %v8911_v23  ;;  %2808 = vrot.lane.b32.xlu2 %v1133_v22, %s7478_s15 }
 0x406   : > { %13529 = vst [vmem:[#allocation290_spill] sm:$0xff] %v8913_v51  ;;  %v1135_v51 = vld [vmem:[#allocation2 + $0xb0] sm:$0xff] }
 0x407   : > { %v8916_v27 = vpop.permute.xlu2 %2678 }
 0x408   : > { %13530 = vst [vmem:[#allocation291_spill] sm:$0xff] %v8916_v27  ;;  %v1134_v27 = vld [vmem:[#allocation2 + $0xa8] sm:$0xff] }
 0x40a   : > { %2806 = vrot.lane.b32.xlu1 %v1132_v20, %s7478_s15  ;;  %2798 = vrot.lane.b32.xlu0 %v1128_v41, %s7478_s15  ;;  %v1139_v41 = vld [vmem:[#allocation2 + $0xe0] sm:$0xff] }
 0x40c   : > { %v8920_v59 = vpop.permute.xlu1 %2594  ;;  %v8922_v46 = vpop.permute.xlu0 %2586 }
 0x40d   : > { %13531 = vst [vmem:[#allocation292_spill] sm:$0xff] %v8920_v59  ;;  %2814 = vrot.lane.b32.xlu2 %v1136_v45, %s7478_s15 }
 0x40e   : > { %13532 = vst [vmem:[#allocation293_spill] sm:$0xff] %v8922_v46  ;;  %v1138_v46 = vld [vmem:[#allocation2 + $0xd8] sm:$0xff] }
 0x40f   : > { %v8925_v23 = vpop.permute.xlu2 %2684 }
 0x410   : > { %13533 = vst [vmem:[#allocation294_spill] sm:$0xff] %v8925_v23 }
 0x412   : > { %2812 = vrot.lane.b32.xlu1 %v1135_v51, %s7478_s15  ;;  %2804 = vrot.lane.b32.xlu0 %v1131_v57, %s7478_s15  ;;  %v1142_v57 = vld [vmem:[#allocation2 + $0x108] sm:$0xff] }
 0x414   : > { %v8929_v22 = vpop.permute.xlu1 %2664  ;;  %v8931_v20 = vpop.permute.xlu0 %2592 }
 0x415   : > { %13534 = vst [vmem:[#allocation295_spill] sm:$0xff] %v8929_v22  ;;  %2820 = vrot.lane.b32.xlu2 %v1139_v41, %s7478_s15  ;;  %v9313_v22 = vld [vmem:[#allocation2 + $0x63] sm:$0xff] }
 0x416   : > { %13535 = vst [vmem:[#allocation296_spill] sm:$0xff] %v8931_v20  ;;  %v1141_v20 = vld [vmem:[#allocation2 + $0xf8] sm:$0xff] }
 0x417   : > { %v8934_v59 = vpop.permute.xlu2 %2690 }
 0x418   : > { %13536 = vst [vmem:[#allocation297_spill] sm:$0xff] %v8934_v59 }
 0x41a   : > { %2818 = vrot.lane.b32.xlu1 %v1138_v46, %s7478_s15  ;;  %2810 = vrot.lane.b32.xlu0 %v1134_v27, %s7478_s15  ;;  %v1145_v27 = vld [vmem:[#allocation2 + $0x128] sm:$0xff] }
 0x41c   : > { %v8938_v45 = vpop.permute.xlu1 %2670  ;;  %v8940_v51 = vpop.permute.xlu0 %2662 }
 0x41d   : > { %13537 = vst [vmem:[#allocation298_spill] sm:$0xff] %v8938_v45  ;;  %2826 = vrot.lane.b32.xlu2 %v1142_v57, %s7478_s15 }
 0x41e   : > { %13538 = vst [vmem:[#allocation299_spill] sm:$0xff] %v8940_v51  ;;  %v1233_v51 = vld [vmem:[#allocation2 + $0xcb] sm:$0xff] }
 0x41f   : > { %v8943_v23 = vpop.permute.xlu2 %2696 }
 0x420   : > { %13539 = vst [vmem:[#allocation300_spill] sm:$0xff] %v8943_v23 }
 0x422   : > { %2824 = vrot.lane.b32.xlu1 %v1141_v20, %s7478_s15  ;;  %2816 = vrot.lane.b32.xlu0 %v1137_v16, %s7478_s15  ;;  %v1148_v16 = vld [vmem:[#allocation2 + $0x150] sm:$0xff] }
 0x424   : > { %v8947_v41 = vpop.permute.xlu1 %2676  ;;  %v8949_v46 = vpop.permute.xlu0 %2668 }
 0x425   : > { %13540 = vst [vmem:[#allocation301_spill] sm:$0xff] %v8947_v41  ;;  %2832 = vrot.lane.b32.xlu2 %v1145_v27, %s7478_s15  ;;  %v1147_v41 = vld [vmem:[#allocation2 + $0x140] sm:$0xff] }
 0x426   : > { %13541 = vst [vmem:[#allocation302_spill] sm:$0xff] %v8949_v46  ;;  %v9239_v46 = vld [vmem:[#allocation2 + $0x18a] sm:$0xff] }
 0x427   : > { %v8952_v59 = vpop.permute.xlu2 %2702 }
 0x428   : > { %13542 = vst [vmem:[#allocation303_spill] sm:$0xff] %v8952_v59 }
 0x42a   : > { %2830 = vrot.lane.b32.xlu1 %v1144_v56, %s7478_s15  ;;  %2822 = vrot.lane.b32.xlu0 %v1140_v6, %s7478_s15  ;;  %v1151_v6 = vld [vmem:[#allocation2 + $0x170] sm:$0xff] }
 0x42c   : > { %v8956_v57 = vpop.permute.xlu1 %2682  ;;  %v8958_v20 = vpop.permute.xlu0 %2674 }
 0x42d   : > { %13543 = vst [vmem:[#allocation304_spill] sm:$0xff] %v8956_v57  ;;  %2838 = vrot.lane.b32.xlu2 %v1148_v16, %s7478_s15  ;;  %v1150_v57 = vld [vmem:[#allocation2 + $0x168] sm:$0xff] }
 0x42e   : > { %13544 = vst [vmem:[#allocation305_spill] sm:$0xff] %v8958_v20  ;;  %v1176_v20 = vld [vmem:[#allocation2 + $0x121] sm:$0xff] }
 0x42f   : > { %v8961_v23 = vpop.permute.xlu2 %2708 }
 0x430   : > { %13545 = vst [vmem:[#allocation306_spill] sm:$0xff] %v8961_v23  ;;  %v1149_v23 = vld [vmem:[#allocation2 + $0x158] sm:$0xff] }
 0x432   : > { %2836 = vrot.lane.b32.xlu1 %v1147_v41, %s7478_s15  ;;  %2828 = vrot.lane.b32.xlu0 %v1143_v10, %s7478_s15  ;;  %v1154_v10 = vld [vmem:[#allocation2 + $0x198] sm:$0xff] }
 0x434   : > { %v8965_v27 = vpop.permute.xlu1 %2688  ;;  %v8967_v56 = vpop.permute.xlu0 %2680 }
 0x435   : > { %13546 = vst [vmem:[#allocation307_spill] sm:$0xff] %v8965_v27  ;;  %2844 = vrot.lane.b32.xlu2 %v1151_v6, %s7478_s15 }
 0x436   : > { %13547 = vst [vmem:[#allocation308_spill] sm:$0xff] %v8967_v56  ;;  %v1153_v56 = vld [vmem:[#allocation2 + $0x188] sm:$0xff] }
 0x437   : > { %v8970_v59 = vpop.permute.xlu2 %2714 }
 0x438   : > { %13548 = vst [vmem:[#allocation309_spill] sm:$0xff] %v8970_v59  ;;  %v1155_v59 = vld [vmem:[#allocation2 + $0x1a0] sm:$0xff] }
 0x43a   : > { %2842 = vrot.lane.b32.xlu1 %v1150_v57, %s7478_s15  ;;  %2834 = vrot.lane.b32.xlu0 %v1146_v29, %s7478_s15  ;;  %v1157_v29 = vld [vmem:[#allocation2 + $0x39] sm:$0xff] }
 0x43c   : > { %v8974_v16 = vpop.permute.xlu1 %2694  ;;  %v8976_v41 = vpop.permute.xlu0 %2686 }
 0x43d   : > { %13549 = vst [vmem:[#allocation310_spill] sm:$0xff] %v8974_v16  ;;  %2850 = vrot.lane.b32.xlu2 %v1154_v10, %s7478_s15  ;;  %v1152_v10 = vld [vmem:[#allocation2 + $0x180] sm:$0xff] }
 0x43e   : > { %13550 = vst [vmem:[#allocation311_spill] sm:$0xff] %v8976_v41  ;;  %v1156_v41 = vld [vmem:[#allocation2 + $0x31] sm:$0xff] }
 0x43f   : > { %v8979_v27 = vpop.permute.xlu2 %2720 }
 0x440   : > { %13551 = vst [vmem:[#allocation312_spill] sm:$0xff] %v8979_v27 }
 0x442   : > { %2848 = vrot.lane.b32.xlu1 %v1153_v56, %s7478_s15  ;;  %2840 = vrot.lane.b32.xlu0 %v1149_v23, %s7478_s15  ;;  %v1160_v23 = vld [vmem:[#allocation2 + $0x61] sm:$0xff] }
 0x444   : > { %v8983_v6 = vpop.permute.xlu1 %2700  ;;  %v8985_v57 = vpop.permute.xlu0 %2692 }
 0x445   : > { %13552 = vst [vmem:[#allocation313_spill] sm:$0xff] %v8983_v6  ;;  %2920 = vrot.lane.b32.xlu2 %v1157_v29, %s7479_s16 }
 0x446   : > { %13553 = vst [vmem:[#allocation314_spill] sm:$0xff] %v8985_v57  ;;  %v1159_v57 = vld [vmem:[#allocation2 + $0x51] sm:$0xff] }
 0x447   : > { %v8988_v16 = vpop.permute.xlu2 %2790 }
 0x448   : > { %13554 = vst [vmem:[#allocation315_spill] sm:$0xff] %v8988_v16  ;;  %v1230_v16 = vld [vmem:[#allocation2 + $0xab] sm:$0xff] }
 0x44a   : > { %2918 = vrot.lane.b32.xlu1 %v1156_v41, %s7479_s16  ;;  %2846 = vrot.lane.b32.xlu0 %v1152_v10, %s7478_s15  ;;  %v1163_v10 = vld [vmem:[#allocation2 + $0x81] sm:$0xff] }
 0x44c   : > { %v8992_v27 = vpop.permute.xlu1 %2706  ;;  %v8994_v56 = vpop.permute.xlu0 %2698 }
 0x44d   : > { %13555 = vst [vmem:[#allocation316_spill] sm:$0xff] %v8992_v27  ;;  %2926 = vrot.lane.b32.xlu2 %v1160_v23, %s7479_s16  ;;  %v9175_v27 = vld [vmem:[#allocation2 + $0xc2] sm:$0xff] }
 0x44e   : > { %13556 = vst [vmem:[#allocation317_spill] sm:$0xff] %v8994_v56  ;;  %v1162_v56 = vld [vmem:[#allocation2 + $0x79] sm:$0xff] }
 0x44f   : > { %v8997_v6 = vpop.permute.xlu2 %2796 }
 0x450   : > { %13557 = vst [vmem:[#allocation318_spill] sm:$0xff] %v8997_v6  ;;  %v9229_v6 = vld [vmem:[#allocation2 + $0x12a] sm:$0xff] }
 0x452   : > { %2924 = vrot.lane.b32.xlu1 %v1159_v57, %s7479_s16  ;;  %2852 = vrot.lane.b32.xlu0 %v1155_v59, %s7478_s15  ;;  %v1166_v59 = vld [vmem:[#allocation2 + $0xa9] sm:$0xff] }
 0x454   : > { %v9001_v29 = vpop.permute.xlu1 %2712  ;;  %v9003_v41 = vpop.permute.xlu0 %2704 }
 0x455   : > { %13558 = vst [vmem:[#allocation319_spill] sm:$0xff] %v9001_v29  ;;  %2932 = vrot.lane.b32.xlu2 %v1163_v10, %s7479_s16 }
 0x456   : > { %13559 = vst [vmem:[#allocation320_spill] sm:$0xff] %v9003_v41  ;;  %v1165_v41 = vld [vmem:[#allocation2 + $0x99] sm:$0xff] }
 0x457   : > { %v9006_v3 = vpop.permute.xlu2 %2802 }
 0x458   : > { %13560 = vst [vmem:[#allocation321_spill] sm:$0xff] %v9006_v3  ;;  %v1177_v3 = vld [vmem:[#allocation2 + $0x129] sm:$0xff] }
 0x45a   : > { %2930 = vrot.lane.b32.xlu1 %v1162_v56, %s7479_s16  ;;  %2922 = vrot.lane.b32.xlu0 %v1158_v5, %s7479_s16  ;;  %v1169_v5 = vld [vmem:[#allocation2 + $0xc9] sm:$0xff] }
 0x45c   : > { %v9010_v23 = vpop.permute.xlu1 %2718  ;;  %v9012_v57 = vpop.permute.xlu0 %2710 }
 0x45d   : > { %13561 = vst [vmem:[#allocation322_spill] sm:$0xff] %v9010_v23  ;;  %2938 = vrot.lane.b32.xlu2 %v1166_v59, %s7479_s16 }
 0x45e   : > { %13562 = vst [vmem:[#allocation323_spill] sm:$0xff] %v9012_v57  ;;  %v1168_v57 = vld [vmem:[#allocation2 + $0xc1] sm:$0xff] }
 0x45f   : > { %v9015_v29 = vpop.permute.xlu2 %2808 }
 0x460   : > { %13563 = vst [vmem:[#allocation324_spill] sm:$0xff] %v9015_v29  ;;  %v1167_v29 = vld [vmem:[#allocation2 + $0xb1] sm:$0xff] }
 0x462   : > { %2936 = vrot.lane.b32.xlu1 %v1165_v41, %s7479_s16  ;;  %2928 = vrot.lane.b32.xlu0 %v1161_v11, %s7479_s16  ;;  %v1172_v11 = vld [vmem:[#allocation2 + $0xf1] sm:$0xff] }
 0x464   : > { %v9019_v10 = vpop.permute.xlu1 %2724  ;;  %v9021_v56 = vpop.permute.xlu0 %2716 }
 0x465   : > { %13564 = vst [vmem:[#allocation325_spill] sm:$0xff] %v9019_v10  ;;  %2944 = vrot.lane.b32.xlu2 %v1169_v5, %s7479_s16 }
 0x466   : > { %13565 = vst [vmem:[#allocation326_spill] sm:$0xff] %v9021_v56  ;;  %v1171_v56 = vld [vmem:[#allocation2 + $0xe1] sm:$0xff] }
 0x467   : > { %v9024_v23 = vpop.permute.xlu2 %2814 }
 0x468   : > { %13566 = vst [vmem:[#allocation327_spill] sm:$0xff] %v9024_v23 }
 0x46a   : > { %2942 = vrot.lane.b32.xlu1 %v1168_v57, %s7479_s16  ;;  %2934 = vrot.lane.b32.xlu0 %v1164_v1, %s7479_s16  ;;  %v1175_v1 = vld [vmem:[#allocation2 + $0x111] sm:$0xff] }
 0x46c   : > { %v9028_v59 = vpop.permute.xlu1 %2794  ;;  %v9030_v41 = vpop.permute.xlu0 %2722 }
 0x46d   : > { %13567 = vst [vmem:[#allocation328_spill] sm:$0xff] %v9028_v59  ;;  %2950 = vrot.lane.b32.xlu2 %v1172_v11, %s7479_s16 }
 0x46e   : > { %13568 = vst [vmem:[#allocation329_spill] sm:$0xff] %v9030_v41  ;;  %v1174_v41 = vld [vmem:[#allocation2 + $0x109] sm:$0xff] }
 0x46f   : > { %v9033_v10 = vpop.permute.xlu2 %2820 }
 0x470   : > { %13569 = vst [vmem:[#allocation330_spill] sm:$0xff] %v9033_v10 }
 0x472   : > { %2948 = vrot.lane.b32.xlu1 %v1171_v56, %s7479_s16  ;;  %2940 = vrot.lane.b32.xlu0 %v1167_v29, %s7479_s16  ;;  %v1178_v29 = vld [vmem:[#allocation2 + $0x139] sm:$0xff] }
 0x474   : > { %v9037_v5 = vpop.permute.xlu1 %2800  ;;  %v9039_v57 = vpop.permute.xlu0 %2792 }
 0x475   : > { %13570 = vst [vmem:[#allocation331_spill] sm:$0xff] %v9037_v5  ;;  %2956 = vrot.lane.b32.xlu2 %v1175_v1, %s7479_s16  ;;  %v9137_v5 = vld [vmem:[#allocation2 + $0xaa] sm:$0xff] }
 0x476   : > { %13571 = vst [vmem:[#allocation332_spill] sm:$0xff] %v9039_v57 }
 0x477   : > { %v9042_v23 = vpop.permute.xlu2 %2826 }
 0x478   : > { %13572 = vst [vmem:[#allocation333_spill] sm:$0xff] %v9042_v23 }
 0x47a   : > { %2954 = vrot.lane.b32.xlu1 %v1174_v41, %s7479_s16  ;;  %2946 = vrot.lane.b32.xlu0 %v1170_v48, %s7479_s16  ;;  %v1181_v48 = vld [vmem:[#allocation2 + $0x159] sm:$0xff] }
 0x47c   : > { %v9046_v11 = vpop.permute.xlu1 %2806  ;;  %v9048_v56 = vpop.permute.xlu0 %2798 }
 0x47d   : > { %13573 = vst [vmem:[#allocation334_spill] sm:$0xff] %v9046_v11  ;;  %2962 = vrot.lane.b32.xlu2 %v1178_v29, %s7479_s16  ;;  %v1180_v11 = vld [vmem:[#allocation2 + $0x151] sm:$0xff] }
 0x47e   : > { %13574 = vst [vmem:[#allocation335_spill] sm:$0xff] %v9048_v56  ;;  %v9173_v56 = vld [vmem:[#allocation2 + $0xf2] sm:$0xff] }
 0x47f   : > { %v9051_v10 = vpop.permute.xlu2 %2832 }
 0x480   : > { %13575 = vst [vmem:[#allocation336_spill] sm:$0xff] %v9051_v10 }
 0x482   : > { %2960 = vrot.lane.b32.xlu1 %v1177_v3, %s7479_s16  ;;  %2952 = vrot.lane.b32.xlu0 %v1173_v40, %s7479_s16  ;;  %v1184_v40 = vld [vmem:[#allocation2 + $0x181] sm:$0xff] }
 0x484   : > { %v9055_v1 = vpop.permute.xlu1 %2812  ;;  %v9057_v41 = vpop.permute.xlu0 %2804 }
 0x485   : > { %13576 = vst [vmem:[#allocation337_spill] sm:$0xff] %v9055_v1  ;;  %2968 = vrot.lane.b32.xlu2 %v1181_v48, %s7479_s16  ;;  %v1183_v1 = vld [vmem:[#allocation2 + $0x171] sm:$0xff] }
 0x486   : > { %13577 = vst [vmem:[#allocation338_spill] sm:$0xff] %v9057_v41  ;;  %v1179_v41 = vld [vmem:[#allocation2 + $0x141] sm:$0xff] }
 0x487   : > { %v9060_v23 = vpop.permute.xlu2 %2838 }
 0x488   : > { %13578 = vst [vmem:[#allocation339_spill] sm:$0xff] %v9060_v23  ;;  %v1182_v23 = vld [vmem:[#allocation2 + $0x169] sm:$0xff] }
 0x48a   : > { %2966 = vrot.lane.b32.xlu1 %v1180_v11, %s7479_s16  ;;  %2958 = vrot.lane.b32.xlu0 %v1176_v20, %s7479_s16  ;;  %v1187_v20 = vld [vmem:[#allocation2 + $0x1a1] sm:$0xff] }
 0x48c   : > { %v9064_v29 = vpop.permute.xlu1 %2818  ;;  %v9066_v3 = vpop.permute.xlu0 %2810 }
 0x48d   : > { %13579 = vst [vmem:[#allocation340_spill] sm:$0xff] %v9064_v29  ;;  %2974 = vrot.lane.b32.xlu2 %v1184_v40, %s7479_s16 }
 0x48e   : > { %13580 = vst [vmem:[#allocation341_spill] sm:$0xff] %v9066_v3  ;;  %v1186_v3 = vld [vmem:[#allocation2 + $0x199] sm:$0xff] }
 0x48f   : > { %v9069_v10 = vpop.permute.xlu2 %2844 }
 0x490   : > { %13581 = vst [vmem:[#allocation342_spill] sm:$0xff] %v9069_v10  ;;  %v1188_v10 = vld [vmem:[#allocation2 + $0x32] sm:$0xff] }
 0x492   : > { %2972 = vrot.lane.b32.xlu1 %v1183_v1, %s7479_s16  ;;  %2964 = vrot.lane.b32.xlu0 %v1179_v41, %s7479_s16  ;;  %v9086_v41 = vld [vmem:[#allocation2 + $0x4a] sm:$0xff] }
 0x494   : > { %v9073_v48 = vpop.permute.xlu1 %2824  ;;  %v9075_v11 = vpop.permute.xlu0 %2816 }
 0x495   : > { %13582 = vst [vmem:[#allocation343_spill] sm:$0xff] %v9073_v48  ;;  %2980 = vrot.lane.b32.xlu2 %v1187_v20, %s7479_s16  ;;  %v1189_v20 = vld [vmem:[#allocation2 + $0x3a] sm:$0xff] }
 0x496   : > { %13583 = vst [vmem:[#allocation344_spill] sm:$0xff] %v9075_v11  ;;  %v9104_v11 = vld [vmem:[#allocation2 + $0x62] sm:$0xff] }
 0x497   : > { %v9078_v29 = vpop.permute.xlu2 %2850 }
 0x498   : > { %13584 = vst [vmem:[#allocation345_spill] sm:$0xff] %v9078_v29  ;;  %v1185_v29 = vld [vmem:[#allocation2 + $0x189] sm:$0xff] }
 0x49a   : > { %2978 = vrot.lane.b32.xlu1 %v1186_v3, %s7479_s16  ;;  %2970 = vrot.lane.b32.xlu0 %v1182_v23, %s7479_s16 }
 0x49c   : > { %v9082_v40 = vpop.permute.xlu1 %2830  ;;  %v9084_v1 = vpop.permute.xlu0 %2822 }
 0x49d   : > { %13585 = vst [vmem:[#allocation346_spill] sm:$0xff] %v9082_v40  ;;  %3050 = vrot.lane.b32.xlu2 %v9086_v41, %s7480_s17  ;;  %v9098_v40 = vld [vmem:[#allocation2 + $0x6a] sm:$0xff] }
 0x49e   : > { %13586 = vst [vmem:[#allocation347_spill] sm:$0xff] %v9084_v1 }
 0x49f   : > { %v9090_v48 = vpop.permute.xlu2 %2920 }
 0x4a0   : > { %13587 = vst [vmem:[#allocation348_spill] sm:$0xff] %v9090_v48 }
 0x4a2   : > { %3048 = vrot.lane.b32.xlu1 %v1189_v20, %s7480_s17  ;;  %2976 = vrot.lane.b32.xlu0 %v1185_v29, %s7479_s16 }
 0x4a4   : > { %v9094_v3 = vpop.permute.xlu1 %2836  ;;  %v9096_v23 = vpop.permute.xlu0 %2828 }
 0x4a5   : > { %13588 = vst [vmem:[#allocation349_spill] sm:$0xff] %v9094_v3  ;;  %3056 = vrot.lane.b32.xlu2 %v9098_v40, %s7480_s17 }
 0x4a6   : > { %13589 = vst [vmem:[#allocation350_spill] sm:$0xff] %v9096_v23  ;;  %v9113_v23 = vld [vmem:[#allocation2 + $0x92] sm:$0xff] }
 0x4a7   : > { %v9102_v1 = vpop.permute.xlu2 %2926 }
 0x4a8   : > { %13590 = vst [vmem:[#allocation351_spill] sm:$0xff] %v9102_v1 }
 0x4aa   : > { %3054 = vrot.lane.b32.xlu1 %v9104_v11, %s7480_s17  ;;  %3046 = vrot.lane.b32.xlu0 %v1188_v10, %s7480_s17 }
 0x4ac   : > { %v9109_v29 = vpop.permute.xlu1 %2842  ;;  %v9111_v20 = vpop.permute.xlu0 %2834 }
 0x4ad   : > { %13591 = vst [vmem:[#allocation352_spill] sm:$0xff] %v9109_v29  ;;  %3062 = vrot.lane.b32.xlu2 %v9113_v23, %s7480_s17 }
 0x4ae   : > { %13592 = vst [vmem:[#allocation353_spill] sm:$0xff] %v9111_v20  ;;  %v9167_v20 = vld [vmem:[#allocation2 + $0xfa] sm:$0xff] }
 0x4af   : > { %v9117_v3 = vpop.permute.xlu2 %2932 }
 0x4b0   : > { %13593 = vst [vmem:[#allocation354_spill] sm:$0xff] %v9117_v3 }
 0x4b2   : > { %3060 = vrot.lane.b32.xlu1 %v9119_v31, %s7480_s17  ;;  %3052 = vrot.lane.b32.xlu0 %v9121_v54, %s7480_s17 }
 0x4b4   : > { %v9127_v10 = vpop.permute.xlu1 %2848  ;;  %v9129_v29 = vpop.permute.xlu0 %2840 }
 0x4b5   : > { %13594 = vst [vmem:[#allocation355_spill] sm:$0xff] %v9127_v10  ;;  %3068 = vrot.lane.b32.xlu2 %v9131_v50, %s7480_s17 }
 0x4b6   : > { %13595 = vst [vmem:[#allocation356_spill] sm:$0xff] %v9129_v29 }
 0x4b7   : > { %v9135_v3 = vpop.permute.xlu2 %2938 }
 0x4b8   : > { %13596 = vst [vmem:[#allocation357_spill] sm:$0xff] %v9135_v3 }
 0x4ba   : > { %3066 = vrot.lane.b32.xlu1 %v9137_v5, %s7480_s17  ;;  %3058 = vrot.lane.b32.xlu0 %v9139_v63, %s7480_s17 }
 0x4bc   : > { %v9145_v10 = vpop.permute.xlu1 %2918  ;;  %v9147_v29 = vpop.permute.xlu0 %2846 }
 0x4bd   : > { %13597 = vst [vmem:[#allocation358_spill] sm:$0xff] %v9145_v10  ;;  %3074 = vrot.lane.b32.xlu2 %v9149_v26, %s7480_s17  ;;  %v1234_v10 = vld [vmem:[#allocation2 + $0xdb] sm:$0xff] }
 0x4be   : > { %13598 = vst [vmem:[#allocation359_spill] sm:$0xff] %v9147_v29 }
 0x4bf   : > { %v9153_v3 = vpop.permute.xlu2 %2944 }
 0x4c0   : > { %13599 = vst [vmem:[#allocation360_spill] sm:$0xff] %v9153_v3 }
 0x4c2   : > { %3072 = vrot.lane.b32.xlu1 %v9155_v34, %s7480_s17  ;;  %3064 = vrot.lane.b32.xlu0 %v9157_v36, %s7480_s17 }
 0x4c4   : > { %v9163_v1 = vpop.permute.xlu1 %2924  ;;  %v9165_v29 = vpop.permute.xlu0 %2852 }
 0x4c5   : > { %13600 = vst [vmem:[#allocation361_spill] sm:$0xff] %v9163_v1  ;;  %3080 = vrot.lane.b32.xlu2 %v9167_v20, %s7480_s17  ;;  %v9227_v1 = vld [vmem:[#allocation2 + $0x15a] sm:$0xff] }
 0x4c6   : > { %13601 = vst [vmem:[#allocation362_spill] sm:$0xff] %v9165_v29 }
 0x4c7   : > { %v9171_v3 = vpop.permute.xlu2 %2950 }
 0x4c8   : > { %13602 = vst [vmem:[#allocation363_spill] sm:$0xff] %v9171_v3 }
 0x4ca   : > { %3078 = vrot.lane.b32.xlu1 %v9173_v56, %s7480_s17  ;;  %3070 = vrot.lane.b32.xlu0 %v9175_v27, %s7480_s17 }
 0x4cc   : > { %v9181_v45 = vpop.permute.xlu1 %2930  ;;  %v9183_v29 = vpop.permute.xlu0 %2922 }
 0x4cd   : > { %13603 = vst [vmem:[#allocation364_spill] sm:$0xff] %v9181_v45  ;;  %3086 = vrot.lane.b32.xlu2 %v9185_v8, %s7480_s17 }
 0x4ce   : > { %13604 = vst [vmem:[#allocation365_spill] sm:$0xff] %v9183_v29  ;;  %v9262_v29 = vld [vmem:[#allocation2 + $0x172] sm:$0xff] }
 0x4cf   : > { %v9189_v3 = vpop.permute.xlu2 %2956 }
 0x4d0   : > { %13605 = vst [vmem:[#allocation366_spill] sm:$0xff] %v9189_v3 }
 0x4d2   : > { %3084 = vrot.lane.b32.xlu1 %v9191_v28, %s7480_s17  ;;  %3076 = vrot.lane.b32.xlu0 %v9193_v17, %s7480_s17 }
 0x4d4   : > { %v9199_v45 = vpop.permute.xlu1 %2936  ;;  %v9201_v33 = vpop.permute.xlu0 %2928 }
 0x4d5   : > { %13606 = vst [vmem:[#allocation367_spill] sm:$0xff] %v9199_v45  ;;  %3092 = vrot.lane.b32.xlu2 %v9203_v39, %s7480_s17 }
 0x4d6   : > { %13607 = vst [vmem:[#allocation368_spill] sm:$0xff] %v9201_v33 }
 0x4d7   : > { %v9207_v3 = vpop.permute.xlu2 %2962 }
 0x4d8   : > { %13608 = vst [vmem:[#allocation369_spill] sm:$0xff] %v9207_v3 }
 0x4da   : > { %3090 = vrot.lane.b32.xlu1 %v9209_v19, %s7480_s17  ;;  %3082 = vrot.lane.b32.xlu0 %v9211_v7, %s7480_s17 }
 0x4dc   : > { %v9217_v45 = vpop.permute.xlu1 %2942  ;;  %v9219_v33 = vpop.permute.xlu0 %2934 }
 0x4dd   : > { %13609 = vst [vmem:[#allocation370_spill] sm:$0xff] %v9217_v45  ;;  %3098 = vrot.lane.b32.xlu2 %v9221_v14, %s7480_s17 }
 0x4de   : > { %13610 = vst [vmem:[#allocation371_spill] sm:$0xff] %v9219_v33 }
 0x4df   : > { %v9225_v3 = vpop.permute.xlu2 %2968 }
 0x4e0   : > { %13611 = vst [vmem:[#allocation372_spill] sm:$0xff] %v9225_v3 }
 0x4e2   : > { %3096 = vrot.lane.b32.xlu1 %v9227_v1, %s7480_s17  ;;  %3088 = vrot.lane.b32.xlu0 %v9229_v6, %s7480_s17 }
 0x4e4   : > { %v9235_v45 = vpop.permute.xlu1 %2948  ;;  %v9237_v33 = vpop.permute.xlu0 %2940 }
 0x4e5   : > { %13612 = vst [vmem:[#allocation373_spill] sm:$0xff] %v9235_v45  ;;  %3104 = vrot.lane.b32.xlu2 %v9239_v46, %s7480_s17 }
 0x4e6   : > { %13613 = vst [vmem:[#allocation374_spill] sm:$0xff] %v9237_v33 }
 0x4e7   : > { %v9243_v3 = vpop.permute.xlu2 %2974 }
 0x4e8   : > { %13614 = vst [vmem:[#allocation375_spill] sm:$0xff] %v9243_v3  ;;  %v9260_v3 = vld [vmem:[#allocation2 + $0x1a2] sm:$0xff] }
 0x4ea   : > { %3102 = vrot.lane.b32.xlu1 %v9245_v55, %s7480_s17  ;;  %3094 = vrot.lane.b32.xlu0 %v9247_v61, %s7480_s17 }
 0x4ec   : > { %v9253_v45 = vpop.permute.xlu1 %2954  ;;  %v9255_v33 = vpop.permute.xlu0 %2946 }
 0x4ed   : > { %13615 = vst [vmem:[#allocation376_spill] sm:$0xff] %v9253_v45  ;;  %3174 = vrot.lane.b32.xlu2 %v1220_v49, %s7481_s18 }
 0x4ee   : > { %13616 = vst [vmem:[#allocation377_spill] sm:$0xff] %v9255_v33  ;;  %v9272_v33 = vld [vmem:[#allocation2 + $0x53] sm:$0xff] }
 0x4ef   : > { %v9258_v4 = vpop.permute.xlu2 %2980 }
 0x4f0   : > { %13617 = vst [vmem:[#allocation378_spill] sm:$0xff] %v9258_v4  ;;  %v9278_v4 = vld [vmem:[#allocation2 + $0x4b] sm:$0xff] }
 0x4f2   : > { %3108 = vrot.lane.b32.xlu1 %v9260_v3, %s7480_s17  ;;  %3100 = vrot.lane.b32.xlu0 %v9262_v29, %s7480_s17 }
 0x4f4   : > { %v9268_v59 = vpop.permute.xlu1 %2960  ;;  %v9270_v45 = vpop.permute.xlu0 %2952 }
 0x4f5   : > { %13618 = vst [vmem:[#allocation379_spill] sm:$0xff] %v9268_v59  ;;  %3180 = vrot.lane.b32.xlu2 %v9272_v33, %s7481_s18 }
 0x4f6   : > { %13619 = vst [vmem:[#allocation380_spill] sm:$0xff] %v9270_v45 }
 0x4f7   : > { %v9276_v49 = vpop.permute.xlu2 %3050 }
 0x4f8   : > { %13620 = vst [vmem:[#allocation381_spill] sm:$0xff] %v9276_v49 }
 0x4fa   : > { %3178 = vrot.lane.b32.xlu1 %v9278_v4, %s7481_s18  ;;  %3106 = vrot.lane.b32.xlu0 %v9280_v0, %s7480_s17  ;;  %s12984_s17 = scalar_lea.vmem %s13159_s6, %s7365_s25 }
 0x4fc   : > { %v9286_v59 = vpop.permute.xlu1 %2966  ;;  %v9288_v45 = vpop.permute.xlu0 %2958 }
 0x4fd   : > { %13621 = vst [vmem:[#allocation382_spill] sm:$0xff] %v9286_v59  ;;  %3186 = vrot.lane.b32.xlu2 %v9290_v2, %s7481_s18 }
 0x4fe   : > { %13622 = vst [vmem:[#allocation383_spill] sm:$0xff] %v9288_v45  ;;  %v9305_v45 = vld [vmem:[#allocation2 + $0x9b] sm:$0xff] }
 0x4ff   : > { %v9294_v49 = vpop.permute.xlu2 %3056 }
 0x500   : > { %13623 = vst [vmem:[#allocation384_spill] sm:$0xff] %v9294_v49  ;;  %v9311_v49 = vld [vmem:[#allocation2 + $0x93] sm:$0xff] }
 0x502   : > { %3184 = vrot.lane.b32.xlu1 %v9296_v53, %s7481_s18  ;;  %3176 = vrot.lane.b32.xlu0 %v1221_v47, %s7481_s18 }
 0x504   : > { %v9301_v48 = vpop.permute.xlu1 %2972  ;;  %v9303_v59 = vpop.permute.xlu0 %2964 }
 0x505   : > { %13624 = vst [vmem:[#allocation385_spill] sm:$0xff] %v9301_v48  ;;  %3192 = vrot.lane.b32.xlu2 %v9305_v45, %s7481_s18 }
 0x506   : > { %13625 = vst [vmem:[#allocation386_spill] sm:$0xff] %v9303_v59  ;;  %v9323_v59 = vld [vmem:[#allocation2 + $0xc3] sm:$0xff] }
 0x507   : > { %v9309_v57 = vpop.permute.xlu2 %3062 }
 0x508   : > { %13626 = vst [vmem:[#allocation387_spill] sm:$0xff] %v9309_v57 }
 0x50a   : > { %3190 = vrot.lane.b32.xlu1 %v9311_v49, %s7481_s18  ;;  %3182 = vrot.lane.b32.xlu0 %v9313_v22, %s7481_s18 }
 0x50c   : > { %v9319_v47 = vpop.permute.xlu1 %2978  ;;  %v9321_v48 = vpop.permute.xlu0 %2970 }
 0x50d   : > { %13627 = vst [vmem:[#allocation388_spill] sm:$0xff] %v9319_v47  ;;  %3198 = vrot.lane.b32.xlu2 %v9323_v59, %s7481_s18  ;;  %v1235_v47 = vld [vmem:[#allocation2 + $0xe3] sm:$0xff] }
 0x50e   : > { %13628 = vst [vmem:[#allocation389_spill] sm:$0xff] %v9321_v48 }
 0x50f   : > { %v9327_v57 = vpop.permute.xlu2 %3068 }
 0x510   : > { %13629 = vst [vmem:[#allocation390_spill] sm:$0xff] %v9327_v57 }
 0x512   : > { %3196 = vrot.lane.b32.xlu1 %v1231_v60, %s7481_s18  ;;  %3188 = vrot.lane.b32.xlu0 %v1227_v25, %s7481_s18  ;;  %v1238_v25 = vld [vmem:[#allocation2 + $0x10b] sm:$0xff] }
 0x514   : > { %v9331_v9 = vpop.permute.xlu1 %3048  ;;  %v9333_v38 = vpop.permute.xlu0 %2976 }
 0x515   : > { %13630 = vst [vmem:[#allocation391_spill] sm:$0xff] %v9331_v9  ;;  %3204 = vrot.lane.b32.xlu2 %v1235_v47, %s7481_s18 }
 0x516   : > { %13631 = vst [vmem:[#allocation392_spill] sm:$0xff] %v9333_v38  ;;  %v1237_v38 = vld [vmem:[#allocation2 + $0xfb] sm:$0xff] }
 0x517   : > { %v9336_v48 = vpop.permute.xlu2 %3074 }
 0x518   : > { %13632 = vst [vmem:[#allocation393_spill] sm:$0xff] %v9336_v48 }
 0x51a   : > { %3202 = vrot.lane.b32.xlu1 %v1234_v10, %s7481_s18  ;;  %3194 = vrot.lane.b32.xlu0 %v1230_v16, %s7481_s18  ;;  %v1241_v16 = vld [vmem:[#allocation2 + $0x12b] sm:$0xff] }
 0x51c   : > { %v9340_v57 = vpop.permute.xlu1 %3054  ;;  %v9342_v60 = vpop.permute.xlu0 %3046 }
 0x51d   : > { %13633 = vst [vmem:[#allocation394_spill] sm:$0xff] %v9340_v57  ;;  %3210 = vrot.lane.b32.xlu2 %v1238_v25, %s7481_s18  ;;  %v1240_v57 = vld [vmem:[#allocation2 + $0x123] sm:$0xff] }
 0x51e   : > { %13634 = vst [vmem:[#allocation395_spill] sm:$0xff] %v9342_v60  ;;  %v1236_v60 = vld [vmem:[#allocation2 + $0xf3] sm:$0xff] }
 0x51f   : > { %v9345_v9 = vpop.permute.xlu2 %3080 }
 0x520   : > { %13635 = vst [vmem:[#allocation396_spill] sm:$0xff] %v9345_v9 }
 0x522   : > { %3208 = vrot.lane.b32.xlu1 %v1237_v38, %s7481_s18  ;;  %3200 = vrot.lane.b32.xlu0 %v1233_v51, %s7481_s18  ;;  %v1244_v51 = vld [vmem:[#allocation2 + $0x153] sm:$0xff] }
 0x524   : > { %v9349_v47 = vpop.permute.xlu1 %3060  ;;  %v9351_v10 = vpop.permute.xlu0 %3052 }
 0x525   : > { %13636 = vst [vmem:[#allocation397_spill] sm:$0xff] %v9349_v47  ;;  %3216 = vrot.lane.b32.xlu2 %v1241_v16, %s7481_s18  ;;  %v1243_v47 = vld [vmem:[#allocation2 + $0x143] sm:$0xff] }
 0x526   : > { %13637 = vst [vmem:[#allocation398_spill] sm:$0xff] %v9351_v10  ;;  %v1239_v10 = vld [vmem:[#allocation2 + $0x113] sm:$0xff] }
 0x527   : > { %v9354_v48 = vpop.permute.xlu2 %3086 }
 0x528   : > { %13638 = vst [vmem:[#allocation399_spill] sm:$0xff] %v9354_v48 }
 0x52a   : > { %3214 = vrot.lane.b32.xlu1 %v1240_v57, %s7481_s18  ;;  %3206 = vrot.lane.b32.xlu0 %v1236_v60, %s7481_s18  ;;  %v1247_v60 = vld [vmem:[#allocation2 + $0x173] sm:$0xff] }
 0x52c   : > { %v9358_v25 = vpop.permute.xlu1 %3066  ;;  %v9360_v38 = vpop.permute.xlu0 %3058 }
 0x52d   : > { %13639 = vst [vmem:[#allocation400_spill] sm:$0xff] %v9358_v25  ;;  %3222 = vrot.lane.b32.xlu2 %v1244_v51, %s7481_s18  ;;  %v1246_v25 = vld [vmem:[#allocation2 + $0x16b] sm:$0xff] }
 0x52e   : > { %13640 = vst [vmem:[#allocation401_spill] sm:$0xff] %v9360_v38  ;;  %v1242_v38 = vld [vmem:[#allocation2 + $0x13b] sm:$0xff] }
 0x52f   : > { %v9363_v9 = vpop.permute.xlu2 %3092 }
 0x530   : > { %13641 = vst [vmem:[#allocation402_spill] sm:$0xff] %v9363_v9  ;;  %v1245_v9 = vld [vmem:[#allocation2 + $0x15b] sm:$0xff] }
 0x532   : > { %3220 = vrot.lane.b32.xlu1 %v1243_v47, %s7481_s18  ;;  %3212 = vrot.lane.b32.xlu0 %v1239_v10, %s7481_s18  ;;  %v1250_v10 = vld [vmem:[#allocation2 + $0x19b] sm:$0xff] }
 0x534   : > { %v9367_v16 = vpop.permute.xlu1 %3072  ;;  %v9369_v57 = vpop.permute.xlu0 %3064 }
 0x535   : > { %13642 = vst [vmem:[#allocation403_spill] sm:$0xff] %v9367_v16  ;;  %3228 = vrot.lane.b32.xlu2 %v1247_v60, %s7481_s18 }
 0x536   : > { %13643 = vst [vmem:[#allocation404_spill] sm:$0xff] %v9369_v57  ;;  %v1249_v57 = vld [vmem:[#allocation2 + $0x18b] sm:$0xff] }
 0x537   : > { %v9372_v48 = vpop.permute.xlu2 %3098 }
 0x538   : > { %13644 = vst [vmem:[#allocation405_spill] sm:$0xff] %v9372_v48  ;;  %v1251_v48 = vld [vmem:[#allocation2 + $0x1a3] sm:$0xff] }
 0x53a   : > { %3226 = vrot.lane.b32.xlu1 %v1246_v25, %s7481_s18  ;;  %3218 = vrot.lane.b32.xlu0 %v1242_v38, %s7481_s18  ;;  %v1253_v38 = vld [vmem:[#allocation2 + $0x3c] sm:$0xff] }
 0x53c   : > { %v9376_v51 = vpop.permute.xlu1 %3078  ;;  %v9378_v47 = vpop.permute.xlu0 %3070 }
 0x53d   : > { %13645 = vst [vmem:[#allocation406_spill] sm:$0xff] %v9376_v51  ;;  %3234 = vrot.lane.b32.xlu2 %v1250_v10, %s7481_s18  ;;  %v1248_v10 = vld [vmem:[#allocation2 + $0x183] sm:$0xff] }
 0x53e   : > { %13646 = vst [vmem:[#allocation407_spill] sm:$0xff] %v9378_v47  ;;  %v1252_v47 = vld [vmem:[#allocation2 + $0x34] sm:$0xff] }
 0x53f   : > { %v9381_v16 = vpop.permute.xlu2 %3104 }
 0x540   : > { %13647 = vst [vmem:[#allocation408_spill] sm:$0xff] %v9381_v16 }
 0x542   : > { %3232 = vrot.lane.b32.xlu1 %v1249_v57, %s7481_s18  ;;  %3224 = vrot.lane.b32.xlu0 %v1245_v9, %s7481_s18  ;;  %v1256_v9 = vld [vmem:[#allocation2 + $0x64] sm:$0xff] }
 0x544   : > { %v9385_v60 = vpop.permute.xlu1 %3084  ;;  %v9387_v25 = vpop.permute.xlu0 %3076 }
 0x545   : > { %13648 = vst [vmem:[#allocation409_spill] sm:$0xff] %v9385_v60  ;;  %3304 = vrot.lane.b32.xlu2 %v1253_v38, %s7482_s19 }
 0x546   : > { %13649 = vst [vmem:[#allocation410_spill] sm:$0xff] %v9387_v25  ;;  %v1255_v25 = vld [vmem:[#allocation2 + $0x54] sm:$0xff] }
 0x547   : > { %v9390_v51 = vpop.permute.xlu2 %3174 }
 0x548   : > { %13650 = vst [vmem:[#allocation411_spill] sm:$0xff] %v9390_v51  ;;  %v1254_v51 = vld [vmem:[#allocation2 + $0x4c] sm:$0xff] }
 0x54a   : > { %3302 = vrot.lane.b32.xlu1 %v1252_v47, %s7482_s19  ;;  %3230 = vrot.lane.b32.xlu0 %v1248_v10, %s7481_s18  ;;  %v1259_v10 = vld [vmem:[#allocation2 + $0x84] sm:$0xff] }
 0x54c   : > { %v9394_v16 = vpop.permute.xlu1 %3090  ;;  %v9396_v57 = vpop.permute.xlu0 %3082 }
 0x54d   : > { %13651 = vst [vmem:[#allocation412_spill] sm:$0xff] %v9394_v16  ;;  %3310 = vrot.lane.b32.xlu2 %v1256_v9, %s7482_s19 }
 0x54e   : > { %13652 = vst [vmem:[#allocation413_spill] sm:$0xff] %v9396_v57  ;;  %v1258_v57 = vld [vmem:[#allocation2 + $0x7c] sm:$0xff] }
 0x54f   : > { %v9399_v60 = vpop.permute.xlu2 %3180 }
 0x550   : > { %13653 = vst [vmem:[#allocation414_spill] sm:$0xff] %v9399_v60  ;;  %v1257_v60 = vld [vmem:[#allocation2 + $0x6c] sm:$0xff] }
 0x552   : > { %3308 = vrot.lane.b32.xlu1 %v1255_v25, %s7482_s19  ;;  %3236 = vrot.lane.b32.xlu0 %v1251_v48, %s7481_s18  ;;  %v1262_v48 = vld [vmem:[#allocation2 + $0xac] sm:$0xff] }
 0x554   : > { %v9403_v38 = vpop.permute.xlu1 %3096  ;;  %v9405_v47 = vpop.permute.xlu0 %3088 }
 0x555   : > { %13654 = vst [vmem:[#allocation415_spill] sm:$0xff] %v9403_v38  ;;  %3316 = vrot.lane.b32.xlu2 %v1259_v10, %s7482_s19 }
 0x556   : > { %13655 = vst [vmem:[#allocation416_spill] sm:$0xff] %v9405_v47  ;;  %v1261_v47 = vld [vmem:[#allocation2 + $0x9c] sm:$0xff] }
 0x557   : > { %v9408_v16 = vpop.permute.xlu2 %3186 }
 0x558   : > { %13656 = vst [vmem:[#allocation417_spill] sm:$0xff] %v9408_v16  ;;  %v1260_v16 = vld [vmem:[#allocation2 + $0x94] sm:$0xff] }
 0x55a   : > { %3314 = vrot.lane.b32.xlu1 %v1258_v57, %s7482_s19  ;;  %3306 = vrot.lane.b32.xlu0 %v1254_v51, %s7482_s19  ;;  %v1265_v51 = vld [vmem:[#allocation2 + $0xcc] sm:$0xff] }
 0x55c   : > { %v9412_v9 = vpop.permute.xlu1 %3102  ;;  %v9414_v25 = vpop.permute.xlu0 %3094 }
 0x55d   : > { %13657 = vst [vmem:[#allocation418_spill] sm:$0xff] %v9412_v9  ;;  %3322 = vrot.lane.b32.xlu2 %v1262_v48, %s7482_s19 }
 0x55e   : > { %13658 = vst [vmem:[#allocation419_spill] sm:$0xff] %v9414_v25  ;;  %v1264_v25 = vld [vmem:[#allocation2 + $0xc4] sm:$0xff] }
 0x55f   : > { %v9417_v38 = vpop.permute.xlu2 %3192 }
 0x560   : > { %13659 = vst [vmem:[#allocation420_spill] sm:$0xff] %v9417_v38  ;;  %v1263_v38 = vld [vmem:[#allocation2 + $0xb4] sm:$0xff] }
 0x562   : > { %3320 = vrot.lane.b32.xlu1 %v1261_v47, %s7482_s19  ;;  %3312 = vrot.lane.b32.xlu0 %v1257_v60, %s7482_s19  ;;  %v1268_v60 = vld [vmem:[#allocation2 + $0xf4] sm:$0xff] }
 0x564   : > { %v9421_v10 = vpop.permute.xlu1 %3108  ;;  %v9423_v57 = vpop.permute.xlu0 %3100 }
 0x565   : > { %13660 = vst [vmem:[#allocation421_spill] sm:$0xff] %v9421_v10  ;;  %3328 = vrot.lane.b32.xlu2 %v1265_v51, %s7482_s19 }
 0x566   : > { %13661 = vst [vmem:[#allocation422_spill] sm:$0xff] %v9423_v57  ;;  %v1267_v57 = vld [vmem:[#allocation2 + $0xe4] sm:$0xff] }
 0x567   : > { %v9426_v9 = vpop.permute.xlu2 %3198 }
 0x568   : > { %13662 = vst [vmem:[#allocation423_spill] sm:$0xff] %v9426_v9 }
 0x56a   : > { %3326 = vrot.lane.b32.xlu1 %v1264_v25, %s7482_s19  ;;  %3318 = vrot.lane.b32.xlu0 %v1260_v16, %s7482_s19  ;;  %v1271_v16 = vld [vmem:[#allocation2 + $0x114] sm:$0xff] }
 0x56c   : > { %v9430_v48 = vpop.permute.xlu1 %3178  ;;  %v9432_v47 = vpop.permute.xlu0 %3106 }
 0x56d   : > { %13663 = vst [vmem:[#allocation424_spill] sm:$0xff] %v9430_v48  ;;  %3334 = vrot.lane.b32.xlu2 %v1268_v60, %s7482_s19  ;;  %v1266_v48 = vld [vmem:[#allocation2 + $0xdc] sm:$0xff] }
 0x56e   : > { %13664 = vst [vmem:[#allocation425_spill] sm:$0xff] %v9432_v47  ;;  %v1270_v47 = vld [vmem:[#allocation2 + $0x10c] sm:$0xff] }
 0x56f   : > { %v9435_v10 = vpop.permute.xlu2 %3204 }
 0x570   : > { %13665 = vst [vmem:[#allocation426_spill] sm:$0xff] %v9435_v10 }
 0x572   : > { %3332 = vrot.lane.b32.xlu1 %v1267_v57, %s7482_s19  ;;  %3324 = vrot.lane.b32.xlu0 %v1263_v38, %s7482_s19  ;;  %v1274_v38 = vld [vmem:[#allocation2 + $0x13c] sm:$0xff] }
 0x574   : > { %v9439_v51 = vpop.permute.xlu1 %3184  ;;  %v9441_v25 = vpop.permute.xlu0 %3176 }
 0x575   : > { %13666 = vst [vmem:[#allocation427_spill] sm:$0xff] %v9439_v51  ;;  %3340 = vrot.lane.b32.xlu2 %v1271_v16, %s7482_s19  ;;  %v1273_v51 = vld [vmem:[#allocation2 + $0x12c] sm:$0xff] }
 0x576   : > { %13667 = vst [vmem:[#allocation428_spill] sm:$0xff] %v9441_v25  ;;  %v1269_v25 = vld [vmem:[#allocation2 + $0xfc] sm:$0xff] }
 0x577   : > { %v9444_v9 = vpop.permute.xlu2 %3210 }
 0x578   : > { %13668 = vst [vmem:[#allocation429_spill] sm:$0xff] %v9444_v9 }
 0x57a   : > { %3338 = vrot.lane.b32.xlu1 %v1270_v47, %s7482_s19  ;;  %3330 = vrot.lane.b32.xlu0 %v1266_v48, %s7482_s19  ;;  %v1277_v48 = vld [vmem:[#allocation2 + $0x15c] sm:$0xff] }
 0x57c   : > { %v9448_v60 = vpop.permute.xlu1 %3190  ;;  %v9450_v57 = vpop.permute.xlu0 %3182 }
 0x57d   : > { %13669 = vst [vmem:[#allocation430_spill] sm:$0xff] %v9448_v60  ;;  %3346 = vrot.lane.b32.xlu2 %v1274_v38, %s7482_s19  ;;  %v1276_v60 = vld [vmem:[#allocation2 + $0x154] sm:$0xff] }
 0x57e   : > { %13670 = vst [vmem:[#allocation431_spill] sm:$0xff] %v9450_v57  ;;  %v1272_v57 = vld [vmem:[#allocation2 + $0x124] sm:$0xff] }
 0x57f   : > { %v9453_v10 = vpop.permute.xlu2 %3216 }
 0x580   : > { %13671 = vst [vmem:[#allocation432_spill] sm:$0xff] %v9453_v10 }
 0x582   : > { %3344 = vrot.lane.b32.xlu1 %v1273_v51, %s7482_s19  ;;  %3336 = vrot.lane.b32.xlu0 %v1269_v25, %s7482_s19  ;;  %v1280_v25 = vld [vmem:[#allocation2 + $0x184] sm:$0xff] }
 0x584   : > { %v9457_v16 = vpop.permute.xlu1 %3196  ;;  %v9459_v47 = vpop.permute.xlu0 %3188 }
 0x585   : > { %13672 = vst [vmem:[#allocation433_spill] sm:$0xff] %v9457_v16  ;;  %3352 = vrot.lane.b32.xlu2 %v1277_v48, %s7482_s19  ;;  %v1279_v16 = vld [vmem:[#allocation2 + $0x174] sm:$0xff] }
 0x586   : > { %13673 = vst [vmem:[#allocation434_spill] sm:$0xff] %v9459_v47  ;;  %v1275_v47 = vld [vmem:[#allocation2 + $0x144] sm:$0xff] }
 0x587   : > { %v9462_v9 = vpop.permute.xlu2 %3222 }
 0x588   : > { %13674 = vst [vmem:[#allocation435_spill] sm:$0xff] %v9462_v9  ;;  %v1278_v9 = vld [vmem:[#allocation2 + $0x16c] sm:$0xff] }
 0x58a   : > { %3350 = vrot.lane.b32.xlu1 %v1276_v60, %s7482_s19  ;;  %3342 = vrot.lane.b32.xlu0 %v1272_v57, %s7482_s19  ;;  %v1283_v57 = vld [vmem:[#allocation2 + $0x1a4] sm:$0xff] }
 0x58c   : > { %v9466_v38 = vpop.permute.xlu1 %3202  ;;  %v9468_v51 = vpop.permute.xlu0 %3194 }
 0x58d   : > { %13675 = vst [vmem:[#allocation436_spill] sm:$0xff] %v9466_v38  ;;  %3358 = vrot.lane.b32.xlu2 %v1280_v25, %s7482_s19 }
 0x58e   : > { %13676 = vst [vmem:[#allocation437_spill] sm:$0xff] %v9468_v51  ;;  %v1282_v51 = vld [vmem:[#allocation2 + $0x19c] sm:$0xff] }
 0x58f   : > { %v9471_v10 = vpop.permute.xlu2 %3228 }
 0x590   : > { %13677 = vst [vmem:[#allocation438_spill] sm:$0xff] %v9471_v10  ;;  %v1285_v10 = vld [vmem:[#allocation2 + $0x48] sm:$0xff] }
 0x592   : > { %3356 = vrot.lane.b32.xlu1 %v1279_v16, %s7482_s19  ;;  %3348 = vrot.lane.b32.xlu0 %v1275_v47, %s7482_s19  ;;  %v1287_v47 = vld [vmem:[#allocation2 + $0x60] sm:$0xff] }
 0x594   : > { %v9475_v48 = vpop.permute.xlu1 %3208  ;;  %v9477_v60 = vpop.permute.xlu0 %3200 }
 0x595   : > { %13678 = vst [vmem:[#allocation439_spill] sm:$0xff] %v9475_v48  ;;  %3364 = vrot.lane.b32.xlu2 %v1283_v57, %s7482_s19  ;;  %v1281_v57 = vld [vmem:[#allocation2 + $0x18c] sm:$0xff] }
 0x596   : > { %13679 = vst [vmem:[#allocation440_spill] sm:$0xff] %v9477_v60  ;;  %v1286_v60 = vld [vmem:[#allocation2 + $0x50] sm:$0xff] }
 0x597   : > { %v9480_v38 = vpop.permute.xlu2 %3234 }
 0x598   : > { %13680 = vst [vmem:[#allocation441_spill] sm:$0xff] %v9480_v38 }
 0x59a   : > { %3362 = vrot.lane.b32.xlu1 %v1282_v51, %s7482_s19  ;;  %3354 = vrot.lane.b32.xlu0 %v1278_v9, %s7482_s19  ;;  %v1290_v9 = vld [vmem:[#allocation2 + $0x80] sm:$0xff] }
 0x59c   : > { %v9484_v25 = vpop.permute.xlu1 %3214  ;;  %v9486_v16 = vpop.permute.xlu0 %3206 }
 0x59d   : > { %13681 = vst [vmem:[#allocation442_spill] sm:$0xff] %v9484_v25  ;;  %3434 = vrot.lane.b32.xlu2 %v1287_v47, %s7483_s20 }
 0x59e   : > { %13682 = vst [vmem:[#allocation443_spill] sm:$0xff] %v9486_v16  ;;  %v1289_v16 = vld [vmem:[#allocation2 + $0x78] sm:$0xff] }
 0x59f   : > { %v9489_v48 = vpop.permute.xlu2 %3304 }
 0x5a0   : > { %13683 = vst [vmem:[#allocation444_spill] sm:$0xff] %v9489_v48  ;;  %v1288_v48 = vld [vmem:[#allocation2 + $0x68] sm:$0xff] }
 0x5a2   : > { %3432 = vrot.lane.b32.xlu1 %v1286_v60, %s7483_s20  ;;  %3360 = vrot.lane.b32.xlu0 %v1281_v57, %s7482_s19  ;;  %v1293_v57 = vld [vmem:[#allocation2 + $0xa8] sm:$0xff] }
 0x5a4   : > { %v9493_v38 = vpop.permute.xlu1 %3220  ;;  %v9495_v51 = vpop.permute.xlu0 %3212 }
 0x5a5   : > { %13684 = vst [vmem:[#allocation445_spill] sm:$0xff] %v9493_v38  ;;  %3440 = vrot.lane.b32.xlu2 %v1290_v9, %s7483_s20 }
 0x5a6   : > { %13685 = vst [vmem:[#allocation446_spill] sm:$0xff] %v9495_v51  ;;  %v1292_v51 = vld [vmem:[#allocation2 + $0x98] sm:$0xff] }
 0x5a7   : > { %v9498_v25 = vpop.permute.xlu2 %3310 }
 0x5a8   : > { %13686 = vst [vmem:[#allocation447_spill] sm:$0xff] %v9498_v25  ;;  %v1295_v25 = vld [vmem:[#allocation2 + $0xc0] sm:$0xff] }
 0x5aa   : > { %3438 = vrot.lane.b32.xlu1 %v1289_v16, %s7483_s20  ;;  %3430 = vrot.lane.b32.xlu0 %v1285_v10, %s7483_s20  ;;  %v1296_v10 = vld [vmem:[#allocation2 + $0xc8] sm:$0xff] }
 0x5ac   : > { %v9502_v47 = vpop.permute.xlu1 %3226  ;;  %v9504_v60 = vpop.permute.xlu0 %3218 }
 0x5ad   : > { %13687 = vst [vmem:[#allocation448_spill] sm:$0xff] %v9502_v47  ;;  %3446 = vrot.lane.b32.xlu2 %v1293_v57, %s7483_s20 }
 0x5ae   : > { %13688 = vst [vmem:[#allocation449_spill] sm:$0xff] %v9504_v60  ;;  %v1291_v60 = vld [vmem:[#allocation2 + $0x90] sm:$0xff] }
 0x5af   : > { %v9507_v38 = vpop.permute.xlu2 %3316 }
 0x5b0   : > { %13689 = vst [vmem:[#allocation450_spill] sm:$0xff] %v9507_v38  ;;  %v1294_v38 = vld [vmem:[#allocation2 + $0xb0] sm:$0xff] }
 0x5b2   : > { %3444 = vrot.lane.b32.xlu1 %v1292_v51, %s7483_s20  ;;  %3436 = vrot.lane.b32.xlu0 %v1288_v48, %s7483_s20  ;;  %v1299_v48 = vld [vmem:[#allocation2 + $0xf0] sm:$0xff] }
 0x5b4   : > { %v9511_v9 = vpop.permute.xlu1 %3232  ;;  %v9513_v16 = vpop.permute.xlu0 %3224 }
 0x5b5   : > { %13690 = vst [vmem:[#allocation451_spill] sm:$0xff] %v9511_v9  ;;  %3452 = vrot.lane.b32.xlu2 %v1296_v10, %s7483_s20 }
 0x5b6   : > { %13691 = vst [vmem:[#allocation452_spill] sm:$0xff] %v9513_v16  ;;  %v1298_v16 = vld [vmem:[#allocation2 + $0xe0] sm:$0xff] }
 0x5b7   : > { %v9516_v47 = vpop.permute.xlu2 %3322 }
 0x5b8   : > { %13692 = vst [vmem:[#allocation453_spill] sm:$0xff] %v9516_v47 }
 0x5ba   : > { %3450 = vrot.lane.b32.xlu1 %v1295_v25, %s7483_s20  ;;  %3442 = vrot.lane.b32.xlu0 %v1291_v60, %s7483_s20  ;;  %v1302_v60 = vld [vmem:[#allocation2 + $0x110] sm:$0xff] }
 0x5bc   : > { %v9520_v57 = vpop.permute.xlu1 %3302  ;;  %v9522_v51 = vpop.permute.xlu0 %3230 }
 0x5bd   : > { %13693 = vst [vmem:[#allocation454_spill] sm:$0xff] %v9520_v57  ;;  %3458 = vrot.lane.b32.xlu2 %v1299_v48, %s7483_s20  ;;  %v1297_v57 = vld [vmem:[#allocation2 + $0xd8] sm:$0xff] }
 0x5be   : > { %13694 = vst [vmem:[#allocation455_spill] sm:$0xff] %v9522_v51  ;;  %v1301_v51 = vld [vmem:[#allocation2 + $0x108] sm:$0xff] }
 0x5bf   : > { %v9525_v9 = vpop.permute.xlu2 %3328 }
 0x5c0   : > { %13695 = vst [vmem:[#allocation456_spill] sm:$0xff] %v9525_v9 }
 0x5c2   : > { %3456 = vrot.lane.b32.xlu1 %v1298_v16, %s7483_s20  ;;  %3448 = vrot.lane.b32.xlu0 %v1294_v38, %s7483_s20  ;;  %v1305_v38 = vld [vmem:[#allocation2 + $0x138] sm:$0xff] }
 0x5c4   : > { %v9529_v10 = vpop.permute.xlu1 %3308  ;;  %v9531_v25 = vpop.permute.xlu0 %3236 }
 0x5c5   : > { %13696 = vst [vmem:[#allocation457_spill] sm:$0xff] %v9529_v10  ;;  %3464 = vrot.lane.b32.xlu2 %v1302_v60, %s7483_s20  ;;  %v1300_v10 = vld [vmem:[#allocation2 + $0xf8] sm:$0xff] }
 0x5c6   : > { %13697 = vst [vmem:[#allocation458_spill] sm:$0xff] %v9531_v25  ;;  %v1304_v25 = vld [vmem:[#allocation2 + $0x128] sm:$0xff] }
 0x5c7   : > { %v9534_v47 = vpop.permute.xlu2 %3334 }
 0x5c8   : > { %13698 = vst [vmem:[#allocation459_spill] sm:$0xff] %v9534_v47 }
 0x5ca   : > { %3462 = vrot.lane.b32.xlu1 %v1301_v51, %s7483_s20  ;;  %3454 = vrot.lane.b32.xlu0 %v1297_v57, %s7483_s20  ;;  %v1308_v57 = vld [vmem:[#allocation2 + $0x158] sm:$0xff] }
 0x5cc   : > { %v9538_v48 = vpop.permute.xlu1 %3314  ;;  %v9540_v16 = vpop.permute.xlu0 %3306 }
 0x5cd   : > { %13699 = vst [vmem:[#allocation460_spill] sm:$0xff] %v9538_v48  ;;  %3470 = vrot.lane.b32.xlu2 %v1305_v38, %s7483_s20  ;;  %v1307_v48 = vld [vmem:[#allocation2 + $0x150] sm:$0xff] }
 0x5ce   : > { %13700 = vst [vmem:[#allocation461_spill] sm:$0xff] %v9540_v16  ;;  %v1303_v16 = vld [vmem:[#allocation2 + $0x120] sm:$0xff] }
 0x5cf   : > { %v9543_v9 = vpop.permute.xlu2 %3340 }
 0x5d0   : > { %13701 = vst [vmem:[#allocation462_spill] sm:$0xff] %v9543_v9 }
 0x5d2   : > { %3468 = vrot.lane.b32.xlu1 %v1304_v25, %s7483_s20  ;;  %3460 = vrot.lane.b32.xlu0 %v1300_v10, %s7483_s20  ;;  %v1311_v10 = vld [vmem:[#allocation2 + $0x180] sm:$0xff] }
 0x5d4   : > { %v9547_v60 = vpop.permute.xlu1 %3320  ;;  %v9549_v51 = vpop.permute.xlu0 %3312 }
 0x5d5   : > { %13702 = vst [vmem:[#allocation463_spill] sm:$0xff] %v9547_v60  ;;  %3476 = vrot.lane.b32.xlu2 %v1308_v57, %s7483_s20  ;;  %v1310_v60 = vld [vmem:[#allocation2 + $0x170] sm:$0xff] }
 0x5d6   : > { %13703 = vst [vmem:[#allocation464_spill] sm:$0xff] %v9549_v51  ;;  %v1306_v51 = vld [vmem:[#allocation2 + $0x140] sm:$0xff] }
 0x5d7   : > { %v9552_v47 = vpop.permute.xlu2 %3346 }
 0x5d8   : > { %13704 = vst [vmem:[#allocation465_spill] sm:$0xff] %v9552_v47  ;;  %v1309_v47 = vld [vmem:[#allocation2 + $0x168] sm:$0xff] }
 0x5da   : > { %3474 = vrot.lane.b32.xlu1 %v1307_v48, %s7483_s20  ;;  %3466 = vrot.lane.b32.xlu0 %v1303_v16, %s7483_s20  ;;  %v1314_v16 = vld [vmem:[#allocation2 + $0x1a0] sm:$0xff] }
 0x5dc   : > { %v9556_v38 = vpop.permute.xlu1 %3326  ;;  %v9558_v25 = vpop.permute.xlu0 %3318 }
 0x5dd   : > { %13705 = vst [vmem:[#allocation466_spill] sm:$0xff] %v9556_v38  ;;  %3482 = vrot.lane.b32.xlu2 %v1311_v10, %s7483_s20 }
 0x5de   : > { %13706 = vst [vmem:[#allocation467_spill] sm:$0xff] %v9558_v25  ;;  %v1313_v25 = vld [vmem:[#allocation2 + $0x198] sm:$0xff] }
 0x5df   : > { %v9561_v9 = vpop.permute.xlu2 %3352 }
 0x5e0   : > { %13707 = vst [vmem:[#allocation468_spill] sm:$0xff] %v9561_v9 }
 0x5e2   : > { %3480 = vrot.lane.b32.xlu1 %v1310_v60, %s7483_s20  ;;  %3472 = vrot.lane.b32.xlu0 %v1306_v51, %s7483_s20 }
 0x5e4   : > { %v9565_v57 = vpop.permute.xlu1 %3332  ;;  %v9567_v48 = vpop.permute.xlu0 %3324 }
 0x5e5   : > { %13708 = vst [vmem:[#allocation469_spill] sm:$0xff] %v9565_v57  ;;  %3488 = vrot.lane.b32.xlu2 %v1314_v16, %s7483_s20  ;;  %v1316_v57 = vld [vmem:[#allocation2 + $0x1b8] sm:$0xff] }
 0x5e6   : > { %13709 = vst [vmem:[#allocation470_spill] sm:$0xff] %v9567_v48  ;;  %v1312_v48 = vld [vmem:[#allocation2 + $0x188] sm:$0xff] }
 0x5e7   : > { %v9570_v38 = vpop.permute.xlu2 %3358 }
 0x5e8   : > { %13710 = vst [vmem:[#allocation471_spill] sm:$0xff] %v9570_v38 }
 0x5ea   : > { %3486 = vrot.lane.b32.xlu1 %v1313_v25, %s7483_s20  ;;  %3478 = vrot.lane.b32.xlu0 %v1309_v47, %s7483_s20 }
 0x5ec   : > { %v9574_v10 = vpop.permute.xlu1 %3338  ;;  %v9576_v60 = vpop.permute.xlu0 %3330 }
 0x5ed   : > { %13711 = vst [vmem:[#allocation472_spill] sm:$0xff] %v9574_v10  ;;  %4052 = vrot.lane.b32.xlu2 %v9086_v41, %s7468_s29  ;;  %v1315_v10 = vld [vmem:[#allocation2 + $0x1b0] sm:$0xff] }
 0x5ee   : > { %13712 = vst [vmem:[#allocation473_spill] sm:$0xff] %v9576_v60  ;;  %v1401_v60 = vld [vmem:[#allocation2 + $0x13b] sm:$0xff] }
 0x5ef   : > { %v9580_v51 = vpop.permute.xlu2 %3364 }
 0x5f0   : > { %13713 = vst [vmem:[#allocation474_spill] sm:$0xff] %v9580_v51  ;;  %v1392_v51 = vld [vmem:[#allocation2 + $0xcb] sm:$0xff] }
 0x5f2   : > { %3492 = vrot.lane.b32.xlu1 %v1316_v57, %s7483_s20  ;;  %3484 = vrot.lane.b32.xlu0 %v1312_v48, %s7483_s20 }
 0x5f4   : > { %v9584_v16 = vpop.permute.xlu1 %3344  ;;  %v9586_v25 = vpop.permute.xlu0 %3336 }
 0x5f5   : > { %13714 = vst [vmem:[#allocation475_spill] sm:$0xff] %v9584_v16  ;;  %4058 = vrot.lane.b32.xlu2 %v9098_v40, %s7468_s29 }
 0x5f6   : > { %13715 = vst [vmem:[#allocation476_spill] sm:$0xff] %v9586_v25  ;;  %v1396_v25 = vld [vmem:[#allocation2 + $0xfb] sm:$0xff] }
 0x5f7   : > { %v9590_v47 = vpop.permute.xlu2 %3434 }
 0x5f8   : > { %13716 = vst [vmem:[#allocation477_spill] sm:$0xff] %v9590_v47  ;;  %v1425_v47 = vld [vmem:[#allocation2 + $0xdc] sm:$0xff] }
 0x5fa   : > { %4056 = vrot.lane.b32.xlu1 %v9104_v11, %s7468_s29  ;;  %3490 = vrot.lane.b32.xlu0 %v1315_v10, %s7483_s20 }
 0x5fc   : > { %v9595_v41 = vpop.permute.xlu1 %3350  ;;  %v9597_v57 = vpop.permute.xlu0 %3342 }
 0x5fd   : > { %13717 = vst [vmem:[#allocation478_spill] sm:$0xff] %v9595_v41  ;;  %4064 = vrot.lane.b32.xlu2 %v9113_v23, %s7468_s29 }
 0x5fe   : > { %13718 = vst [vmem:[#allocation479_spill] sm:$0xff] %v9597_v57  ;;  %v1386_v57 = vld [vmem:[#allocation2 + $0x83] sm:$0xff] }
 0x5ff   : > { %v9601_v48 = vpop.permute.xlu2 %3440 }
 0x600   : > { %13719 = vst [vmem:[#allocation480_spill] sm:$0xff] %v9601_v48  ;;  %v1426_v48 = vld [vmem:[#allocation2 + $0xe4] sm:$0xff] }
 0x602   : > { %4062 = vrot.lane.b32.xlu1 %v9119_v31, %s7468_s29  ;;  %4054 = vrot.lane.b32.xlu0 %v9121_v54, %s7468_s29 }
 0x604   : > { %v9607_v40 = vpop.permute.xlu1 %3356  ;;  %v9609_v11 = vpop.permute.xlu0 %3348 }
 0x605   : > { %13720 = vst [vmem:[#allocation481_spill] sm:$0xff] %v9607_v40  ;;  %4070 = vrot.lane.b32.xlu2 %v9131_v50, %s7468_s29 }
 0x606   : > { %13721 = vst [vmem:[#allocation482_spill] sm:$0xff] %v9609_v11 }
 0x607   : > { %v9613_v10 = vpop.permute.xlu2 %3446 }
 0x608   : > { %13722 = vst [vmem:[#allocation483_spill] sm:$0xff] %v9613_v10  ;;  %v1423_v10 = vld [vmem:[#allocation2 + $0xc4] sm:$0xff] }
 0x60a   : > { %4068 = vrot.lane.b32.xlu1 %v9137_v5, %s7468_s29  ;;  %4060 = vrot.lane.b32.xlu0 %v9139_v63, %s7468_s29 }
 0x60c   : > { %v9619_v23 = vpop.permute.xlu1 %3362  ;;  %v9621_v31 = vpop.permute.xlu0 %3354 }
 0x60d   : > { %13723 = vst [vmem:[#allocation484_spill] sm:$0xff] %v9619_v23  ;;  %4076 = vrot.lane.b32.xlu2 %v9149_v26, %s7468_s29  ;;  %v1395_v23 = vld [vmem:[#allocation2 + $0xf3] sm:$0xff] }
 0x60e   : > { %13724 = vst [vmem:[#allocation485_spill] sm:$0xff] %v9621_v31 }
 0x60f   : > { %v9625_v54 = vpop.permute.xlu2 %3452 }
 0x610   : > { %13725 = vst [vmem:[#allocation486_spill] sm:$0xff] %v9625_v54  ;;  %v1410_v54 = vld [vmem:[#allocation2 + $0x1a3] sm:$0xff] }
 0x612   : > { %4074 = vrot.lane.b32.xlu1 %v9155_v34, %s7468_s29  ;;  %4066 = vrot.lane.b32.xlu0 %v9157_v36, %s7468_s29 }
 0x614   : > { %v9631_v50 = vpop.permute.xlu1 %3432  ;;  %v9633_v5 = vpop.permute.xlu0 %3360 }
 0x615   : > { %13726 = vst [vmem:[#allocation487_spill] sm:$0xff] %v9631_v50  ;;  %4082 = vrot.lane.b32.xlu2 %v9167_v20, %s7468_s29 }
 0x616   : > { %13727 = vst [vmem:[#allocation488_spill] sm:$0xff] %v9633_v5  ;;  %v1398_v5 = vld [vmem:[#allocation2 + $0x113] sm:$0xff] }
 0x617   : > { %v9637_v63 = vpop.permute.xlu2 %3458 }
 0x618   : > { %13728 = vst [vmem:[#allocation489_spill] sm:$0xff] %v9637_v63  ;;  %v1405_v63 = vld [vmem:[#allocation2 + $0x16b] sm:$0xff] }
 0x61a   : > { %4080 = vrot.lane.b32.xlu1 %v9173_v56, %s7468_s29  ;;  %4072 = vrot.lane.b32.xlu0 %v9175_v27, %s7468_s29 }
 0x61c   : > { %v9643_v26 = vpop.permute.xlu1 %3438  ;;  %v9645_v34 = vpop.permute.xlu0 %3430 }
 0x61d   : > { %13729 = vst [vmem:[#allocation490_spill] sm:$0xff] %v9643_v26  ;;  %4088 = vrot.lane.b32.xlu2 %v9185_v8, %s7468_s29 }
 0x61e   : > { %13730 = vst [vmem:[#allocation491_spill] sm:$0xff] %v9645_v34  ;;  %v1432_v34 = vld [vmem:[#allocation2 + $0x12c] sm:$0xff] }
 0x61f   : > { %v9649_v36 = vpop.permute.xlu2 %3464 }
 0x620   : > { %13731 = vst [vmem:[#allocation492_spill] sm:$0xff] %v9649_v36  ;;  %v1389_v36 = vld [vmem:[#allocation2 + $0xab] sm:$0xff] }
 0x622   : > { %4086 = vrot.lane.b32.xlu1 %v9191_v28, %s7468_s29  ;;  %4078 = vrot.lane.b32.xlu0 %v9193_v17, %s7468_s29 }
 0x624   : > { %v9655_v20 = vpop.permute.xlu1 %3444  ;;  %v9657_v56 = vpop.permute.xlu0 %3436 }
 0x625   : > { %13732 = vst [vmem:[#allocation493_spill] sm:$0xff] %v9655_v20  ;;  %4094 = vrot.lane.b32.xlu2 %v9203_v39, %s7468_s29  ;;  %v1419_v20 = vld [vmem:[#allocation2 + $0x94] sm:$0xff] }
 0x626   : > { %13733 = vst [vmem:[#allocation494_spill] sm:$0xff] %v9657_v56  ;;  %v1429_v56 = vld [vmem:[#allocation2 + $0x10c] sm:$0xff] }
 0x627   : > { %v9661_v27 = vpop.permute.xlu2 %3470 }
 0x628   : > { %13734 = vst [vmem:[#allocation495_spill] sm:$0xff] %v9661_v27  ;;  %v1380_v27 = vld [vmem:[#allocation2 + $0x1ba] sm:$0xff] }
 0x62a   : > { %4092 = vrot.lane.b32.xlu1 %v9209_v19, %s7468_s29  ;;  %4084 = vrot.lane.b32.xlu0 %v9211_v7, %s7468_s29 }
 0x62c   : > { %v9667_v8 = vpop.permute.xlu1 %3450  ;;  %v9669_v28 = vpop.permute.xlu0 %3442 }
 0x62d   : > { %13735 = vst [vmem:[#allocation496_spill] sm:$0xff] %v9667_v8  ;;  %4100 = vrot.lane.b32.xlu2 %v9221_v14, %s7468_s29  ;;  %v1379_v14 = vld [vmem:[#allocation2 + $0x1b2] sm:$0xff] }
 0x62e   : > { %13736 = vst [vmem:[#allocation497_spill] sm:$0xff] %v9669_v28  ;;  %v1413_v8 = vld [vmem:[#allocation2 + $0x4c] sm:$0xff] }
 0x62f   : > { %v9673_v17 = vpop.permute.xlu2 %3476 }
 0x630   : > { %13737 = vst [vmem:[#allocation498_spill] sm:$0xff] %v9673_v17  ;;  %v1416_v17 = vld [vmem:[#allocation2 + $0x6c] sm:$0xff] }
 0x632   : > { %4098 = vrot.lane.b32.xlu1 %v9227_v1, %s7468_s29  ;;  %4090 = vrot.lane.b32.xlu0 %v9229_v6, %s7468_s29 }
 0x634   : > { %v9679_v39 = vpop.permute.xlu1 %3456  ;;  %v9681_v19 = vpop.permute.xlu0 %3448 }
 0x635   : > { %13738 = vst [vmem:[#allocation499_spill] sm:$0xff] %v9679_v39  ;;  %4106 = vrot.lane.b32.xlu2 %v9239_v46, %s7468_s29  ;;  %v1404_v39 = vld [vmem:[#allocation2 + $0x15b] sm:$0xff] }
 0x636   : > { %13739 = vst [vmem:[#allocation500_spill] sm:$0xff] %v9681_v19  ;;  %v1420_v19 = vld [vmem:[#allocation2 + $0x9c] sm:$0xff] }
 0x637   : > { %v9685_v7 = vpop.permute.xlu2 %3482 }
 0x638   : > { %13740 = vst [vmem:[#allocation501_spill] sm:$0xff] %v9685_v7  ;;  %v1407_v7 = vld [vmem:[#allocation2 + $0x183] sm:$0xff] }
 0x63a   : > { %4104 = vrot.lane.b32.xlu1 %v9245_v55, %s7468_s29  ;;  %4096 = vrot.lane.b32.xlu0 %v9247_v61, %s7468_s29 }
 0x63c   : > { %v9691_v1 = vpop.permute.xlu1 %3462  ;;  %v9693_v16 = vpop.permute.xlu0 %3454 }
 0x63d   : > { %13741 = vst [vmem:[#allocation502_spill] sm:$0xff] %v9691_v1  ;;  %4112 = vrot.lane.b32.xlu2 %v1379_v14, %s7468_s29 }
 0x63e   : > { %13742 = vst [vmem:[#allocation503_spill] sm:$0xff] %v9693_v16  ;;  %v1411_v16 = vld [vmem:[#allocation2 + $0x1b3] sm:$0xff] }
 0x63f   : > { %v9696_v6 = vpop.permute.xlu2 %3488 }
 0x640   : > { %13743 = vst [vmem:[#allocation504_spill] sm:$0xff] %v9696_v6  ;;  %v1402_v6 = vld [vmem:[#allocation2 + $0x143] sm:$0xff] }
 0x642   : > { %4110 = vrot.lane.b32.xlu1 %v9260_v3, %s7468_s29  ;;  %4102 = vrot.lane.b32.xlu0 %v9262_v29, %s7468_s29 }
 0x644   : > { %v9702_v46 = vpop.permute.xlu1 %3468  ;;  %v9704_v55 = vpop.permute.xlu0 %3460 }
 0x645   : > { %13744 = vst [vmem:[#allocation505_spill] sm:$0xff] %v9702_v46  ;;  %4182 = vrot.lane.b32.xlu2 %v9272_v33, %s7469_s30 }
 0x646   : > { %13745 = vst [vmem:[#allocation506_spill] sm:$0xff] %v9704_v55 }
 0x647   : > { %v9708_v61 = vpop.permute.xlu2 %4052 }
 0x64a   : > { %4180 = vrot.lane.b32.xlu1 %v9278_v4, %s7469_s30  ;;  %4108 = vrot.lane.b32.xlu0 %v9280_v0, %s7468_s29 }
 0x64c   : > { %v9714_v14 = vpop.permute.xlu1 %3474  ;;  %v9716_v3 = vpop.permute.xlu0 %3466 }
 0x64d   : > { %13746 = vst [vmem:[#allocation507_spill] sm:$0xff] %v9714_v14  ;;  %4188 = vrot.lane.b32.xlu2 %v9290_v2, %s7469_s30  ;;  %v1422_v14 = vld [vmem:[#allocation2 + $0xb4] sm:$0xff] }
 0x64e   : > { %13747 = vst [vmem:[#allocation508_spill] sm:$0xff] %v9716_v3  ;;  %v1393_v3 = vld [vmem:[#allocation2 + $0xdb] sm:$0xff] }
 0x64f   : > { %v9720_v29 = vpop.permute.xlu2 %4058 }
 0x652   : > { %4186 = vrot.lane.b32.xlu1 %v9296_v53, %s7469_s30  ;;  %4114 = vrot.lane.b32.xlu0 %v1380_v27, %s7468_s29 }
 0x654   : > { %v9725_v33 = vpop.permute.xlu1 %3480  ;;  %v9727_v4 = vpop.permute.xlu0 %3472 }
 0x655   : > { %13748 = vst [vmem:[#allocation509_spill] sm:$0xff] %v9725_v33  ;;  %4194 = vrot.lane.b32.xlu2 %v9305_v45, %s7469_s30  ;;  %v1414_v33 = vld [vmem:[#allocation2 + $0x54] sm:$0xff] }
 0x656   : > { %13749 = vst [vmem:[#allocation510_spill] sm:$0xff] %v9727_v4  ;;  %v1390_v4 = vld [vmem:[#allocation2 + $0xb3] sm:$0xff] }
 0x657   : > { %v9731_v0 = vpop.permute.xlu2 %4064 }
 0x65a   : > { %4192 = vrot.lane.b32.xlu1 %v9311_v49, %s7469_s30  ;;  %4184 = vrot.lane.b32.xlu0 %v9313_v22, %s7469_s30  ;;  %v1394_v22 = vld [vmem:[#allocation2 + $0xe3] sm:$0xff] }
 0x65c   : > { %v9737_v2 = vpop.permute.xlu1 %3486  ;;  %v9739_v53 = vpop.permute.xlu0 %3478 }
 0x65d   : > { %13750 = vst [vmem:[#allocation511_spill] sm:$0xff] %v9737_v2  ;;  %4200 = vrot.lane.b32.xlu2 %v9323_v59, %s7469_s30 }
 0x65e   : > { %13751 = vst [vmem:[#allocation512_spill] sm:$0xff] %v9739_v53  ;;  %v1417_v53 = vld [vmem:[#allocation2 + $0x7c] sm:$0xff] }
 0x65f   : > { %v9743_v27 = vpop.permute.xlu2 %4070 }
 0x660   : > { %13752 = vst [vmem:[#allocation513_spill] sm:$0xff] %v9743_v27  ;;  %v1564_v27 = vld [vmem:[#allocation2 + $0x16b] sm:$0xff] }
 0x662   : > { %4198 = vrot.lane.b32.xlu1 %v1390_v4, %s7469_s30  ;;  %4190 = vrot.lane.b32.xlu0 %v1386_v57, %s7469_s30  ;;  %v1397_v57 = vld [vmem:[#allocation2 + $0x10b] sm:$0xff] }
 0x664   : > { %v9747_v45 = vpop.permute.xlu1 %3492  ;;  %v9749_v49 = vpop.permute.xlu0 %3484 }
 0x665   : > { %13753 = vst [vmem:[#allocation514_spill] sm:$0xff] %v9747_v45  ;;  %4206 = vrot.lane.b32.xlu2 %v1394_v22, %s7469_s30 }
 0x666   : > { %13754 = vst [vmem:[#allocation515_spill] sm:$0xff] %v9749_v49  ;;  %v1408_v49 = vld [vmem:[#allocation2 + $0x18b] sm:$0xff] }
 0x667   : > { %v9752_v46 = vpop.permute.xlu2 %4076 }
 0x668   : > { %13755 = vst [vmem:[#allocation516_spill] sm:$0xff] %v9752_v46  ;;  %v1525_v46 = vld [vmem:[#allocation2 + $0x112] sm:$0xff] }
 0x66a   : > { %4204 = vrot.lane.b32.xlu1 %v1393_v3, %s7469_s30  ;;  %4196 = vrot.lane.b32.xlu0 %v1389_v36, %s7469_s30  ;;  %v1400_v36 = vld [vmem:[#allocation2 + $0x12b] sm:$0xff] }
 0x66c   : > { %v9756_v59 = vpop.permute.xlu1 %4056  ;;  %v9758_v4 = vpop.permute.xlu0 %3490 }
 0x66d   : > { %13756 = vst [vmem:[#allocation517_spill] sm:$0xff] %v9758_v4  ;;  %4212 = vrot.lane.b32.xlu2 %v1397_v57, %s7469_s30  ;;  %v1399_v4 = vld [vmem:[#allocation2 + $0x123] sm:$0xff] }
 0x66f   : > { %v9761_v45 = vpop.permute.xlu2 %4082 }
 0x670   : > { %13757 = vst [vmem:[#allocation518_spill] sm:$0xff] %v9761_v45  ;;  %v1462_v45 = vld [vmem:[#allocation2 + $0x120] sm:$0xff] }
 0x672   : > { %4210 = vrot.lane.b32.xlu1 %v1396_v25, %s7469_s30  ;;  %4202 = vrot.lane.b32.xlu0 %v1392_v51, %s7469_s30  ;;  %v1403_v51 = vld [vmem:[#allocation2 + $0x153] sm:$0xff] }
 0x674   : > { %v9765_v22 = vpop.permute.xlu1 %4062  ;;  %v9767_v3 = vpop.permute.xlu0 %4054 }
 0x675   : > { %13758 = vst [vmem:[#allocation519_spill] sm:$0xff] %v9765_v22  ;;  %4218 = vrot.lane.b32.xlu2 %v1400_v36, %s7469_s30  ;;  %v1561_v22 = vld [vmem:[#allocation2 + $0x143] sm:$0xff] }
 0x677   : > { %v9770_v1 = vpop.permute.xlu2 %4088 }
 0x678   : > { %13759 = vst [vmem:[#allocation520_spill] sm:$0xff] %v9770_v1  ;;  %v10041_v1 = vld [vmem:[#allocation2 + $0x79] sm:$0xff] }
 0x67a   : > { %4216 = vrot.lane.b32.xlu1 %v1399_v4, %s7469_s30  ;;  %4208 = vrot.lane.b32.xlu0 %v1395_v23, %s7469_s30  ;;  %v1406_v23 = vld [vmem:[#allocation2 + $0x173] sm:$0xff] }
 0x67c   : > { %v9774_v57 = vpop.permute.xlu1 %4068  ;;  %v9776_v25 = vpop.permute.xlu0 %4060 }
 0x67d   : > { %13760 = vst [vmem:[#allocation521_spill] sm:$0xff] %v9774_v57  ;;  %4224 = vrot.lane.b32.xlu2 %v1403_v51, %s7469_s30 }
 0x67f   : > { %v9779_v55 = vpop.permute.xlu2 %4094 }
 0x680   : > { %13761 = vst [vmem:[#allocation522_spill] sm:$0xff] %v9779_v55  ;;  %v1448_v55 = vld [vmem:[#allocation2 + $0x78] sm:$0xff] }
 0x682   : > { %4222 = vrot.lane.b32.xlu1 %v1402_v6, %s7469_s30  ;;  %4214 = vrot.lane.b32.xlu0 %v1398_v5, %s7469_s30  ;;  %v1409_v5 = vld [vmem:[#allocation2 + $0x19b] sm:$0xff] }
 0x684   : > { %v9783_v36 = vpop.permute.xlu1 %4074  ;;  %v9785_v4 = vpop.permute.xlu0 %4066 }
 0x685   : > { %13762 = vst [vmem:[#allocation523_spill] sm:$0xff] %v9783_v36  ;;  %4230 = vrot.lane.b32.xlu2 %v1406_v23, %s7469_s30  ;;  %v1412_v23 = vld [vmem:[#allocation2 + $0x1bb] sm:$0xff]  ;;  %v10099_v36 = vld [vmem:[#allocation2 + $0x109] sm:$0xff] }
 0x686   : > { %13841 = vst [vmem:[#allocation602_spill] sm:$0xff] %v10099_v36 }
 0x687   : > { %v9788_v2 = vpop.permute.xlu2 %4100 }
 0x688   : > { %13763 = vst [vmem:[#allocation524_spill] sm:$0xff] %v9788_v2  ;;  %v10039_v2 = vld [vmem:[#allocation2 + $0xa9] sm:$0xff] }
 0x689   : > { %13825 = vst [vmem:[#allocation586_spill] sm:$0xff] %v10039_v2 }
 0x68a   : > { %4228 = vrot.lane.b32.xlu1 %v1405_v63, %s7469_s30  ;;  %4220 = vrot.lane.b32.xlu0 %v1401_v60, %s7469_s30 }
 0x68c   : > { %v9792_v51 = vpop.permute.xlu1 %4080  ;;  %v9794_v6 = vpop.permute.xlu0 %4072 }
 0x68d   : > { %13764 = vst [vmem:[#allocation525_spill] sm:$0xff] %v9792_v51  ;;  %4236 = vrot.lane.b32.xlu2 %v1409_v5, %s7469_s30 }
 0x68f   : > { %v9797_v38 = vpop.permute.xlu2 %4106 }
 0x690   : > { %13765 = vst [vmem:[#allocation526_spill] sm:$0xff] %v9797_v38  ;;  %v10024_v38 = vld [vmem:[#allocation2 + $0x81] sm:$0xff] }
 0x691   : > { %13820 = vst [vmem:[#allocation581_spill] sm:$0xff] %v10024_v38 }
 0x692   : > { %4234 = vrot.lane.b32.xlu1 %v1408_v49, %s7469_s30  ;;  %4226 = vrot.lane.b32.xlu0 %v1404_v39, %s7469_s30  ;;  %v1415_v39 = vld [vmem:[#allocation2 + $0x64] sm:$0xff] }
 0x694   : > { %v9801_v40 = vpop.permute.xlu1 %4086  ;;  %v9803_v63 = vpop.permute.xlu0 %4078 }
 0x695   : > { %13766 = vst [vmem:[#allocation527_spill] sm:$0xff] %v9801_v40  ;;  %4242 = vrot.lane.b32.xlu2 %v1412_v23, %s7469_s30  ;;  %v1460_v40 = vld [vmem:[#allocation2 + $0x108] sm:$0xff] }
 0x696   : > { %13767 = vst [vmem:[#allocation528_spill] sm:$0xff] %v9803_v63  ;;  %v1335_v63 = vld [vmem:[#allocation2 + $0x121] sm:$0xff] }
 0x697   : > { %v9806_v60 = vpop.permute.xlu2 %4112 }
 0x698   : > { %13768 = vst [vmem:[#allocation529_spill] sm:$0xff] %v9806_v60  ;;  %v1438_v60 = vld [vmem:[#allocation2 + $0x174] sm:$0xff] }
 0x69a   : > { %4240 = vrot.lane.b32.xlu1 %v1411_v16, %s7469_s30  ;;  %4232 = vrot.lane.b32.xlu0 %v1407_v7, %s7469_s30  ;;  %v1418_v7 = vld [vmem:[#allocation2 + $0x84] sm:$0xff] }
 0x69c   : > { %v9810_v5 = vpop.permute.xlu1 %4092  ;;  %v9812_v49 = vpop.permute.xlu0 %4084 }
 0x69d   : > { %13769 = vst [vmem:[#allocation530_spill] sm:$0xff] %v9810_v5  ;;  %4312 = vrot.lane.b32.xlu2 %v1415_v39, %s7470_s7 }
 0x69e   : > { %13770 = vst [vmem:[#allocation531_spill] sm:$0xff] %v9812_v49  ;;  %v10059_v49 = vld [vmem:[#allocation2 + $0x99] sm:$0xff] }
 0x69f   : > { %v9815_v31 = vpop.permute.xlu2 %4182 }
 0x6a2   : > { %4310 = vrot.lane.b32.xlu1 %v1414_v33, %s7470_s7  ;;  %4238 = vrot.lane.b32.xlu0 %v1410_v54, %s7469_s30  ;;  %v1421_v54 = vld [vmem:[#allocation2 + $0xac] sm:$0xff] }
 0x6a4   : > { %v9819_v23 = vpop.permute.xlu1 %4098  ;;  %v9821_v16 = vpop.permute.xlu0 %4090 }
 0x6a5   : > { %13771 = vst [vmem:[#allocation532_spill] sm:$0xff] %v9819_v23  ;;  %4318 = vrot.lane.b32.xlu2 %v1418_v7, %s7470_s7  ;;  %v10009_v23 = vld [vmem:[#allocation2 + $0x61] sm:$0xff] }
 0x6a6   : > { %13772 = vst [vmem:[#allocation533_spill] sm:$0xff] %v9821_v16  ;;  %v1454_v16 = vld [vmem:[#allocation2 + $0xc0] sm:$0xff] }
 0x6a7   : > { %v9824_v9 = vpop.permute.xlu2 %4188 }
 0x6aa   : > { %4316 = vrot.lane.b32.xlu1 %v1417_v53, %s7470_s7  ;;  %4308 = vrot.lane.b32.xlu0 %v1413_v8, %s7470_s7  ;;  %v1424_v8 = vld [vmem:[#allocation2 + $0xcc] sm:$0xff] }
 0x6ac   : > { %v9828_v39 = vpop.permute.xlu1 %4104  ;;  %v9830_v33 = vpop.permute.xlu0 %4096 }
 0x6ad   : > { %13773 = vst [vmem:[#allocation534_spill] sm:$0xff] %v9828_v39  ;;  %4324 = vrot.lane.b32.xlu2 %v1421_v54, %s7470_s7  ;;  %v1465_v39 = vld [vmem:[#allocation2 + $0x140] sm:$0xff] }
 0x6ae   : > { %13774 = vst [vmem:[#allocation535_spill] sm:$0xff] %v9830_v33  ;;  %v1516_v33 = vld [vmem:[#allocation2 + $0xaa] sm:$0xff] }
 0x6af   : > { %v9833_v41 = vpop.permute.xlu2 %4194 }
 0x6b2   : > { %4322 = vrot.lane.b32.xlu1 %v1420_v19, %s7470_s7  ;;  %4314 = vrot.lane.b32.xlu0 %v1416_v17, %s7470_s7  ;;  %v1427_v17 = vld [vmem:[#allocation2 + $0xf4] sm:$0xff] }
 0x6b4   : > { %v9837_v7 = vpop.permute.xlu1 %4110  ;;  %v9839_v53 = vpop.permute.xlu0 %4102 }
 0x6b5   : > { %13775 = vst [vmem:[#allocation536_spill] sm:$0xff] %v9837_v7  ;;  %4330 = vrot.lane.b32.xlu2 %v1424_v8, %s7470_s7  ;;  %v1450_v7 = vld [vmem:[#allocation2 + $0x90] sm:$0xff] }
 0x6b6   : > { %13776 = vst [vmem:[#allocation537_spill] sm:$0xff] %v9839_v53  ;;  %v1471_v53 = vld [vmem:[#allocation2 + $0x188] sm:$0xff] }
 0x6b7   : > { %v9842_v11 = vpop.permute.xlu2 %4200 }
 0x6ba   : > { %4328 = vrot.lane.b32.xlu1 %v1423_v10, %s7470_s7  ;;  %4320 = vrot.lane.b32.xlu0 %v1419_v20, %s7470_s7  ;;  %v1430_v20 = vld [vmem:[#allocation2 + $0x114] sm:$0xff] }
 0x6bc   : > { %v9846_v54 = vpop.permute.xlu1 %4180  ;;  %v9848_v19 = vpop.permute.xlu0 %4108 }
 0x6bd   : > { %13777 = vst [vmem:[#allocation538_spill] sm:$0xff] %v9848_v19  ;;  %4336 = vrot.lane.b32.xlu2 %v1427_v17, %s7470_s7  ;;  %v1469_v19 = vld [vmem:[#allocation2 + $0x170] sm:$0xff] }
 0x6bf   : > { %v9851_v28 = vpop.permute.xlu2 %4206 }
 0x6c0   : > { %13778 = vst [vmem:[#allocation539_spill] sm:$0xff] %v9851_v28  ;;  %v10072_v28 = vld [vmem:[#allocation2 + $0xf1] sm:$0xff] }
 0x6c1   : > { %13834 = vst [vmem:[#allocation595_spill] sm:$0xff] %v10072_v28 }
 0x6c2   : > { %4334 = vrot.lane.b32.xlu1 %v1426_v48, %s7470_s7  ;;  %4326 = vrot.lane.b32.xlu0 %v1422_v14, %s7470_s7  ;;  %v1433_v14 = vld [vmem:[#allocation2 + $0x13c] sm:$0xff] }
 0x6c4   : > { %v9855_v8 = vpop.permute.xlu1 %4186  ;;  %v9857_v10 = vpop.permute.xlu0 %4114 }
 0x6c5   : > { %13779 = vst [vmem:[#allocation540_spill] sm:$0xff] %v9857_v10  ;;  %4342 = vrot.lane.b32.xlu2 %v1430_v20, %s7470_s7  ;;  %v1456_v10 = vld [vmem:[#allocation2 + $0xd8] sm:$0xff] }
 0x6c7   : > { %v9860_v26 = vpop.permute.xlu2 %4212 }
 0x6c8   : > { %13780 = vst [vmem:[#allocation541_spill] sm:$0xff] %v9860_v26  ;;  %v10057_v26 = vld [vmem:[#allocation2 + $0xc9] sm:$0xff] }
 0x6c9   : > { %13830 = vst [vmem:[#allocation591_spill] sm:$0xff] %v10057_v26 }
 0x6ca   : > { %4340 = vrot.lane.b32.xlu1 %v1429_v56, %s7470_s7  ;;  %4332 = vrot.lane.b32.xlu0 %v1425_v47, %s7470_s7  ;;  %v1436_v47 = vld [vmem:[#allocation2 + $0x15c] sm:$0xff] }
 0x6cc   : > { %v9864_v17 = vpop.permute.xlu1 %4192  ;;  %v9866_v48 = vpop.permute.xlu0 %4184 }
 0x6cd   : > { %4348 = vrot.lane.b32.xlu2 %v1433_v14, %s7470_s7 }
 0x6cf   : > { %v9869_v50 = vpop.permute.xlu2 %4218 }
 0x6d0   : > { %13781 = vst [vmem:[#allocation542_spill] sm:$0xff] %v9869_v50 }
 0x6d2   : > { %4346 = vrot.lane.b32.xlu1 %v1432_v34, %s7470_s7  ;;  %4338 = vrot.lane.b32.xlu0 %v1428_v18, %s7470_s7  ;;  %v1439_v18 = vld [vmem:[#allocation2 + $0x184] sm:$0xff] }
 0x6d4   : > { %v9873_v20 = vpop.permute.xlu1 %4198  ;;  %v9875_v56 = vpop.permute.xlu0 %4190 }
 0x6d5   : > { %13782 = vst [vmem:[#allocation543_spill] sm:$0xff] %v9873_v20  ;;  %4354 = vrot.lane.b32.xlu2 %v1436_v47, %s7470_s7  ;;  %v1558_v20 = vld [vmem:[#allocation2 + $0x123] sm:$0xff] }
 0x6d6   : > { %13783 = vst [vmem:[#allocation544_spill] sm:$0xff] %v9875_v56  ;;  %v1562_v56 = vld [vmem:[#allocation2 + $0x153] sm:$0xff] }
 0x6d7   : > { %v9878_v52 = vpop.permute.xlu2 %4224 }
 0x6d8   : > { %13784 = vst [vmem:[#allocation545_spill] sm:$0xff] %v9878_v52  ;;  %v1345_v52 = vld [vmem:[#allocation2 + $0x199] sm:$0xff] }
 0x6da   : > { %4352 = vrot.lane.b32.xlu1 %v1435_v13, %s7470_s7  ;;  %4344 = vrot.lane.b32.xlu0 %v1431_v43, %s7470_s7  ;;  %v1442_v43 = vld [vmem:[#allocation2 + $0x1a4] sm:$0xff] }
 0x6dc   : > { %v9882_v14 = vpop.permute.xlu1 %4204  ;;  %v9884_v34 = vpop.permute.xlu0 %4196 }
 0x6dd   : > { %13785 = vst [vmem:[#allocation546_spill] sm:$0xff] %v9882_v14  ;;  %4360 = vrot.lane.b32.xlu2 %v1439_v18, %s7470_s7  ;;  %v1508_v14 = vld [vmem:[#allocation2 + $0x1c9] sm:$0xff] }
 0x6de   : > { %13786 = vst [vmem:[#allocation547_spill] sm:$0xff] %v9884_v34 }
 0x6df   : > { %v9887_v15 = vpop.permute.xlu2 %4230 }
 0x6e0   : > { %13787 = vst [vmem:[#allocation548_spill] sm:$0xff] %v9887_v15  ;;  %v1475_v15 = vld [vmem:[#allocation2 + $0x1b8] sm:$0xff] }
 0x6e2   : > { %4358 = vrot.lane.b32.xlu1 %v1438_v60, %s7470_s7  ;;  %4350 = vrot.lane.b32.xlu0 %v1434_v32, %s7470_s7  ;;  %v1446_v32 = vld [vmem:[#allocation2 + $0x60] sm:$0xff] }
 0x6e4   : > { %v9891_v47 = vpop.permute.xlu1 %4210  ;;  %v9893_v13 = vpop.permute.xlu0 %4202 }
 0x6e5   : > { %13788 = vst [vmem:[#allocation549_spill] sm:$0xff] %v9891_v47  ;;  %4366 = vrot.lane.b32.xlu2 %v1442_v43, %s7470_s7  ;;  %v1459_v47 = vld [vmem:[#allocation2 + $0xf8] sm:$0xff] }
 0x6e6   : > { %13789 = vst [vmem:[#allocation550_spill] sm:$0xff] %v9893_v13 }
 0x6e7   : > { %v9896_v62 = vpop.permute.xlu2 %4236 }
 0x6e8   : > { %13790 = vst [vmem:[#allocation551_spill] sm:$0xff] %v9896_v62  ;;  %v1466_v62 = vld [vmem:[#allocation2 + $0x150] sm:$0xff] }
 0x6ea   : > { %4364 = vrot.lane.b32.xlu1 %v1441_v21, %s7470_s7  ;;  %4356 = vrot.lane.b32.xlu0 %v1437_v24, %s7470_s7  ;;  %v1449_v24 = vld [vmem:[#allocation2 + $0x80] sm:$0xff] }
 0x6ec   : > { %v9900_v18 = vpop.permute.xlu1 %4216  ;;  %v9902_v60 = vpop.permute.xlu0 %4208 }
 0x6ed   : > { %13791 = vst [vmem:[#allocation552_spill] sm:$0xff] %v9900_v18  ;;  %4436 = vrot.lane.b32.xlu2 %v1446_v32, %s7471_s8 }
 0x6ee   : > { %13792 = vst [vmem:[#allocation553_spill] sm:$0xff] %v9902_v60  ;;  %v10074_v60 = vld [vmem:[#allocation2 + $0xc1] sm:$0xff] }
 0x6ef   : > { %v9905_v35 = vpop.permute.xlu2 %4242 }
 0x6f0   : > { %13793 = vst [vmem:[#allocation554_spill] sm:$0xff] %v9905_v35  ;;  %v1453_v35 = vld [vmem:[#allocation2 + $0xb0] sm:$0xff] }
 0x6f2   : > { %4370 = vrot.lane.b32.xlu1 %v1444_v30, %s7470_s7  ;;  %4362 = vrot.lane.b32.xlu0 %v1440_v44, %s7470_s7  ;;  %v1452_v44 = vld [vmem:[#allocation2 + $0xa8] sm:$0xff] }
 0x6f4   : > { %v9909_v43 = vpop.permute.xlu1 %4222  ;;  %v9911_v21 = vpop.permute.xlu0 %4214 }
 0x6f5   : > { %13794 = vst [vmem:[#allocation555_spill] sm:$0xff] %v9909_v43  ;;  %4442 = vrot.lane.b32.xlu2 %v1449_v24, %s7471_s8 }
 0x6f6   : > { %13795 = vst [vmem:[#allocation556_spill] sm:$0xff] %v9911_v21 }
 0x6f7   : > { %v9914_v37 = vpop.permute.xlu2 %4312 }
 0x6fa   : > { %4440 = vrot.lane.b32.xlu1 %v1448_v55, %s7471_s8  ;;  %4368 = vrot.lane.b32.xlu0 %v1443_v58, %s7470_s7  ;;  %v1455_v58 = vld [vmem:[#allocation2 + $0xc8] sm:$0xff] }
 0x6fc   : > { %v9918_v32 = vpop.permute.xlu1 %4228  ;;  %v9920_v30 = vpop.permute.xlu0 %4220 }
 0x6fd   : > { %13796 = vst [vmem:[#allocation557_spill] sm:$0xff] %v9918_v32  ;;  %4448 = vrot.lane.b32.xlu2 %v1452_v44, %s7471_s8 }
 0x6fe   : > { %13797 = vst [vmem:[#allocation558_spill] sm:$0xff] %v9920_v30  ;;  %v1457_v30 = vld [vmem:[#allocation2 + $0xe0] sm:$0xff] }
 0x6ff   : > { %v9923_v43 = vpop.permute.xlu2 %4318 }
 0x700   : > { %13798 = vst [vmem:[#allocation559_spill] sm:$0xff] %v9923_v43  ;;  %v1555_v43 = vld [vmem:[#allocation2 + $0xfb] sm:$0xff] }
 0x702   : > { %4446 = vrot.lane.b32.xlu1 %v1451_v42, %s7471_s8  ;;  %4438 = vrot.lane.b32.xlu0 %v1447_v12, %s7471_s8  ;;  %v1458_v12 = vld [vmem:[#allocation2 + $0xf0] sm:$0xff] }
 0x704   : > { %v9927_v24 = vpop.permute.xlu1 %4234  ;;  %v9929_v55 = vpop.permute.xlu0 %4226 }
 0x705   : > { %13799 = vst [vmem:[#allocation560_spill] sm:$0xff] %v9927_v24  ;;  %4454 = vrot.lane.b32.xlu2 %v1455_v58, %s7471_s8  ;;  %v1468_v24 = vld [vmem:[#allocation2 + $0x168] sm:$0xff] }
 0x706   : > { %13800 = vst [vmem:[#allocation561_spill] sm:$0xff] %v9929_v55  ;;  %v1472_v55 = vld [vmem:[#allocation2 + $0x198] sm:$0xff] }
 0x707   : > { %v9932_v50 = vpop.permute.xlu2 %4324 }
 0x708   : > { %13801 = vst [vmem:[#allocation562_spill] sm:$0xff] %v9932_v50  ;;  %v10120_v50 = vld [vmem:[#allocation2 + $0x151] sm:$0xff] }
 0x709   : > { %13846 = vst [vmem:[#allocation607_spill] sm:$0xff] %v10120_v50 }
 0x70a   : > { %4452 = vrot.lane.b32.xlu1 %v1454_v16, %s7471_s8  ;;  %4444 = vrot.lane.b32.xlu0 %v1450_v7, %s7471_s8  ;;  %v1461_v7 = vld [vmem:[#allocation2 + $0x110] sm:$0xff] }
 0x70c   : > { %v9936_v44 = vpop.permute.xlu1 %4240  ;;  %v9938_v42 = vpop.permute.xlu0 %4232 }
 0x70d   : > { %13802 = vst [vmem:[#allocation563_spill] sm:$0xff] %v9936_v44  ;;  %4460 = vrot.lane.b32.xlu2 %v1458_v12, %s7471_s8 }
 0x70e   : > { %13803 = vst [vmem:[#allocation564_spill] sm:$0xff] %v9938_v42 }
 0x70f   : > { %v9941_v21 = vpop.permute.xlu2 %4330 }
 0x710   : > { %13804 = vst [vmem:[#allocation565_spill] sm:$0xff] %v9941_v21  ;;  %v10087_v21 = vld [vmem:[#allocation2 + $0xe1] sm:$0xff] }
 0x711   : > { %13838 = vst [vmem:[#allocation599_spill] sm:$0xff] %v10087_v21 }
 0x712   : > { %4458 = vrot.lane.b32.xlu1 %v1457_v30, %s7471_s8  ;;  %4450 = vrot.lane.b32.xlu0 %v1453_v35, %s7471_s8  ;;  %v1464_v35 = vld [vmem:[#allocation2 + $0x138] sm:$0xff] }
 0x714   : > { %v9945_v58 = vpop.permute.xlu1 %4310  ;;  %v9947_v16 = vpop.permute.xlu0 %4238 }
 0x715   : > { %13805 = vst [vmem:[#allocation566_spill] sm:$0xff] %v9947_v16  ;;  %4466 = vrot.lane.b32.xlu2 %v1461_v7, %s7471_s8  ;;  %v1463_v16 = vld [vmem:[#allocation2 + $0x128] sm:$0xff] }
 0x717   : > { %v9950_v44 = vpop.permute.xlu2 %4336 }
 0x718   : > { %13806 = vst [vmem:[#allocation567_spill] sm:$0xff] %v9950_v44 }
 0x71a   : > { %4464 = vrot.lane.b32.xlu1 %v1460_v40, %s7471_s8  ;;  %4456 = vrot.lane.b32.xlu0 %v1456_v10, %s7471_s8  ;;  %v1467_v10 = vld [vmem:[#allocation2 + $0x158] sm:$0xff] }
 0x71c   : > { %v9954_v12 = vpop.permute.xlu1 %4316  ;;  %v9956_v30 = vpop.permute.xlu0 %4308 }
 0x71d   : > { %4472 = vrot.lane.b32.xlu2 %v1464_v35, %s7471_s8 }
 0x71f   : > { %v9959_v5 = vpop.permute.xlu2 %4342 }
 0x720   : > { %13807 = vst [vmem:[#allocation568_spill] sm:$0xff] %v9959_v5 }
 0x722   : > { %4470 = vrot.lane.b32.xlu1 %v1463_v16, %s7471_s8  ;;  %4462 = vrot.lane.b32.xlu0 %v1459_v47, %s7471_s8  ;;  %v1470_v47 = vld [vmem:[#allocation2 + $0x180] sm:$0xff] }
 0x724   : > { %v9963_v7 = vpop.permute.xlu1 %4322  ;;  %v9965_v40 = vpop.permute.xlu0 %4314 }
 0x725   : > { %4478 = vrot.lane.b32.xlu2 %v1467_v10, %s7471_s8 }
 0x727   : > { %v9968_v42 = vpop.permute.xlu2 %4348 }
 0x728   : > { %13808 = vst [vmem:[#allocation569_spill] sm:$0xff] %v9968_v42 }
 0x72a   : > { %4476 = vrot.lane.b32.xlu1 %v1466_v62, %s7471_s8  ;;  %4468 = vrot.lane.b32.xlu0 %v1462_v45, %s7471_s8  ;;  %v1473_v45 = vld [vmem:[#allocation2 + $0x1a0] sm:$0xff] }
 0x72c   : > { %v9972_v35 = vpop.permute.xlu1 %4328  ;;  %v9974_v16 = vpop.permute.xlu0 %4320 }
 0x72d   : > { %4484 = vrot.lane.b32.xlu2 %v1470_v47, %s7471_s8  ;;  %v1476_v47 = vld [vmem:[#allocation2 + $0x1c8] sm:$0xff] }
 0x72f   : > { %v9977_v5 = vpop.permute.xlu2 %4354 }
 0x730   : > { %13809 = vst [vmem:[#allocation570_spill] sm:$0xff] %v9977_v5 }
 0x732   : > { %4482 = vrot.lane.b32.xlu1 %v1469_v19, %s7471_s8  ;;  %4474 = vrot.lane.b32.xlu0 %v1465_v39, %s7471_s8 }
 0x734   : > { %v9981_v10 = vpop.permute.xlu1 %4334  ;;  %v9983_v62 = vpop.permute.xlu0 %4326 }
 0x735   : > { %13810 = vst [vmem:[#allocation571_spill] sm:$0xff] %v9981_v10  ;;  %4490 = vrot.lane.b32.xlu2 %v1473_v45, %s7471_s8  ;;  %v9999_v45 = vld [vmem:[#allocation2 + $0x69] sm:$0xff]  ;;  %v1332_v10 = vld [vmem:[#allocation2 + $0xf9] sm:$0xff] }
 0x736   : > { %13811 = vst [vmem:[#allocation572_spill] sm:$0xff] %v9983_v62  ;;  %v1546_v62 = vld [vmem:[#allocation2 + $0x93] sm:$0xff] }
 0x737   : > { %v9986_v42 = vpop.permute.xlu2 %4360 }
 0x738   : > { %13812 = vst [vmem:[#allocation573_spill] sm:$0xff] %v9986_v42 }
 0x73a   : > { %4488 = vrot.lane.b32.xlu1 %v1472_v55, %s7471_s8  ;;  %4480 = vrot.lane.b32.xlu0 %v1468_v24, %s7471_s8 }
 0x73c   : > { %v9990_v5 = vpop.permute.xlu1 %4340  ;;  %v9992_v19 = vpop.permute.xlu0 %4332 }
 0x73d   : > { %13813 = vst [vmem:[#allocation574_spill] sm:$0xff] %v9990_v5  ;;  %4496 = vrot.lane.b32.xlu2 %v1476_v47, %s7471_s8  ;;  %v1474_v47 = vld [vmem:[#allocation2 + $0x1b0] sm:$0xff] }
 0x73e   : > { %13814 = vst [vmem:[#allocation575_spill] sm:$0xff] %v9992_v19 }
 0x73f   : > { %v9995_v39 = vpop.permute.xlu2 %4366 }
 0x740   : > { %13815 = vst [vmem:[#allocation576_spill] sm:$0xff] %v9995_v39 }
 0x742   : > { %4494 = vrot.lane.b32.xlu1 %v1475_v15, %s7471_s8  ;;  %4486 = vrot.lane.b32.xlu0 %v1471_v53, %s7471_s8  ;;  %v10014_v15 = vld [vmem:[#allocation2 + $0x91] sm:$0xff] }
 0x744   : > { %v10001_v55 = vpop.permute.xlu1 %4346  ;;  %v10003_v24 = vpop.permute.xlu0 %4338 }
 0x745   : > { %13816 = vst [vmem:[#allocation577_spill] sm:$0xff] %v10001_v55  ;;  %4566 = vrot.lane.b32.xlu2 %v9999_v45, %s7472_s9 }
 0x746   : > { %13817 = vst [vmem:[#allocation578_spill] sm:$0xff] %v10003_v24  ;;  %v1477_v24 = vld [vmem:[#allocation2 + $0x1d0] sm:$0xff] }
 0x747   : > { %v10007_v42 = vpop.permute.xlu2 %4436 }
 0x74a   : > { %4564 = vrot.lane.b32.xlu1 %v10009_v23, %s7472_s9  ;;  %4492 = vrot.lane.b32.xlu0 %v1474_v47, %s7471_s8  ;;  %v10029_v47 = vld [vmem:[#allocation2 + $0xb1] sm:$0xff] }
 0x74b   : > { %13821 = vst [vmem:[#allocation582_spill] sm:$0xff] %v10029_v47 }
 0x74c   : > { %v10016_v53 = vpop.permute.xlu1 %4352  ;;  %v10018_v55 = vpop.permute.xlu0 %4344 }
 0x74d   : > { %13818 = vst [vmem:[#allocation579_spill] sm:$0xff] %v10016_v53  ;;  %4572 = vrot.lane.b32.xlu2 %v10014_v15, %s7472_s9  ;;  %v1336_v53 = vld [vmem:[#allocation2 + $0x129] sm:$0xff] }
 0x74e   : > { %13819 = vst [vmem:[#allocation580_spill] sm:$0xff] %v10018_v55 }
 0x74f   : > { %v10022_v39 = vpop.permute.xlu2 %4442 }
 0x752   : > { %4570 = vrot.lane.b32.xlu1 %v10024_v38, %s7472_s9  ;;  %4498 = vrot.lane.b32.xlu0 %v1477_v24, %s7471_s8  ;;  %v10047_v24 = vld [vmem:[#allocation2 + $0xd9] sm:$0xff]  ;;  %s7486_s8 = smov 2  }
 0x753   : > { %13826 = vst [vmem:[#allocation587_spill] sm:$0xff] %v10047_v24  ;;  %v1565_v38 = vld [vmem:[#allocation2 + $0x173] sm:$0xff] }
 0x754   : > { %v10031_v32 = vpop.permute.xlu1 %4358  ;;  %v10033_v18 = vpop.permute.xlu0 %4350 }
 0x755   : > { %13822 = vst [vmem:[#allocation583_spill] sm:$0xff] %v10031_v32  ;;  %4578 = vrot.lane.b32.xlu2 %v10029_v47, %s7472_s9  ;;  %v1568_v47 = vld [vmem:[#allocation2 + $0x19b] sm:$0xff] }
 0x756   : > { %13823 = vst [vmem:[#allocation584_spill] sm:$0xff] %v10033_v18 }
 0x757   : > { %v10037_v55 = vpop.permute.xlu2 %4448 }
 0x758   : > { %13824 = vst [vmem:[#allocation585_spill] sm:$0xff] %v10037_v55  ;;  %v1318_v55 = vld [vmem:[#allocation2 + $0x51] sm:$0xff] }
 0x75a   : > { %4576 = vrot.lane.b32.xlu1 %v10039_v2, %s7472_s9  ;;  %4568 = vrot.lane.b32.xlu0 %v10041_v1, %s7472_s9  ;;  %v1519_v2 = vld [vmem:[#allocation2 + $0xca] sm:$0xff] }
 0x75c   : > { %v10049_v32 = vpop.permute.xlu1 %4364  ;;  %v10051_v18 = vpop.permute.xlu0 %4356 }
 0x75d   : > { %13827 = vst [vmem:[#allocation588_spill] sm:$0xff] %v10049_v32  ;;  %4584 = vrot.lane.b32.xlu2 %v10047_v24, %s7472_s9  ;;  %v1522_v24 = vld [vmem:[#allocation2 + $0xf2] sm:$0xff] }
 0x75e   : > { %13828 = vst [vmem:[#allocation589_spill] sm:$0xff] %v10051_v18 }
 0x75f   : > { %v10055_v5 = vpop.permute.xlu2 %4454 }
 0x760   : > { %13829 = vst [vmem:[#allocation590_spill] sm:$0xff] %v10055_v5  ;;  %v1528_v5 = vld [vmem:[#allocation2 + $0x13a] sm:$0xff] }
 0x762   : > { %4582 = vrot.lane.b32.xlu1 %v10057_v26, %s7472_s9  ;;  %4574 = vrot.lane.b32.xlu0 %v10059_v49, %s7472_s9 }
 0x764   : > { %v10065_v44 = vpop.permute.xlu1 %4370  ;;  %v10067_v32 = vpop.permute.xlu0 %4362 }
 0x765   : > { %13831 = vst [vmem:[#allocation592_spill] sm:$0xff] %v10065_v44  ;;  %4590 = vrot.lane.b32.xlu2 %v1332_v10, %s7472_s9 }
 0x766   : > { %13832 = vst [vmem:[#allocation593_spill] sm:$0xff] %v10067_v32  ;;  %v1334_v32 = vld [vmem:[#allocation2 + $0x111] sm:$0xff] }
 0x767   : > { %v10070_v18 = vpop.permute.xlu2 %4460 }
 0x768   : > { %13833 = vst [vmem:[#allocation594_spill] sm:$0xff] %v10070_v18 }
 0x76a   : > { %4588 = vrot.lane.b32.xlu1 %v10072_v28, %s7472_s9  ;;  %4580 = vrot.lane.b32.xlu0 %v10074_v60, %s7472_s9  ;;  %v1338_v28 = vld [vmem:[#allocation2 + $0x141] sm:$0xff] }
 0x76c   : > { %v10080_v51 = vpop.permute.xlu1 %4440  ;;  %v10082_v44 = vpop.permute.xlu0 %4368 }
 0x76d   : > { %13835 = vst [vmem:[#allocation596_spill] sm:$0xff] %v10080_v51  ;;  %4596 = vrot.lane.b32.xlu2 %v1335_v63, %s7472_s9  ;;  %v1337_v63 = vld [vmem:[#allocation2 + $0x139] sm:$0xff] }
 0x76e   : > { %13836 = vst [vmem:[#allocation597_spill] sm:$0xff] %v10082_v44  ;;  %v1597_v51 = vld [vmem:[#allocation2 + $0x174] sm:$0xff] }
 0x76f   : > { %v10085_v10 = vpop.permute.xlu2 %4466 }
 0x770   : > { %13837 = vst [vmem:[#allocation598_spill] sm:$0xff] %v10085_v10 }
 0x772   : > { %4594 = vrot.lane.b32.xlu1 %v1334_v32, %s7472_s9  ;;  %4586 = vrot.lane.b32.xlu0 %v10087_v21, %s7472_s9  ;;  %v1341_v32 = vld [vmem:[#allocation2 + $0x169] sm:$0xff] }
 0x774   : > { %v10092_v13 = vpop.permute.xlu1 %4446  ;;  %v10094_v26 = vpop.permute.xlu0 %4438 }
 0x775   : > { %13839 = vst [vmem:[#allocation600_spill] sm:$0xff] %v10092_v13  ;;  %4602 = vrot.lane.b32.xlu2 %v1338_v28, %s7472_s9  ;;  %v1340_v28 = vld [vmem:[#allocation2 + $0x159] sm:$0xff]  ;;  %v1532_v13 = vld [vmem:[#allocation2 + $0x16a] sm:$0xff] }
 0x777   : > { %v10097_v44 = vpop.permute.xlu2 %4472 }
 0x778   : > { %13840 = vst [vmem:[#allocation601_spill] sm:$0xff] %v10097_v44  ;;  %v1344_v44 = vld [vmem:[#allocation2 + $0x189] sm:$0xff] }
 0x77a   : > { %4600 = vrot.lane.b32.xlu1 %v1337_v63, %s7472_s9  ;;  %4592 = vrot.lane.b32.xlu0 %v10099_v36, %s7472_s9 }
 0x77c   : > { %v10104_v10 = vpop.permute.xlu1 %4452  ;;  %v10106_v21 = vpop.permute.xlu0 %4444 }
 0x77d   : > { %13842 = vst [vmem:[#allocation603_spill] sm:$0xff] %v10104_v10  ;;  %4608 = vrot.lane.b32.xlu2 %v1341_v32, %s7472_s9  ;;  %v1343_v10 = vld [vmem:[#allocation2 + $0x181] sm:$0xff]  ;;  %v1347_v32 = vld [vmem:[#allocation2 + $0x1b1] sm:$0xff] }
 0x77f   : > { %v10109_v18 = vpop.permute.xlu2 %4478 }
 0x780   : > { %13843 = vst [vmem:[#allocation604_spill] sm:$0xff] %v10109_v18 }
 0x782   : > { %4606 = vrot.lane.b32.xlu1 %v1340_v28, %s7472_s9  ;;  %4598 = vrot.lane.b32.xlu0 %v1336_v53, %s7472_s9 }
 0x784   : > { %v10113_v63 = vpop.permute.xlu1 %4458  ;;  %v10115_v19 = vpop.permute.xlu0 %4450 }
 0x785   : > { %13844 = vst [vmem:[#allocation605_spill] sm:$0xff] %v10113_v63  ;;  %4614 = vrot.lane.b32.xlu2 %v1344_v44, %s7472_s9  ;;  %v1346_v44 = vld [vmem:[#allocation2 + $0x1a1] sm:$0xff]  ;;  %v1342_v63 = vld [vmem:[#allocation2 + $0x171] sm:$0xff] }
 0x787   : > { %v10118_v36 = vpop.permute.xlu2 %4484 }
 0x788   : > { %13845 = vst [vmem:[#allocation606_spill] sm:$0xff] %v10118_v36  ;;  %v1509_v36 = vld [vmem:[#allocation2 + $0x1d1] sm:$0xff] }
 0x78a   : > { %4612 = vrot.lane.b32.xlu1 %v1343_v10, %s7472_s9  ;;  %4604 = vrot.lane.b32.xlu0 %v10120_v50, %s7472_s9  ;;  %v1513_v50 = vld [vmem:[#allocation2 + $0x82] sm:$0xff] }
 0x78c   : > { %v10125_v28 = vpop.permute.xlu1 %4464  ;;  %v10127_v53 = vpop.permute.xlu0 %4456 }
 0x78d   : > { %13847 = vst [vmem:[#allocation608_spill] sm:$0xff] %v10125_v28  ;;  %4620 = vrot.lane.b32.xlu2 %v1347_v32, %s7472_s9 }
 0x78f   : > { %v10130_v18 = vpop.permute.xlu2 %4490 }
 0x790   : > { %13848 = vst [vmem:[#allocation609_spill] sm:$0xff] %v10130_v18  ;;  %v1348_v18 = vld [vmem:[#allocation2 + $0x1b9] sm:$0xff] }
 0x792   : > { %4618 = vrot.lane.b32.xlu1 %v1346_v44, %s7472_s9  ;;  %4610 = vrot.lane.b32.xlu0 %v1342_v63, %s7472_s9  ;;  %v1512_v63 = vld [vmem:[#allocation2 + $0x7a] sm:$0xff] }
 0x794   : > { %v10134_v10 = vpop.permute.xlu1 %4470  ;;  %v10136_v34 = vpop.permute.xlu0 %4462 }
 0x795   : > { %13849 = vst [vmem:[#allocation610_spill] sm:$0xff] %v10134_v10  ;;  %4626 = vrot.lane.b32.xlu2 %v1509_v36, %s7472_s9 }
 0x796   : > { %13850 = vst [vmem:[#allocation611_spill] sm:$0xff] %v10136_v34  ;;  %v1511_v34 = vld [vmem:[#allocation2 + $0x6a] sm:$0xff] }
 0x797   : > { %v10139_v28 = vpop.permute.xlu2 %4496 }
 0x798   : > { %13851 = vst [vmem:[#allocation612_spill] sm:$0xff] %v10139_v28 }
 0x79a   : > { %4624 = vrot.lane.b32.xlu1 %v1508_v14, %s7472_s9  ;;  %4616 = vrot.lane.b32.xlu0 %v1345_v52, %s7472_s9  ;;  %v1515_v52 = vld [vmem:[#allocation2 + $0x9a] sm:$0xff] }
 0x79c   : > { %v10143_v32 = vpop.permute.xlu1 %4476  ;;  %v10145_v44 = vpop.permute.xlu0 %4468 }
 0x79d   : > { %13852 = vst [vmem:[#allocation613_spill] sm:$0xff] %v10143_v32  ;;  %4696 = vrot.lane.b32.xlu2 %v1512_v63, %s7474_s11  ;;  %v1514_v32 = vld [vmem:[#allocation2 + $0x92] sm:$0xff] }
 0x79e   : > { %13853 = vst [vmem:[#allocation614_spill] sm:$0xff] %v10145_v44  ;;  %v1510_v44 = vld [vmem:[#allocation2 + $0x62] sm:$0xff] }
 0x79f   : > { %v10148_v10 = vpop.permute.xlu2 %4566 }
 0x7a2   : > { %4694 = vrot.lane.b32.xlu1 %v1511_v34, %s7474_s11  ;;  %4622 = vrot.lane.b32.xlu0 %v1348_v18, %s7472_s9  ;;  %v1518_v18 = vld [vmem:[#allocation2 + $0xc2] sm:$0xff]  ;;  %s7487_s9 = smov 6  }
 0x7a4   : > { %v10152_v36 = vpop.permute.xlu1 %4482  ;;  %v10154_v14 = vpop.permute.xlu0 %4474 }
 0x7a5   : > { %13854 = vst [vmem:[#allocation615_spill] sm:$0xff] %v10152_v36  ;;  %4702 = vrot.lane.b32.xlu2 %v1515_v52, %s7474_s11 }
 0x7a6   : > { %13855 = vst [vmem:[#allocation616_spill] sm:$0xff] %v10154_v14  ;;  %v1517_v14 = vld [vmem:[#allocation2 + $0xb2] sm:$0xff] }
 0x7a7   : > { %v10157_v28 = vpop.permute.xlu2 %4572 }
 0x7aa   : > { %4700 = vrot.lane.b32.xlu1 %v1514_v32, %s7474_s11  ;;  %4692 = vrot.lane.b32.xlu0 %v1510_v44, %s7474_s11  ;;  %v1521_v44 = vld [vmem:[#allocation2 + $0xe2] sm:$0xff] }
 0x7ac   : > { %v10161_v63 = vpop.permute.xlu1 %4488  ;;  %v10163_v34 = vpop.permute.xlu0 %4480 }
 0x7ad   : > { %13856 = vst [vmem:[#allocation617_spill] sm:$0xff] %v10161_v63  ;;  %4708 = vrot.lane.b32.xlu2 %v1518_v18, %s7474_s11 }
 0x7ae   : > { %13857 = vst [vmem:[#allocation618_spill] sm:$0xff] %v10163_v34  ;;  %v1520_v34 = vld [vmem:[#allocation2 + $0xda] sm:$0xff] }
 0x7af   : > { %v10166_v36 = vpop.permute.xlu2 %4578 }
 0x7b2   : > { %4706 = vrot.lane.b32.xlu1 %v1517_v14, %s7474_s11  ;;  %4698 = vrot.lane.b32.xlu0 %v1513_v50, %s7474_s11  ;;  %v1524_v50 = vld [vmem:[#allocation2 + $0x10a] sm:$0xff] }
 0x7b4   : > { %v10170_v52 = vpop.permute.xlu1 %4494  ;;  %v10172_v32 = vpop.permute.xlu0 %4486 }
 0x7b5   : > { %13858 = vst [vmem:[#allocation619_spill] sm:$0xff] %v10170_v52  ;;  %4714 = vrot.lane.b32.xlu2 %v1521_v44, %s7474_s11 }
 0x7b6   : > { %13859 = vst [vmem:[#allocation620_spill] sm:$0xff] %v10172_v32  ;;  %v1523_v32 = vld [vmem:[#allocation2 + $0xfa] sm:$0xff] }
 0x7b7   : > { %v10175_v63 = vpop.permute.xlu2 %4584 }
 0x7ba   : > { %4712 = vrot.lane.b32.xlu1 %v1520_v34, %s7474_s11  ;;  %4704 = vrot.lane.b32.xlu0 %v1516_v33, %s7474_s11  ;;  %v1527_v33 = vld [vmem:[#allocation2 + $0x12a] sm:$0xff] }
 0x7bc   : > { %v10179_v18 = vpop.permute.xlu1 %4564  ;;  %v10181_v14 = vpop.permute.xlu0 %4492 }
 0x7bd   : > { %13860 = vst [vmem:[#allocation621_spill] sm:$0xff] %v10181_v14  ;;  %4720 = vrot.lane.b32.xlu2 %v1524_v50, %s7474_s11  ;;  %v1526_v14 = vld [vmem:[#allocation2 + $0x122] sm:$0xff] }
 0x7bf   : > { %v10184_v52 = vpop.permute.xlu2 %4590 }
 0x7c0   : > { %13861 = vst [vmem:[#allocation622_spill] sm:$0xff] %v10184_v52 }
 0x7c2   : > { %4718 = vrot.lane.b32.xlu1 %v1523_v32, %s7474_s11  ;;  %4710 = vrot.lane.b32.xlu0 %v1519_v2, %s7474_s11  ;;  %v1530_v2 = vld [vmem:[#allocation2 + $0x152] sm:$0xff] }
 0x7c4   : > { %v10188_v44 = vpop.permute.xlu1 %4570  ;;  %v10190_v34 = vpop.permute.xlu0 %4498 }
 0x7c5   : > { %13862 = vst [vmem:[#allocation623_spill] sm:$0xff] %v10190_v34  ;;  %4726 = vrot.lane.b32.xlu2 %v1527_v33, %s7474_s11  ;;  %v1529_v34 = vld [vmem:[#allocation2 + $0x142] sm:$0xff] }
 0x7c7   : > { %v10193_v57 = vpop.permute.xlu2 %4596 }
 0x7c8   : > { %13863 = vst [vmem:[#allocation624_spill] sm:$0xff] %v10193_v57 }
 0x7ca   : > { %4724 = vrot.lane.b32.xlu1 %v1526_v14, %s7474_s11  ;;  %4716 = vrot.lane.b32.xlu0 %v1522_v24, %s7474_s11  ;;  %v1533_v24 = vld [vmem:[#allocation2 + $0x172] sm:$0xff] }
 0x7cc   : > { %v10197_v50 = vpop.permute.xlu1 %4576  ;;  %v10199_v32 = vpop.permute.xlu0 %4568 }
 0x7cd   : > { %13864 = vst [vmem:[#allocation625_spill] sm:$0xff] %v10197_v50  ;;  %4732 = vrot.lane.b32.xlu2 %v1530_v2, %s7474_s11  ;;  %v1594_v50 = vld [vmem:[#allocation2 + $0x154] sm:$0xff] }
 0x7ce   : > { %13865 = vst [vmem:[#allocation626_spill] sm:$0xff] %v10199_v32  ;;  %v1591_v32 = vld [vmem:[#allocation2 + $0x12c] sm:$0xff] }
 0x7cf   : > { %v10202_v52 = vpop.permute.xlu2 %4602 }
 0x7d0   : > { %13866 = vst [vmem:[#allocation627_spill] sm:$0xff] %v10202_v52 }
 0x7d2   : > { %4730 = vrot.lane.b32.xlu1 %v1529_v34, %s7474_s11  ;;  %4722 = vrot.lane.b32.xlu0 %v1525_v46, %s7474_s11  ;;  %v1536_v46 = vld [vmem:[#allocation2 + $0x19a] sm:$0xff] }
 0x7d4   : > { %v10206_v33 = vpop.permute.xlu1 %4582  ;;  %v10208_v14 = vpop.permute.xlu0 %4574 }
 0x7d5   : > { %13867 = vst [vmem:[#allocation628_spill] sm:$0xff] %v10206_v33  ;;  %4738 = vrot.lane.b32.xlu2 %v1533_v24, %s7474_s11  ;;  %v1531_v33 = vld [vmem:[#allocation2 + $0x15a] sm:$0xff] }
 0x7d6   : > { %13868 = vst [vmem:[#allocation629_spill] sm:$0xff] %v10208_v14  ;;  %v1535_v14 = vld [vmem:[#allocation2 + $0x18a] sm:$0xff]  ;;  %v1539_v24 = vld [vmem:[#allocation2 + $0x1ba] sm:$0xff] }
 0x7d7   : > { %v10211_v57 = vpop.permute.xlu2 %4608 }
 0x7d8   : > { %13869 = vst [vmem:[#allocation630_spill] sm:$0xff] %v10211_v57 }
 0x7da   : > { %4736 = vrot.lane.b32.xlu1 %v1532_v13, %s7474_s11  ;;  %4728 = vrot.lane.b32.xlu0 %v1528_v5, %s7474_s11 }
 0x7dc   : > { %v10215_v2 = vpop.permute.xlu1 %4588  ;;  %v10217_v34 = vpop.permute.xlu0 %4580 }
 0x7dd   : > { %13870 = vst [vmem:[#allocation631_spill] sm:$0xff] %v10215_v2  ;;  %4744 = vrot.lane.b32.xlu2 %v1536_v46, %s7474_s11  ;;  %v1534_v2 = vld [vmem:[#allocation2 + $0x182] sm:$0xff] }
 0x7de   : > { %13871 = vst [vmem:[#allocation632_spill] sm:$0xff] %v10217_v34  ;;  %v1538_v34 = vld [vmem:[#allocation2 + $0x1b2] sm:$0xff] }
 0x7df   : > { %v10220_v52 = vpop.permute.xlu2 %4614 }
 0x7e0   : > { %13872 = vst [vmem:[#allocation633_spill] sm:$0xff] %v10220_v52  ;;  %v1541_v52 = vld [vmem:[#allocation2 + $0x1d2] sm:$0xff] }
 0x7e2   : > { %4742 = vrot.lane.b32.xlu1 %v1535_v14, %s7474_s11  ;;  %4734 = vrot.lane.b32.xlu0 %v1531_v33, %s7474_s11  ;;  %v1542_v33 = vld [vmem:[#allocation2 + $0x63] sm:$0xff] }
 0x7e4   : > { %v10224_v57 = vpop.permute.xlu1 %4594  ;;  %v10226_v13 = vpop.permute.xlu0 %4586 }
 0x7e5   : > { %13873 = vst [vmem:[#allocation634_spill] sm:$0xff] %v10224_v57  ;;  %4750 = vrot.lane.b32.xlu2 %v1539_v24, %s7474_s11 }
 0x7e6   : > { %13874 = vst [vmem:[#allocation635_spill] sm:$0xff] %v10226_v13  ;;  %v1537_v13 = vld [vmem:[#allocation2 + $0x1a2] sm:$0xff] }
 0x7e7   : > { %v10229_v5 = vpop.permute.xlu2 %4620 }
 0x7e8   : > { %13875 = vst [vmem:[#allocation636_spill] sm:$0xff] %v10229_v5 }
 0x7ea   : > { %4748 = vrot.lane.b32.xlu1 %v1538_v34, %s7474_s11  ;;  %4740 = vrot.lane.b32.xlu0 %v1534_v2, %s7474_s11  ;;  %v1545_v2 = vld [vmem:[#allocation2 + $0x83] sm:$0xff] }
 0x7ec   : > { %v10233_v46 = vpop.permute.xlu1 %4600  ;;  %v10235_v14 = vpop.permute.xlu0 %4592 }
 0x7ed   : > { %13876 = vst [vmem:[#allocation637_spill] sm:$0xff] %v10233_v46  ;;  %4820 = vrot.lane.b32.xlu2 %v1542_v33, %s7475_s12  ;;  %v1540_v46 = vld [vmem:[#allocation2 + $0x1ca] sm:$0xff] }
 0x7ee   : > { %13877 = vst [vmem:[#allocation638_spill] sm:$0xff] %v10235_v14  ;;  %v1544_v14 = vld [vmem:[#allocation2 + $0x7b] sm:$0xff] }
 0x7ef   : > { %v10238_v57 = vpop.permute.xlu2 %4626 }
 0x7f0   : > { %13878 = vst [vmem:[#allocation639_spill] sm:$0xff] %v10238_v57  ;;  %v1543_v57 = vld [vmem:[#allocation2 + $0x6b] sm:$0xff] }
 0x7f2   : > { %4754 = vrot.lane.b32.xlu1 %v1541_v52, %s7474_s11  ;;  %4746 = vrot.lane.b32.xlu0 %v1537_v13, %s7474_s11  ;;  %v1548_v13 = vld [vmem:[#allocation2 + $0xab] sm:$0xff] }
 0x7f4   : > { %v10242_v24 = vpop.permute.xlu1 %4606  ;;  %v10244_v34 = vpop.permute.xlu0 %4598 }
 0x7f5   : > { %13879 = vst [vmem:[#allocation640_spill] sm:$0xff] %v10242_v24  ;;  %4826 = vrot.lane.b32.xlu2 %v1545_v2, %s7475_s12 }
 0x7f6   : > { %13880 = vst [vmem:[#allocation641_spill] sm:$0xff] %v10244_v34  ;;  %v1547_v34 = vld [vmem:[#allocation2 + $0x9b] sm:$0xff] }
 0x7f7   : > { %v10247_v5 = vpop.permute.xlu2 %4696 }
 0x7f8   : > { %13881 = vst [vmem:[#allocation642_spill] sm:$0xff] %v10247_v5  ;;  %v1579_v5 = vld [vmem:[#allocation2 + $0x9c] sm:$0xff] }
 0x7fa   : > { %4824 = vrot.lane.b32.xlu1 %v1544_v14, %s7475_s12  ;;  %4752 = vrot.lane.b32.xlu0 %v1540_v46, %s7474_s11  ;;  %v1551_v46 = vld [vmem:[#allocation2 + $0xcb] sm:$0xff] }
 0x7fc   : > { %v10251_v33 = vpop.permute.xlu1 %4612  ;;  %v10253_v52 = vpop.permute.xlu0 %4604 }
 0x7fd   : > { %13882 = vst [vmem:[#allocation643_spill] sm:$0xff] %v10251_v33  ;;  %4832 = vrot.lane.b32.xlu2 %v1548_v13, %s7475_s12 }
 0x7fe   : > { %13883 = vst [vmem:[#allocation644_spill] sm:$0xff] %v10253_v52  ;;  %v1550_v52 = vld [vmem:[#allocation2 + $0xc3] sm:$0xff] }
 0x7ff   : > { %v10256_v24 = vpop.permute.xlu2 %4702 }
 0x800   : > { %13884 = vst [vmem:[#allocation645_spill] sm:$0xff] %v10256_v24  ;;  %v1549_v24 = vld [vmem:[#allocation2 + $0xb3] sm:$0xff] }
 0x802   : > { %4830 = vrot.lane.b32.xlu1 %v1547_v34, %s7475_s12  ;;  %4822 = vrot.lane.b32.xlu0 %v1543_v57, %s7475_s12  ;;  %v1554_v57 = vld [vmem:[#allocation2 + $0xf3] sm:$0xff] }
 0x804   : > { %v10260_v2 = vpop.permute.xlu1 %4618  ;;  %v10262_v14 = vpop.permute.xlu0 %4610 }
 0x805   : > { %13885 = vst [vmem:[#allocation646_spill] sm:$0xff] %v10260_v2  ;;  %4838 = vrot.lane.b32.xlu2 %v1551_v46, %s7475_s12 }
 0x806   : > { %13886 = vst [vmem:[#allocation647_spill] sm:$0xff] %v10262_v14  ;;  %v1553_v14 = vld [vmem:[#allocation2 + $0xe3] sm:$0xff] }
 0x807   : > { %v10265_v33 = vpop.permute.xlu2 %4708 }
 0x808   : > { %13887 = vst [vmem:[#allocation648_spill] sm:$0xff] %v10265_v33  ;;  %v1552_v33 = vld [vmem:[#allocation2 + $0xdb] sm:$0xff] }
 0x80a   : > { %4836 = vrot.lane.b32.xlu1 %v1550_v52, %s7475_s12  ;;  %4828 = vrot.lane.b32.xlu0 %v1546_v62, %s7475_s12  ;;  %v1557_v62 = vld [vmem:[#allocation2 + $0x113] sm:$0xff] }
 0x80c   : > { %v10269_v13 = vpop.permute.xlu1 %4624  ;;  %v10271_v34 = vpop.permute.xlu0 %4616 }
 0x80d   : > { %13888 = vst [vmem:[#allocation649_spill] sm:$0xff] %v10269_v13  ;;  %4844 = vrot.lane.b32.xlu2 %v1554_v57, %s7475_s12 }
 0x80e   : > { %13889 = vst [vmem:[#allocation650_spill] sm:$0xff] %v10271_v34  ;;  %v1556_v34 = vld [vmem:[#allocation2 + $0x10b] sm:$0xff] }
 0x80f   : > { %v10274_v2 = vpop.permute.xlu2 %4714 }
 0x810   : > { %13890 = vst [vmem:[#allocation651_spill] sm:$0xff] %v10274_v2 }
 0x812   : > { %4842 = vrot.lane.b32.xlu1 %v1553_v14, %s7475_s12  ;;  %4834 = vrot.lane.b32.xlu0 %v1549_v24, %s7475_s12  ;;  %v1560_v24 = vld [vmem:[#allocation2 + $0x13b] sm:$0xff] }
 0x814   : > { %v10278_v46 = vpop.permute.xlu1 %4694  ;;  %v10280_v52 = vpop.permute.xlu0 %4622 }
 0x815   : > { %13891 = vst [vmem:[#allocation652_spill] sm:$0xff] %v10280_v52  ;;  %4850 = vrot.lane.b32.xlu2 %v1557_v62, %s7475_s12  ;;  %v1559_v52 = vld [vmem:[#allocation2 + $0x12b] sm:$0xff] }
 0x817   : > { %v10283_v13 = vpop.permute.xlu2 %4720 }
 0x818   : > { %13892 = vst [vmem:[#allocation653_spill] sm:$0xff] %v10283_v13 }
 0x81a   : > { %4848 = vrot.lane.b32.xlu1 %v1556_v34, %s7475_s12  ;;  %4840 = vrot.lane.b32.xlu0 %v1552_v33, %s7475_s12  ;;  %v1563_v33 = vld [vmem:[#allocation2 + $0x15b] sm:$0xff] }
 0x81c   : > { %v10287_v57 = vpop.permute.xlu1 %4700  ;;  %v10289_v14 = vpop.permute.xlu0 %4692 }
 0x81d   : > { %4856 = vrot.lane.b32.xlu2 %v1560_v24, %s7475_s12 }
 0x81f   : > { %v10292_v2 = vpop.permute.xlu2 %4726 }
 0x820   : > { %13893 = vst [vmem:[#allocation654_spill] sm:$0xff] %v10292_v2 }
 0x822   : > { %4854 = vrot.lane.b32.xlu1 %v1559_v52, %s7475_s12  ;;  %4846 = vrot.lane.b32.xlu0 %v1555_v43, %s7475_s12  ;;  %v1566_v43 = vld [vmem:[#allocation2 + $0x183] sm:$0xff] }
 0x824   : > { %v10296_v62 = vpop.permute.xlu1 %4706  ;;  %v10298_v34 = vpop.permute.xlu0 %4698 }
 0x825   : > { %4862 = vrot.lane.b32.xlu2 %v1563_v33, %s7475_s12 }
 0x827   : > { %v10301_v13 = vpop.permute.xlu2 %4732 }
 0x828   : > { %13894 = vst [vmem:[#allocation655_spill] sm:$0xff] %v10301_v13 }
 0x82a   : > { %4860 = vrot.lane.b32.xlu1 %v1562_v56, %s7475_s12  ;;  %4852 = vrot.lane.b32.xlu0 %v1558_v20, %s7475_s12  ;;  %v1569_v20 = vld [vmem:[#allocation2 + $0x1a3] sm:$0xff] }
 0x82c   : > { %v10305_v24 = vpop.permute.xlu1 %4712  ;;  %v10307_v52 = vpop.permute.xlu0 %4704 }
 0x82d   : > { %13895 = vst [vmem:[#allocation656_spill] sm:$0xff] %v10307_v52  ;;  %4868 = vrot.lane.b32.xlu2 %v1566_v43, %s7475_s12  ;;  %v1572_v43 = vld [vmem:[#allocation2 + $0x1cb] sm:$0xff]  ;;  %v1576_v52 = vld [vmem:[#allocation2 + $0x7c] sm:$0xff] }
 0x82f   : > { %v10310_v2 = vpop.permute.xlu2 %4738 }
 0x830   : > { %13896 = vst [vmem:[#allocation657_spill] sm:$0xff] %v10310_v2 }
 0x832   : > { %4866 = vrot.lane.b32.xlu1 %v1565_v38, %s7475_s12  ;;  %4858 = vrot.lane.b32.xlu0 %v1561_v22, %s7475_s12 }
 0x834   : > { %v10314_v33 = vpop.permute.xlu1 %4718  ;;  %v10316_v56 = vpop.permute.xlu0 %4710 }
 0x835   : > { %13897 = vst [vmem:[#allocation658_spill] sm:$0xff] %v10314_v33  ;;  %4874 = vrot.lane.b32.xlu2 %v1569_v20, %s7475_s12  ;;  %v1571_v33 = vld [vmem:[#allocation2 + $0x1bb] sm:$0xff] }
 0x836   : > { %13898 = vst [vmem:[#allocation659_spill] sm:$0xff] %v10316_v56  ;;  %v1567_v56 = vld [vmem:[#allocation2 + $0x18b] sm:$0xff] }
 0x837   : > { %v10319_v13 = vpop.permute.xlu2 %4744 }
 0x838   : > { %13899 = vst [vmem:[#allocation660_spill] sm:$0xff] %v10319_v13 }
 0x83a   : > { %4872 = vrot.lane.b32.xlu1 %v1568_v47, %s7475_s12  ;;  %4864 = vrot.lane.b32.xlu0 %v1564_v27, %s7475_s12  ;;  %v1575_v27 = vld [vmem:[#allocation2 + $0x6c] sm:$0xff] }
 0x83c   : > { %v10323_v2 = vpop.permute.xlu1 %4724  ;;  %v10325_v38 = vpop.permute.xlu0 %4716 }
 0x83d   : > { %13900 = vst [vmem:[#allocation661_spill] sm:$0xff] %v10323_v2  ;;  %4880 = vrot.lane.b32.xlu2 %v1572_v43, %s7475_s12  ;;  %v1570_v2 = vld [vmem:[#allocation2 + $0x1b3] sm:$0xff] }
 0x83e   : > { %13901 = vst [vmem:[#allocation662_spill] sm:$0xff] %v10325_v38  ;;  %v1574_v38 = vld [vmem:[#allocation2 + $0x64] sm:$0xff] }
 0x83f   : > { %v10328_v22 = vpop.permute.xlu2 %4750 }
 0x840   : > { %13902 = vst [vmem:[#allocation663_spill] sm:$0xff] %v10328_v22  ;;  %v1573_v22 = vld [vmem:[#allocation2 + $0x1d3] sm:$0xff] }
 0x842   : > { %4878 = vrot.lane.b32.xlu1 %v1571_v33, %s7475_s12  ;;  %4870 = vrot.lane.b32.xlu0 %v1567_v56, %s7475_s12  ;;  %v1578_v56 = vld [vmem:[#allocation2 + $0x94] sm:$0xff] }
 0x844   : > { %v10332_v20 = vpop.permute.xlu1 %4730  ;;  %v10334_v47 = vpop.permute.xlu0 %4722 }
 0x845   : > { %13903 = vst [vmem:[#allocation664_spill] sm:$0xff] %v10332_v20  ;;  %4950 = vrot.lane.b32.xlu2 %v1575_v27, %s7476_s13 }
 0x846   : > { %13904 = vst [vmem:[#allocation665_spill] sm:$0xff] %v10334_v47  ;;  %v1577_v47 = vld [vmem:[#allocation2 + $0x84] sm:$0xff] }
 0x847   : > { %v10337_v13 = vpop.permute.xlu2 %4820 }
 0x84a   : > { %4948 = vrot.lane.b32.xlu1 %v1574_v38, %s7476_s13  ;;  %4876 = vrot.lane.b32.xlu0 %v1570_v2, %s7475_s12  ;;  %v1581_v2 = vld [vmem:[#allocation2 + $0xb4] sm:$0xff] }
 0x84c   : > { %v10341_v43 = vpop.permute.xlu1 %4736  ;;  %v10343_v33 = vpop.permute.xlu0 %4728 }
 0x84d   : > { %13905 = vst [vmem:[#allocation666_spill] sm:$0xff] %v10341_v43  ;;  %4956 = vrot.lane.b32.xlu2 %v1578_v56, %s7476_s13 }
 0x84e   : > { %13906 = vst [vmem:[#allocation667_spill] sm:$0xff] %v10343_v33  ;;  %v1580_v33 = vld [vmem:[#allocation2 + $0xac] sm:$0xff] }
 0x84f   : > { %v10346_v20 = vpop.permute.xlu2 %4826 }
 0x852   : > { %4954 = vrot.lane.b32.xlu1 %v1577_v47, %s7476_s13  ;;  %4882 = vrot.lane.b32.xlu0 %v1573_v22, %s7475_s12  ;;  %v1584_v22 = vld [vmem:[#allocation2 + $0xdc] sm:$0xff] }
 0x854   : > { %v10350_v27 = vpop.permute.xlu1 %4742  ;;  %v10352_v38 = vpop.permute.xlu0 %4734 }
 0x855   : > { %13907 = vst [vmem:[#allocation668_spill] sm:$0xff] %v10350_v27  ;;  %4962 = vrot.lane.b32.xlu2 %v1581_v2, %s7476_s13 }
 0x856   : > { %13908 = vst [vmem:[#allocation669_spill] sm:$0xff] %v10352_v38  ;;  %v1583_v38 = vld [vmem:[#allocation2 + $0xcc] sm:$0xff] }
 0x857   : > { %v10355_v43 = vpop.permute.xlu2 %4832 }
 0x858   : > { %13909 = vst [vmem:[#allocation670_spill] sm:$0xff] %v10355_v43  ;;  %v1582_v43 = vld [vmem:[#allocation2 + $0xc4] sm:$0xff] }
 0x85a   : > { %4960 = vrot.lane.b32.xlu1 %v1580_v33, %s7476_s13  ;;  %4952 = vrot.lane.b32.xlu0 %v1576_v52, %s7476_s13  ;;  %v1587_v52 = vld [vmem:[#allocation2 + $0xfc] sm:$0xff] }
 0x85c   : > { %v10359_v56 = vpop.permute.xlu1 %4748  ;;  %v10361_v47 = vpop.permute.xlu0 %4740 }
 0x85d   : > { %13910 = vst [vmem:[#allocation671_spill] sm:$0xff] %v10359_v56  ;;  %4968 = vrot.lane.b32.xlu2 %v1584_v22, %s7476_s13 }
 0x85e   : > { %13911 = vst [vmem:[#allocation672_spill] sm:$0xff] %v10361_v47  ;;  %v1586_v47 = vld [vmem:[#allocation2 + $0xf4] sm:$0xff] }
 0x85f   : > { %v10364_v27 = vpop.permute.xlu2 %4838 }
 0x860   : > { %13912 = vst [vmem:[#allocation673_spill] sm:$0xff] %v10364_v27  ;;  %v1585_v27 = vld [vmem:[#allocation2 + $0xe4] sm:$0xff] }
 0x862   : > { %4966 = vrot.lane.b32.xlu1 %v1583_v38, %s7476_s13  ;;  %4958 = vrot.lane.b32.xlu0 %v1579_v5, %s7476_s13  ;;  %v1590_v5 = vld [vmem:[#allocation2 + $0x124] sm:$0xff] }
 0x864   : > { %v10368_v2 = vpop.permute.xlu1 %4754  ;;  %v10370_v33 = vpop.permute.xlu0 %4746 }
 0x865   : > { %13913 = vst [vmem:[#allocation674_spill] sm:$0xff] %v10368_v2  ;;  %4974 = vrot.lane.b32.xlu2 %v1587_v52, %s7476_s13 }
 0x866   : > { %13914 = vst [vmem:[#allocation675_spill] sm:$0xff] %v10370_v33  ;;  %v1589_v33 = vld [vmem:[#allocation2 + $0x114] sm:$0xff] }
 0x867   : > { %v10373_v56 = vpop.permute.xlu2 %4844 }
 0x868   : > { %13915 = vst [vmem:[#allocation676_spill] sm:$0xff] %v10373_v56  ;;  %v1593_v56 = vld [vmem:[#allocation2 + $0x144] sm:$0xff] }
 0x86a   : > { %4972 = vrot.lane.b32.xlu1 %v1586_v47, %s7476_s13  ;;  %4964 = vrot.lane.b32.xlu0 %v1582_v43, %s7476_s13 }
 0x86c   : > { %v10377_v22 = vpop.permute.xlu1 %4824  ;;  %v10379_v38 = vpop.permute.xlu0 %4752 }
 0x86d   : > { %13916 = vst [vmem:[#allocation677_spill] sm:$0xff] %v10377_v22  ;;  %4980 = vrot.lane.b32.xlu2 %v1590_v5, %s7476_s13  ;;  %v1588_v22 = vld [vmem:[#allocation2 + $0x10c] sm:$0xff] }
 0x86e   : > { %13917 = vst [vmem:[#allocation678_spill] sm:$0xff] %v10379_v38  ;;  %v1592_v38 = vld [vmem:[#allocation2 + $0x13c] sm:$0xff] }
 0x86f   : > { %v10382_v2 = vpop.permute.xlu2 %4850 }
 0x870   : > { %13918 = vst [vmem:[#allocation679_spill] sm:$0xff] %v10382_v2 }
 0x872   : > { %4978 = vrot.lane.b32.xlu1 %v1589_v33, %s7476_s13  ;;  %4970 = vrot.lane.b32.xlu0 %v1585_v27, %s7476_s13  ;;  %v1596_v33 = vld [vmem:[#allocation2 + $0x16c] sm:$0xff] }
 0x874   : > { %v10386_v52 = vpop.permute.xlu1 %4830  ;;  %v4823_v47 = vpop.permute.xlu0 %4822 }
 0x875   : > { %13919 = vst [vmem:[#allocation680_spill] sm:$0xff] %v10386_v52  ;;  %4986 = vrot.lane.b32.xlu2 %v1593_v56, %s7476_s13  ;;  %v1595_v52 = vld [vmem:[#allocation2 + $0x15c] sm:$0xff] }
 0x877   : > { %v10389_v43 = vpop.permute.xlu2 %4856 }
 0x878   : > { %13920 = vst [vmem:[#allocation681_spill] sm:$0xff] %v10389_v43 }
 0x87a   : > { %4984 = vrot.lane.b32.xlu1 %v1592_v38, %s7476_s13  ;;  %4976 = vrot.lane.b32.xlu0 %v1588_v22, %s7476_s13  ;;  %v1599_v22 = vld [vmem:[#allocation2 + $0x18c] sm:$0xff] }
 0x87c   : > { %v10393_v5 = vpop.permute.xlu1 %4836  ;;  %v10395_v2 = vpop.permute.xlu0 %4828 }
 0x87d   : > { %13921 = vst [vmem:[#allocation682_spill] sm:$0xff] %v10393_v5  ;;  %4992 = vrot.lane.b32.xlu2 %v1596_v33, %s7476_s13  ;;  %v1598_v5 = vld [vmem:[#allocation2 + $0x184] sm:$0xff]  ;;  %v1602_v33 = vld [vmem:[#allocation2 + $0x1b4] sm:$0xff] }
 0x87f   : > { %v10398_v27 = vpop.permute.xlu2 %4862 }
 0x880   : > { %13922 = vst [vmem:[#allocation683_spill] sm:$0xff] %v10398_v27 }
 0x882   : > { %4990 = vrot.lane.b32.xlu1 %v1595_v52, %s7476_s13  ;;  %4982 = vrot.lane.b32.xlu0 %v1591_v32, %s7476_s13 }
 0x884   : > { %v10402_v56 = vpop.permute.xlu1 %4842  ;;  %v10404_v38 = vpop.permute.xlu0 %4834 }
 0x885   : > { %13923 = vst [vmem:[#allocation684_spill] sm:$0xff] %v10402_v56  ;;  %4998 = vrot.lane.b32.xlu2 %v1599_v22, %s7476_s13  ;;  %v1601_v56 = vld [vmem:[#allocation2 + $0x1a4] sm:$0xff]  ;;  %v1605_v22 = vld [vmem:[#allocation2 + $0x1d4] sm:$0xff] }
 0x887   : > { %v10407_v43 = vpop.permute.xlu2 %4868 }
 0x888   : > { %13924 = vst [vmem:[#allocation685_spill] sm:$0xff] %v10407_v43 }
 0x88a   : > { %4996 = vrot.lane.b32.xlu1 %v1598_v5, %s7476_s13  ;;  %4988 = vrot.lane.b32.xlu0 %v1594_v50, %s7476_s13 }
 0x88c   : > { %v10411_v27 = vpop.permute.xlu1 %4848  ;;  %v10413_v52 = vpop.permute.xlu0 %4840 }
 0x88d   : > { %13925 = vst [vmem:[#allocation686_spill] sm:$0xff] %v10411_v27  ;;  %5004 = vrot.lane.b32.xlu2 %v1602_v33, %s7476_s13  ;;  %v1604_v27 = vld [vmem:[#allocation2 + $0x1cc] sm:$0xff]  ;;  %v5045_v33 = vsel %vm285_vm1, %v1318_v55, %v9767_v3 }
 0x88f   : > { %v10416_v32 = vpop.permute.xlu2 %4874 }
 0x890   : > { %13926 = vst [vmem:[#allocation687_spill] sm:$0xff] %v10416_v32  ;;  %v1600_v32 = vld [vmem:[#allocation2 + $0x19c] sm:$0xff] }
 0x892   : > { %5002 = vrot.lane.b32.xlu1 %v1601_v56, %s7476_s13  ;;  %4994 = vrot.lane.b32.xlu0 %v1597_v51, %s7476_s13  ;;  %v5077_v51 = vsel %vm3558_vm9, %v5045_v33, %v9815_v31 }
 0x893   : > { %v5109_v56 = vsel %vm3591_vm10, %v5077_v51, %v9945_v58 }
 0x894   : > { %v10420_v43 = vpop.permute.xlu1 %4854  ;;  %v10422_v5 = vpop.permute.xlu0 %4846 }
 0x895   : > { %5010 = vrot.lane.b32.xlu2 %v1605_v22, %s7476_s13  ;;  %v5141_v22 = vsel %vm13238_vm11, %v5109_v56, %v10094_v26  ;;  %v5048_v26 = vsel %vm285_vm1, %v10041_v1, %v9776_v25 }
 0x896   : > { %v5173_v31 = vsel %vm13237_vm12, %v5141_v22, %v10148_v10  ;;  %v5080_v51 = vsel %vm3558_vm9, %v5048_v26, %v9824_v9 }
 0x897   : > { %v10425_v50 = vpop.permute.xlu2 %4880  ;;  %v5205_v55 = vsel %vm3690_vm13, %v5173_v31, %v10278_v46  ;;  %v5112_v10 = vsel %vm3591_vm10, %v5080_v51, %v9954_v12 }
 0x898   : > { %13927 = vst [vmem:[#allocation688_spill] sm:$0xff] %v10425_v50  ;;  %v5144_v46 = vsel %vm13238_vm11, %v5112_v10, %v10106_v21  ;;  %v5051_v21 = vsel %vm285_vm1, %v10059_v49, %v9785_v4 }
 0x899   : > { %v5176_v1 = vsel %vm13237_vm12, %v5144_v46, %v10157_v28  ;;  %v5083_v12 = vsel %vm3558_vm9, %v5051_v21, %v9833_v41 }
 0x89a   : > { %5008 = vrot.lane.b32.xlu1 %v1604_v27, %s7476_s13  ;;  %5000 = vrot.lane.b32.xlu0 %v1600_v32, %s7476_s13  ;;  %v5237_v27 = vsel %vm3723_vm14, %v5205_v55, %v4823_v47  ;;  %v1603_v32 = vld [vmem:[#allocation2 + $0x1bc] sm:$0xff]  ;;  %v5208_v9 = vsel %vm3690_vm13, %v5176_v1, %v10287_v57  ;;  %v5115_v28 = vsel %vm3591_vm10, %v5083_v12, %v9963_v7 }
 0x89b   : > { %v5240_v25 = vsel %vm3723_vm14, %v5208_v9, %v10395_v2  ;;  %v5147_v57 = vsel %vm13238_vm11, %v5115_v28, %v10115_v19  ;;  %v5054_v7 = vsel %vm285_vm1, %v10074_v60, %v9794_v6  ;;  %v13930_v12 = vld [vmem:[#allocation625_spill] sm:$0xff]  ;;  %v13931_v28 = vld [vmem:[#allocation626_spill] sm:$0xff] }
 0x89c   : > { %v10437_v50 = vpop.permute.xlu1 %4860  ;;  %v10439_v3 = vpop.permute.xlu0 %4852  ;;  %v5086_v19 = vsel %vm3558_vm9, %v5054_v7, %v9842_v11 }
 0x89f   : > { %v4951_v58 = vpop.permute.xlu2 %4950 }
 0x8a0   : > { %v5269_v33 = vsel %vm13242_vm15, %v5237_v27, %v4951_v58  ;;  %v5179_v27 = vsel %vm13237_vm12, %v5147_v57, %v10166_v36  ;;  %v5118_v36 = vsel %vm3591_vm10, %v5086_v19, %v9972_v35  ;;  %v13932_v57 = vld [vmem:[#allocation642_spill] sm:$0xff] }
 0x8a1   : > { %v5211_v4 = vsel %vm3690_vm13, %v5179_v27, %v10296_v62  ;;  %v5150_v62 = vsel %vm13238_vm11, %v5118_v36, %v10127_v53 }
 0x8a2   : > { %5006 = vrot.lane.b32.xlu0 %v1603_v32, %s7476_s13  ;;  %5334 = vrot.lane.b32.xlu1 %v5269_v33, %s7484_s23  ;;  %v5243_v41 = vsel %vm3723_vm14, %v5211_v4, %v10404_v38  ;;  %v1317_v33 = vld [vmem:[#allocation2 + $0x49] sm:$0xff]  ;;  %v5182_v26 = vsel %vm13237_vm12, %v5150_v62, %v10175_v63 }
 0x8a3   : > { %v5044_v6 = vsel %vm285_vm1, %v1317_v33, %v9708_v61  ;;  %v5214_v11 = vsel %vm3690_vm13, %v5182_v26, %v10305_v24  ;;  %v13933_v4 = vld [vmem:[#allocation656_spill] sm:$0xff]  ;;  %v13936_v33 = vld [vmem:[#allocation513_spill] sm:$0xff]  ;;  %v13937_v26 = vld [vmem:[#allocation582_spill] sm:$0xff] }
 0x8a4   : > { %v10458_v47 = vpop.permute.xlu1 %4866  ;;  %v10460_v56 = vpop.permute.xlu0 %4858  ;;  %v5076_v60 = vsel %vm3558_vm9, %v5044_v6, %v9846_v54  ;;  %v5246_v35 = vsel %vm3723_vm14, %v5214_v11, %v10413_v52  ;;  %v5053_v6 = vsel %vm285_vm1, %v13937_v26, %v13936_v33  ;;  %v13938_v11 = vld [vmem:[#allocation519_spill] sm:$0xff]  ;;  %v13961_v33 = vld [vmem:[#allocation562_spill] sm:$0xff] }
 0x8a5   : > { %v5108_v51 = vsel %vm3591_vm10, %v5076_v60, %v9956_v30  ;;  %v13939_v60 = vld [vmem:[#allocation581_spill] sm:$0xff] }
 0x8a6   : > { %v5140_v63 = vsel %vm13238_vm11, %v5108_v51, %v10007_v42  ;;  %v5047_v42 = vsel %vm285_vm1, %v9999_v45, %v9720_v29 }
 0x8a7   : > { %v4957_v22 = vpop.permute.xlu2 %4956  ;;  %v5172_v61 = vsel %vm13237_vm12, %v5140_v63, %v10179_v18  ;;  %v5079_v18 = vsel %vm3558_vm9, %v5047_v42, %v9855_v8  ;;  %v13944_v42 = vld [vmem:[#allocation590_spill] sm:$0xff] }
 0x8a8   : > { %v5272_v31 = vsel %vm13242_vm15, %v5240_v25, %v4957_v22  ;;  %v5204_v54 = vsel %vm3690_vm13, %v5172_v61, %v10289_v14  ;;  %v5111_v14 = vsel %vm3591_vm10, %v5079_v18, %v9965_v40  ;;  %v5050_v40 = vsel %vm285_vm1, %v10014_v15, %v9731_v0  ;;  %v13928_v15 = vld [vmem:[#allocation585_spill] sm:$0xff]  ;;  %v13942_v61 = vld [vmem:[#allocation559_spill] sm:$0xff] }
 0x8a9   : > { %v5236_v24 = vsel %vm3723_vm14, %v5204_v54, %v10337_v13  ;;  %v5143_v13 = vsel %vm13238_vm11, %v5111_v14, %v10022_v39  ;;  %v5046_v39 = vsel %vm285_vm1, %v10009_v23, %v9756_v59  ;;  %v13929_v59 = vld [vmem:[#allocation596_spill] sm:$0xff] }
 0x8aa   : > { %5340 = vrot.lane.b32.xlu1 %v5272_v31, %s7484_s23  ;;  %v5175_v9 = vsel %vm13237_vm12, %v5143_v13, %v10188_v44  ;;  %v5082_v44 = vsel %vm3558_vm9, %v5050_v40, %v9864_v17  ;;  %v13945_v14 = vld [vmem:[#allocation600_spill] sm:$0xff] }
 0x8ab   : > { %v5207_v25 = vsel %vm3690_vm13, %v5175_v9, %v10298_v34  ;;  %v5078_v34 = vsel %vm3558_vm9, %v5046_v39, %v9866_v48  ;;  %v5114_v0 = vsel %vm3591_vm10, %v5082_v44, %v9974_v16  ;;  %v13946_v9 = vld [vmem:[#allocation628_spill] sm:$0xff]  ;;  %v13949_v39 = vld [vmem:[#allocation659_spill] sm:$0xff] }
 0x8ac   : > { %v10479_v55 = vpop.permute.xlu1 %4872  ;;  %v10481_v2 = vpop.permute.xlu0 %4864  ;;  %v5239_v29 = vsel %vm3723_vm14, %v5207_v25, %v10346_v20  ;;  %v5110_v31 = vsel %vm3591_vm10, %v5078_v34, %v9914_v37  ;;  %v5146_v21 = vsel %vm13238_vm11, %v5114_v0, %v13928_v15  ;;  %v13950_v34 = vld [vmem:[#allocation673_spill] sm:$0xff]  ;;  %v13951_v0 = vld [vmem:[#allocation680_spill] sm:$0xff] }
 0x8ad   : > { %v5142_v23 = vsel %vm13238_vm11, %v5110_v31, %v13929_v59  ;;  %v5178_v17 = vsel %vm13237_vm12, %v5146_v21, %v13930_v12 }
 0x8ae   : > { %v5174_v48 = vsel %vm13237_vm12, %v5142_v23, %v13931_v28  ;;  %v5210_v37 = vsel %vm3690_vm13, %v5178_v17, %v13933_v4  ;;  %v13952_v17 = vld [vmem:[#allocation516_spill] sm:$0xff]  ;;  %v13953_v28 = vld [vmem:[#allocation587_spill] sm:$0xff] }
 0x8af   : > { %v4963_v49 = vpop.permute.xlu2 %4962  ;;  %v5206_v27 = vsel %vm3690_vm13, %v5174_v48, %v13932_v57  ;;  %v5056_v48 = vsel %vm285_vm1, %v13953_v28, %v13952_v17  ;;  %v13954_v57 = vld [vmem:[#allocation521_spill] sm:$0xff]  ;;  %v13975_v28 = vld [vmem:[#allocation523_spill] sm:$0xff] }
 0x8b0   : > { %v5275_v58 = vsel %vm13242_vm15, %v5243_v41, %v4963_v49  ;;  %v13934_v41 = vld [vmem:[#allocation670_spill] sm:$0xff]  ;;  %v13935_v49 = vld [vmem:[#allocation677_spill] sm:$0xff] }
 0x8b1   : > { %v5242_v16 = vsel %vm3723_vm14, %v5210_v37, %v13934_v41  ;;  %v13956_v37 = vld [vmem:[#allocation535_spill] sm:$0xff] }
 0x8b2   : > { %5346 = vrot.lane.b32.xlu1 %v5275_v58, %s7484_s23  ;;  %v5238_v58 = vsel %vm3723_vm14, %v5206_v27, %v13935_v49  ;;  %v13955_v27 = vld [vmem:[#allocation586_spill] sm:$0xff]  ;;  %v13957_v41 = vld [vmem:[#allocation607_spill] sm:$0xff]  ;;  %v13958_v49 = vld [vmem:[#allocation545_spill] sm:$0xff] }
 0x8b3   : > { %v5052_v4 = vsel %vm285_vm1, %v13955_v27, %v13954_v57  ;;  %v13977_v27 = vld [vmem:[#allocation550_spill] sm:$0xff] }
 0x8b4   : > { %v10500_v32 = vpop.permute.xlu1 %4878  ;;  %v10502_v38 = vpop.permute.xlu0 %4870 }
 0x8b7   : > { %v4969_v53 = vpop.permute.xlu2 %4968 }
 0x8b8   : > { %v5278_v10 = vsel %vm13242_vm15, %v5246_v35, %v4969_v53  ;;  %v5049_v35 = vsel %vm285_vm1, %v13939_v60, %v13938_v11  ;;  %v13940_v53 = vld [vmem:[#allocation543_spill] sm:$0xff] }
 0x8b9   : > { %v5085_v51 = vsel %vm3558_vm9, %v5053_v6, %v13940_v53  ;;  %v13962_v6 = vld [vmem:[#allocation575_spill] sm:$0xff]  ;;  %v13964_v53 = vld [vmem:[#allocation594_spill] sm:$0xff] }
 0x8ba   : > { %5352 = vrot.lane.b32.xlu1 %v5278_v10, %s7484_s23  ;;  %v13941_v10 = vld [vmem:[#allocation544_spill] sm:$0xff]  ;;  %v13963_v60 = vld [vmem:[#allocation579_spill] sm:$0xff] }
 0x8bb   : > { %v5081_v63 = vsel %vm3558_vm9, %v5049_v35, %v13941_v10  ;;  %v13965_v10 = vld [vmem:[#allocation603_spill] sm:$0xff] }
 0x8bc   : > { %v4949_v52 = vpop.permute.xlu1 %4948  ;;  %v10526_v46 = vpop.permute.xlu0 %4876  ;;  %v5113_v54 = vsel %vm3591_vm10, %v5081_v63, %v13942_v61  ;;  %v13966_v61 = vld [vmem:[#allocation618_spill] sm:$0xff] }
 0x8bd   : > { %v5268_v30 = vsel %vm13242_vm15, %v5236_v24, %v4949_v52  ;;  %v13943_v24 = vld [vmem:[#allocation572_spill] sm:$0xff]  ;;  %v5145_v13 = vsel %vm13238_vm11, %v5113_v54, %v13945_v14 }
 0x8be   : > { %5332 = vrot.lane.b32.xlu0 %v5268_v30, %s7484_s23  ;;  %v5117_v52 = vsel %vm3591_vm10, %v5085_v51, %v13943_v24  ;;  %v13967_v24 = vld [vmem:[#allocation630_spill] sm:$0xff]  ;;  %v13969_v14 = vld [vmem:[#allocation632_spill] sm:$0xff] }
 0x8bf   : > { %v10535_v1 = vpop.permute.xlu2 %4974  ;;  %v5149_v18 = vsel %vm13238_vm11, %v5117_v52, %v13944_v42  ;;  %v13968_v42 = vld [vmem:[#allocation631_spill] sm:$0xff] }
 0x8c0   : > { %v5181_v25 = vsel %vm13237_vm12, %v5149_v18, %v13946_v9 }
 0x8c1   : > { %v5213_v44 = vsel %vm3690_vm13, %v5181_v25, %v13949_v39  ;;  %v13970_v25 = vld [vmem:[#allocation648_spill] sm:$0xff] }
 0x8c2   : > { %v5245_v31 = vsel %vm3723_vm14, %v5213_v44, %v13950_v34  ;;  %v13973_v44 = vld [vmem:[#allocation676_spill] sm:$0xff] }
 0x8c4   : > { %v4955_v45 = vpop.permute.xlu1 %4954  ;;  %v10547_v22 = vpop.permute.xlu0 %4882 }
 0x8c5   : > { %v5271_v8 = vsel %vm13242_vm15, %v5239_v29, %v4955_v45  ;;  %v13947_v29 = vld [vmem:[#allocation629_spill] sm:$0xff] }
 0x8c6   : > { %5338 = vrot.lane.b32.xlu0 %v5271_v8, %s7484_s23  ;;  %v5177_v45 = vsel %vm13237_vm12, %v5145_v13, %v13947_v29  ;;  %v13948_v8 = vld [vmem:[#allocation645_spill] sm:$0xff] }
 0x8c7   : > { %v10561_v20 = vpop.permute.xlu2 %4980  ;;  %v5209_v40 = vsel %vm3690_vm13, %v5177_v45, %v13948_v8  ;;  %v13971_v45 = vld [vmem:[#allocation662_spill] sm:$0xff] }
 0x8c8   : > { %v5241_v15 = vsel %vm3723_vm14, %v5209_v40, %v13951_v0  ;;  %v13972_v40 = vld [vmem:[#allocation666_spill] sm:$0xff] }
 0x8cc   : > { %v4961_v7 = vpop.permute.xlu1 %4960  ;;  %v4953_v19 = vpop.permute.xlu0 %4952 }
 0x8cd   : > { %v5274_v36 = vsel %vm13242_vm15, %v5242_v16, %v4961_v7  ;;  %v5270_v62 = vsel %vm13242_vm15, %v5238_v58, %v4953_v19  ;;  %v5066_v16 = vsel %vm285_vm1, %v13957_v41, %v13956_v37  ;;  %v13959_v7 = vld [vmem:[#allocation546_spill] sm:$0xff]  ;;  %v13979_v41 = vld [vmem:[#allocation605_spill] sm:$0xff] }
 0x8ce   : > { %5344 = vrot.lane.b32.xlu0 %v5274_v36, %s7484_s23  ;;  %5336 = vrot.lane.b32.xlu2 %v5270_v62, %s7484_s23  ;;  %v5098_v58 = vsel %vm3558_vm9, %v5066_v16, %v13958_v49  ;;  %v5088_v19 = vsel %vm3558_vm9, %v5056_v48, %v13959_v7  ;;  %v13960_v36 = vld [vmem:[#allocation547_spill] sm:$0xff] }
 0x8cf   : > { %v10601_v30 = vpop.permute.xlu2 %4986  ;;  %v5084_v62 = vsel %vm3558_vm9, %v5052_v4, %v13960_v36  ;;  %v5120_v11 = vsel %vm3591_vm10, %v5088_v19, %v13962_v6  ;;  %v5130_v35 = vsel %vm3591_vm10, %v5098_v58, %v13963_v60  ;;  %v13976_v48 = vld [vmem:[#allocation591_spill] sm:$0xff]  ;;  %v13982_v36 = vld [vmem:[#allocation684_spill] sm:$0xff] }
 0x8d0   : > { %v5116_v26 = vsel %vm3591_vm10, %v5084_v62, %v13961_v33  ;;  %v5152_v51 = vsel %vm13238_vm11, %v5120_v11, %v13964_v53  ;;  %v5162_v54 = vsel %vm13238_vm11, %v5130_v35, %v13966_v61  ;;  %v5055_v57 = vsel %vm285_vm1, %v13976_v48, %v13975_v28  ;;  %v13980_v49 = vld [vmem:[#allocation635_spill] sm:$0xff]  ;;  %v13983_v11 = vld [vmem:[#allocation525_spill] sm:$0xff]  ;;  %v13985_v53 = vld [vmem:[#allocation528_spill] sm:$0xff] }
 0x8d1   : > { %v5148_v63 = vsel %vm13238_vm11, %v5116_v26, %v13965_v10  ;;  %v5194_v52 = vsel %vm13237_vm12, %v5162_v54, %v13967_v24  ;;  %v5184_v18 = vsel %vm13237_vm12, %v5152_v51, %v13968_v42  ;;  %v5087_v4 = vsel %vm3558_vm9, %v5055_v57, %v13977_v27  ;;  %v13981_v7 = vld [vmem:[#allocation651_spill] sm:$0xff]  ;;  %v13999_v48 = vld [vmem:[#allocation602_spill] sm:$0xff] }
 0x8d2   : > { %v5180_v13 = vsel %vm13237_vm12, %v5148_v63, %v13969_v14  ;;  %v5216_v8 = vsel %vm3690_vm13, %v5184_v18, %v13971_v45  ;;  %v5226_v39 = vsel %vm3690_vm13, %v5194_v52, %v13972_v40  ;;  %v13984_v60 = vld [vmem:[#allocation595_spill] sm:$0xff]  ;;  %v13987_v63 = vld [vmem:[#allocation553_spill] sm:$0xff]  ;;  %v13993_v45 = vld [vmem:[#allocation638_spill] sm:$0xff] }
 0x8d3   : > { %v5212_v29 = vsel %vm3690_vm13, %v5180_v13, %v13970_v25  ;;  %v5248_v34 = vsel %vm3723_vm14, %v5216_v8, %v13973_v44  ;;  %v5058_v35 = vsel %vm285_vm1, %v13984_v60, %v13983_v11  ;;  %v13986_v51 = vld [vmem:[#allocation599_spill] sm:$0xff]  ;;  %v13991_v13 = vld [vmem:[#allocation608_spill] sm:$0xff]  ;;  %v13994_v40 = vld [vmem:[#allocation622_spill] sm:$0xff] }
 0x8d4   : > { %v4967_v21 = vpop.permute.xlu1 %4966  ;;  %v4959_v59 = vpop.permute.xlu0 %4958  ;;  %v5057_v10 = vsel %vm285_vm1, %v13986_v51, %v13985_v53  ;;  %v5090_v61 = vsel %vm3558_vm9, %v5058_v35, %v13987_v63  ;;  %v13988_v54 = vld [vmem:[#allocation539_spill] sm:$0xff]  ;;  %v13995_v44 = vld [vmem:[#allocation653_spill] sm:$0xff]  ;;  %v14005_v11 = vld [vmem:[#allocation520_spill] sm:$0xff] }
 0x8d5   : > { %v5277_v23 = vsel %vm13242_vm15, %v5245_v31, %v4967_v21  ;;  %v5273_v12 = vsel %vm13242_vm15, %v5241_v15, %v4959_v59  ;;  %v13974_v31 = vld [vmem:[#allocation682_spill] sm:$0xff]  ;;  %v5258_v15 = vsel %vm3723_vm14, %v5226_v39, %v10481_v2  ;;  %v13978_v2 = vld [vmem:[#allocation565_spill] sm:$0xff]  ;;  %v5089_v24 = vsel %vm3558_vm9, %v5057_v10, %v13988_v54  ;;  %v13989_v52 = vld [vmem:[#allocation567_spill] sm:$0xff] }
 0x8d6   : > { %5350 = vrot.lane.b32.xlu0 %v5277_v23, %s7484_s23  ;;  %5342 = vrot.lane.b32.xlu2 %v5273_v12, %s7484_s23  ;;  %v5244_v0 = vsel %vm3723_vm14, %v5212_v29, %v13974_v31  ;;  %v5119_v37 = vsel %vm3591_vm10, %v5087_v4, %v13978_v2  ;;  %v5122_v42 = vsel %vm3591_vm10, %v5090_v61, %v13989_v52  ;;  %v13990_v18 = vld [vmem:[#allocation571_spill] sm:$0xff]  ;;  %v13996_v31 = vld [vmem:[#allocation658_spill] sm:$0xff]  ;;  %v14000_v4 = vld [vmem:[#allocation541_spill] sm:$0xff] }
 0x8d7   : > { %v4993_v9 = vpop.permute.xlu2 %4992  ;;  %v5151_v16 = vsel %vm13238_vm11, %v5119_v37, %v13979_v41  ;;  %v5121_v14 = vsel %vm3591_vm10, %v5089_v24, %v13990_v18  ;;  %v13992_v25 = vld [vmem:[#allocation611_spill] sm:$0xff]  ;;  %v14001_v37 = vld [vmem:[#allocation574_spill] sm:$0xff]  ;;  %v14006_v53 = vld [vmem:[#allocation524_spill] sm:$0xff] }
 0x8d8   : > { %v5290_v23 = vsel %vm13242_vm15, %v5258_v15, %v4993_v9  ;;  %v5183_v58 = vsel %vm13237_vm12, %v5151_v16, %v13980_v49  ;;  %v5154_v9 = vsel %vm13238_vm11, %v5122_v42, %v13991_v13  ;;  %v5153_v29 = vsel %vm13238_vm11, %v5121_v14, %v13992_v25  ;;  %v13997_v15 = vld [vmem:[#allocation686_spill] sm:$0xff]  ;;  %v13998_v28 = vld [vmem:[#allocation531_spill] sm:$0xff]  ;;  %v14003_v49 = vld [vmem:[#allocation624_spill] sm:$0xff] }
 0x8d9   : > { %v5215_v19 = vsel %vm3690_vm13, %v5183_v58, %v13981_v7  ;;  %v5186_v8 = vsel %vm13237_vm12, %v5154_v9, %v13993_v45  ;;  %v5185_v39 = vsel %vm13237_vm12, %v5153_v29, %v13994_v40  ;;  %v5060_v57 = vsel %vm285_vm1, %v13999_v48, %v13998_v28  ;;  %v14004_v7 = vld [vmem:[#allocation661_spill] sm:$0xff]  ;;  %v7415_v35 = vld [vmem:[#allocation2 + $0x169] sm:$0xff]  ;;  %v14012_v9 = vld [vmem:[#allocation606_spill] sm:$0xff] }
 0x8da   : > { %v5247_v62 = vsel %vm3723_vm14, %v5215_v19, %v13982_v36  ;;  %v5092_v2 = vsel %vm3558_vm9, %v5060_v57, %v14000_v4  ;;  %v5068_v51 = vsel %vm285_vm1, %v7415_v35, %v14006_v53  ;;  %v14007_v10 = vld [vmem:[#allocation552_spill] sm:$0xff]  ;;  %v14008_v63 = vld [vmem:[#allocation557_spill] sm:$0xff]  ;;  %v14019_v4 = vld [vmem:[#allocation526_spill] sm:$0xff] }
 0x8db   : > { %v5124_v41 = vsel %vm3591_vm10, %v5092_v2, %v14001_v37  ;;  %v5100_v61 = vsel %vm3558_vm9, %v5068_v51, %v14008_v63  ;;  %v5472_v54 = vld [vmem:[%s13155_s2 + $0x58] sm:$0xff]  ;;  %v14009_v24 = vld [vmem:[#allocation580_spill] sm:$0xff]  ;;  %v5469_v35 = vld [vmem:[%s13155_s2 + $0x40] sm:$0xff] }
 0x8dc   : > { %v4973_v21 = vpop.permute.xlu1 %4972  ;;  %v4965_v59 = vpop.permute.xlu0 %4964  ;;  %v14010_v42 = vld [vmem:[#allocation589_spill] sm:$0xff]  ;;  %v5471_v28 = vld [vmem:[%s13155_s2 + $0x50] sm:$0xff]  ;;  %v14025_v53 = vld [vmem:[#allocation570_spill] sm:$0xff] }
 0x8dd   : > { %v5280_v12 = vsel %vm13242_vm15, %v5248_v34, %v4973_v21  ;;  %v5276_v17 = vsel %vm13242_vm15, %v5244_v0, %v4965_v59  ;;  %v5218_v34 = vsel %vm3690_vm13, %v5186_v8, %v13995_v44  ;;  %v5217_v0 = vsel %vm3690_vm13, %v5185_v39, %v13996_v31  ;;  %v14011_v14 = vld [vmem:[#allocation601_spill] sm:$0xff]  ;;  %v14014_v8 = vld [vmem:[#allocation643_spill] sm:$0xff] }
 0x8de   : > { %5356 = vrot.lane.b32.xlu1 %v5280_v12, %s7484_s23  ;;  %5376 = vrot.lane.b32.xlu0 %v5290_v23, %s7484_s23  ;;  %v5250_v21 = vsel %vm3723_vm14, %v5218_v34, %v13997_v15  ;;  %v5249_v12 = vsel %vm3723_vm14, %v5217_v0, %v10422_v5  ;;  %v14002_v5 = vld [vmem:[#allocation614_spill] sm:$0xff]  ;;  %v5132_v18 = vsel %vm3591_vm10, %v5100_v61, %v14010_v42  ;;  %v14013_v29 = vld [vmem:[#allocation637_spill] sm:$0xff]  ;;  %v14015_v39 = vld [vmem:[#allocation667_spill] sm:$0xff] }
 0x8df   : > { %5348 = vrot.lane.b32.xlu2 %v5276_v17, %s7484_s23  ;;  %v5281_v27 = vsel %vm13242_vm15, %v5249_v12, %v10535_v1  ;;  %v5156_v16 = vsel %vm13238_vm11, %v5124_v41, %v14002_v5  ;;  %v5164_v25 = vsel %vm13238_vm11, %v5132_v18, %v14012_v9  ;;  %v14016_v34 = vld [vmem:[#allocation672_spill] sm:$0xff]  ;;  %v14017_v0 = vld [vmem:[#allocation681_spill] sm:$0xff] }
 0x8e0   : > { %v5188_v58 = vsel %vm13237_vm12, %v5156_v16, %v14003_v49  ;;  %v5196_v40 = vsel %vm13237_vm12, %v5164_v25, %v14014_v8  ;;  %v7417_v37 = vld [vmem:[#allocation2 + $0x159] sm:$0xff]  ;;  %v14020_v41 = vld [vmem:[#allocation532_spill] sm:$0xff] }
 0x8e1   : > { %v5220_v19 = vsel %vm3690_vm13, %v5188_v58, %v14004_v7  ;;  %v5228_v31 = vsel %vm3690_vm13, %v5196_v40, %v14016_v34  ;;  %v5067_v5 = vsel %vm285_vm1, %v7417_v37, %v14020_v41  ;;  %v7418_v16 = vld [vmem:[#allocation2 + $0x171] sm:$0xff]  ;;  %v4999_v7 = vpop.permute.xlu2 %4998  ;;  %v14032_v25 = vld [vmem:[#allocation646_spill] sm:$0xff] }
 0x8e2   : > { %v5252_v1 = vsel %vm3723_vm14, %v5220_v19, %v10439_v3  ;;  %v14021_v49 = vld [vmem:[#allocation537_spill] sm:$0xff]  ;;  %v14030_v42 = vld [vmem:[#allocation620_spill] sm:$0xff]  ;;  %v7419_v37 = vld [vmem:[#allocation2 + $0x181] sm:$0xff] }
 0x8e3   : > { %v5069_v58 = vsel %vm285_vm1, %v7418_v16, %v14021_v49  ;;  %v14027_v63 = vld [vmem:[#allocation593_spill] sm:$0xff]  ;;  %v14038_v41 = vld [vmem:[#allocation534_spill] sm:$0xff] }
 0x8e4   : > { %v10689_v33 = vpop.permute.xlu1 %4978  ;;  %v4971_v26 = vpop.permute.xlu0 %4970  ;;  %v14034_v40 = vld [vmem:[#allocation657_spill] sm:$0xff] }
 0x8e5   : > { %v5279_v6 = vsel %vm13242_vm15, %v5247_v62, %v4971_v26  ;;  %v5284_v26 = vsel %vm13242_vm15, %v5252_v1, %v10561_v20  ;;  %v5473_v20 = vld [vmem:[%s13155_s2 + $0x60] sm:$0xf]  ;;  %v14023_v1 = vld [vmem:[#allocation560_spill] sm:$0xff] }
 0x8e6   : > { %7297 = vmatpush.msk.msra.mxu1 %vm13234_vm0, %v5473_v20  ;;  %7368 = vmatpush.msk.msrb.mxu3 %vm13234_vm0, %v5473_v20  ;;  %v14028_v20 = vld [vmem:[#allocation609_spill] sm:$0xff]  ;;  %vm13239_vm0 = vcmask 818176  }
 0x8e7   : > { %5354 = vrot.lane.b32.xlu2 %v5279_v6, %s7484_s23  ;;  %v7414_v6 = vld [vmem:[#allocation2 + $0x121] sm:$0xff]  ;;  %v7421_v49 = vld [vmem:[#allocation2 + $0xf9] sm:$0xff] }
 0x8e8   : > { %v5062_v60 = vsel %vm285_vm1, %v7414_v6, %v14005_v11  ;;  %5578 = vmatpush.msra.mxu1 %v5472_v54  ;;  %7369 = vmatpush.msrb.mxu3 %v5472_v54  ;;  %v14024_v6 = vld [vmem:[#allocation561_spill] sm:$0xff] }
 0x8e9   : > { %v5094_v3 = vsel %vm3558_vm9, %v5062_v60, %v14007_v10  ;;  %v5099_v11 = vsel %vm3558_vm9, %v5067_v5, %v14024_v6  ;;  %v5470_v60 = vld [vmem:[%s13155_s2 + $0x48] sm:$0xff]  ;;  %v7420_v5 = vld [vmem:[#allocation2 + $0x199] sm:$0xff] }
 0x8ea   : > { %v5126_v52 = vsel %vm3591_vm10, %v5094_v3, %v14009_v24  ;;  %5579 = vmatpush.msra.mxu1 %v5471_v28  ;;  %7370 = vmatpush.msrb.mxu3 %v5471_v28  ;;  %v5131_v51 = vsel %vm3591_vm10, %v5099_v11, %v14025_v53  ;;  %v14026_v10 = vld [vmem:[#allocation583_spill] sm:$0xff]  ;;  %v14043_v11 = vld [vmem:[#allocation549_spill] sm:$0xff] }
 0x8eb   : > { %v5158_v13 = vsel %vm13238_vm11, %v5126_v52, %v14011_v14  ;;  %v14029_v24 = vld [vmem:[#allocation615_spill] sm:$0xff]  ;;  %v5468_v14 = vld [vmem:[%s13155_s2 + $0x38] sm:$0xff] }
 0x8ec   : > { %v4985_v59 = vpop.permute.xlu1 %4984  ;;  %v4977_v23 = vpop.permute.xlu0 %4976  ;;  %v5190_v45 = vsel %vm13237_vm12, %v5158_v13, %v14013_v29  ;;  %5580 = vmatpush.msra.mxu1 %v5470_v60  ;;  %7371 = vmatpush.msrb.mxu3 %v5470_v60  ;;  %v5163_v52 = vsel %vm13238_vm11, %v5131_v51, %v14029_v24  ;;  %v14031_v13 = vld [vmem:[#allocation633_spill] sm:$0xff]  ;;  %v5466_v6 = vld [vmem:[%s13155_s2 + $0x28] sm:$0xff]  ;;  %v14045_v51 = vld [vmem:[#allocation588_spill] sm:$0xff] }
 0x8ed   : > { %v5282_v17 = vsel %vm13242_vm15, %v5250_v21, %v4977_v23  ;;  %v5222_v44 = vsel %vm3690_vm13, %v5190_v45, %v14015_v39  ;;  %v14018_v21 = vld [vmem:[#allocation685_spill] sm:$0xff]  ;;  %v14033_v45 = vld [vmem:[#allocation647_spill] sm:$0xff] }
 0x8ee   : > { %5360 = vrot.lane.b32.xlu1 %v5282_v17, %s7484_s23  ;;  %v5254_v15 = vsel %vm3723_vm14, %v5222_v44, %v14017_v0  ;;  %v5260_v23 = vsel %vm3723_vm14, %v5228_v31, %v14018_v21  ;;  %v5195_v8 = vsel %vm13237_vm12, %v5163_v52, %v14033_v45  ;;  %5581 = vmatpush.msra.mxu1 %v5469_v35  ;;  %v14035_v44 = vld [vmem:[#allocation668_spill] sm:$0xff]  ;;  %v14036_v31 = vld [vmem:[#allocation675_spill] sm:$0xff]  ;;  %v14048_v52 = vld [vmem:[#allocation621_spill] sm:$0xff] }
 0x8ef   : > { %5358 = vrot.lane.b32.xlu2 %v5281_v27, %s7484_s23  ;;  %v5286_v48 = vsel %vm13242_vm15, %v5254_v15, %v4985_v59  ;;  %v7416_v27 = vld [vmem:[#allocation2 + $0x189] sm:$0xff]  ;;  %7372 = vmatpush.msrb.mxu3 %v5469_v35  ;;  %v5227_v39 = vsel %vm3690_vm13, %v5195_v8, %v14034_v40  ;;  %v14044_v35 = vld [vmem:[#allocation573_spill] sm:$0xff]  ;;  %v14052_v8 = vld [vmem:[#allocation634_spill] sm:$0xff] }
 0x8f0   : > { %v5071_v2 = vsel %vm285_vm1, %v7416_v27, %v14019_v4  ;;  %v14022_v59 = vld [vmem:[#allocation548_spill] sm:$0xff]  ;;  %v14037_v15 = vld [vmem:[#allocation687_spill] sm:$0xff]  ;;  %5582 = vmatpush.msra.mxu1 %v5468_v14  ;;  %v5464_v45 = vld [vmem:[%s13155_s2 + $0x18] sm:$0xff] }
 0x8f1   : > { %v5101_v19 = vsel %vm3558_vm9, %v5069_v58, %v14022_v59  ;;  %7373 = vmatpush.msrb.mxu3 %v5468_v14  ;;  %v14040_v58 = vld [vmem:[#allocation518_spill] sm:$0xff]  ;;  %v14041_v59 = vld [vmem:[#allocation551_spill] sm:$0xff] }
 0x8f2   : > { %v5133_v3 = vsel %vm3591_vm10, %v5101_v19, %v14026_v10 }
 0x8f3   : > { %v5165_v18 = vsel %vm13238_vm11, %v5133_v3, %v14030_v42  ;;  %v5005_v3 = vpop.permute.xlu2 %5004 }
 0x8f4   : > { %v10743_v36 = vpop.permute.xlu1 %4990  ;;  %v10745_v62 = vpop.permute.xlu0 %4982  ;;  %v5197_v9 = vsel %vm13237_vm12, %v5165_v18, %v14031_v13  ;;  %v14049_v18 = vld [vmem:[#allocation598_spill] sm:$0xff]  ;;  %v14050_v13 = vld [vmem:[#allocation636_spill] sm:$0xff] }
 0x8f5   : > { %v5229_v34 = vsel %vm3690_vm13, %v5197_v9, %v14035_v44 }
 0x8f6   : > { %5364 = vrot.lane.b32.xlu1 %v5284_v26, %s7484_s23  ;;  %v5103_v26 = vsel %vm3558_vm9, %v5071_v2, %v14023_v1  ;;  %v14042_v1 = vld [vmem:[#allocation564_spill] sm:$0xff] }
 0x8f7   : > { %v5135_v61 = vsel %vm3591_vm10, %v5103_v26, %v14027_v63  ;;  %v5465_v63 = vld [vmem:[%s13155_s2 + $0x20] sm:$0xff] }
 0x8f8   : > { %v5167_v54 = vsel %vm13238_vm11, %v5135_v61, %v14028_v20  ;;  %v14046_v61 = vld [vmem:[#allocation578_spill] sm:$0xff] }
 0x8f9   : > { %v5199_v29 = vsel %vm13237_vm12, %v5167_v54, %v14032_v25  ;;  %v14047_v54 = vld [vmem:[#allocation617_spill] sm:$0xff]  ;;  %v14051_v25 = vld [vmem:[#allocation650_spill] sm:$0xff] }
 0x8fa   : > { %v5231_v0 = vsel %vm3690_vm13, %v5199_v29, %v14036_v31 }
 0x8fb   : > { %v5263_v21 = vsel %vm3723_vm14, %v5231_v0, %v14037_v15  ;;  %v14055_v0 = vld [vmem:[#allocation665_spill] sm:$0xff] }
 0x8fc   : > { %v4997_v12 = vpop.permute.xlu1 %4996  ;;  %v10786_v17 = vpop.permute.xlu0 %4988 }
 0x8fd   : > { %v5292_v57 = vsel %vm13242_vm15, %v5260_v23, %v4997_v12  ;;  %v5259_v23 = vsel %vm3723_vm14, %v5227_v39, %v10458_v47  ;;  %v5261_v12 = vsel %vm3723_vm14, %v5229_v34, %v10502_v38  ;;  %v5070_v47 = vsel %vm285_vm1, %v7419_v37, %v14038_v41  ;;  %v14039_v38 = vld [vmem:[#allocation538_spill] sm:$0xff]  ;;  %v14053_v39 = vld [vmem:[#allocation660_spill] sm:$0xff]  ;;  %v14054_v34 = vld [vmem:[#allocation671_spill] sm:$0xff] }
 0x8fe   : > { %5380 = vrot.lane.b32.xlu2 %v5292_v57, %s7484_s23  ;;  %5368 = vrot.lane.b32.xlu1 %v5286_v48, %s7484_s23  ;;  %v5467_v57 = vld [vmem:[%s13155_s2 + $0x30] sm:$0xff]  ;;  %v5293_v27 = vsel %vm13242_vm15, %v5261_v12, %v4999_v7  ;;  %v5072_v16 = vsel %vm285_vm1, %v7420_v5, %v14039_v38  ;;  %v5059_v7 = vsel %vm285_vm1, %v7421_v49, %v14040_v58  ;;  %v14057_v37 = vld [vmem:[#allocation530_spill] sm:$0xff] }
 0x8ff   : > { %v5104_v19 = vsel %vm3558_vm9, %v5072_v16, %v14041_v59  ;;  %v5102_v26 = vsel %vm3558_vm9, %v5070_v47, %v14042_v1  ;;  %5583 = vmatpush.msra.mxu1 %v5467_v57  ;;  %v5091_v60 = vsel %vm3558_vm9, %v5059_v7, %v14043_v11  ;;  %7374 = vmatpush.msrb.mxu3 %v5467_v57  ;;  %v7423_v41 = vld [vmem:[#allocation2 + $0x1b9] sm:$0xff]  ;;  %v7424_v38 = vld [vmem:[#allocation2 + $0x111] sm:$0xff]  ;;  %v14059_v16 = vld [vmem:[#allocation527_spill] sm:$0xff] }
 0x900   : > { %v5134_v53 = vsel %vm3591_vm10, %v5102_v26, %v14044_v35  ;;  %v5136_v10 = vsel %vm3591_vm10, %v5104_v19, %v14045_v51  ;;  %v5123_v20 = vsel %vm3591_vm10, %v5091_v60, %v14046_v61  ;;  %v5061_v49 = vsel %vm285_vm1, %v7424_v38, %v14059_v16  ;;  %v14060_v58 = vld [vmem:[#allocation554_spill] sm:$0xff]  ;;  %v14062_v1 = vld [vmem:[#allocation556_spill] sm:$0xff]  ;;  %v14067_v61 = vld [vmem:[#allocation623_spill] sm:$0xff] }
 0x901   : > { %v5166_v24 = vsel %vm13238_vm11, %v5134_v53, %v14047_v54  ;;  %v5168_v42 = vsel %vm13238_vm11, %v5136_v10, %v14048_v52  ;;  %5584 = vmatpush.msra.mxu1 %v5466_v6  ;;  %v5155_v14 = vsel %vm13238_vm11, %v5123_v20, %v14049_v18  ;;  %7375 = vmatpush.msrb.mxu3 %v5466_v6  ;;  %v14061_v59 = vld [vmem:[#allocation558_spill] sm:$0xff]  ;;  %v14063_v6 = vld [vmem:[#allocation569_spill] sm:$0xff]  ;;  %v14064_v60 = vld [vmem:[#allocation592_spill] sm:$0xff] }
 0x902   : > { %v5200_v9 = vsel %vm13237_vm12, %v5168_v42, %v14050_v13  ;;  %v5198_v29 = vsel %vm13237_vm12, %v5166_v24, %v14051_v25  ;;  %v5187_v40 = vsel %vm13237_vm12, %v5155_v14, %v14052_v8  ;;  %v5093_v26 = vsel %vm3558_vm9, %v5061_v49, %v14062_v1  ;;  %v5461_v53 = vld [vmem:[%s13155_s2] sm:$0xff]  ;;  %v14065_v51 = vld [vmem:[#allocation568_spill] sm:$0xff]  ;;  %v14069_v52 = vld [vmem:[#allocation639_spill] sm:$0xff]  ;;  %v5011_v13 = vpop.permute.xlu2 %5010 }
 0x903   : > { %v5230_v44 = vsel %vm3690_vm13, %v5198_v29, %v14053_v39  ;;  %v5232_v31 = vsel %vm3690_vm13, %v5200_v9, %v14054_v34  ;;  %5585 = vmatpush.msra.mxu1 %v5465_v63  ;;  %v5219_v15 = vsel %vm3690_vm13, %v5187_v40, %v14055_v0  ;;  %7376 = vmatpush.msrb.mxu3 %v5465_v63  ;;  %v14068_v54 = vld [vmem:[#allocation610_spill] sm:$0xff]  ;;  %v14070_v18 = vld [vmem:[#allocation644_spill] sm:$0xff]  ;;  %v14071_v9 = vld [vmem:[#allocation641_spill] sm:$0xff] }
 0x904   : > { %v5003_v28 = vpop.permute.xlu1 %5002  ;;  %v4995_v48 = vpop.permute.xlu0 %4994  ;;  %v5125_v10 = vsel %vm3591_vm10, %v5093_v26, %v14065_v51  ;;  %v14072_v29 = vld [vmem:[#allocation655_spill] sm:$0xff]  ;;  %v14073_v8 = vld [vmem:[#allocation674_spill] sm:$0xff]  ;;  %v14083_v16 = vld [vmem:[#allocation616_spill] sm:$0xff] }
 0x905   : > { %v5295_v4 = vsel %vm13242_vm15, %v5263_v21, %v5003_v28  ;;  %v5291_v2 = vsel %vm13242_vm15, %v5259_v23, %v4995_v48  ;;  %v5262_v21 = vsel %vm3723_vm14, %v5230_v44, %v10479_v55  ;;  %v5264_v23 = vsel %vm3723_vm14, %v5232_v31, %v10526_v46  ;;  %v5463_v28 = vld [vmem:[%s13155_s2 + $0x10] sm:$0xff]  ;;  %v14056_v48 = vld [vmem:[#allocation679_spill] sm:$0xff]  ;;  %5586 = vmatpush.msra.mxu1 %v5464_v45  ;;  %v14074_v39 = vld [vmem:[#allocation654_spill] sm:$0xff] }
 0x906   : > { %5382 = vrot.lane.b32.xlu2 %v5293_v27, %s7484_s23  ;;  %5386 = vrot.lane.b32.xlu1 %v5295_v4, %s7484_s23  ;;  %v5251_v57 = vsel %vm3723_vm14, %v5219_v15, %v14056_v48  ;;  %v5296_v27 = vsel %vm13242_vm15, %v5264_v23, %v5005_v3  ;;  %v14058_v46 = vld [vmem:[#allocation540_spill] sm:$0xff]  ;;  %v14066_v3 = vld [vmem:[#allocation613_spill] sm:$0xff]  ;;  %v5157_v24 = vsel %vm13238_vm11, %v5125_v10, %v14068_v54  ;;  %v7425_v23 = vld [vmem:[#allocation2 + $0x1a1] sm:$0xff] }
 0x907   : > { %5378 = vrot.lane.b32.xlu0 %v5291_v2, %s7484_s23  ;;  %v7422_v2 = vld [vmem:[#allocation2 + $0x139] sm:$0xff]  ;;  %v5075_v47 = vsel %vm285_vm1, %v7423_v41, %v14058_v46  ;;  %v5283_v5 = vsel %vm13242_vm15, %v5251_v57, %v10689_v33  ;;  %5587 = vmatpush.msra.mxu1 %v5463_v28  ;;  %v5462_v33 = vld [vmem:[%s13155_s2 + $0x8] sm:$0xff]  ;;  %v5189_v25 = vsel %vm13237_vm12, %v5157_v24, %v14071_v9 }
 0x908   : > { %v5064_v55 = vsel %vm285_vm1, %v7422_v2, %v14057_v37  ;;  %v5107_v7 = vsel %vm3558_vm9, %v5075_v47, %v14060_v58  ;;  %7377 = vmatpush.msrb.mxu3 %v5464_v45  ;;  %v5221_v44 = vsel %vm3690_vm13, %v5189_v25, %v14074_v39  ;;  %v14076_v57 = vld [vmem:[#allocation533_spill] sm:$0xff]  ;;  %v14079_v37 = vld [vmem:[#allocation576_spill] sm:$0xff]  ;;  %v14081_v46 = vld [vmem:[#allocation619_spill] sm:$0xff] }
 0x909   : > { %v5096_v19 = vsel %vm3558_vm9, %v5064_v55, %v14061_v59  ;;  %v5139_v35 = vsel %vm3591_vm10, %v5107_v7, %v14064_v60  ;;  %5588 = vmatpush.msra.mxu1 %v5462_v33  ;;  %v5253_v0 = vsel %vm3723_vm14, %v5221_v44, %v10420_v43  ;;  %v14080_v55 = vld [vmem:[#allocation577_spill] sm:$0xff]  ;;  %v14084_v58 = vld [vmem:[#allocation652_spill] sm:$0xff]  ;;  %v14086_v1 = vld [vmem:[#allocation663_spill] sm:$0xff] }
 0x90a   : > { %v5128_v11 = vsel %vm3591_vm10, %v5096_v19, %v14063_v6  ;;  %v5171_v20 = vsel %vm13238_vm11, %v5139_v35, %v14067_v61  ;;  %7378 = vmatpush.msrb.mxu3 %v5463_v28  ;;  %v5285_v48 = vsel %vm13242_vm15, %v5253_v0, %v10745_v62  ;;  %v14085_v19 = vld [vmem:[#allocation627_spill] sm:$0xff]  ;;  %v14087_v6 = vld [vmem:[#allocation664_spill] sm:$0xff]  ;;  %v14095_v25 = vld [vmem:[#allocation29_spill] sm:$0xff] }
 0x90b   : > { %v5160_v63 = vsel %vm13238_vm11, %v5128_v11, %v14066_v3  ;;  %v5203_v42 = vsel %vm13237_vm12, %v5171_v20, %v14069_v52  ;;  %5589 = vmatpush.msra.mxu1 %v5461_v53  ;;  %v14088_v35 = vld [vmem:[#allocation27_spill] sm:$0xff]  ;;  %v14089_v20 = vld [vmem:[#allocation522_spill] sm:$0xff]  ;;  %v14098_v44 = vld [vmem:[#allocation669_spill] sm:$0xff] }
 0x90c   : > { %v5001_v12 = vpop.permute.xlu0 %5000  ;;  %v5192_v14 = vsel %vm13237_vm12, %v5160_v63, %v14070_v18  ;;  %v5235_v40 = vsel %vm3690_vm13, %v5203_v42, %v14073_v8  ;;  %7379 = vmatpush.msrb.mxu3 %v5462_v33  ;;  %v804_v3 = vld [vmem:[#allocation2 + $0x8] sm:$0xff]  ;;  %v14092_v42 = vld [vmem:[#allocation24_spill] sm:$0xff] }
 0x90d   : > { %v5294_v4 = vsel %vm13242_vm15, %v5262_v21, %v5001_v12  ;;  %v5224_v45 = vsel %vm3690_vm13, %v5192_v14, %v14072_v29  ;;  %v5267_v31 = vsel %vm3723_vm14, %v5235_v40, %v10547_v22  ;;  %v14075_v12 = vld [vmem:[#allocation536_spill] sm:$0xff]  ;;  %v7427_v61 = vld [vmem:[#allocation2 + $0x141] sm:$0xff]  ;;  %v3527_v18 = vsel %vm285_vm1, %v804_v3, %v14092_v42  ;;  %v14097_v40 = vld [vmem:[#allocation21_spill] sm:$0xff] }
 0x90e   : > { %5388 = vrot.lane.b32.xlu1 %v5296_v27, %s7484_s23  ;;  %5384 = vrot.lane.b32.xlu2 %v5294_v4, %s7484_s23  ;;  %v5256_v34 = vsel %vm3723_vm14, %v5224_v45, %v10437_v50  ;;  %v5299_v15 = vsel %vm13242_vm15, %v5267_v31, %v5011_v13  ;;  %v5073_v28 = vsel %vm285_vm1, %v7425_v23, %v14075_v12  ;;  %v803_v50 = vld [vmem:[#allocation2] sm:$0xff]  ;;  %v7426_v22 = vld [vmem:[#allocation2 + $0x129] sm:$0xff] }
 0x90f   : > { %5362 = vrot.lane.b32.xlu0 %v5283_v5, %s7484_s23  ;;  %v5288_v21 = vsel %vm13242_vm15, %v5256_v34, %v10786_v17  ;;  %v5063_v43 = vsel %vm285_vm1, %v7426_v22, %v14076_v57  ;;  %v14077_v27 = vld [vmem:[#allocation566_spill] sm:$0xff]  ;;  %7380 = vmatpush.msrb.mxu3 %v5461_v53  ;;  %v14082_v5 = vld [vmem:[#allocation15_spill] sm:$0xff]  ;;  %v5065_v54 = vsel %vm285_vm1, %v7427_v61, %v14089_v20  ;;  %v14093_v14 = vld [vmem:[#allocation584_spill] sm:$0xff] }
 0x910   : > { %v5105_v4 = vsel %vm3558_vm9, %v5073_v28, %v14077_v27  ;;  %v14078_v17 = vld [vmem:[#allocation542_spill] sm:$0xff]  ;;  %v3526_v38 = vsel %vm285_vm1, %v803_v50, %v14082_v5  ;;  %v14091_v52 = vld [vmem:[#allocation555_spill] sm:$0xff]  ;;  %v14094_v13 = vld [vmem:[#allocation604_spill] sm:$0xff]  ;;  %v3560_v39 = vsel %vm3558_vm9, %v3527_v18, %v14097_v40 }
 0x911   : > { %v5095_v2 = vsel %vm3558_vm9, %v5063_v43, %v14078_v17  ;;  %v5137_v62 = vsel %vm3591_vm10, %v5105_v4, %v14079_v37  ;;  %v3559_v53 = vsel %vm3558_vm9, %v3526_v38, %v14088_v35  ;;  %v14096_v45 = vld [vmem:[#allocation640_spill] sm:$0xff]  ;;  %v14099_v31 = vld [vmem:[#allocation683_spill] sm:$0xff]  ;;  %v7429_v50 = vld [vmem:[#allocation2 + $0x20] sm:$0xff] }
 0x912   : > { %v5127_v41 = vsel %vm3591_vm10, %v5095_v2, %v14080_v55  ;;  %v5169_v47 = vsel %vm13238_vm11, %v5137_v62, %v14081_v46  ;;  %v14101_v12 = vld [vmem:[#allocation43_spill] sm:$0xff]  ;;  %v14102_v22 = vld [vmem:[#allocation18_spill] sm:$0xff]  ;;  %v7430_v2 = vld [vmem:[#allocation2 + $0x1b1] sm:$0xff] }
 0x913   : > { %v5159_v49 = vsel %vm13238_vm11, %v5127_v41, %v14083_v16  ;;  %v5201_v7 = vsel %vm13237_vm12, %v5169_v47, %v14084_v58  ;;  %v3529_v57 = vsel %vm285_vm1, %v7429_v50, %v14102_v22  ;;  %v14103_v43 = vld [vmem:[#allocation35_spill] sm:$0xff]  ;;  %v14105_v37 = vld [vmem:[#allocation529_spill] sm:$0xff]  ;;  %v14108_v47 = vld [vmem:[#allocation28_spill] sm:$0xff] }
 0x914   : > { %v5007_v59 = vpop.permute.xlu0 %5006  ;;  %v5191_v33 = vsel %vm13237_vm12, %v5159_v49, %v14085_v19  ;;  %v5233_v26 = vsel %vm3690_vm13, %v5201_v7, %v14086_v1  ;;  %v3593_v27 = vsel %vm3591_vm10, %v3560_v39, %v14103_v43  ;;  %v14104_v4 = vld [vmem:[#allocation203_spill] sm:$0xff]  ;;  %v5074_v62 = vsel %vm285_vm1, %v7430_v2, %v14105_v37  ;;  %v14109_v38 = vld [vmem:[#allocation262_spill] sm:$0xff]  ;;  %v14110_v49 = vld [vmem:[#allocation597_spill] sm:$0xff] }
 0x915   : > { %v5223_v11 = vsel %vm3690_vm13, %v5191_v33, %v14087_v6  ;;  %v5265_v60 = vsel %vm3723_vm14, %v5233_v26, %v10500_v32  ;;  %v14090_v32 = vld [vmem:[#allocation33_spill] sm:$0xff]  ;;  %v14106_v55 = vld [vmem:[#allocation219_spill] sm:$0xff]  ;;  %v14114_v6 = vld [vmem:[#allocation612_spill] sm:$0xff] }
 0x916   : > { %5394 = vrot.lane.b32.xlu1 %v5299_v15, %s7484_s23  ;;  %5372 = vrot.lane.b32.xlu2 %v5288_v21, %s7484_s23  ;;  %v5255_v51 = vsel %vm3723_vm14, %v5223_v11, %v10460_v56  ;;  %v5297_v10 = vsel %vm13242_vm15, %v5265_v60, %v5007_v59  ;;  %v3592_v24 = vsel %vm3591_vm10, %v3559_v53, %v14090_v32  ;;  %v7428_v15 = vld [vmem:[#allocation2 + $0x18] sm:$0xff]  ;;  %v14100_v21 = vld [vmem:[#allocation23_spill] sm:$0xff]  ;;  %v14117_v3 = vld [vmem:[#allocation358_spill] sm:$0xff] }
 0x917   : > { %5366 = vrot.lane.b32.xlu0 %v5285_v48, %s7484_s23  ;;  %v5287_v63 = vsel %vm13242_vm15, %v5255_v51, %v10601_v30  ;;  %v5097_v56 = vsel %vm3558_vm9, %v5065_v54, %v14091_v52  ;;  %v3625_v29 = vsel %vm13238_vm11, %v3592_v24, %v14095_v25  ;;  %v3528_v23 = vsel %vm285_vm1, %v7428_v15, %v14100_v21  ;;  %v14111_v7 = vld [vmem:[#allocation31_spill] sm:$0xff]  ;;  %v14112_v19 = vld [vmem:[#allocation41_spill] sm:$0xff]  ;;  %v14118_v61 = vld [vmem:[#allocation678_spill] sm:$0xff] }
 0x918   : > { %v5129_v30 = vsel %vm3591_vm10, %v5097_v56, %v14093_v14  ;;  %v3658_v28 = vsel %vm13237_vm12, %v3625_v29, %v14101_v12  ;;  %v3561_v5 = vsel %vm3558_vm9, %v3528_v23, %v14108_v47  ;;  %v3562_v59 = vsel %vm3558_vm9, %v3529_v57, %v14111_v7  ;;  %v14113_v1 = vld [vmem:[#allocation299_spill] sm:$0xff]  ;;  %v14116_v53 = vld [vmem:[#allocation649_spill] sm:$0xff]  ;;  %v14122_v18 = vld [vmem:[#allocation688_spill] sm:$0xff] }
 0x919   : > { %v5161_v9 = vsel %vm13238_vm11, %v5129_v30, %v14094_v13  ;;  %v3691_v17 = vsel %vm3690_vm13, %v3658_v28, %v14104_v4  ;;  %v3626_v33 = vsel %vm13238_vm11, %v3593_v27, %v14112_v19  ;;  %v14115_v60 = vld [vmem:[#allocation315_spill] sm:$0xff]  ;;  %v14119_v54 = vld [vmem:[#allocation25_spill] sm:$0xff]  ;;  %v14123_v30 = vld [vmem:[#allocation38_spill] sm:$0xff] }
 0x91a   : > { %v5193_v8 = vsel %vm13237_vm12, %v5161_v9, %v14096_v45  ;;  %v3724_v41 = vsel %vm3723_vm14, %v3691_v17, %v14106_v55  ;;  %v3594_v32 = vsel %vm3591_vm10, %v3561_v5, %v14119_v54  ;;  %v14120_v24 = vld [vmem:[#allocation37_spill] sm:$0xff]  ;;  %v14121_v56 = vld [vmem:[#allocation395_spill] sm:$0xff]  ;;  %v3659_v13 = vsel %vm13237_vm12, %v3626_v33, %v14123_v30  ;;  %v14126_v40 = vld [vmem:[#allocation454_spill] sm:$0xff] }
 0x91b   : > { %v5225_v34 = vsel %vm3690_vm13, %v5193_v8, %v14098_v44  ;;  %v3757_v16 = vsel %vm13242_vm15, %v3724_v41, %v14109_v38  ;;  %v3595_v52 = vsel %vm3591_vm10, %v3562_v59, %v14120_v24  ;;  %v14124_v9 = vld [vmem:[#allocation411_spill] sm:$0xff]  ;;  %v7431_v44 = vld [vmem:[#allocation2 + $0x30] sm:$0xff]  ;;  %v7432_v28 = vld [vmem:[#allocation2 + $0x38] sm:$0xff] }
 0x91c   : > { %v5257_v0 = vsel %vm3723_vm14, %v5225_v34, %v14099_v31  ;;  %v3790_v26 = vsel %vm3789_vm3, %v3757_v16, %v14113_v1  ;;  %v14125_v45 = vld [vmem:[#allocation199_spill] sm:$0xff]  ;;  %v14131_v22 = vld [vmem:[#allocation252_spill] sm:$0xff]  ;;  %v14135_v55 = vld [vmem:[#allocation34_spill] sm:$0xff] }
 0x91d   : > { %v5289_v48 = vsel %vm13242_vm15, %v5257_v0, %v10743_v36  ;;  %v14107_v36 = vld [vmem:[#allocation563_spill] sm:$0xff]  ;;  %v3823_v35 = vsel %vm13240_vm2, %v3790_v26, %v14115_v60  ;;  %v3692_v8 = vsel %vm3690_vm13, %v3659_v13, %v14125_v45  ;;  %v14128_v0 = vld [vmem:[#allocation236_spill] sm:$0xff]  ;;  %v3628_v41 = vsel %vm13238_vm11, %v3595_v52, %v14135_v55  ;;  %v14137_v5 = vld [vmem:[#allocation74_spill] sm:$0xff] }
 0x91e   : > { %5390 = vrot.lane.b32.xlu2 %v5297_v10, %s7484_s23  ;;  %v5106_v46 = vsel %vm3558_vm9, %v5074_v62, %v14107_v36  ;;  %v5009_v10 = vpop.permute.xlu1 %5008  ;;  %v14127_v34 = vld [vmem:[#allocation55_spill] sm:$0xff]  ;;  %v3725_v15 = vsel %vm3723_vm14, %v3692_v8, %v14128_v0  ;;  %v14132_v27 = vld [vmem:[#allocation40_spill] sm:$0xff]  ;;  %v14136_v36 = vld [vmem:[#allocation50_spill] sm:$0xff] }
 0x91f   : > { %5370 = vrot.lane.b32.xlu0 %v5287_v63, %s7484_s23  ;;  %v5138_v58 = vsel %vm3591_vm10, %v5106_v46, %v14110_v49  ;;  %v3856_v63 = vsel %vm13236_vm4, %v3823_v35, %v14117_v3  ;;  %v3530_v31 = vsel %vm285_vm1, %v7431_v44, %v14127_v34  ;;  %v14129_v21 = vld [vmem:[#allocation491_spill] sm:$0xff]  ;;  %v3758_v57 = vsel %vm13242_vm15, %v3725_v15, %v14131_v22  ;;  %v14133_v17 = vld [vmem:[#allocation64_spill] sm:$0xff]  ;;  %v14140_v19 = vld [vmem:[#allocation57_spill] sm:$0xff] }
 0x920   : > { %v5170_v11 = vsel %vm13238_vm11, %v5138_v58, %v14114_v6  ;;  %v3889_v42 = vsel %vm3888_vm6, %v3856_v63, %v14121_v56  ;;  %v3627_v4 = vsel %vm13238_vm11, %v3594_v32, %v14132_v27  ;;  %v14134_v37 = vld [vmem:[#allocation295_spill] sm:$0xff]  ;;  %v3563_v46 = vsel %vm3558_vm9, %v3530_v31, %v14136_v36  ;;  %v7433_v47 = vld [vmem:[#allocation2 + $0x170] sm:$0xff]  ;;  %v14143_v35 = vld [vmem:[#allocation65_spill] sm:$0xff] }
 0x921   : > { %v5202_v51 = vsel %vm13237_vm12, %v5170_v11, %v14116_v53  ;;  %v3922_v25 = vsel %vm13235_vm5, %v3889_v42, %v14124_v9  ;;  %vm13241_vm5 = vcmask 523264   ;;  %v3791_v62 = vsel %vm3789_vm3, %v3758_v57, %v14134_v37  ;;  %v14138_v16 = vld [vmem:[#allocation332_spill] sm:$0xff]  ;;  %v7434_v58 = vld [vmem:[#allocation2 + $0x168] sm:$0xff]  ;;  %v14145_v63 = vld [vmem:[#allocation82_spill] sm:$0xff] }
 0x922   : > { %v5234_v20 = vsel %vm3690_vm13, %v5202_v51, %v14118_v61  ;;  %v3955_v39 = vsel %vm3954_vm8, %v3922_v25, %v14126_v40  ;;  %v3557_v38 = vsel %vm285_vm1, %v7433_v47, %v14137_v5  ;;  %v3824_v49 = vsel %vm13240_vm2, %v3791_v62, %v14138_v16  ;;  %v14139_v7 = vld [vmem:[#allocation56_spill] sm:$0xff]  ;;  %v7435_v1 = vld [vmem:[#allocation2 + $0x48] sm:$0xff]  ;;  %v14148_v52 = vld [vmem:[#allocation73_spill] sm:$0xff] }
 0x923   : > { %v5266_v14 = vsel %vm3723_vm14, %v5234_v20, %v14122_v18  ;;  %v3988_v23 = vsel %vm3987_vm7, %v3955_v39, %v14129_v21  ;;  %v3556_v59 = vsel %vm285_vm1, %v7434_v58, %v14139_v7  ;;  %v3660_v33 = vsel %vm13237_vm12, %v3627_v4, %v14140_v19  ;;  %v14141_v26 = vld [vmem:[#allocation59_spill] sm:$0xff]  ;;  %v14142_v11 = vld [vmem:[#allocation348_spill] sm:$0xff]  ;;  %v14149_v42 = vld [vmem:[#allocation66_spill] sm:$0xff] }
 0x924   : > { %v5298_v29 = vsel %vm13242_vm15, %v5266_v14, %v5009_v10  ;;  %v3532_v6 = vsel %vm285_vm1, %v7435_v1, %v14141_v26  ;;  %v3857_v60 = vsel %vm13236_vm4, %v3824_v49, %v14142_v11  ;;  %v3596_v53 = vsel %vm3591_vm10, %v3563_v46, %v14143_v35  ;;  %v14144_v51 = vld [vmem:[#allocation52_spill] sm:$0xff]  ;;  %v14146_v20 = vld [vmem:[#allocation391_spill] sm:$0xff]  ;;  %v14154_v8 = vld [vmem:[#allocation189_spill] sm:$0xff] }
 0x925   : > { %v7436_v3 = vld [vmem:[#allocation2 + $0x50] sm:$0xff]  ;;  %v3890_v54 = vsel %vm3888_vm6, %v3857_v60, %v14146_v20  ;;  %v14147_v32 = vld [vmem:[#allocation67_spill] sm:$0xff]  ;;  %v3589_v56 = vsel %vm3558_vm9, %v3556_v59, %v14148_v52  ;;  %v3590_v18 = vsel %vm3558_vm9, %v3557_v38, %v14149_v42  ;;  %vm14151_vm4 = vcmask 424960   ;;  %v14156_v34 = vld [vmem:[#allocation78_spill] sm:$0xff] }
 0x926   : > { %v3533_v61 = vsel %vm285_vm1, %v7436_v3, %v14145_v63  ;;  %v3629_v24 = vsel %vm13238_vm11, %v3596_v53, %v14147_v32  ;;  %v14150_v14 = vld [vmem:[#allocation428_spill] sm:$0xff]  ;;  %v5335_v13 = vpop.permute.xlu1 %5334  ;;  %v3693_v40 = vsel %vm3690_vm13, %v3660_v33, %v14154_v8  ;;  %v3623_v31 = vsel %vm3591_vm10, %v3590_v18, %v14156_v34  ;;  %v14162_v27 = vld [vmem:[#allocation269_spill] sm:$0xff]  ;;  %v14165_v36 = vld [vmem:[#allocation63_spill] sm:$0xff] }
 0x927   : > { %5374 = vrot.lane.b32.xlu0 %v5289_v48, %s7484_s23  ;;  %v14130_v48 = vld [vmem:[#allocation62_spill] sm:$0xff]  ;;  %v3923_v30 = vsel %vm14151_vm4, %v3890_v54, %v14150_v14  ;;  %v14152_v9 = vld [vmem:[#allocation76_spill] sm:$0xff]  ;;  %v14164_v62 = vld [vmem:[#allocation69_spill] sm:$0xff]  ;;  %v11173_v46 = vsel %vm13237_vm12, %v3629_v24, %v14165_v36  ;;  %vm14175_vm4 = vcmask 359424  }
 0x928   : > { %v3531_v50 = vsel %vm285_vm1, %v7432_v28, %v14130_v48  ;;  %v3565_v25 = vsel %vm3558_vm9, %v3532_v6, %v14152_v9  ;;  %v14155_v39 = vld [vmem:[#allocation444_spill] sm:$0xff]  ;;  %v14166_v47 = vld [vmem:[#allocation285_spill] sm:$0xff]  ;;  %v14167_v38 = vld [vmem:[#allocation79_spill] sm:$0xff] }
 0x929   : > { %v3564_v2 = vsel %vm3558_vm9, %v3531_v50, %v14133_v17  ;;  %v3956_v44 = vsel %vm3954_vm8, %v3923_v30, %v14155_v39  ;;  %v14157_v0 = vld [vmem:[#allocation72_spill] sm:$0xff]  ;;  %v11180_v16 = vsel %vm13238_vm11, %v3623_v31, %v14167_v38  ;;  %v7437_v49 = vld [vmem:[#allocation2 + $0x68] sm:$0xff]  ;;  %v14169_v7 = vld [vmem:[#allocation81_spill] sm:$0xff] }
 0x92a   : > { %v3597_v10 = vsel %vm3591_vm10, %v3564_v2, %v14144_v51  ;;  %v3566_v15 = vsel %vm3558_vm9, %v3533_v61, %v14157_v0  ;;  %v14158_v21 = vld [vmem:[#allocation232_spill] sm:$0xff]  ;;  %v14163_v2 = vld [vmem:[#allocation71_spill] sm:$0xff]  ;;  %v14171_v1 = vld [vmem:[#allocation86_spill] sm:$0xff] }
 0x92b   : > { %v14160_v50 = vld [vmem:[#allocation68_spill] sm:$0xff]  ;;  %v3661_v37 = vsel %vm13237_vm12, %v3628_v41, %v14163_v2  ;;  %v3599_v59 = vsel %vm3591_vm10, %v3566_v15, %v14169_v7  ;;  %v7438_v6 = vld [vmem:[#allocation2 + $0x60] sm:$0xff]  ;;  %v14172_v11 = vld [vmem:[#allocation87_spill] sm:$0xff] }
 0x92c   : > { %v3630_v22 = vsel %vm13238_vm11, %v3597_v10, %v14160_v50  ;;  %v14161_v57 = vld [vmem:[#allocation84_spill] sm:$0xff]  ;;  %v3632_v26 = vsel %vm13238_vm11, %v3599_v59, %v14171_v1  ;;  %v3534_v60 = vsel %vm285_vm1, %v7438_v6, %v14172_v11  ;;  %v14173_v35 = vld [vmem:[#allocation75_spill] sm:$0xff]  ;;  %v14174_v51 = vld [vmem:[#allocation365_spill] sm:$0xff] }
 0x92d   : > { %v14168_v58 = vld [vmem:[#allocation80_spill] sm:$0xff]  ;;  %v14177_v61 = vld [vmem:[#allocation89_spill] sm:$0xff]  ;;  %v14180_v42 = vld [vmem:[#allocation98_spill] sm:$0xff] }
 0x92e   : > { %v3535_v41 = vsel %vm285_vm1, %v7437_v49, %v14168_v58  ;;  %v14170_v19 = vld [vmem:[#allocation328_spill] sm:$0xff]  ;;  %v11202_v20 = vsel %vm13237_vm12, %v3630_v22, %v14177_v61  ;;  %v14179_v24 = vld [vmem:[#allocation381_spill] sm:$0xff]  ;;  %v7440_v14 = vld [vmem:[#allocation2 + $0x80] sm:$0xff] }
 0x92f   : > { %5392 = vrot.lane.b32.xlu0 %v5298_v29, %s7484_s23  ;;  %v14153_v29 = vld [vmem:[#allocation77_spill] sm:$0xff]  ;;  %v14176_v3 = vld [vmem:[#allocation88_spill] sm:$0xff]  ;;  %v14181_v30 = vld [vmem:[#allocation99_spill] sm:$0xff] }
 0x930   : > { %v5333_v12 = vpop.permute.xlu0 %5332  ;;  %v3622_v45 = vsel %vm3591_vm10, %v3589_v56, %v14153_v29  ;;  %v11198_v63 = vsel %vm13237_vm12, %v3632_v26, %v14176_v3  ;;  %v14178_v54 = vld [vmem:[#allocation92_spill] sm:$0xff]  ;;  %v7439_v56 = vld [vmem:[#allocation2 + $0x78] sm:$0xff]  ;;  %v7441_v9 = vld [vmem:[#allocation2 + $0x108] sm:$0xff] }
 0x931   : > { %v5429_v43 = vsel %vm13241_vm5, %v3988_v23, %v5333_v12  ;;  %v3726_v23 = vsel %vm3723_vm14, %v3693_v40, %v14158_v21  ;;  %v14159_v12 = vld [vmem:[#allocation487_spill] sm:$0xff]  ;;  %v11169_v55 = vsel %vm13238_vm11, %v3622_v45, %v14164_v62  ;;  %v3567_v32 = vsel %vm3558_vm9, %v3534_v60, %v14178_v54  ;;  %v14183_v45 = vld [vmem:[#allocation424_spill] sm:$0xff]  ;;  %v5337_v40 = vpop.permute.xlu2 %5336  ;;  %v14185_v39 = vld [vmem:[#allocation93_spill] sm:$0xff] }
 0x932   : > { %7298 = vmatmul.msk.f32.vlgmr.msra.gmra.mxu1 %vm13239_vm0, %v5429_v43  ;;  %v3989_v28 = vsel %vm3987_vm7, %v3956_v44, %v14159_v12  ;;  %v3598_v43 = vsel %vm3591_vm10, %v3565_v25, %v14161_v57  ;;  %v3759_v4 = vsel %vm13242_vm15, %v3726_v23, %v14162_v27  ;;  %v3536_v18 = vsel %vm285_vm1, %v7439_v56, %v14180_v42  ;;  %v14182_v25 = vld [vmem:[#allocation152_spill] sm:$0xff]  ;;  %v14187_v0 = vld [vmem:[#allocation206_spill] sm:$0xff]  ;;  %v14188_v21 = vld [vmem:[#allocation461_spill] sm:$0xff] }
 0x933   : > { %v5430_v17 = vsel %vm13241_vm5, %v3989_v28, %v5335_v13  ;;  %v3792_v5 = vsel %vm3789_vm3, %v3759_v4, %v14166_v47  ;;  %v3631_v53 = vsel %vm13238_vm11, %v3598_v43, %v14173_v35  ;;  %v3537_v13 = vsel %vm285_vm1, %v7440_v14, %v14181_v30  ;;  %v14186_v34 = vld [vmem:[#allocation104_spill] sm:$0xff]  ;;  %v14189_v12 = vld [vmem:[#allocation90_spill] sm:$0xff]  ;;  %v14190_v50 = vld [vmem:[#allocation95_spill] sm:$0xff] }
 0x934   : > { %v3825_v33 = vsel %vm13240_vm2, %v3792_v5, %v14170_v19  ;;  %v3548_v29 = vsel %vm285_vm1, %v7441_v9, %v14182_v25  ;;  %v3568_v44 = vsel %vm3558_vm9, %v3535_v41, %v14185_v39  ;;  %v3570_v31 = vsel %vm3558_vm9, %v3537_v13, %v14186_v34  ;;  %v14191_v57 = vld [vmem:[#allocation222_spill] sm:$0xff]  ;;  %v14192_v27 = vld [vmem:[#allocation477_spill] sm:$0xff]  ;;  %v14193_v2 = vld [vmem:[#allocation91_spill] sm:$0xff] }
 0x935   : > { %v3858_v10 = vsel %vm14175_vm4, %v3825_v33, %v14174_v51  ;;  %vm14184_vm4 = vcmask 424960   ;;  %v3694_v15 = vsel %vm3690_vm13, %v3661_v37, %v14187_v0  ;;  %v11226_v28 = vsel %vm13237_vm12, %v3631_v53, %v14189_v12  ;;  %v14194_v62 = vld [vmem:[#allocation141_spill] sm:$0xff]  ;;  %v14196_v49 = vld [vmem:[#allocation83_spill] sm:$0xff]  ;;  %v14197_v41 = vld [vmem:[#allocation102_spill] sm:$0xff] }
 0x936   : > { %v3891_v52 = vsel %vm3888_vm6, %v3858_v10, %v14179_v24  ;;  %v3601_v22 = vsel %vm3591_vm10, %v3568_v44, %v14190_v50  ;;  %v3727_v43 = vsel %vm3723_vm14, %v3694_v15, %v14191_v57  ;;  %v3569_v37 = vsel %vm3558_vm9, %v3536_v18, %v14193_v2  ;;  %v14195_v47 = vld [vmem:[#allocation265_spill] sm:$0xff]  ;;  %v14198_v59 = vld [vmem:[#allocation94_spill] sm:$0xff]  ;;  %v14200_v26 = vld [vmem:[#allocation96_spill] sm:$0xff] }
 0x937   : > { %v3924_v8 = vsel %vm14184_vm4, %v3891_v52, %v14183_v45  ;;  %v3581_v36 = vsel %vm3558_vm9, %v3548_v29, %v14194_v62  ;;  %v3760_v5 = vsel %vm13242_vm15, %v3727_v43, %v14195_v47  ;;  %v3600_v58 = vsel %vm3591_vm10, %v3567_v32, %v14196_v49  ;;  %v14199_v33 = vld [vmem:[#allocation302_spill] sm:$0xff]  ;;  %v14201_v11 = vld [vmem:[#allocation107_spill] sm:$0xff]  ;;  %v14202_v35 = vld [vmem:[#allocation85_spill] sm:$0xff] }
 0x938   : > { %v11156_v48 = vpop.permute.xlu0 %5338  ;;  %v3957_v23 = vsel %vm3954_vm8, %v3924_v8, %v14188_v21  ;;  %v3602_v7 = vsel %vm3591_vm10, %v3569_v37, %v14197_v41  ;;  %v3603_v19 = vsel %vm3591_vm10, %v3570_v31, %v14198_v59  ;;  %v3793_v1 = vsel %vm3789_vm3, %v3760_v5, %v14199_v33  ;;  %v14203_v51 = vld [vmem:[#allocation318_spill] sm:$0xff]  ;;  %v7442_v3 = vld [vmem:[#allocation2 + $0x90] sm:$0xff]  ;;  %v14204_v61 = vld [vmem:[#allocation97_spill] sm:$0xff] }
 0x939   : > { %v3990_v4 = vsel %vm3987_vm7, %v3957_v23, %v14192_v27  ;;  %v3633_v6 = vsel %vm13238_vm11, %v3600_v58, %v14200_v26  ;;  %v3635_v60 = vsel %vm13238_vm11, %v3602_v7, %v14201_v11  ;;  %v3634_v53 = vsel %vm13238_vm11, %v3601_v22, %v14202_v35  ;;  %v14205_v32 = vld [vmem:[#allocation101_spill] sm:$0xff]  ;;  %v14206_v52 = vld [vmem:[#allocation151_spill] sm:$0xff]  ;;  %v14211_v29 = vld [vmem:[#allocation158_spill] sm:$0xff] }
 0x93a   : > { %7299 = vmatmul.msk.f32.gmra.mxu1 %vm13239_vm0, %v5430_v17  ;;  %v5431_v38 = vsel %vm13241_vm5, %v3990_v4, %v5337_v40  ;;  %v3826_v10 = vsel %vm13240_vm2, %v3793_v1, %v14203_v51  ;;  %v3538_v54 = vsel %vm285_vm1, %v7442_v3, %v14204_v61  ;;  %v11264_v24 = vsel %vm13237_vm12, %v3633_v6, %v14205_v32  ;;  %v14207_v42 = vld [vmem:[#allocation361_spill] sm:$0xff]  ;;  %v14212_v8 = vld [vmem:[#allocation398_spill] sm:$0xff]  ;;  %v14213_v39 = vld [vmem:[#allocation108_spill] sm:$0xff] }
 0x93b   : > { %v3614_v56 = vsel %vm3591_vm10, %v3581_v36, %v14206_v52  ;;  %vm14208_vm4 = vcmask 359424   ;;  %v14209_v14 = vld [vmem:[#allocation105_spill] sm:$0xff]  ;;  %v11282_v44 = vsel %vm13237_vm12, %v3634_v53, %v14213_v39  ;;  %v14215_v0 = vld [vmem:[#allocation100_spill] sm:$0xff]  ;;  %v14216_v21 = vld [vmem:[#allocation414_spill] sm:$0xff]  ;;  %v7485_v52 = vmov -inf  }
 0x93c   : > { %v3859_v18 = vsel %vm14208_vm4, %v3826_v10, %v14207_v42  ;;  %v11272_v30 = vsel %vm13238_vm11, %v3603_v19, %v14209_v14  ;;  %v7443_v13 = vld [vmem:[#allocation2 + $0x98] sm:$0xff]  ;;  %v3647_v45 = vsel %vm13238_vm11, %v3614_v56, %v14211_v29  ;;  %v11288_v15 = vsel %vm13237_vm12, %v3635_v60, %v14215_v0  ;;  %v7444_v12 = vld [vmem:[#allocation2 + $0xb0] sm:$0xff]  ;;  %v14219_v57 = vld [vmem:[#allocation202_spill] sm:$0xff]  ;;  %5687 = vst.msk [vmem:[#allocation3] sm:$0xff] %vm285_vm1, %v7485_v52 }
 0x93d   : > { %v14210_v9 = vld [vmem:[#allocation113_spill] sm:$0xff]  ;;  %v3892_v40 = vsel %vm3888_vm6, %v3859_v18, %v14212_v8  ;;  %vm14217_vm4 = vcmask 424960   ;;  %v3695_v43 = vsel %vm3690_vm13, %v11173_v46, %v14219_v57  ;;  %v14220_v27 = vld [vmem:[#allocation220_spill] sm:$0xff]  ;;  %v14222_v62 = vld [vmem:[#allocation103_spill] sm:$0xff]  ;;  %5688 = vst.msk [vmem:[#allocation3 + $0x8] sm:$0xff] %vm285_vm1, %v7485_v52 }
 0x93e   : > { %v3539_v25 = vsel %vm285_vm1, %v7443_v13, %v14210_v9  ;;  %v14214_v34 = vld [vmem:[#allocation177_spill] sm:$0xff]  ;;  %v3925_v23 = vsel %vm14217_vm4, %v3892_v40, %v14216_v21  ;;  %v14223_v47 = vld [vmem:[#allocation239_spill] sm:$0xff]  ;;  %v14225_v58 = vld [vmem:[#allocation494_spill] sm:$0xff]  ;;  %vm5695_vm4 = vcmask 24576   ;;  %5691 = vst.msk [vmem:[#allocation3 + $0x198] sm:$0xff] %vm285_vm1, %v7485_v52 }
 0x93f   : > { %v3680_v31 = vsel %vm13237_vm12, %v3647_v45, %v14214_v34  ;;  %v14218_v50 = vld [vmem:[#allocation109_spill] sm:$0xff]  ;;  %v3572_v36 = vsel %vm3558_vm9, %v3539_v25, %v14222_v62  ;;  %v3728_v5 = vsel %vm3723_vm14, %v3695_v43, %v14223_v47  ;;  %v14226_v46 = vld [vmem:[#allocation110_spill] sm:$0xff]  ;;  %v14227_v19 = vld [vmem:[#allocation255_spill] sm:$0xff]  ;;  %vm14234_vm12 = vcmask 1043456   ;;  %5696 = vst.msk [vmem:[#allocation3 + $0x18] sm:$0x1] %vm5695_vm4, %v7485_v52 }
 0x940   : > { %v11234_v17 = vpop.permute.xlu0 %5344  ;;  %v3541_v22 = vsel %vm285_vm1, %v7444_v12, %v14218_v50  ;;  %v3713_v4 = vsel %vm3690_vm13, %v3680_v31, %v14220_v27  ;;  %v14221_v2 = vld [vmem:[#allocation457_spill] sm:$0xff]  ;;  %v3571_v59 = vsel %vm3558_vm9, %v3538_v54, %v14226_v46  ;;  %v3761_v33 = vsel %vm13242_vm15, %v3728_v5, %v14227_v19  ;;  %v14229_v11 = vld [vmem:[#allocation298_spill] sm:$0xff]  ;;  %v14230_v35 = vld [vmem:[#allocation316_spill] sm:$0xff]  ;;  %5697 = vst.msk [vmem:[#allocation3 + $0x30] sm:$0x1] %vm5695_vm4, %v7485_v52 }
 0x941   : > { %v3958_v37 = vsel %vm3954_vm8, %v3925_v23, %v14221_v2  ;;  %v14228_v1 = vld [vmem:[#allocation273_spill] sm:$0xff]  ;;  %v3794_v60 = vsel %vm3789_vm3, %v3761_v33, %v14229_v11  ;;  %v6305_v51 = vld [vmem:[%s13156_s3] sm:$0xf]  ;;  %v14231_v10 = vld [vmem:[#allocation112_spill] sm:$0xff]  ;;  %5692 = vst.msk [vmem:[#allocation3 + $0x1a0] sm:$0xff] %vm285_vm1, %v7485_v52 }
 0x942   : > { %7300 = vmatmul.msk.f32.gmra.mxu1 %vm13239_vm0, %v5431_v38  ;;  %v14224_v38 = vld [vmem:[#allocation257_spill] sm:$0xff]  ;;  %v3991_v41 = vsel %vm3987_vm7, %v3958_v37, %v14225_v58  ;;  %v3605_v3 = vsel %vm3591_vm10, %v3572_v36, %v14231_v10  ;;  %v14232_v61 = vld [vmem:[#allocation335_spill] sm:$0xff]  ;;  %7330 = vmatpush.msk.msra.mxu2 %vm14234_vm12, %v6305_v51  ;;  %vm14235_vm11 = vmmov %vm14234_vm12  ;;  %v5341_v36 = vpop.permute.xlu1 %5340  ;;  %vm14256_vm12 = vcmask 25600   ;;  %5698 = vst.msk [vmem:[#allocation3 + $0x48] sm:$0x1] %vm5695_vm4, %v7485_v52 }
 0x943   : > { %v3746_v49 = vsel %vm3723_vm14, %v3713_v4, %v14224_v38  ;;  %v5432_v6 = vsel %vm13241_vm5, %v3991_v41, %v11156_v48  ;;  %v3827_v54 = vsel %vm13240_vm2, %v3794_v60, %v14232_v61  ;;  %v14233_v48 = vld [vmem:[#allocation353_spill] sm:$0xff]  ;;  %7381 = vmatpush.msk.msra.mxu3 %vm14235_vm11, %v6305_v51  ;;  %v7445_v56 = vld [vmem:[#allocation2 + $0xa8] sm:$0xff]  ;;  %v14237_v14 = vld [vmem:[#allocation116_spill] sm:$0xff]  ;;  %5689 = vst.msk [vmem:[#allocation3 + $0x10] sm:$0x3] %vm14256_vm12, %v7485_v52 }
 0x944   : > { %v3779_v26 = vsel %vm13242_vm15, %v3746_v49, %v14228_v1  ;;  %v14236_v42 = vld [vmem:[#allocation115_spill] sm:$0xff]  ;;  %v3604_v13 = vsel %vm3591_vm10, %v3571_v59, %v14237_v14  ;;  %v14240_v29 = vld [vmem:[#allocation369_spill] sm:$0xff]  ;;  %v14242_v8 = vld [vmem:[#allocation118_spill] sm:$0xff]  ;;  %5699 = vst.msk [vmem:[#allocation3 + $0x60] sm:$0x1] %vm5695_vm4, %v7485_v52 }
 0x945   : > { %v3812_v53 = vsel %vm3789_vm3, %v3779_v26, %v14230_v35  ;;  %v3540_v18 = vsel %vm285_vm1, %v7445_v56, %v14236_v42  ;;  %v14238_v9 = vld [vmem:[#allocation351_spill] sm:$0xff]  ;;  %v3574_v40 = vsel %vm3558_vm9, %v3541_v22, %v14242_v8  ;;  %v14243_v39 = vld [vmem:[#allocation122_spill] sm:$0xff]  ;;  %v14245_v21 = vld [vmem:[#allocation412_spill] sm:$0xff]  ;;  %5700 = vst.msk [vmem:[#allocation3 + $0x78] sm:$0x1] %vm5695_vm4, %v7485_v52 }
 0x946   : > { %v3845_v32 = vsel %vm13240_vm2, %v3812_v53, %v14233_v48  ;;  %v3573_v34 = vsel %vm3558_vm9, %v3540_v18, %v14243_v39  ;;  %v14244_v31 = vld [vmem:[#allocation394_spill] sm:$0xff]  ;;  %v7446_v12 = vld [vmem:[#allocation2 + $0xc8] sm:$0xff]  ;;  %v14246_v50 = vld [vmem:[#allocation124_spill] sm:$0xff]  ;;  %5701 = vst.msk [vmem:[#allocation3 + $0x90] sm:$0x1] %vm5695_vm4, %v7485_v52 }
 0x947   : > { %v3543_v57 = vsel %vm285_vm1, %v7446_v12, %v14246_v50  ;;  %v7447_v43 = vld [vmem:[#allocation2 + $0xc0] sm:$0xff]  ;;  %v14247_v27 = vld [vmem:[#allocation128_spill] sm:$0xff]  ;;  %v14248_v4 = vld [vmem:[#allocation431_spill] sm:$0xff]  ;;  %5702 = vst.msk [vmem:[#allocation3 + $0xa8] sm:$0x1] %vm5695_vm4, %v7485_v52 }
 0x948   : > { %v11309_v7 = vpop.permute.xlu0 %5350  ;;  %v3542_v22 = vsel %vm285_vm1, %v7447_v43, %v14247_v27  ;;  %v14250_v37 = vld [vmem:[#allocation449_spill] sm:$0xff]  ;;  %v14252_v47 = vld [vmem:[#allocation131_spill] sm:$0xff]  ;;  %v14253_v38 = vld [vmem:[#allocation192_spill] sm:$0xff]  ;;  %5703 = vst.msk [vmem:[#allocation3 + $0xc0] sm:$0x1] %vm5695_vm4, %v7485_v52 }
 0x949   : > { %v3576_v5 = vsel %vm3558_vm9, %v3543_v57, %v14252_v47  ;;  %v3696_v49 = vsel %vm3690_vm13, %v11202_v20, %v14253_v38  ;;  %v14254_v58 = vld [vmem:[#allocation447_spill] sm:$0xff]  ;;  %v14255_v46 = vld [vmem:[#allocation465_spill] sm:$0xff]  ;;  %v14262_v10 = vld [vmem:[#allocation272_spill] sm:$0xff]  ;;  %5704 = vst.msk [vmem:[#allocation3 + $0xd8] sm:$0x1] %vm5695_vm4, %v7485_v52 }
 0x94a   : > { %7301 = vmatmul.msk.f32.gmra.mxu1 %vm13239_vm0, %v5432_v6  ;;  %vm14239_vm0 = vcmask 359424   ;;  %v14257_v19 = vld [vmem:[#allocation111_spill] sm:$0xff]  ;;  %v14259_v6 = vld [vmem:[#allocation490_spill] sm:$0xff]  ;;  %v14261_v53 = vld [vmem:[#allocation125_spill] sm:$0xff]  ;;  %5705 = vst.msk [vmem:[#allocation3 + $0xf0] sm:$0x1] %vm5695_vm4, %v7485_v52 }
 0x94b   : > { %v3860_v25 = vsel %vm14239_vm0, %v3827_v54, %v14238_v9  ;;  %vm14241_vm2 = vmmov %vm14239_vm0  ;;  %vm14249_vm0 = vcmask 424960   ;;  %v3606_v33 = vsel %vm3591_vm10, %v3573_v34, %v14257_v19  ;;  %v14258_v1 = vld [vmem:[#allocation235_spill] sm:$0xff]  ;;  %v3607_v51 = vsel %vm3591_vm10, %v3574_v40, %v14261_v53  ;;  %v14264_v42 = vld [vmem:[#allocation120_spill] sm:$0xff]  ;;  %5706 = vst.msk [vmem:[#allocation3 + $0x108] sm:$0x1] %vm5695_vm4, %v7485_v52 }
 0x94c   : > { %v3878_v45 = vsel %vm14241_vm2, %v3845_v32, %v14240_v29  ;;  %v3893_v0 = vsel %vm3888_vm6, %v3860_v25, %v14244_v31  ;;  %vm14251_vm11 = vmmov %vm14249_vm0  ;;  %v3729_v26 = vsel %vm3723_vm14, %v3696_v49, %v14258_v1  ;;  %v14260_v60 = vld [vmem:[#allocation507_spill] sm:$0xff]  ;;  %v14263_v32 = vld [vmem:[#allocation117_spill] sm:$0xff]  ;;  %v3609_v18 = vsel %vm3591_vm10, %v3576_v5, %v14264_v42  ;;  %5707 = vst.msk [vmem:[#allocation3 + $0x120] sm:$0x1] %vm5695_vm4, %v7485_v52 }
 0x94d   : > { %v3911_v23 = vsel %vm3888_vm6, %v3878_v45, %v14245_v21  ;;  %v3926_v2 = vsel %vm14249_vm0, %v3893_v0, %v14248_v4  ;;  %v3762_v61 = vsel %vm13242_vm15, %v3729_v26, %v14262_v10  ;;  %v3575_v56 = vsel %vm3558_vm9, %v3542_v22, %v14263_v32  ;;  %v14265_v14 = vld [vmem:[#allocation288_spill] sm:$0xff]  ;;  %v5760_v25 = vld [vmem:[#allocation3] sm:$0xff]  ;;  %v14269_v29 = vld [vmem:[#allocation119_spill] sm:$0xff]  ;;  %5708 = vst.msk [vmem:[#allocation3 + $0x138] sm:$0x1] %vm5695_vm4, %v7485_v52 }
 0x94e   : > { %v3944_v62 = vsel %vm14251_vm11, %v3911_v23, %v14250_v37  ;;  %v3959_v41 = vsel %vm3954_vm8, %v3926_v2, %v14254_v58  ;;  %v3795_v9 = vsel %vm3789_vm3, %v3762_v61, %v14265_v14  ;;  %vm14266_vm2 = vcmask 818176   ;;  %vm14268_vm11 = vmmov %vm14256_vm12  ;;  %v14271_v8 = vld [vmem:[#allocation106_spill] sm:$0xff]  ;;  %v14273_v39 = vld [vmem:[#allocation121_spill] sm:$0xff]  ;;  %v5343_v58 = vpop.permute.xlu2 %5342  ;;  %5709 = vst.msk [vmem:[#allocation3 + $0x150] sm:$0x1] %vm5695_vm4, %v7485_v52 }
 0x94f   : > { %v3977_v59 = vsel %vm3954_vm8, %v3944_v62, %v14255_v46  ;;  %v3992_v11 = vsel %vm3987_vm7, %v3959_v41, %v14259_v6  ;;  %vm14267_vm0 = vmmov %vm14266_vm2  ;;  %5693 = vst.msk [vmem:[#allocation3 + $0x1a8] sm:$0x3] %vm14268_vm11, %v7485_v52  ;;  %vm14270_vm12 = vcmask 130048   ;;  %v14275_v31 = vld [vmem:[#allocation331_spill] sm:$0xff]  ;;  %v7448_v12 = vld [vmem:[#allocation2 + $0xd8] sm:$0xff]  ;;  %vm14290_vm11 = vcmask 424960  }
 0x950   : > { %v4010_v20 = vsel %vm3987_vm7, %v3977_v59, %v14260_v60  ;;  %v5377_v35 = vpop.permute.xlu0 %5376  ;;  %v5433_v48 = vsel %vm13241_vm5, %v3992_v11, %v5341_v36  ;;  %v11408_v45 = vsel %vm14270_vm12, %v3605_v3, %v14269_v29  ;;  %v5792_v21 = vld [vmem:[#allocation3 + $0x1] sm:$0xff]  ;;  %v14280_v43 = vld [vmem:[#allocation368_spill] sm:$0xff]  ;;  %v5920_v41 = vld [vmem:[#allocation3 + $0x18] sm:$0xff]  ;;  %5710 = vst.msk [vmem:[#allocation3 + $0x168] sm:$0x1] %vm5695_vm4, %v7485_v52 }
 0x951   : > { %v5451_v54 = vsel %vm13241_vm5, %v4010_v20, %v5377_v35  ;;  %vm14272_vm5 = vmmov %vm14270_vm12  ;;  %v5856_v23 = vld [vmem:[#allocation3 + $0x2] sm:$0xff]  ;;  %v5824_v22 = vmax.f32 %v5760_v25, %v5792_v21  ;;  %v7449_v37 = vld [vmem:[#allocation2 + $0x110] sm:$0xff]  ;;  %5711 = vst.msk [vmem:[#allocation3 + $0x180] sm:$0x1] %vm5695_vm4, %v7485_v52 }
 0x952   : > { %7302 = vmatmul.msk.f32.gmra.mxu1 %vm14266_vm2, %v5433_v48  ;;  %7320 = vmatmul.msk.f32.vlgmr.msrb.gmra.mxu3 %vm14267_vm0, %v5451_v54  ;;  %v11412_v40 = vsel %vm14272_vm5, %v3604_v13, %v14271_v8  ;;  %vm14274_vm15 = vmmov %vm14272_vm5  ;;  %vm14276_vm2 = vcmask 326656   ;;  %v14277_v50 = vld [vmem:[#allocation123_spill] sm:$0xff]  ;;  %v14278_v57 = vld [vmem:[#allocation114_spill] sm:$0xff]  ;;  %5712 = vst.msk [vmem:[#allocation3 + $0x29] sm:$0x1] %vm5695_vm4, %v7485_v52 }
 0x953   : > { %v11416_v34 = vsel %vm14274_vm15, %v3606_v33, %v14273_v39  ;;  %v3828_v0 = vsel %vm14276_vm2, %v3795_v9, %v14275_v31  ;;  %v3544_v3 = vsel %vm285_vm1, %v7448_v12, %v14277_v50  ;;  %vm14279_vm0 = vmmov %vm14272_vm5  ;;  %vm14281_vm5 = vcmask 359424   ;;  %v14282_v4 = vld [vmem:[#allocation127_spill] sm:$0xff]  ;;  %v14283_v62 = vld [vmem:[#allocation148_spill] sm:$0xff]  ;;  %5713 = vst.msk [vmem:[#allocation3 + $0x41] sm:$0x1] %vm5695_vm4, %v7485_v52 }
 0x954   : > { %v11426_v13 = vsel %vm14279_vm0, %v3607_v51, %v14278_v57  ;;  %v3861_v27 = vsel %vm14281_vm5, %v3828_v0, %v14280_v43  ;;  %v3608_v2 = vsel %vm3591_vm10, %v3575_v56, %v14282_v4  ;;  %v3549_v36 = vsel %vm285_vm1, %v7449_v37, %v14283_v62  ;;  %v14284_v47 = vld [vmem:[#allocation130_spill] sm:$0xff]  ;;  %vm14285_vm15 = vmmov %vm14279_vm0  ;;  %v14286_v38 = vld [vmem:[#allocation384_spill] sm:$0xff]  ;;  %5714 = vst.msk [vmem:[#allocation3 + $0x59] sm:$0x1] %vm5695_vm4, %v7485_v52 }
 0x955   : > { %v11438_v5 = vsel %vm14285_vm15, %v3609_v18, %v14284_v47  ;;  %v3894_v49 = vsel %vm3888_vm6, %v3861_v27, %v14286_v38  ;;  %v14287_v46 = vld [vmem:[#allocation133_spill] sm:$0xff]  ;;  %v14288_v19 = vld [vmem:[#allocation155_spill] sm:$0xff]  ;;  %v5888_v6 = vmax.f32 %v5824_v22, %v5856_v23  ;;  %v14291_v20 = vld [vmem:[#allocation134_spill] sm:$0xff]  ;;  %vm14301_vm2 = vcmask 261120   ;;  %5715 = vst.msk [vmem:[#allocation3 + $0x71] sm:$0x1] %vm5695_vm4, %v7485_v52 }
 0x956   : > { %v3577_v59 = vsel %vm3558_vm9, %v3544_v3, %v14287_v46  ;;  %v3582_v33 = vsel %vm3558_vm9, %v3549_v36, %v14288_v19  ;;  %v14289_v1 = vld [vmem:[#allocation427_spill] sm:$0xff]  ;;  %vm14292_vm12 = vmmov %vm14279_vm0  ;;  %v7450_v53 = vld [vmem:[#allocation2 + $0xe0] sm:$0xff]  ;;  %vm14302_vm0 = vcmask 523264   ;;  %vm14305_vm5 = vcmask 818176   ;;  %5716 = vst.msk [vmem:[#allocation3 + $0x89] sm:$0x1] %vm5695_vm4, %v7485_v52 }
 0x957   : > { %v3927_v26 = vsel %vm14290_vm11, %v3894_v49, %v14289_v1  ;;  %v5761_v11 = vld [vmem:[#allocation3 + $0x8] sm:$0xff]  ;;  %v11454_v35 = vsel %vm14292_vm12, %v3608_v2, %v14291_v20  ;;  %v14293_v51 = vld [vmem:[#allocation137_spill] sm:$0xff]  ;;  %v14295_v48 = vld [vmem:[#allocation464_spill] sm:$0xff]  ;;  %v5952_v8 = vmax.f32 %v5888_v6, %v5920_v41  ;;  %vm14310_vm11 = vcmask 326656   ;;  %5717 = vst.msk [vmem:[#allocation3 + $0xa1] sm:$0x1] %vm5695_vm4, %v7485_v52 }
 0x958   : > { %v5793_v60 = vld [vmem:[#allocation3 + $0x9] sm:$0xff]  ;;  %v3545_v10 = vsel %vm285_vm1, %v7450_v53, %v14293_v51  ;;  %v14294_v61 = vld [vmem:[#allocation209_spill] sm:$0xff]  ;;  %v3960_v32 = vsel %vm3954_vm8, %v3927_v26, %v14295_v48  ;;  %v14303_v50 = vld [vmem:[#allocation126_spill] sm:$0xff]  ;;  %5718 = vst.msk [vmem:[#allocation3 + $0xb9] sm:$0x1] %vm5695_vm4, %v7485_v52 }
 0x959   : > { %v3697_v54 = vsel %vm3690_vm13, %v11226_v28, %v14294_v61  ;;  %v5984_v56 = vld [vmem:[#allocation3 + $0x19] sm:$0xff]  ;;  %v14296_v42 = vld [vmem:[#allocation140_spill] sm:$0xff]  ;;  %v5825_v12 = vmax.f32 %v5761_v11, %v5793_v60  ;;  %v11482_v3 = vsel %vm3558_vm9, %v3545_v10, %v14303_v50  ;;  %v7451_v4 = vld [vmem:[#allocation2 + $0x128] sm:$0xff]  ;;  %v11515_v10 = vpop.permute.xlu1 %5346  ;;  %5719 = vst.msk [vmem:[#allocation3 + $0xd1] sm:$0x1] %vm5695_vm4, %v7485_v52 }
 0x95a   : > { %v3610_v18 = vsel %vm3591_vm10, %v3577_v59, %v14296_v42  ;;  %v14297_v14 = vld [vmem:[#allocation225_spill] sm:$0xff]  ;;  %v14298_v25 = vld [vmem:[#allocation480_spill] sm:$0xff]  ;;  %v6016_v27 = vmax.f32 %v5952_v8, %v5984_v56  ;;  %vm14308_vm15 = vmmov %vm14292_vm12  ;;  %5720 = vst.msk [vmem:[#allocation3 + $0xe9] sm:$0x1] %vm5695_vm4, %v7485_v52 }
 0x95b   : > { %v3730_v9 = vsel %vm3723_vm14, %v3697_v54, %v14297_v14  ;;  %v3993_v29 = vsel %vm3987_vm7, %v3960_v32, %v14298_v25  ;;  %v14299_v28 = vld [vmem:[#allocation144_spill] sm:$0xff]  ;;  %v6048_v23 = vld [vmem:[#allocation3 + $0x1a] sm:$0xff]  ;;  %v14311_v59 = vld [vmem:[#allocation147_spill] sm:$0xff]  ;;  %5721 = vst.msk [vmem:[#allocation3 + $0x101] sm:$0x1] %vm5695_vm4, %v7485_v52 }
 0x95c   : > { %v3615_v39 = vsel %vm3591_vm10, %v3582_v33, %v14299_v28  ;;  %v14300_v31 = vld [vmem:[#allocation268_spill] sm:$0xff]  ;;  %v5434_v21 = vsel %vm14302_vm0, %v3993_v29, %v5343_v58  ;;  %v14304_v57 = vld [vmem:[#allocation305_spill] sm:$0xff]  ;;  %v5826_v58 = vmax.f32 %v5920_v41, %v5984_v56  ;;  %v7452_v46 = vld [vmem:[#allocation2 + $0x120] sm:$0xff]  ;;  %v6080_v11 = vmax.f32 %v6016_v27, %v6048_v23  ;;  %5722 = vst.msk [vmem:[#allocation3 + $0x119] sm:$0x1] %vm5695_vm4, %v7485_v52 }
 0x95d   : > { %v3763_v0 = vsel %vm14301_vm2, %v3730_v9, %v14300_v31  ;;  %7303 = vmatmul.msk.f32.gmra.mxu1 %vm14305_vm5, %v5434_v21  ;;  %v5857_v22 = vld [vmem:[#allocation3 + $0xa] sm:$0xff]  ;;  %v14306_v2 = vld [vmem:[#allocation161_spill] sm:$0xff]  ;;  %v3550_v19 = vsel %vm285_vm1, %v7452_v46, %v14311_v59  ;;  %v14312_v33 = vld [vmem:[#allocation154_spill] sm:$0xff]  ;;  %vm14314_vm2 = vcmask 359424   ;;  %vm14320_vm0 = vcmask 424960  }
 0x95e   : > { %v3796_v43 = vsel %vm3789_vm3, %v3763_v0, %v14304_v57  ;;  %v3551_v37 = vsel %vm285_vm1, %v7451_v4, %v14306_v2  ;;  %v14307_v62 = vld [vmem:[#allocation129_spill] sm:$0xff]  ;;  %v11497_v49 = vld [vmem:[#allocation3 + $0x30] sm:$0xff]  ;;  %v11505_v1 = vsel %vm14292_vm12, %v3615_v39, %v14312_v33  ;;  %v7453_v60 = vld [vmem:[#allocation2 + $0x140] sm:$0xff]  ;;  %v5889_v54 = vmax.f32 %v5825_v12, %v5857_v22  ;;  %v11541_v57 = vpop.permute.xlu2 %5348  ;;  %5723 = vst.msk [vmem:[#allocation3 + $0x131] sm:$0x1] %vm5695_vm4, %v7485_v52 }
 0x95f   : > { %v11493_v36 = vsel %vm14308_vm15, %v3610_v18, %v14307_v62  ;;  %v14309_v47 = vld [vmem:[#allocation321_spill] sm:$0xff]  ;;  %v14313_v26 = vld [vmem:[#allocation364_spill] sm:$0xff]  ;;  %v5890_v48 = vmax.f32 %v5826_v58, %v6048_v23  ;;  %v14318_v42 = vld [vmem:[#allocation150_spill] sm:$0xff]  ;;  %v6145_v25 = vmax.f32 %v6080_v11, %v11497_v49  ;;  %vm14329_vm5 = vcmask 261120   ;;  %5724 = vst.msk [vmem:[#allocation3 + $0x149] sm:$0x1] %vm5695_vm4, %v7485_v52 }
 0x960   : > { %v3829_v38 = vsel %vm14310_vm11, %v3796_v43, %v14309_v47  ;;  %v14315_v20 = vld [vmem:[#allocation156_spill] sm:$0xff]  ;;  %v14316_v41 = vld [vmem:[#allocation401_spill] sm:$0xff]  ;;  %v3584_v18 = vsel %vm3558_vm9, %v3551_v37, %v14318_v42  ;;  %v11530_v29 = vld [vmem:[#allocation3 + $0x20] sm:$0xff]  ;;  %vm14330_vm15 = vcmask 523264   ;;  %vm14333_vm11 = vcmask 818176  }
 0x961   : > { %v3862_v6 = vsel %vm14314_vm2, %v3829_v38, %v14313_v26  ;;  %v3553_v53 = vsel %vm285_vm1, %v7453_v60, %v14315_v20  ;;  %v11517_v61 = vld [vmem:[#allocation3 + $0x31] sm:$0xff]  ;;  %v14321_v28 = vld [vmem:[#allocation163_spill] sm:$0xff]  ;;  %v14325_v27 = vld [vmem:[#allocation170_spill] sm:$0xff]  ;;  %v5953_v46 = vmax.f32 %v5889_v54, %v11530_v29  ;;  %v5954_v59 = vmax.f32 %v5890_v48, %v11497_v49  ;;  %5725 = vst.msk [vmem:[#allocation3 + $0x161] sm:$0x1] %vm5695_vm4, %v7485_v52 }
 0x962   : > { %v3895_v51 = vsel %vm3888_vm6, %v3862_v6, %v14316_v41  ;;  %v14317_v32 = vld [vmem:[#allocation157_spill] sm:$0xff]  ;;  %v14322_v31 = vld [vmem:[#allocation164_spill] sm:$0xff]  ;;  %v14326_v4 = vld [vmem:[#allocation242_spill] sm:$0xff]  ;;  %vm14338_vm2 = vcmask 326656   ;;  %5726 = vst.msk [vmem:[#allocation3 + $0x179] sm:$0x1] %vm5695_vm4, %v7485_v52 }
 0x963   : > { %v3583_v56 = vsel %vm3558_vm9, %v3550_v19, %v14317_v32  ;;  %v14319_v14 = vld [vmem:[#allocation417_spill] sm:$0xff]  ;;  %v14324_v12 = vld [vmem:[#allocation460_spill] sm:$0xff]  ;;  %v14328_v47 = vld [vmem:[#allocation258_spill] sm:$0xff]  ;;  %5727 = vst.msk [vmem:[#allocation3 + $0x191] sm:$0x1] %vm5695_vm4, %v7485_v52  ;;  %vm14395_vm4 = vcmask 326656  }
 0x964   : > { %v3928_v9 = vsel %vm14320_vm0, %v3895_v51, %v14319_v14  ;;  %v7454_v8 = vld [vmem:[#allocation2 + $0x138] sm:$0xff]  ;;  %v3616_v0 = vsel %vm3591_vm10, %v3583_v56, %v14322_v31  ;;  %v14331_v19 = vld [vmem:[#allocation160_spill] sm:$0xff]  ;;  %v14334_v60 = vld [vmem:[#allocation166_spill] sm:$0xff]  ;;  %vm14342_vm0 = vcmask 359424  }
 0x965   : > { %v3552_v39 = vsel %vm285_vm1, %v7454_v8, %v14321_v28  ;;  %v14323_v21 = vld [vmem:[#allocation205_spill] sm:$0xff]  ;;  %v3961_v50 = vsel %vm3954_vm8, %v3928_v9, %v14324_v12  ;;  %v3617_v33 = vsel %vm3591_vm10, %v3584_v18, %v14331_v19  ;;  %v3586_v20 = vsel %vm3558_vm9, %v3553_v53, %v14334_v60  ;;  %v14335_v41 = vld [vmem:[#allocation159_spill] sm:$0xff]  ;;  %v14337_v32 = vld [vmem:[#allocation338_spill] sm:$0xff] }
 0x966   : > { %v3698_v23 = vsel %vm3690_vm13, %v11198_v63, %v14323_v21  ;;  %v11543_v43 = vld [vmem:[#allocation3 + $0x32] sm:$0xff]  ;;  %v3585_v22 = vsel %vm3558_vm9, %v3552_v39, %v14325_v27  ;;  %v6209_v63 = vmax.f32 %v6145_v25, %v11517_v61  ;;  %v14340_v9 = vld [vmem:[#allocation195_spill] sm:$0xff]  ;;  %v14341_v25 = vld [vmem:[#allocation354_spill] sm:$0xff] }
 0x967   : > { %v3731_v2 = vsel %vm3723_vm14, %v3698_v23, %v14326_v4  ;;  %v14327_v37 = vld [vmem:[#allocation497_spill] sm:$0xff]  ;;  %v3618_v51 = vsel %vm3591_vm10, %v3585_v22, %v14335_v41  ;;  %v14339_v18 = vld [vmem:[#allocation172_spill] sm:$0xff]  ;;  %v3699_v53 = vsel %vm3690_vm13, %v11264_v24, %v14340_v9  ;;  %v14344_v24 = vld [vmem:[#allocation167_spill] sm:$0xff] }
 0x968   : > { %v3994_v62 = vsel %vm3987_vm7, %v3961_v50, %v14327_v37  ;;  %v3764_v38 = vsel %vm14329_vm5, %v3731_v2, %v14328_v47  ;;  %v14332_v26 = vld [vmem:[#allocation301_spill] sm:$0xff]  ;;  %v6273_v11 = vmax.f32 %v6209_v63, %v11543_v43  ;;  %vm14345_vm5 = vmmov %vm14292_vm12  ;;  %v14346_v12 = vld [vmem:[#allocation168_spill] sm:$0xff] }
 0x969   : > { %v5435_v58 = vsel %vm14330_vm15, %v3994_v62, %v11234_v17  ;;  %v3797_v6 = vsel %vm3789_vm3, %v3764_v38, %v14332_v26  ;;  %v5985_v17 = vld [vmem:[#allocation3 + $0x21] sm:$0xff]  ;;  %v14336_v54 = vld [vmem:[#allocation153_spill] sm:$0xff]  ;;  %v11602_v23 = vsel %vm14345_vm5, %v3617_v33, %v14344_v24  ;;  %vm14347_vm15 = vcmask 162816  }
 0x96a   : > { %7304 = vmatmul.msk.f32.gmra.mxu1 %vm14333_vm11, %v5435_v58  ;;  %v11578_v48 = vsel %vm14292_vm12, %v3616_v0, %v14336_v54  ;;  %v3830_v56 = vsel %vm14338_vm2, %v3797_v6, %v14337_v32  ;;  %v7455_v42 = vld [vmem:[#allocation2 + $0x158] sm:$0xff]  ;;  %7331 = vmatmul.msk.f32.vlgmr.msra.gmra.mxu2 %vm285_vm1, %v6273_v11  ;;  %v6017_v31 = vmax.f32 %v5953_v46, %v5985_v17  ;;  %v14348_v27 = vld [vmem:[#allocation238_spill] sm:$0xff]  ;;  %vm14350_vm11 = vcmask 424960   ;;  %v14351_v37 = vld [vmem:[#allocation171_spill] sm:$0xff]  ;;  %v11628_v46 = vpop.permute.xlu1 %5352 }
 0x96b   : > { %v3555_v14 = vsel %vm285_vm1, %v7455_v42, %v14339_v18  ;;  %v3863_v8 = vsel %vm14342_vm0, %v3830_v56, %v14341_v25  ;;  %v14343_v28 = vld [vmem:[#allocation397_spill] sm:$0xff]  ;;  %v6018_v0 = vmax.f32 %v5954_v59, %v11517_v61  ;;  %v5827_v21 = vmax.f32 %v11530_v29, %v5985_v17  ;;  %v14349_v4 = vld [vmem:[#allocation434_spill] sm:$0xff]  ;;  %vm14352_vm12 = vmmov %vm14347_vm15 }
 0x96c   : > { %v3896_v39 = vsel %vm3888_vm6, %v3863_v8, %v14343_v28  ;;  %v11607_v50 = vsel %vm14347_vm15, %v11408_v45, %v14346_v12  ;;  %v3732_v22 = vsel %vm3723_vm14, %v3699_v53, %v14348_v27  ;;  %v11618_v29 = vsel %vm14352_vm12, %v11454_v35, %v14351_v37  ;;  %v14353_v62 = vld [vmem:[#allocation169_spill] sm:$0xff]  ;;  %vm14354_vm2 = vmmov %vm14345_vm5  ;;  %v14355_v45 = vld [vmem:[#allocation275_spill] sm:$0xff] }
 0x96d   : > { %v3929_v2 = vsel %vm14350_vm11, %v3896_v39, %v14349_v4  ;;  %v11622_v63 = vsel %vm14354_vm2, %v3618_v51, %v14353_v62  ;;  %vm14356_vm0 = vcmask 261120   ;;  %v14357_v38 = vld [vmem:[#allocation450_spill] sm:$0xff]  ;;  %v14358_v59 = vld [vmem:[#allocation61_spill] sm:$0xff]  ;;  %v14360_v26 = vld [vmem:[#allocation291_spill] sm:$0xff]  ;;  %v11644_v51 = vpop.permute.xlu2 %5354  ;;  %vm14362_vm5 = vcmask 523264  }
 0x96e   : > { %v3765_v47 = vsel %vm14356_vm0, %v3732_v22, %v14355_v45  ;;  %v3962_v58 = vsel %vm3954_vm8, %v3929_v2, %v14357_v38  ;;  %v3588_v19 = vsel %vm3558_vm9, %v3555_v14, %v14358_v59  ;;  %v14359_v35 = vld [vmem:[#allocation173_spill] sm:$0xff]  ;;  %v6049_v60 = vld [vmem:[#allocation3 + $0x22] sm:$0xff]  ;;  %v6082_v32 = vmax.f32 %v6018_v0, %v11543_v43  ;;  %v7456_v42 = vld [vmem:[#allocation2 + $0x150] sm:$0xff] }
 0x96f   : > { %v3619_v33 = vsel %vm3591_vm10, %v3586_v20, %v14359_v35  ;;  %v3798_v6 = vsel %vm3789_vm3, %v3765_v47, %v14360_v26  ;;  %v14361_v11 = vld [vmem:[#allocation493_spill] sm:$0xff]  ;;  %v6081_v20 = vmax.f32 %v6017_v31, %v6049_v60  ;;  %v5891_v56 = vmax.f32 %v5827_v21, %v6049_v60  ;;  %v14363_v18 = vld [vmem:[#allocation176_spill] sm:$0xff]  ;;  %v14364_v9 = vld [vmem:[#allocation194_spill] sm:$0xff] }
 0x970   : > { %v3995_v17 = vsel %vm3987_vm7, %v3962_v58, %v14361_v11  ;;  %v11642_v41 = vld [vmem:[#allocation3 + $0x38] sm:$0xff]  ;;  %v3554_v14 = vsel %vm285_vm1, %v7456_v42, %v14363_v18  ;;  %vm14365_vm15 = vmmov %vm14352_vm12  ;;  %v14366_v25 = vld [vmem:[#allocation334_spill] sm:$0xff]  ;;  %vm14367_vm11 = vcmask 326656   ;;  %vm14368_vm12 = vcmask 818176  }
 0x971   : > { %v5436_v54 = vsel %vm14362_vm5, %v3995_v17, %v11515_v10  ;;  %v3681_v53 = vsel %vm14365_vm15, %v11505_v1, %v14364_v9  ;;  %v3831_v8 = vsel %vm14367_vm11, %v3798_v6, %v14366_v25  ;;  %v6178_v10 = vld [vmem:[#allocation3 + $0x39] sm:$0xff]  ;;  %v11661_v28 = vld [vmem:[#allocation3 + $0x48] sm:$0xff]  ;;  %vm14370_vm2 = vcmask 359424   ;;  %v14373_v4 = vld [vmem:[#allocation212_spill] sm:$0xff] }
 0x972   : > { %7305 = vmatmul.msk.f32.gmra.mxu1 %vm14368_vm12, %v5436_v54  ;;  %v14369_v39 = vld [vmem:[#allocation371_spill] sm:$0xff]  ;;  %v6146_v0 = vmax.f32 %v6081_v20, %v11642_v41  ;;  %v5955_v1 = vmax.f32 %v5891_v56, %v11642_v41  ;;  %v5828_v21 = vmax.f32 %v11497_v49, %v11517_v61  ;;  %v14372_v27 = vld [vmem:[#allocation210_spill] sm:$0xff]  ;;  %v3700_v2 = vsel %vm3690_vm13, %v11282_v44, %v14373_v4  ;;  %v14375_v58 = vld [vmem:[#allocation165_spill] sm:$0xff]  ;;  %v11704_v42 = vpop.permute.xlu1 %5356 }
 0x973   : > { %v3864_v31 = vsel %vm14370_vm2, %v3831_v8, %v14369_v39  ;;  %v14371_v24 = vld [vmem:[#allocation51_spill] sm:$0xff]  ;;  %v3714_v22 = vsel %vm3690_vm13, %v3681_v53, %v14372_v27  ;;  %v6242_v45 = vld [vmem:[#allocation3 + $0x3a] sm:$0xff]  ;;  %v6147_v61 = vmax.f32 %v6082_v32, %v11661_v28  ;;  %v3587_v59 = vsel %vm3558_vm9, %v3554_v14, %v14375_v58  ;;  %v14376_v44 = vld [vmem:[#allocation228_spill] sm:$0xff] }
 0x974   : > { %v3621_v12 = vsel %vm3591_vm10, %v3588_v19, %v14371_v24  ;;  %v14374_v37 = vld [vmem:[#allocation387_spill] sm:$0xff]  ;;  %v6210_v49 = vmax.f32 %v6146_v0, %v6178_v10  ;;  %v6019_v47 = vmax.f32 %v5955_v1, %v6178_v10  ;;  %v5892_v38 = vmax.f32 %v5828_v21, %v11543_v43  ;;  %v14377_v35 = vld [vmem:[#allocation253_spill] sm:$0xff]  ;;  %v14378_v6 = vld [vmem:[#allocation430_spill] sm:$0xff] }
 0x975   : > { %v3897_v62 = vsel %vm3888_vm6, %v3864_v31, %v14374_v37  ;;  %v3733_v19 = vsel %vm3723_vm14, %v3700_v2, %v14376_v44  ;;  %v3747_v26 = vsel %vm3723_vm14, %v3714_v22, %v14377_v35  ;;  %vm14379_vm0 = vcmask 424960   ;;  %v11696_v17 = vld [vmem:[#allocation3 + $0x49] sm:$0xff]  ;;  %v14382_v54 = vld [vmem:[#allocation290_spill] sm:$0xff] }
 0x976   : > { %v3930_v11 = vsel %vm14379_vm0, %v3897_v62, %v14378_v6  ;;  %v14380_v60 = vld [vmem:[#allocation271_spill] sm:$0xff]  ;;  %vm14381_vm5 = vcmask 261120   ;;  %v6274_v18 = vmax.f32 %v6210_v49, %v6242_v45  ;;  %v14385_v14 = vld [vmem:[#allocation162_spill] sm:$0xff]  ;;  %vm14386_vm11 = vcmask 130048   ;;  %v14388_v8 = vld [vmem:[#allocation308_spill] sm:$0xff] }
 0x977   : > { %v3766_v43 = vsel %vm14381_vm5, %v3733_v19, %v14380_v60  ;;  %vm14383_vm15 = vmmov %vm14381_vm5  ;;  %v14384_v32 = vld [vmem:[#allocation467_spill] sm:$0xff]  ;;  %v11710_v9 = vsel %vm14386_vm11, %v3619_v33, %v14385_v14  ;;  %v14387_v53 = vld [vmem:[#allocation306_spill] sm:$0xff]  ;;  %vm14390_vm12 = vcmask 523264   ;;  %v6211_v33 = vmax.f32 %v6147_v61, %v11696_v17  ;;  %v11747_v19 = vpop.permute.xlu2 %5358 }
 0x978   : > { %v3780_v20 = vsel %vm14383_vm15, %v3747_v26, %v14382_v54  ;;  %v3963_v56 = vsel %vm3954_vm8, %v3930_v11, %v14384_v32  ;;  %v3799_v39 = vsel %vm3789_vm3, %v3766_v43, %v14388_v8  ;;  %v14389_v31 = vld [vmem:[#allocation483_spill] sm:$0xff]  ;;  %7332 = vmatmul.msk.f32.gmra.mxu2 %vm285_vm1, %v6274_v18  ;;  %v6083_v21 = vmax.f32 %v6019_v47, %v6242_v45  ;;  %v14392_v4 = vld [vmem:[#allocation58_spill] sm:$0xff]  ;;  %vm14393_vm2 = vmmov %vm14386_vm11 }
 0x979   : > { %v3813_v25 = vsel %vm3789_vm3, %v3780_v20, %v14387_v53  ;;  %v3996_v0 = vsel %vm3987_vm7, %v3963_v56, %v14389_v31  ;;  %v5956_v24 = vmax.f32 %v5892_v38, %v11661_v28  ;;  %v14391_v27 = vld [vmem:[#allocation175_spill] sm:$0xff]  ;;  %v11731_v2 = vsel %vm14393_vm2, %v3621_v12, %v14392_v4  ;;  %v14394_v37 = vld [vmem:[#allocation324_spill] sm:$0xff]  ;;  %v14396_v62 = vld [vmem:[#allocation349_spill] sm:$0xff] }
 0x97a   : > { %v5437_v1 = vsel %vm14390_vm12, %v3996_v0, %v11541_v57  ;;  %v11727_v22 = vsel %vm3591_vm10, %v3587_v59, %v14391_v27  ;;  %v3832_v52 = vsel %vm14395_vm4, %v3799_v39, %v14394_v37  ;;  %vm14397_vm0 = vmmov %vm14395_vm4  ;;  %vm14398_vm5 = vcmask 818176   ;;  %v6243_v49 = vld [vmem:[#allocation3 + $0x4a] sm:$0xff]  ;;  %v14399_v47 = vld [vmem:[#allocation190_spill] sm:$0xff] }
 0x97b   : > { %v3846_v57 = vsel %vm14397_vm0, %v3813_v25, %v14396_v62  ;;  %7306 = vmatmul.msk.f32.gmra.mxu1 %vm14398_vm5, %v5437_v1  ;;  %v11738_v61 = vld [vmem:[#allocation3 + $0x50] sm:$0xff]  ;;  %vm14400_vm15 = vcmask 162816   ;;  %v14401_v58 = vld [vmem:[#allocation367_spill] sm:$0xff]  ;;  %vm14402_vm11 = vcmask 359424   ;;  %v14403_v12 = vld [vmem:[#allocation386_spill] sm:$0xff]  ;;  %v5829_v35 = vmax.f32 %v11642_v41, %v6178_v10 }
 0x97c   : > { %v3682_v38 = vsel %vm14400_vm15, %v11578_v48, %v14399_v47  ;;  %v3865_v59 = vsel %vm14402_vm11, %v3832_v52, %v14401_v58  ;;  %vm14404_vm12 = vmmov %vm14402_vm11  ;;  %v14405_v26 = vld [vmem:[#allocation208_spill] sm:$0xff]  ;;  %v14406_v11 = vld [vmem:[#allocation227_spill] sm:$0xff]  ;;  %v6275_v32 = vmax.f32 %v6211_v33, %v6243_v49  ;;  %v6148_v56 = vmax.f32 %v6083_v21, %v11738_v61  ;;  %v11779_v52 = vpop.permute.xlu1 %5360 }
 0x97d   : > { %v3879_v44 = vsel %vm14404_vm12, %v3846_v57, %v14403_v12  ;;  %v3701_v6 = vsel %vm3690_vm13, %v11288_v15, %v14405_v26  ;;  %v3715_v60 = vsel %vm3690_vm13, %v3682_v38, %v14406_v11  ;;  %v14407_v43 = vld [vmem:[#allocation402_spill] sm:$0xff]  ;;  %v14408_v54 = vld [vmem:[#allocation404_spill] sm:$0xff]  ;;  %v6020_v18 = vmax.f32 %v5956_v24, %v11696_v17  ;;  %v14409_v41 = vld [vmem:[#allocation243_spill] sm:$0xff] }
 0x97e   : > { %v3912_v48 = vsel %vm3888_vm6, %v3879_v44, %v14407_v43  ;;  %v3898_v20 = vsel %vm3888_vm6, %v3865_v59, %v14408_v54  ;;  %v5893_v14 = vmax.f32 %v5829_v35, %v6242_v45  ;;  %v3748_v10 = vsel %vm3723_vm14, %v3715_v60, %v14409_v41  ;;  %v14410_v53 = vld [vmem:[#allocation245_spill] sm:$0xff]  ;;  %v14411_v25 = vld [vmem:[#allocation420_spill] sm:$0xff]  ;;  %v14417_v21 = vld [vmem:[#allocation286_spill] sm:$0xff]  ;;  %v5379_v35 = vpop.permute.xlu0 %5378 }
 0x97f   : > { %v3734_v15 = vsel %vm3723_vm14, %v3701_v6, %v14410_v53  ;;  %vm14412_vm2 = vcmask 424960   ;;  %v14413_v39 = vld [vmem:[#allocation445_spill] sm:$0xff]  ;;  %vm14416_vm0 = vcmask 261120   ;;  %v14419_v24 = vld [vmem:[#allocation463_spill] sm:$0xff]  ;;  %v14420_v4 = vld [vmem:[#allocation482_spill] sm:$0xff]  ;;  %vm14425_vm15 = vcmask 523264  }
 0x980   : > { %v3931_v8 = vsel %vm14412_vm2, %v3898_v20, %v14411_v25  ;;  %vm14414_vm4 = vmmov %vm14412_vm2  ;;  %v11769_v0 = vld [vmem:[#allocation3 + $0x51] sm:$0xff]  ;;  %v14422_v47 = vld [vmem:[#allocation323_spill] sm:$0xff]  ;;  %7333 = vmatmul.msk.f32.gmra.mxu2 %vm285_vm1, %v6275_v32  ;;  %v6084_v11 = vmax.f32 %v6020_v18, %v6243_v49  ;;  %v5957_v60 = vmax.f32 %v5893_v14, %v11738_v61  ;;  %vm14427_vm11 = vcmask 162816  }
 0x981   : > { %v3945_v31 = vsel %vm14414_vm4, %v3912_v48, %v14413_v39  ;;  %v14415_v1 = vld [vmem:[#allocation261_spill] sm:$0xff]  ;;  %vm14418_vm5 = vmmov %vm14416_vm0  ;;  %v3964_v27 = vsel %vm3954_vm8, %v3931_v8, %v14419_v24  ;;  %v14421_v62 = vld [vmem:[#allocation304_spill] sm:$0xff]  ;;  %v6212_v6 = vmax.f32 %v6148_v56, %v11769_v0  ;;  %vm14429_vm12 = vcmask 326656   ;;  %v5381_v8 = vpop.permute.xlu2 %5380 }
 0x982   : > { %v3767_v33 = vsel %vm14416_vm0, %v3734_v15, %v14415_v1  ;;  %v3781_v45 = vsel %vm14418_vm5, %v3748_v10, %v14417_v21  ;;  %v3978_v37 = vsel %vm3954_vm8, %v3945_v31, %v14420_v4  ;;  %v14423_v58 = vld [vmem:[#allocation498_spill] sm:$0xff]  ;;  %v14424_v12 = vld [vmem:[#allocation500_spill] sm:$0xff]  ;;  %v14428_v54 = vld [vmem:[#allocation339_spill] sm:$0xff]  ;;  %vm14432_vm4 = vcmask 818176  }
 0x983   : > { %v3800_v57 = vsel %vm3789_vm3, %v3767_v33, %v14421_v62  ;;  %v3814_v38 = vsel %vm3789_vm3, %v3781_v45, %v14422_v47  ;;  %v4011_v59 = vsel %vm3987_vm7, %v3978_v37, %v14423_v58  ;;  %v3997_v44 = vsel %vm3987_vm7, %v3964_v27, %v14424_v12  ;;  %v14426_v43 = vld [vmem:[#allocation180_spill] sm:$0xff]  ;;  %v14430_v41 = vld [vmem:[#allocation341_spill] sm:$0xff]  ;;  %vm14431_vm2 = vmmov %vm14429_vm12 }
 0x984   : > { %v5438_v26 = vsel %vm14425_vm15, %v3997_v44, %v11309_v7  ;;  %v3683_v48 = vsel %vm14427_vm11, %v11602_v23, %v14426_v43  ;;  %v3847_v20 = vsel %vm14429_vm12, %v3814_v38, %v14428_v54  ;;  %v3833_v10 = vsel %vm14431_vm2, %v3800_v57, %v14430_v41  ;;  %vm14433_vm0 = vmmov %vm14425_vm15  ;;  %v6244_v32 = vld [vmem:[#allocation3 + $0x52] sm:$0xff]  ;;  %v11803_v53 = vld [vmem:[#allocation3 + $0x60] sm:$0xff] }
 0x985   : > { %7307 = vmatmul.msk.f32.gmra.mxu1 %vm14432_vm4, %v5438_v26  ;;  %v5452_v7 = vsel %vm14433_vm0, %v4011_v59, %v5379_v35  ;;  %v14434_v56 = vld [vmem:[#allocation182_spill] sm:$0xff]  ;;  %vm14435_vm5 = vmmov %vm14427_vm11  ;;  %v14436_v14 = vld [vmem:[#allocation357_spill] sm:$0xff]  ;;  %vm14437_vm15 = vcmask 359424   ;;  %v5830_v39 = vmax.f32 %v11661_v28, %v11696_v17  ;;  %v6276_v4 = vmax.f32 %v6212_v6, %v6244_v32 }
 0x986   : > { %v3669_v18 = vsel %vm14435_vm5, %v11272_v30, %v14434_v56  ;;  %v3866_v23 = vsel %vm14437_vm15, %v3833_v10, %v14436_v14  ;;  %v14438_v15 = vld [vmem:[#allocation382_spill] sm:$0xff]  ;;  %vm14439_vm11 = vmmov %vm14437_vm15  ;;  %v14442_v33 = vld [vmem:[#allocation223_spill] sm:$0xff]  ;;  %v6149_v37 = vmax.f32 %v6084_v11, %v11803_v53  ;;  %v6021_v62 = vmax.f32 %v5957_v60, %v11769_v0 }
 0x987   : > { %v3880_v25 = vsel %vm14439_vm11, %v3847_v20, %v14438_v15  ;;  %vm14440_vm12 = vmmov %vm14432_vm4  ;;  %v14441_v31 = vld [vmem:[#allocation198_spill] sm:$0xff]  ;;  %v3716_v21 = vsel %vm3690_vm13, %v3683_v48, %v14442_v33  ;;  %v14443_v45 = vld [vmem:[#allocation400_spill] sm:$0xff]  ;;  %v5894_v57 = vmax.f32 %v5830_v39, %v6243_v49  ;;  %vm14448_vm2 = vcmask 424960   ;;  %v11851_v15 = vpop.permute.xlu1 %5364 }
 0x988   : > { %7321 = vmatmul.msk.f32.gmra.mxu3 %vm14440_vm12, %v5452_v7  ;;  %v3702_v1 = vsel %vm3690_vm13, %v3669_v18, %v14441_v31  ;;  %v3899_v30 = vsel %vm3888_vm6, %v3866_v23, %v14443_v45  ;;  %v14444_v24 = vld [vmem:[#allocation419_spill] sm:$0xff]  ;;  %v14445_v47 = vld [vmem:[#allocation241_spill] sm:$0xff]  ;;  %v14446_v17 = vld [vmem:[#allocation260_spill] sm:$0xff]  ;;  %vm14452_vm0 = vcmask 261120   ;;  %vm14461_vm15 = vcmask 523264   ;;  %7334 = vmatmul.msk.f32.gmra.mxu2 %vm285_vm1, %v6276_v4 }
 0x989   : > { %v3913_v27 = vsel %vm3888_vm6, %v3880_v25, %v14444_v24  ;;  %v3735_v28 = vsel %vm3723_vm14, %v3702_v1, %v14445_v47  ;;  %v3749_v38 = vsel %vm3723_vm14, %v3716_v21, %v14446_v17  ;;  %v14447_v58 = vld [vmem:[#allocation435_spill] sm:$0xff]  ;;  %v14449_v12 = vld [vmem:[#allocation437_spill] sm:$0xff]  ;;  %vm14450_vm4 = vmmov %vm14448_vm2  ;;  %v6085_v31 = vmax.f32 %v6021_v62, %v6244_v32 }
 0x98a   : > { %v3946_v59 = vsel %vm14448_vm2, %v3913_v27, %v14447_v58  ;;  %v3932_v44 = vsel %vm14450_vm4, %v3899_v30, %v14449_v12  ;;  %v11833_v35 = vld [vmem:[#allocation3 + $0x61] sm:$0xff]  ;;  %v14451_v26 = vld [vmem:[#allocation276_spill] sm:$0xff]  ;;  %vm14454_vm5 = vmmov %vm14452_vm0  ;;  %v5958_v1 = vmax.f32 %v5894_v57, %v11803_v53  ;;  %vm14463_vm11 = vcmask 162816  }
 0x98b   : > { %v3782_v6 = vsel %vm14452_vm0, %v3749_v38, %v14451_v26  ;;  %v14453_v11 = vld [vmem:[#allocation278_spill] sm:$0xff]  ;;  %v14455_v60 = vld [vmem:[#allocation453_spill] sm:$0xff]  ;;  %v14458_v10 = vld [vmem:[#allocation319_spill] sm:$0xff]  ;;  %v6213_v39 = vmax.f32 %v6149_v37, %v11833_v35  ;;  %vm14465_vm12 = vcmask 326656   ;;  %vm14468_vm4 = vcmask 818176  }
 0x98c   : > { %v3768_v49 = vsel %vm14454_vm5, %v3735_v28, %v14453_v11  ;;  %v3965_v43 = vsel %vm3954_vm8, %v3932_v44, %v14455_v60  ;;  %v14456_v48 = vld [vmem:[#allocation478_spill] sm:$0xff]  ;;  %v3815_v7 = vsel %vm3789_vm3, %v3782_v6, %v14458_v10  ;;  %v14459_v56 = vld [vmem:[#allocation496_spill] sm:$0xff]  ;;  %v14464_v45 = vld [vmem:[#allocation337_spill] sm:$0xff]  ;;  %v5831_v38 = vmax.f32 %v11738_v61, %v11769_v0  ;;  %v5383_v11 = vpop.permute.xlu2 %5382 }
 0x98d   : > { %v3979_v54 = vsel %vm3954_vm8, %v3946_v59, %v14456_v48  ;;  %v14457_v20 = vld [vmem:[#allocation294_spill] sm:$0xff]  ;;  %v3998_v18 = vsel %vm3987_vm7, %v3965_v43, %v14459_v56  ;;  %v14460_v14 = vld [vmem:[#allocation512_spill] sm:$0xff]  ;;  %vm14467_vm2 = vmmov %vm14465_vm12  ;;  %v6022_v43 = vmax.f32 %v5958_v1, %v11833_v35 }
 0x98e   : > { %v3801_v41 = vsel %vm3789_vm3, %v3768_v49, %v14457_v20  ;;  %v4012_v23 = vsel %vm3987_vm7, %v3979_v54, %v14460_v14  ;;  %v5439_v25 = vsel %vm14461_vm15, %v3998_v18, %v11628_v46  ;;  %v14462_v33 = vld [vmem:[#allocation178_spill] sm:$0xff]  ;;  %v14466_v24 = vld [vmem:[#allocation356_spill] sm:$0xff]  ;;  %vm14469_vm0 = vmmov %vm14461_vm15  ;;  %vm14473_vm15 = vcmask 359424  }
 0x98f   : > { %v3670_v21 = vsel %vm14463_vm11, %v11412_v40, %v14462_v33  ;;  %v3834_v30 = vsel %vm14465_vm12, %v3801_v41, %v14464_v45  ;;  %v3848_v27 = vsel %vm14467_vm2, %v3815_v7, %v14466_v24  ;;  %7308 = vmatmul.msk.f32.gmra.mxu1 %vm14468_vm4, %v5439_v25  ;;  %v5453_v46 = vsel %vm14469_vm0, %v4012_v23, %v5381_v8  ;;  %v6245_v4 = vld [vmem:[#allocation3 + $0x62] sm:$0xff]  ;;  %v14470_v37 = vld [vmem:[#allocation197_spill] sm:$0xff]  ;;  %vm14471_vm5 = vmmov %vm14463_vm11 }
 0x990   : > { %v11867_v47 = vld [vmem:[#allocation3 + $0x68] sm:$0xff]  ;;  %v3684_v62 = vsel %vm14471_vm5, %v11622_v63, %v14470_v37  ;;  %v14472_v57 = vld [vmem:[#allocation372_spill] sm:$0xff]  ;;  %v14474_v28 = vld [vmem:[#allocation374_spill] sm:$0xff]  ;;  %v6277_v49 = vmax.f32 %v6213_v39, %v6245_v4  ;;  %v5895_v48 = vmax.f32 %v5831_v38, %v6244_v32  ;;  %vm14484_vm2 = vcmask 424960  }
 0x991   : > { %v3881_v40 = vsel %vm14473_vm15, %v3848_v27, %v14472_v57  ;;  %vm14475_vm11 = vmmov %vm14473_vm15  ;;  %v14477_v58 = vld [vmem:[#allocation213_spill] sm:$0xff]  ;;  %v14478_v59 = vld [vmem:[#allocation215_spill] sm:$0xff]  ;;  %v6150_v60 = vmax.f32 %v6085_v31, %v11867_v47  ;;  %vm14488_vm0 = vcmask 261120   ;;  %vm14497_vm15 = vcmask 523264  }
 0x992   : > { %v3867_v17 = vsel %vm14475_vm11, %v3834_v30, %v14474_v28  ;;  %vm14476_vm12 = vmmov %vm14468_vm4  ;;  %v3717_v8 = vsel %vm3690_vm13, %v3684_v62, %v14477_v58  ;;  %v3703_v12 = vsel %vm3690_vm13, %v3670_v21, %v14478_v59  ;;  %v14479_v44 = vld [vmem:[#allocation390_spill] sm:$0xff]  ;;  %v14480_v26 = vld [vmem:[#allocation415_spill] sm:$0xff]  ;;  %v11907_v21 = vpop.permute.xlu0 %5362  ;;  %7335 = vmatmul.msk.f32.gmra.mxu2 %vm285_vm1, %v6277_v49  ;;  %v5959_v38 = vmax.f32 %v5895_v48, %v11867_v47 }
 0x993   : > { %7322 = vmatmul.msk.f32.gmra.mxu3 %vm14476_vm12, %v5453_v46  ;;  %v3900_v63 = vsel %vm3888_vm6, %v3867_v17, %v14479_v44  ;;  %v3914_v6 = vsel %vm3888_vm6, %v3881_v40, %v14480_v26  ;;  %v14481_v61 = vld [vmem:[#allocation231_spill] sm:$0xff]  ;;  %v14482_v54 = vld [vmem:[#allocation256_spill] sm:$0xff]  ;;  %v14483_v41 = vld [vmem:[#allocation433_spill] sm:$0xff]  ;;  %v6086_v17 = vmax.f32 %v6022_v43, %v6245_v4  ;;  %vm14499_vm11 = vcmask 130048  }
 0x994   : > { %v3736_v0 = vsel %vm3723_vm14, %v3703_v12, %v14481_v61  ;;  %v3750_v20 = vsel %vm3723_vm14, %v3717_v8, %v14482_v54  ;;  %v3933_v10 = vsel %vm14484_vm2, %v3900_v63, %v14483_v41  ;;  %v14485_v7 = vld [vmem:[#allocation452_spill] sm:$0xff]  ;;  %vm14486_vm4 = vmmov %vm14484_vm2  ;;  %v14487_v14 = vld [vmem:[#allocation274_spill] sm:$0xff]  ;;  %vm14501_vm12 = vcmask 326656  }
 0x995   : > { %v3947_v56 = vsel %vm14486_vm4, %v3914_v6, %v14485_v7  ;;  %v11897_v18 = vld [vmem:[#allocation3 + $0x69] sm:$0xff]  ;;  %v3769_v23 = vsel %vm14488_vm0, %v3736_v0, %v14487_v14  ;;  %v14489_v25 = vld [vmem:[#allocation293_spill] sm:$0xff]  ;;  %vm14490_vm5 = vmmov %vm14488_vm0  ;;  %vm14504_vm4 = vcmask 818176   ;;  %v11940_v0 = vpop.permute.xlu1 %5368 }
 0x996   : > { %v3783_v32 = vsel %vm14490_vm5, %v3750_v20, %v14489_v25  ;;  %v14491_v39 = vld [vmem:[#allocation468_spill] sm:$0xff]  ;;  %v14492_v1 = vld [vmem:[#allocation470_spill] sm:$0xff]  ;;  %v14493_v45 = vld [vmem:[#allocation309_spill] sm:$0xff]  ;;  %v6214_v28 = vmax.f32 %v6150_v60, %v11897_v18  ;;  %vm14507_vm5 = vcmask 162816  }
 0x997   : > { %v3980_v31 = vsel %vm3954_vm8, %v3947_v56, %v14491_v39  ;;  %v3966_v33 = vsel %vm3954_vm8, %v3933_v10, %v14492_v1  ;;  %v3816_v30 = vsel %vm3789_vm3, %v3783_v32, %v14493_v45  ;;  %v14494_v24 = vld [vmem:[#allocation311_spill] sm:$0xff]  ;;  %v14495_v46 = vld [vmem:[#allocation486_spill] sm:$0xff]  ;;  %v14496_v62 = vld [vmem:[#allocation509_spill] sm:$0xff]  ;;  %v6023_v32 = vmax.f32 %v5959_v38, %v11897_v18 }
 0x998   : > { %v3802_v27 = vsel %vm3789_vm3, %v3769_v23, %v14494_v24  ;;  %v3999_v37 = vsel %vm3987_vm7, %v3966_v33, %v14495_v46  ;;  %v4013_v57 = vsel %vm3987_vm7, %v3980_v31, %v14496_v62  ;;  %v14498_v58 = vld [vmem:[#allocation179_spill] sm:$0xff]  ;;  %v14502_v44 = vld [vmem:[#allocation352_spill] sm:$0xff]  ;;  %vm14503_vm2 = vmmov %vm14501_vm12 }
 0x999   : > { %v5440_v40 = vsel %vm14497_vm15, %v3999_v37, %v11644_v51  ;;  %v3653_v8 = vsel %vm14499_vm11, %v11727_v22, %v14498_v58  ;;  %v14500_v59 = vld [vmem:[#allocation327_spill] sm:$0xff]  ;;  %v3849_v63 = vsel %vm14503_vm2, %v3816_v30, %v14502_v44  ;;  %vm14505_vm0 = vmmov %vm14497_vm15  ;;  %v11931_v6 = vld [vmem:[#allocation3 + $0x78] sm:$0xff]  ;;  %vm14509_vm15 = vcmask 359424  }
 0x99a   : > { %v3835_v12 = vsel %vm14501_vm12, %v3802_v27, %v14500_v59  ;;  %7309 = vmatmul.msk.f32.gmra.mxu1 %vm14504_vm4, %v5440_v40  ;;  %v5454_v51 = vsel %vm14505_vm0, %v4013_v57, %v5383_v11  ;;  %v6246_v26 = vld [vmem:[#allocation3 + $0x6a] sm:$0xff]  ;;  %v14506_v49 = vld [vmem:[#allocation193_spill] sm:$0xff]  ;;  %v14508_v43 = vld [vmem:[#allocation370_spill] sm:$0xff]  ;;  %v5832_v11 = vmax.f32 %v11803_v53, %v11833_v35  ;;  %v6151_v25 = vmax.f32 %v6086_v17, %v11931_v6  ;;  %v5385_v17 = vpop.permute.xlu2 %5384 }
 0x99b   : > { %v3685_v60 = vsel %vm14507_vm5, %v11710_v9, %v14506_v49  ;;  %v3868_v22 = vsel %vm14509_vm15, %v3835_v12, %v14508_v43  ;;  %v14510_v48 = vld [vmem:[#allocation389_spill] sm:$0xff]  ;;  %vm14511_vm11 = vmmov %vm14509_vm15  ;;  %v14513_v54 = vld [vmem:[#allocation211_spill] sm:$0xff]  ;;  %v6278_v23 = vmax.f32 %v6214_v28, %v6246_v26  ;;  %vm14520_vm2 = vcmask 424960  }
 0x99c   : > { %v3882_v61 = vsel %vm14511_vm11, %v3849_v63, %v14510_v48  ;;  %vm14512_vm12 = vmmov %vm14504_vm4  ;;  %v3704_v20 = vsel %vm3690_vm13, %v11607_v50, %v14513_v54  ;;  %v14514_v41 = vld [vmem:[#allocation230_spill] sm:$0xff]  ;;  %v14515_v10 = vld [vmem:[#allocation405_spill] sm:$0xff]  ;;  %v5896_v39 = vmax.f32 %v5832_v11, %v6245_v4  ;;  %vm14524_vm0 = vcmask 261120  }
 0x99d   : > { %7323 = vmatmul.msk.f32.gmra.mxu3 %vm14512_vm12, %v5454_v51  ;;  %v3718_v9 = vsel %vm3690_vm13, %v3685_v60, %v14514_v41  ;;  %v3915_v7 = vsel %vm3888_vm6, %v3882_v61, %v14515_v10  ;;  %v14516_v56 = vld [vmem:[#allocation407_spill] sm:$0xff]  ;;  %v14517_v53 = vld [vmem:[#allocation246_spill] sm:$0xff]  ;;  %v14518_v31 = vld [vmem:[#allocation248_spill] sm:$0xff]  ;;  %v11982_v60 = vpop.permute.xlu0 %5366  ;;  %vm14533_vm15 = vcmask 523264   ;;  %7336 = vmatmul.msk.f32.gmra.mxu2 %vm285_vm1, %v6278_v23  ;;  %v6087_v48 = vmax.f32 %v6023_v32, %v6246_v26 }
 0x99e   : > { %v3901_v14 = vsel %vm3888_vm6, %v3868_v22, %v14516_v56  ;;  %v3751_v35 = vsel %vm3723_vm14, %v3718_v9, %v14517_v53  ;;  %v3737_v50 = vsel %vm3723_vm14, %v3704_v20, %v14518_v31  ;;  %v14519_v1 = vld [vmem:[#allocation423_spill] sm:$0xff]  ;;  %v14521_v45 = vld [vmem:[#allocation448_spill] sm:$0xff]  ;;  %vm14522_vm4 = vmmov %vm14520_vm2  ;;  %v5960_v61 = vmax.f32 %v5896_v39, %v11931_v6 }
 0x99f   : > { %v3934_v33 = vsel %vm14520_vm2, %v3901_v14, %v14519_v1  ;;  %v3948_v30 = vsel %vm14522_vm4, %v3915_v7, %v14521_v45  ;;  %v11964_v24 = vld [vmem:[#allocation3 + $0x79] sm:$0xff]  ;;  %v14523_v27 = vld [vmem:[#allocation264_spill] sm:$0xff]  ;;  %vm14526_vm5 = vmmov %vm14524_vm0  ;;  %vm14535_vm11 = vcmask 162816   ;;  %vm14537_vm12 = vcmask 326656  }
 0x9a0   : > { %v3770_v46 = vsel %vm14524_vm0, %v3737_v50, %v14523_v27  ;;  %v14525_v37 = vld [vmem:[#allocation289_spill] sm:$0xff]  ;;  %v14527_v62 = vld [vmem:[#allocation466_spill] sm:$0xff]  ;;  %v14529_v38 = vld [vmem:[#allocation307_spill] sm:$0xff]  ;;  %v6215_v22 = vmax.f32 %v6151_v25, %v11964_v24  ;;  %vm14540_vm4 = vcmask 818176   ;;  %v5833_v53 = vmax.f32 %v11867_v47, %v11897_v18  ;;  %v5387_v27 = vpop.permute.xlu1 %5386 }
 0x9a1   : > { %v3784_v4 = vsel %vm14526_vm5, %v3751_v35, %v14525_v37  ;;  %v3967_v57 = vsel %vm3954_vm8, %v3934_v33, %v14527_v62  ;;  %v14528_v40 = vld [vmem:[#allocation485_spill] sm:$0xff]  ;;  %v3803_v58 = vsel %vm3789_vm3, %v3770_v46, %v14529_v38  ;;  %v14530_v59 = vld [vmem:[#allocation326_spill] sm:$0xff]  ;;  %v14532_v51 = vld [vmem:[#allocation503_spill] sm:$0xff] }
 0x9a2   : > { %v3981_v28 = vsel %vm3954_vm8, %v3948_v30, %v14528_v40  ;;  %v3817_v12 = vsel %vm3789_vm3, %v3784_v4, %v14530_v59  ;;  %v14531_v44 = vld [vmem:[#allocation501_spill] sm:$0xff]  ;;  %v4000_v49 = vsel %vm3987_vm7, %v3967_v57, %v14532_v51  ;;  %v14534_v11 = vld [vmem:[#allocation183_spill] sm:$0xff]  ;;  %v14536_v20 = vld [vmem:[#allocation342_spill] sm:$0xff]  ;;  %v6024_v4 = vmax.f32 %v5960_v61, %v11964_v24 }
 0x9a3   : > { %v4014_v63 = vsel %vm3987_vm7, %v3981_v28, %v14531_v44  ;;  %v5441_v43 = vsel %vm14533_vm15, %v4000_v49, %v11704_v42  ;;  %v3686_v54 = vsel %vm14535_vm11, %v3653_v8, %v14534_v11  ;;  %v3850_v41 = vsel %vm14537_vm12, %v3817_v12, %v14536_v20  ;;  %v14538_v9 = vld [vmem:[#allocation344_spill] sm:$0xff]  ;;  %vm14539_vm2 = vmmov %vm14537_vm12  ;;  %v6247_v7 = vld [vmem:[#allocation3 + $0x7a] sm:$0xff] }
 0x9a4   : > { %v3836_v10 = vsel %vm14539_vm2, %v3803_v58, %v14538_v9  ;;  %7310 = vmatmul.msk.f32.gmra.mxu1 %vm14540_vm4, %v5441_v43  ;;  %vm14541_vm0 = vmmov %vm14533_vm15  ;;  %v11997_v56 = vld [vmem:[#allocation3 + $0x80] sm:$0xff]  ;;  %v14542_v14 = vld [vmem:[#allocation185_spill] sm:$0xff]  ;;  %vm14545_vm15 = vcmask 359424   ;;  %v6279_v46 = vmax.f32 %v6215_v22, %v6247_v7  ;;  %v5897_v62 = vmax.f32 %v5833_v53, %v6246_v26 }
 0x9a5   : > { %v5455_v42 = vsel %vm14541_vm0, %v4014_v63, %v5385_v17  ;;  %vm14543_vm5 = vmmov %vm14535_vm11  ;;  %v14544_v25 = vld [vmem:[#allocation360_spill] sm:$0xff]  ;;  %v14546_v32 = vld [vmem:[#allocation385_spill] sm:$0xff]  ;;  %v6152_v37 = vmax.f32 %v6087_v48, %v11997_v56  ;;  %vm14556_vm2 = vcmask 424960   ;;  %vm14560_vm0 = vcmask 261120  }
 0x9a6   : > { %v3672_v23 = vsel %vm14543_vm5, %v11416_v34, %v14542_v14  ;;  %v3869_v8 = vsel %vm14545_vm15, %v3836_v10, %v14544_v25  ;;  %vm14547_vm11 = vmmov %vm14545_vm15  ;;  %v14549_v35 = vld [vmem:[#allocation201_spill] sm:$0xff]  ;;  %v14550_v50 = vld [vmem:[#allocation226_spill] sm:$0xff]  ;;  %vm14569_vm15 = vcmask 523264   ;;  %7337 = vmatmul.msk.f32.gmra.mxu2 %vm285_vm1, %v6279_v46  ;;  %v5961_v25 = vmax.f32 %v5897_v62, %v11997_v56 }
 0x9a7   : > { %v3883_v39 = vsel %vm14547_vm11, %v3850_v41, %v14546_v32  ;;  %vm14548_vm12 = vmmov %vm14540_vm4  ;;  %v3705_v31 = vsel %vm3690_vm13, %v3672_v23, %v14549_v35  ;;  %v3719_v1 = vsel %vm3690_vm13, %v3686_v54, %v14550_v50  ;;  %v14551_v33 = vld [vmem:[#allocation403_spill] sm:$0xff]  ;;  %v14552_v45 = vld [vmem:[#allocation422_spill] sm:$0xff]  ;;  %v6088_v23 = vmax.f32 %v6024_v4, %v6247_v7 }
 0x9a8   : > { %7324 = vmatmul.msk.f32.gmra.mxu3 %vm14548_vm12, %v5455_v42  ;;  %v3902_v34 = vsel %vm3888_vm6, %v3869_v8, %v14551_v33  ;;  %v3916_v30 = vsel %vm3888_vm6, %v3883_v39, %v14552_v45  ;;  %v14553_v47 = vld [vmem:[#allocation244_spill] sm:$0xff]  ;;  %v14554_v57 = vld [vmem:[#allocation263_spill] sm:$0xff]  ;;  %v14555_v28 = vld [vmem:[#allocation438_spill] sm:$0xff]  ;;  %vm14571_vm11 = vcmask 162816   ;;  %vm14573_vm12 = vcmask 326656  }
 0x9a9   : > { %v3738_v18 = vsel %vm3723_vm14, %v3705_v31, %v14553_v47  ;;  %v3752_v40 = vsel %vm3723_vm14, %v3719_v1, %v14554_v57  ;;  %v3949_v17 = vsel %vm14556_vm2, %v3916_v30, %v14555_v28  ;;  %v14557_v38 = vld [vmem:[#allocation440_spill] sm:$0xff]  ;;  %vm14558_vm4 = vmmov %vm14556_vm2  ;;  %v12027_v59 = vld [vmem:[#allocation3 + $0x81] sm:$0xff] }
 0x9aa   : > { %v3935_v58 = vsel %vm14558_vm4, %v3902_v34, %v14557_v38  ;;  %v14559_v12 = vld [vmem:[#allocation279_spill] sm:$0xff]  ;;  %v14561_v63 = vld [vmem:[#allocation281_spill] sm:$0xff]  ;;  %vm14562_vm5 = vmmov %vm14560_vm0  ;;  %v6216_v14 = vmax.f32 %v6152_v37, %v12027_v59  ;;  %vm14576_vm4 = vcmask 818176   ;;  %v12068_v37 = vpop.permute.xlu0 %5370 }
 0x9ab   : > { %v3785_v44 = vsel %vm14560_vm0, %v3752_v40, %v14559_v12  ;;  %v3771_v26 = vsel %vm14562_vm5, %v3738_v18, %v14561_v63  ;;  %v14563_v51 = vld [vmem:[#allocation456_spill] sm:$0xff]  ;;  %v14564_v43 = vld [vmem:[#allocation481_spill] sm:$0xff]  ;;  %v14566_v11 = vld [vmem:[#allocation322_spill] sm:$0xff]  ;;  %v6025_v12 = vmax.f32 %v5961_v25, %v12027_v59 }
 0x9ac   : > { %v3968_v49 = vsel %vm3954_vm8, %v3935_v58, %v14563_v51  ;;  %v3982_v22 = vsel %vm3954_vm8, %v3949_v17, %v14564_v43  ;;  %v14565_v48 = vld [vmem:[#allocation297_spill] sm:$0xff]  ;;  %v3818_v54 = vsel %vm3789_vm3, %v3785_v44, %v14566_v11  ;;  %v14567_v20 = vld [vmem:[#allocation499_spill] sm:$0xff]  ;;  %v14572_v39 = vld [vmem:[#allocation340_spill] sm:$0xff]  ;;  %v12081_v17 = vpop.permute.xlu2 %5372 }
 0x9ad   : > { %v3804_v61 = vsel %vm3789_vm3, %v3771_v26, %v14565_v48  ;;  %v4001_v41 = vsel %vm3987_vm7, %v3968_v49, %v14567_v20  ;;  %v14568_v9 = vld [vmem:[#allocation515_spill] sm:$0xff]  ;;  %v14570_v8 = vld [vmem:[#allocation181_spill] sm:$0xff]  ;;  %vm14575_vm2 = vmmov %vm14573_vm12 }
 0x9ae   : > { %v4015_v10 = vsel %vm3987_vm7, %v3982_v22, %v14568_v9  ;;  %v5442_v42 = vsel %vm14569_vm15, %v4001_v41, %v11747_v19  ;;  %v3673_v32 = vsel %vm14571_vm11, %v11426_v13, %v14570_v8  ;;  %v3837_v53 = vsel %vm14573_vm12, %v3804_v61, %v14572_v39  ;;  %v14574_v35 = vld [vmem:[#allocation359_spill] sm:$0xff]  ;;  %vm14577_vm0 = vmmov %vm14569_vm15  ;;  %v12059_v1 = vld [vmem:[#allocation3 + $0x90] sm:$0xff] }
 0x9af   : > { %v3851_v31 = vsel %vm14575_vm2, %v3818_v54, %v14574_v35  ;;  %7311 = vmatmul.msk.f32.gmra.mxu1 %vm14576_vm4, %v5442_v42  ;;  %v5456_v19 = vsel %vm14577_vm0, %v4015_v10, %v5387_v27  ;;  %v6248_v50 = vld [vmem:[#allocation3 + $0x82] sm:$0xff]  ;;  %v14578_v33 = vld [vmem:[#allocation200_spill] sm:$0xff]  ;;  %vm14579_vm5 = vmmov %vm14571_vm11  ;;  %vm14581_vm15 = vcmask 359424   ;;  %v5834_v27 = vmax.f32 %v11931_v6, %v11964_v24  ;;  %v5389_v42 = vpop.permute.xlu1 %5388 }
 0x9b0   : > { %v3687_v34 = vsel %vm14579_vm5, %v11731_v2, %v14578_v33  ;;  %v14580_v45 = vld [vmem:[#allocation375_spill] sm:$0xff]  ;;  %v14582_v30 = vld [vmem:[#allocation377_spill] sm:$0xff]  ;;  %vm14583_vm11 = vmmov %vm14581_vm15  ;;  %v6280_v38 = vmax.f32 %v6216_v14, %v6248_v50  ;;  %v6153_v58 = vmax.f32 %v6088_v23, %v12059_v1  ;;  %vm14592_vm2 = vcmask 424960  }
 0x9b1   : > { %v3884_v13 = vsel %vm14581_vm15, %v3851_v31, %v14580_v45  ;;  %v3870_v46 = vsel %vm14583_vm11, %v3837_v53, %v14582_v30  ;;  %vm14584_vm12 = vmmov %vm14576_vm4  ;;  %v14585_v4 = vld [vmem:[#allocation216_spill] sm:$0xff]  ;;  %v14586_v47 = vld [vmem:[#allocation218_spill] sm:$0xff]  ;;  %v5898_v6 = vmax.f32 %v5834_v27, %v6247_v7  ;;  %vm14596_vm0 = vcmask 261120  }
 0x9b2   : > { %7325 = vmatmul.msk.f32.gmra.mxu3 %vm14584_vm12, %v5456_v19  ;;  %v3720_v62 = vsel %vm3690_vm13, %v3687_v34, %v14585_v4  ;;  %v3706_v18 = vsel %vm3690_vm13, %v3673_v32, %v14586_v47  ;;  %v14587_v2 = vld [vmem:[#allocation393_spill] sm:$0xff]  ;;  %v14588_v40 = vld [vmem:[#allocation418_spill] sm:$0xff]  ;;  %v14590_v63 = vld [vmem:[#allocation259_spill] sm:$0xff]  ;;  %vm14605_vm15 = vcmask 523264   ;;  %7338 = vmatmul.msk.f32.gmra.mxu2 %vm285_vm1, %v6280_v38  ;;  %v6089_v33 = vmax.f32 %v6025_v12, %v6248_v50 }
 0x9b3   : > { %v3903_v57 = vsel %vm3888_vm6, %v3870_v46, %v14587_v2  ;;  %v3917_v28 = vsel %vm3888_vm6, %v3884_v13, %v14588_v40  ;;  %v14589_v24 = vld [vmem:[#allocation234_spill] sm:$0xff]  ;;  %v3753_v26 = vsel %vm3723_vm14, %v3720_v62, %v14590_v63  ;;  %v14591_v51 = vld [vmem:[#allocation436_spill] sm:$0xff]  ;;  %v14593_v43 = vld [vmem:[#allocation455_spill] sm:$0xff]  ;;  %v5962_v34 = vmax.f32 %v5898_v6, %v12059_v1  ;;  %v12148_v63 = vpop.permute.xlu0 %5374 }
 0x9b4   : > { %v3739_v44 = vsel %vm3723_vm14, %v3706_v18, %v14589_v24  ;;  %v3936_v49 = vsel %vm14592_vm2, %v3903_v57, %v14591_v51  ;;  %vm14594_vm4 = vmmov %vm14592_vm2  ;;  %v12093_v48 = vld [vmem:[#allocation3 + $0x91] sm:$0xff]  ;;  %v14599_v20 = vld [vmem:[#allocation471_spill] sm:$0xff]  ;;  %vm14607_vm11 = vcmask 326656   ;;  %vm14610_vm2 = vcmask 818176  }
 0x9b5   : > { %v3950_v22 = vsel %vm14594_vm4, %v3917_v28, %v14593_v43  ;;  %v14595_v61 = vld [vmem:[#allocation277_spill] sm:$0xff]  ;;  %v14597_v54 = vld [vmem:[#allocation296_spill] sm:$0xff]  ;;  %vm14598_vm5 = vmmov %vm14596_vm0  ;;  %v6217_v19 = vmax.f32 %v6153_v58, %v12093_v48 }
 0x9b6   : > { %v3772_v11 = vsel %vm14596_vm0, %v3739_v44, %v14595_v61  ;;  %v3786_v7 = vsel %vm14598_vm5, %v3753_v26, %v14597_v54  ;;  %v3983_v41 = vsel %vm3954_vm8, %v3950_v22, %v14599_v20  ;;  %v14600_v9 = vld [vmem:[#allocation473_spill] sm:$0xff]  ;;  %v14601_v14 = vld [vmem:[#allocation312_spill] sm:$0xff]  ;;  %v14602_v25 = vld [vmem:[#allocation314_spill] sm:$0xff]  ;;  %vm14613_vm0 = vcmask 162816  }
 0x9b7   : > { %v3969_v10 = vsel %vm3954_vm8, %v3936_v49, %v14600_v9  ;;  %v3819_v23 = vsel %vm3789_vm3, %v3786_v7, %v14601_v14  ;;  %v3805_v8 = vsel %vm3789_vm3, %v3772_v11, %v14602_v25  ;;  %v14603_v32 = vld [vmem:[#allocation489_spill] sm:$0xff]  ;;  %v14604_v53 = vld [vmem:[#allocation511_spill] sm:$0xff]  ;;  %v14606_v45 = vld [vmem:[#allocation330_spill] sm:$0xff]  ;;  %v6026_v49 = vmax.f32 %v5962_v34, %v12093_v48 }
 0x9b8   : > { %v4002_v39 = vsel %vm3987_vm7, %v3969_v10, %v14603_v32  ;;  %v4016_v35 = vsel %vm3987_vm7, %v3983_v41, %v14604_v53  ;;  %v3838_v13 = vsel %vm14607_vm11, %v3805_v8, %v14606_v45  ;;  %v14608_v30 = vld [vmem:[#allocation355_spill] sm:$0xff]  ;;  %vm14609_vm12 = vmmov %vm14607_vm11  ;;  %v6249_v4 = vld [vmem:[#allocation3 + $0x92] sm:$0xff] }
 0x9b9   : > { %v5443_v31 = vsel %vm14605_vm15, %v4002_v39, %v11779_v52  ;;  %v3852_v46 = vsel %vm14609_vm12, %v3819_v23, %v14608_v30  ;;  %vm14611_vm4 = vmmov %vm14605_vm15  ;;  %v12122_v62 = vld [vmem:[#allocation3 + $0x98] sm:$0xff]  ;;  %v5835_v52 = vmax.f32 %v11997_v56, %v12027_v59  ;;  %v14612_v47 = vld [vmem:[#allocation184_spill] sm:$0xff]  ;;  %vm14617_vm15 = vcmask 359424   ;;  %v5391_v39 = vpop.permute.xlu2 %5390 }
 0x9ba   : > { %7312 = vmatmul.msk.f32.gmra.mxu1 %vm14610_vm2, %v5443_v31  ;;  %v5457_v27 = vsel %vm14611_vm4, %v4016_v35, %v5389_v42  ;;  %v12129_v18 = vsel %vm14613_vm0, %v11493_v36, %v14612_v47  ;;  %v14614_v2 = vld [vmem:[#allocation196_spill] sm:$0xff]  ;;  %vm14615_vm5 = vmmov %vm14613_vm0  ;;  %v14616_v40 = vld [vmem:[#allocation373_spill] sm:$0xff]  ;;  %v6281_v26 = vmax.f32 %v6217_v19, %v6249_v4  ;;  %v6154_v51 = vmax.f32 %v6089_v33, %v12122_v62 }
 0x9bb   : > { %v3688_v57 = vsel %vm14615_vm5, %v11169_v55, %v14614_v2  ;;  %v3871_v28 = vsel %vm14617_vm15, %v3838_v13, %v14616_v40  ;;  %v14618_v38 = vld [vmem:[#allocation392_spill] sm:$0xff]  ;;  %vm14619_vm11 = vmmov %vm14617_vm15  ;;  %v14621_v12 = vld [vmem:[#allocation214_spill] sm:$0xff]  ;;  %v5899_v43 = vmax.f32 %v5835_v52, %v6248_v50  ;;  %vm14632_vm0 = vcmask 261120  }
 0x9bc   : > { %v3885_v58 = vsel %vm14619_vm11, %v3852_v46, %v14618_v38  ;;  %vm14620_vm12 = vmmov %vm14610_vm2  ;;  %v3707_v56 = vsel %vm3690_vm13, %v11618_v29, %v14621_v12  ;;  %v14622_v59 = vld [vmem:[#allocation233_spill] sm:$0xff]  ;;  %v14623_v6 = vld [vmem:[#allocation408_spill] sm:$0xff]  ;;  %vm14628_vm2 = vcmask 424960   ;;  %vm14641_vm15 = vcmask 523264   ;;  %7339 = vmatmul.msk.f32.gmra.mxu2 %vm285_vm1, %v6281_v26 }
 0x9bd   : > { %7326 = vmatmul.msk.f32.gmra.mxu3 %vm14620_vm12, %v5457_v27  ;;  %v3721_v36 = vsel %vm3690_vm13, %v3688_v57, %v14622_v59  ;;  %v3918_v24 = vsel %vm3888_vm6, %v3885_v58, %v14623_v6  ;;  %v14624_v44 = vld [vmem:[#allocation410_spill] sm:$0xff]  ;;  %v14625_v22 = vld [vmem:[#allocation249_spill] sm:$0xff]  ;;  %v14626_v61 = vld [vmem:[#allocation251_spill] sm:$0xff]  ;;  %v6090_v27 = vmax.f32 %v6026_v49, %v6249_v4  ;;  %v5963_v52 = vmax.f32 %v5899_v43, %v12122_v62 }
 0x9be   : > { %v3904_v55 = vsel %vm3888_vm6, %v3871_v28, %v14624_v44  ;;  %v3754_v29 = vsel %vm3723_vm14, %v3721_v36, %v14625_v22  ;;  %v3740_v11 = vsel %vm3723_vm14, %v3707_v56, %v14626_v61  ;;  %v14627_v54 = vld [vmem:[#allocation426_spill] sm:$0xff]  ;;  %v14629_v20 = vld [vmem:[#allocation451_spill] sm:$0xff]  ;;  %vm14630_vm4 = vmmov %vm14628_vm2  ;;  %vm14643_vm11 = vcmask 326656  }
 0x9bf   : > { %v3937_v7 = vsel %vm14628_vm2, %v3904_v55, %v14627_v54  ;;  %v3951_v41 = vsel %vm14630_vm4, %v3918_v24, %v14629_v20  ;;  %v12160_v9 = vld [vmem:[#allocation3 + $0x99] sm:$0xff]  ;;  %v14631_v10 = vld [vmem:[#allocation267_spill] sm:$0xff]  ;;  %v14633_v14 = vld [vmem:[#allocation292_spill] sm:$0xff]  ;;  %vm14646_vm2 = vcmask 818176  }
 0x9c0   : > { %v3773_v42 = vsel %vm14632_vm0, %v3740_v11, %v14631_v10  ;;  %vm14634_vm5 = vmmov %vm14632_vm0  ;;  %v14635_v23 = vld [vmem:[#allocation469_spill] sm:$0xff]  ;;  %v14636_v8 = vld [vmem:[#allocation488_spill] sm:$0xff]  ;;  %v6218_v46 = vmax.f32 %v6154_v51, %v12160_v9  ;;  %vm14649_vm0 = vcmask 162816   ;;  %v6027_v61 = vmax.f32 %v5963_v52, %v12160_v9 }
 0x9c1   : > { %v3787_v50 = vsel %vm14634_vm5, %v3754_v29, %v14633_v14  ;;  %v3970_v25 = vsel %vm3954_vm8, %v3937_v7, %v14635_v23  ;;  %v3984_v32 = vsel %vm3954_vm8, %v3951_v41, %v14636_v8  ;;  %v14637_v53 = vld [vmem:[#allocation310_spill] sm:$0xff]  ;;  %v14638_v31 = vld [vmem:[#allocation329_spill] sm:$0xff]  ;;  %v14639_v33 = vld [vmem:[#allocation504_spill] sm:$0xff] }
 0x9c2   : > { %v3806_v35 = vsel %vm3789_vm3, %v3773_v42, %v14637_v53  ;;  %v3820_v19 = vsel %vm3789_vm3, %v3787_v50, %v14638_v31  ;;  %v4017_v34 = vsel %vm3987_vm7, %v3984_v32, %v14639_v33  ;;  %v14640_v45 = vld [vmem:[#allocation506_spill] sm:$0xff]  ;;  %v14642_v47 = vld [vmem:[#allocation345_spill] sm:$0xff]  ;;  %v14644_v57 = vld [vmem:[#allocation347_spill] sm:$0xff]  ;;  %v5591_v33 = vpop.f32.mrf.mxu1 }
 0x9c3   : > { %v4003_v13 = vsel %vm3987_vm7, %v3970_v25, %v14640_v45  ;;  %v3853_v2 = vsel %vm14643_vm11, %v3820_v19, %v14642_v47  ;;  %vm14645_vm12 = vmmov %vm14643_vm11  ;;  %v6250_v38 = vld [vmem:[#allocation3 + $0x9a] sm:$0xff]  ;;  %v12189_v58 = vld [vmem:[#allocation3 + $0xa8] sm:$0xff]  ;;  %v5393_v19 = vpop.permute.xlu0 %5392  ;;  %6550 = vrot.lane.b32.xlu2 %v5591_v33, %s7486_s8  ;;  %v5395_v33 = vpop.permute.xlu1 %5394 }
 0x9c4   : > { %v5444_v30 = vsel %vm14641_vm15, %v4003_v13, %v11907_v21  ;;  %v3839_v40 = vsel %vm14645_vm12, %v3806_v35, %v14644_v57  ;;  %vm14647_vm4 = vmmov %vm14641_vm15  ;;  %v5836_v21 = vmax.f32 %v12059_v1, %v12093_v48  ;;  %v14648_v12 = vld [vmem:[#allocation186_spill] sm:$0xff]  ;;  %v14650_v59 = vld [vmem:[#allocation188_spill] sm:$0xff]  ;;  %vm14653_vm15 = vcmask 359424  }
 0x9c5   : > { %7313 = vmatmul.msk.f32.gmra.mxu1 %vm14646_vm2, %v5444_v30  ;;  %v5458_v28 = vsel %vm14647_vm4, %v4017_v34, %v5391_v39  ;;  %v3689_v56 = vsel %vm14649_vm0, %v11180_v16, %v14648_v12  ;;  %vm14651_vm5 = vmmov %vm14649_vm0  ;;  %v14652_v6 = vld [vmem:[#allocation363_spill] sm:$0xff]  ;;  %v14654_v44 = vld [vmem:[#allocation388_spill] sm:$0xff]  ;;  %v6282_v22 = vmax.f32 %v6218_v46, %v6250_v38  ;;  %v6155_v29 = vmax.f32 %v6090_v27, %v12189_v58 }
 0x9c6   : > { %v3675_v36 = vsel %vm14651_vm5, %v11438_v5, %v14650_v59  ;;  %v3872_v24 = vsel %vm14653_vm15, %v3839_v40, %v14652_v6  ;;  %vm14655_vm11 = vmmov %vm14653_vm15  ;;  %v14657_v26 = vld [vmem:[#allocation204_spill] sm:$0xff]  ;;  %v14658_v1 = vld [vmem:[#allocation229_spill] sm:$0xff]  ;;  %v5900_v11 = vmax.f32 %v5836_v21, %v6249_v4  ;;  %vm14668_vm0 = vcmask 261120  }
 0x9c7   : > { %v3886_v55 = vsel %vm14655_vm11, %v3853_v2, %v14654_v44  ;;  %vm14656_vm12 = vmmov %vm14646_vm2  ;;  %v3708_v51 = vsel %vm3690_vm13, %v3675_v36, %v14657_v26  ;;  %v3722_v48 = vsel %vm3690_vm13, %v3689_v56, %v14658_v1  ;;  %v14659_v49 = vld [vmem:[#allocation406_spill] sm:$0xff]  ;;  %v14660_v43 = vld [vmem:[#allocation425_spill] sm:$0xff]  ;;  %vm14664_vm2 = vcmask 424960   ;;  %7340 = vmatmul.msk.f32.gmra.mxu2 %vm285_vm1, %v6282_v22 }
 0x9c8   : > { %7327 = vmatmul.msk.f32.gmra.mxu3 %vm14656_vm12, %v5458_v28  ;;  %v3905_v16 = vsel %vm3888_vm6, %v3872_v24, %v14659_v49  ;;  %v3919_v5 = vsel %vm3888_vm6, %v3886_v55, %v14660_v43  ;;  %v14661_v54 = vld [vmem:[#allocation247_spill] sm:$0xff]  ;;  %v14662_v20 = vld [vmem:[#allocation266_spill] sm:$0xff]  ;;  %v14663_v10 = vld [vmem:[#allocation441_spill] sm:$0xff]  ;;  %vm14677_vm15 = vcmask 523264   ;;  %v6091_v40 = vmax.f32 %v6027_v61, %v6250_v38 }
 0x9c9   : > { %v3741_v7 = vsel %vm3723_vm14, %v3708_v51, %v14661_v54  ;;  %v3755_v41 = vsel %vm3723_vm14, %v3722_v48, %v14662_v20  ;;  %v3952_v42 = vsel %vm14664_vm2, %v3919_v5, %v14663_v10  ;;  %v14665_v14 = vld [vmem:[#allocation443_spill] sm:$0xff]  ;;  %vm14666_vm4 = vmmov %vm14664_vm2  ;;  %v14667_v25 = vld [vmem:[#allocation282_spill] sm:$0xff]  ;;  %v5964_v28 = vmax.f32 %v5900_v11, %v12189_v58 }
 0x9ca   : > { %v3938_v50 = vsel %vm14666_vm4, %v3905_v16, %v14665_v14  ;;  %v12222_v23 = vld [vmem:[#allocation3 + $0xa9] sm:$0xff]  ;;  %v3788_v8 = vsel %vm14668_vm0, %v3755_v41, %v14667_v25  ;;  %vm14670_vm5 = vmmov %vm14668_vm0  ;;  %v14674_v13 = vld [vmem:[#allocation325_spill] sm:$0xff]  ;;  %vm14679_vm11 = vcmask 326656   ;;  %vm14682_vm2 = vcmask 818176  }
 0x9cb   : > { %v14669_v32 = vld [vmem:[#allocation284_spill] sm:$0xff]  ;;  %v14671_v39 = vld [vmem:[#allocation459_spill] sm:$0xff]  ;;  %v3821_v30 = vsel %vm3789_vm3, %v3788_v8, %v14674_v13  ;;  %v14675_v46 = vld [vmem:[#allocation502_spill] sm:$0xff]  ;;  %v6219_v57 = vmax.f32 %v6155_v29, %v12222_v23  ;;  %vm14686_vm0 = vcmask 359424   ;;  %v6028_v11 = vmax.f32 %v5964_v28, %v12222_v23 }
 0x9cc   : > { %v3774_v4 = vsel %vm14670_vm5, %v3741_v7, %v14669_v32  ;;  %v3971_v53 = vsel %vm3954_vm8, %v3938_v50, %v14671_v39  ;;  %v14672_v35 = vld [vmem:[#allocation484_spill] sm:$0xff]  ;;  %v14676_v52 = vld [vmem:[#allocation517_spill] sm:$0xff]  ;;  %v14678_v21 = vld [vmem:[#allocation343_spill] sm:$0xff] }
 0x9cd   : > { %v3985_v31 = vsel %vm3954_vm8, %v3952_v42, %v14672_v35  ;;  %v14673_v34 = vld [vmem:[#allocation300_spill] sm:$0xff]  ;;  %v4004_v27 = vsel %vm3987_vm7, %v3971_v53, %v14675_v46  ;;  %v14680_v56 = vld [vmem:[#allocation362_spill] sm:$0xff]  ;;  %vm14681_vm12 = vmmov %vm14679_vm11 }
 0x9ce   : > { %v3807_v45 = vsel %vm3789_vm3, %v3774_v4, %v14673_v34  ;;  %v4018_v47 = vsel %vm3987_vm7, %v3985_v31, %v14676_v52  ;;  %v5445_v2 = vsel %vm14677_vm15, %v4004_v27, %v11851_v15  ;;  %v3854_v59 = vsel %vm14681_vm12, %v3821_v30, %v14680_v56  ;;  %vm14683_vm4 = vmmov %vm14677_vm15  ;;  %v6251_v6 = vld [vmem:[#allocation3 + $0xaa] sm:$0xff]  ;;  %v14684_v44 = vld [vmem:[#allocation221_spill] sm:$0xff]  ;;  %v5594_v34 = vpop.f32.mrf.mxu1 }
 0x9cf   : > { %v3840_v12 = vsel %vm14679_vm11, %v3807_v45, %v14678_v21  ;;  %7314 = vmatmul.msk.f32.gmra.mxu1 %vm14682_vm2, %v5445_v2  ;;  %v5459_v36 = vsel %vm14683_vm4, %v4018_v47, %v5393_v19  ;;  %v12252_v24 = vld [vmem:[#allocation3 + $0xb0] sm:$0xff]  ;;  %v5837_v15 = vmax.f32 %v12122_v62, %v12160_v9  ;;  %v3709_v55 = vsel %vm3690_vm13, %v12129_v18, %v14684_v44  ;;  %v14685_v26 = vld [vmem:[#allocation378_spill] sm:$0xff]  ;;  %vm14688_vm5 = vmmov %vm14686_vm0 }
 0x9d0   : > { %v3887_v51 = vsel %vm14686_vm0, %v3854_v59, %v14685_v26  ;;  %v14687_v1 = vld [vmem:[#allocation380_spill] sm:$0xff]  ;;  %vm14689_vm15 = vmmov %vm14682_vm2  ;;  %v14691_v43 = vld [vmem:[#allocation237_spill] sm:$0xff]  ;;  %v6283_v29 = vmax.f32 %v6219_v57, %v6251_v6  ;;  %v6156_v61 = vmax.f32 %v6091_v40, %v12252_v24  ;;  %vm14696_vm11 = vcmask 261120   ;;  %6552 = vrot.lane.b32.xlu0 %v5594_v34, %s7486_s8 }
 0x9d1   : > { %v3873_v48 = vsel %vm14688_vm5, %v3840_v12, %v14687_v1  ;;  %7328 = vmatmul.msk.f32.gmra.mxu3 %vm14689_vm15, %v5459_v36  ;;  %v14690_v49 = vld [vmem:[#allocation136_spill] sm:$0xff]  ;;  %v3742_v5 = vsel %vm3723_vm14, %v3709_v55, %v14691_v43  ;;  %v14693_v22 = vld [vmem:[#allocation421_spill] sm:$0xff]  ;;  %v5901_v54 = vmax.f32 %v5837_v15, %v6250_v38  ;;  %v14694_v20 = vld [vmem:[#allocation139_spill] sm:$0xff]  ;;  %vm14698_vm12 = vcmask 424960  }
 0x9d2   : > { %v3611_v16 = vsel %vm3591_vm10, %v11482_v3, %v14690_v49  ;;  %v14692_v62 = vld [vmem:[#allocation396_spill] sm:$0xff]  ;;  %v3920_v18 = vsel %vm3888_vm6, %v3887_v51, %v14693_v22  ;;  %v14697_v42 = vld [vmem:[#allocation439_spill] sm:$0xff]  ;;  %v14699_v50 = vld [vmem:[#allocation458_spill] sm:$0xff]  ;;  %vm14702_vm4 = vcmask 130048   ;;  %vm14708_vm0 = vcmask 326656   ;;  %7341 = vmatmul.msk.f32.gmra.mxu2 %vm285_vm1, %v6283_v29 }
 0x9d3   : > { %v3906_v9 = vsel %vm3888_vm6, %v3873_v48, %v14692_v62  ;;  %v7457_v7 = vld [vmem:[#allocation2 + $0xf0] sm:$0xff]  ;;  %vm14700_vm2 = vmmov %vm14698_vm12  ;;  %v14701_v32 = vld [vmem:[#allocation143_spill] sm:$0xff]  ;;  %vm14711_vm5 = vcmask 523264   ;;  %v6092_v28 = vmax.f32 %v6028_v11, %v6251_v6  ;;  %v5965_v21 = vmax.f32 %v5901_v54, %v12252_v24 }
 0x9d4   : > { %v3546_v41 = vsel %vm285_vm1, %v7457_v7, %v14694_v20  ;;  %v14695_v3 = vld [vmem:[#allocation280_spill] sm:$0xff]  ;;  %v3939_v14 = vsel %vm14698_vm12, %v3906_v9, %v14697_v42  ;;  %v3953_v25 = vsel %vm14700_vm2, %v3920_v18, %v14699_v50  ;;  %v3644_v4 = vsel %vm14702_vm4, %v3611_v16, %v14701_v32  ;;  %v14703_v39 = vld [vmem:[#allocation317_spill] sm:$0xff]  ;;  %v14704_v53 = vld [vmem:[#allocation474_spill] sm:$0xff] }
 0x9d5   : > { %v3775_v10 = vsel %vm14696_vm11, %v3742_v5, %v14695_v3  ;;  %v12283_v8 = vld [vmem:[#allocation3 + $0xb1] sm:$0xff]  ;;  %v3986_v35 = vsel %vm3954_vm8, %v3953_v25, %v14704_v53  ;;  %v14706_v45 = vld [vmem:[#allocation146_spill] sm:$0xff]  ;;  %vm14713_vm15 = vcmask 162816   ;;  %vm14715_vm11 = vcmask 359424   ;;  %vm14717_vm2 = vmmov %vm14711_vm5 }
 0x9d6   : > { %v3808_v38 = vsel %vm3789_vm3, %v3775_v10, %v14703_v39  ;;  %v14705_v31 = vld [vmem:[#allocation476_spill] sm:$0xff]  ;;  %v3579_v13 = vsel %vm3558_vm9, %v3546_v41, %v14706_v45  ;;  %v14707_v30 = vld [vmem:[#allocation333_spill] sm:$0xff]  ;;  %v14710_v47 = vld [vmem:[#allocation514_spill] sm:$0xff]  ;;  %v6220_v40 = vmax.f32 %v6156_v61, %v12283_v8  ;;  %vm14716_vm12 = vcmask 818176   ;;  %v5597_v42 = vpop.f32.mrf.mxu1 }
 0x9d7   : > { %v3972_v19 = vsel %vm3954_vm8, %v3939_v14, %v14705_v31  ;;  %v3841_v46 = vsel %vm14708_vm0, %v3808_v38, %v14707_v30  ;;  %v14709_v27 = vld [vmem:[#allocation492_spill] sm:$0xff]  ;;  %v4019_v2 = vsel %vm3987_vm7, %v3986_v35, %v14710_v47  ;;  %v14712_v12 = vld [vmem:[#allocation174_spill] sm:$0xff]  ;;  %v14718_v26 = vld [vmem:[#allocation217_spill] sm:$0xff]  ;;  %vm14724_vm0 = vcmask 424960   ;;  %6554 = vrot.lane.b32.xlu1 %v5597_v42, %s7486_s8 }
 0x9d8   : > { %v4005_v52 = vsel %vm3987_vm7, %v3972_v19, %v14709_v27  ;;  %v3677_v56 = vsel %vm14713_vm15, %v3644_v4, %v14712_v12  ;;  %v14714_v59 = vld [vmem:[#allocation376_spill] sm:$0xff]  ;;  %v5460_v15 = vsel %vm14717_vm2, %v4019_v2, %v5395_v33  ;;  %v12313_v55 = vld [vmem:[#allocation3 + $0xc0] sm:$0xff]  ;;  %v14719_v1 = vld [vmem:[#allocation413_spill] sm:$0xff]  ;;  %vm14731_vm15 = vcmask 130048  }
 0x9d9   : > { %v5446_v57 = vsel %vm14711_vm5, %v4005_v52, %v11982_v60  ;;  %v3874_v36 = vsel %vm14715_vm11, %v3841_v46, %v14714_v59  ;;  %v6252_v44 = vld [vmem:[#allocation3 + $0xb2] sm:$0xff]  ;;  %v5838_v60 = vmax.f32 %v12189_v58, %v12222_v23  ;;  %v3710_v51 = vsel %vm3690_vm13, %v3677_v56, %v14718_v26  ;;  %vm14720_vm4 = vmmov %vm14716_vm12  ;;  %v14721_v49 = vld [vmem:[#allocation135_spill] sm:$0xff] }
 0x9da   : > { %7315 = vmatmul.msk.f32.gmra.mxu1 %vm14716_vm12, %v5446_v57  ;;  %v3907_v48 = vsel %vm3888_vm6, %v3874_v36, %v14719_v1  ;;  %7329 = vmatmul.msk.f32.gmra.mxu3 %vm14720_vm4, %v5460_v15  ;;  %v3612_v16 = vsel %vm3591_vm10, %v3579_v13, %v14721_v49  ;;  %v14722_v43 = vld [vmem:[#allocation254_spill] sm:$0xff]  ;;  %v14723_v62 = vld [vmem:[#allocation429_spill] sm:$0xff]  ;;  %v6284_v22 = vmax.f32 %v6220_v40, %v6252_v44  ;;  %vm14726_vm5 = vcmask 261120   ;;  %v14727_v11 = vld [vmem:[#allocation472_spill] sm:$0xff] }
 0x9db   : > { %v3743_v5 = vsel %vm3723_vm14, %v3710_v51, %v14722_v43  ;;  %v3940_v9 = vsel %vm14724_vm0, %v3907_v48, %v14723_v62  ;;  %v6157_v58 = vmax.f32 %v6092_v28, %v12313_v55  ;;  %v6029_v23 = vmax.f32 %v5965_v21, %v12283_v8  ;;  %v14725_v29 = vld [vmem:[#allocation270_spill] sm:$0xff]  ;;  %v14728_v20 = vld [vmem:[#allocation313_spill] sm:$0xff]  ;;  %v14729_v3 = vld [vmem:[#allocation508_spill] sm:$0xff] }
 0x9dc   : > { %v5902_v18 = vmax.f32 %v5838_v60, %v6251_v6  ;;  %v3776_v61 = vsel %vm14726_vm5, %v3743_v5, %v14725_v29  ;;  %v3973_v54 = vsel %vm3954_vm8, %v3940_v9, %v14727_v11  ;;  %v6189_v7 = vld [vmem:[#allocation3 + $0xc1] sm:$0xff]  ;;  %v14730_v14 = vld [vmem:[#allocation145_spill] sm:$0xff]  ;;  %vm14733_vm11 = vcmask 326656   ;;  %vm14734_vm12 = vmmov %vm14717_vm2  ;;  %7342 = vmatmul.msk.f32.gmra.mxu2 %vm285_vm1, %v6284_v22 }
 0x9dd   : > { %v3809_v41 = vsel %vm3789_vm3, %v3776_v61, %v14728_v20  ;;  %v4006_v10 = vsel %vm3987_vm7, %v3973_v54, %v14729_v3  ;;  %v3645_v50 = vsel %vm14731_vm15, %v3612_v16, %v14730_v14  ;;  %v14732_v25 = vld [vmem:[#allocation350_spill] sm:$0xff]  ;;  %v6221_v4 = vmax.f32 %v6157_v58, %v6189_v7  ;;  %v7458_v35 = vld [vmem:[#allocation2 + $0xf8] sm:$0xff]  ;;  %v14735_v31 = vld [vmem:[#allocation132_spill] sm:$0xff] }
 0x9de   : > { %v3842_v6 = vsel %vm14733_vm11, %v3809_v41, %v14732_v25  ;;  %v5447_v32 = vsel %vm14734_vm12, %v4006_v10, %v11940_v0  ;;  %v6093_v39 = vmax.f32 %v6029_v23, %v6252_v44  ;;  %v5966_v38 = vmax.f32 %v5902_v18, %v12313_v55  ;;  %v14736_v33 = vld [vmem:[#allocation191_spill] sm:$0xff]  ;;  %v14738_v45 = vld [vmem:[#allocation366_spill] sm:$0xff]  ;;  %v14744_v2 = vld [vmem:[#allocation149_spill] sm:$0xff]  ;;  %v5600_v62 = vpop.f32.mrf.mxu1 }
 0x9df   : > { %v5839_v53 = vmax.f32 %v12252_v24, %v12283_v8  ;;  %v3547_v19 = vsel %vm285_vm1, %v7458_v35, %v14735_v31  ;;  %vm14737_vm2 = vcmask 162816   ;;  %vm14739_vm4 = vcmask 359424   ;;  %v6253_v0 = vld [vmem:[#allocation3 + $0xc2] sm:$0xff]  ;;  %v14743_v8 = vld [vmem:[#allocation409_spill] sm:$0xff]  ;;  %6556 = vrot.lane.b32.xlu2 %v5600_v62, %s7486_s8  ;;  %v6254_v10 = vld [vmem:[#allocation3 + $0xca] sm:$0xff] }
 0x9e0   : > { %v3678_v34 = vsel %vm14737_vm2, %v3645_v50, %v14736_v33  ;;  %v3875_v13 = vsel %vm14739_vm4, %v3842_v6, %v14738_v45  ;;  %vm14740_vm0 = vcmask 818176   ;;  %v12356_v30 = vld [vmem:[#allocation3 + $0xc8] sm:$0xff]  ;;  %v14741_v46 = vld [vmem:[#allocation142_spill] sm:$0xff]  ;;  %vm14747_vm5 = vcmask 424960   ;;  %v14752_v43 = vld [vmem:[#allocation505_spill] sm:$0xff] }
 0x9e1   : > { %v3580_v27 = vsel %vm3558_vm9, %v3547_v19, %v14741_v46  ;;  %v14742_v52 = vld [vmem:[#allocation207_spill] sm:$0xff]  ;;  %v3908_v47 = vsel %vm3888_vm6, %v3875_v13, %v14743_v8  ;;  %v14745_v40 = vld [vmem:[#allocation250_spill] sm:$0xff]  ;;  %v6285_v56 = vmax.f32 %v6221_v4, %v6253_v0  ;;  %v6158_v59 = vmax.f32 %v6093_v39, %v12356_v30  ;;  %v6127_v42 = vld [vmem:[#allocation3 + $0xd8] sm:$0xff] }
 0x9e2   : > { %7316 = vmatmul.msk.f32.gmra.mxu1 %vm14740_vm0, %v5447_v32  ;;  %v3711_v24 = vsel %vm3690_vm13, %v3678_v34, %v14742_v52  ;;  %v3613_v57 = vsel %vm3591_vm10, %v3580_v27, %v14744_v2  ;;  %v14746_v21 = vld [vmem:[#allocation446_spill] sm:$0xff]  ;;  %v6030_v36 = vmax.f32 %v5966_v38, %v6189_v7  ;;  %v5903_v15 = vmax.f32 %v5839_v53, %v6252_v44  ;;  %v14748_v60 = vld [vmem:[#allocation287_spill] sm:$0xff]  ;;  %v14758_v14 = vld [vmem:[#allocation224_spill] sm:$0xff] }
 0x9e3   : > { %v3744_v28 = vsel %vm3723_vm14, %v3711_v24, %v14745_v40  ;;  %v3941_v12 = vsel %vm14747_vm5, %v3908_v47, %v14746_v21  ;;  %vm14749_vm15 = vcmask 261120   ;;  %v14750_v51 = vld [vmem:[#allocation462_spill] sm:$0xff]  ;;  %v6190_v48 = vld [vmem:[#allocation3 + $0xc9] sm:$0xff]  ;;  %vm14754_vm10 = vcmask 130048  }
 0x9e4   : > { %v3777_v26 = vsel %vm14749_vm15, %v3744_v28, %v14748_v60  ;;  %v3974_v1 = vsel %vm3954_vm8, %v3941_v12, %v14750_v51  ;;  %v14751_v49 = vld [vmem:[#allocation303_spill] sm:$0xff]  ;;  %v14753_v9 = vld [vmem:[#allocation138_spill] sm:$0xff]  ;;  %7343 = vmatmul.msk.f32.gmra.mxu2 %vm285_vm1, %v6285_v56  ;;  %v6222_v18 = vmax.f32 %v6158_v59, %v6190_v48  ;;  %v6094_v29 = vmax.f32 %v6030_v36, %v6253_v0  ;;  %v14760_v6 = vld [vmem:[#allocation240_spill] sm:$0xff] }
 0x9e5   : > { %v3810_v16 = vsel %vm3789_vm3, %v3777_v26, %v14751_v49  ;;  %v4007_v5 = vsel %vm3987_vm7, %v3974_v1, %v14752_v43  ;;  %v3646_v22 = vsel %vm14754_vm10, %v3613_v57, %v14753_v9  ;;  %v14755_v58 = vld [vmem:[#allocation346_spill] sm:$0xff]  ;;  %v5967_v61 = vmax.f32 %v5903_v15, %v12356_v30  ;;  %v14756_v54 = vld [vmem:[#allocation187_spill] sm:$0xff]  ;;  %v14764_v45 = vld [vmem:[#allocation320_spill] sm:$0xff] }
 0x9e6   : > { %v3843_v44 = vsel %vm14733_vm11, %v3810_v16, %v14755_v58  ;;  %v5448_v23 = vsel %vm14734_vm12, %v4007_v5, %v12068_v37  ;;  %v5840_v11 = vmax.f32 %v12313_v55, %v6189_v7  ;;  %v3679_v20 = vsel %vm14737_vm2, %v3646_v22, %v14756_v54  ;;  %v14757_v41 = vld [vmem:[#allocation383_spill] sm:$0xff]  ;;  %v14761_v55 = vld [vmem:[#allocation442_spill] sm:$0xff]  ;;  %v5603_v52 = vpop.f32.mrf.mxu1  ;;  %v14766_v24 = vld [vmem:[#allocation336_spill] sm:$0xff] }
 0x9e7   : > { %v3876_v3 = vsel %vm14739_vm4, %v3843_v44, %v14757_v41  ;;  %v3712_v37 = vsel %vm3690_vm13, %v3679_v20, %v14758_v14  ;;  %v14759_v50 = vld [vmem:[#allocation399_spill] sm:$0xff]  ;;  %v6286_v4 = vmax.f32 %v6222_v18, %v6254_v10  ;;  %v6159_v39 = vmax.f32 %v6094_v29, %v6127_v42  ;;  %v6191_v34 = vld [vmem:[#allocation3 + $0xd9] sm:$0xff]  ;;  %vm14767_vm13 = vmmov %vm14733_vm11  ;;  %6558 = vrot.lane.b32.xlu0 %v5603_v52, %s7486_s8 }
 0x9e8   : > { %v3909_v25 = vsel %vm3888_vm6, %v3876_v3, %v14759_v50  ;;  %v3745_v32 = vsel %vm3723_vm14, %v3712_v37, %v14760_v6  ;;  %v6031_v38 = vmax.f32 %v5967_v61, %v6190_v48  ;;  %v5904_v53 = vmax.f32 %v5840_v11, %v6253_v0  ;;  %v14762_v35 = vld [vmem:[#allocation283_spill] sm:$0xff]  ;;  %vm14768_vm14 = vmmov %vm14734_vm12  ;;  %v6255_v12 = vld [vmem:[#allocation3 + $0xda] sm:$0xff] }
 0x9e9   : > { %v3942_v7 = vsel %vm14747_vm5, %v3909_v25, %v14761_v55  ;;  %v3778_v31 = vsel %vm14749_vm15, %v3745_v32, %v14762_v35  ;;  %v14763_v19 = vld [vmem:[#allocation479_spill] sm:$0xff]  ;;  %v6223_v47 = vmax.f32 %v6159_v39, %v6191_v34  ;;  %v5841_v40 = vmax.f32 %v12356_v30, %v6190_v48  ;;  %vm14771_vm10 = vmmov %vm14740_vm0  ;;  %v6128_v56 = vld [vmem:[#allocation3 + $0xe0] sm:$0xff] }
 0x9ea   : > { %7317 = vmatmul.msk.f32.gmra.mxu1 %vm14740_vm0, %v5448_v23  ;;  %v3975_v33 = vsel %vm3954_vm8, %v3942_v7, %v14763_v19  ;;  %v3811_v13 = vsel %vm3789_vm3, %v3778_v31, %v14764_v45  ;;  %v14765_v46 = vld [vmem:[#allocation495_spill] sm:$0xff]  ;;  %v6095_v2 = vmax.f32 %v6031_v38, %v6254_v10  ;;  %v5968_v57 = vmax.f32 %v5904_v53, %v6127_v42  ;;  %vm14770_vm3 = vmmov %vm14739_vm4  ;;  %v14772_v59 = vld [vmem:[#allocation416_spill] sm:$0xff] }
 0x9eb   : > { %v4008_v27 = vsel %vm3987_vm7, %v3975_v33, %v14765_v46  ;;  %v3844_v8 = vsel %vm14767_vm13, %v3811_v13, %v14766_v24  ;;  %v14769_v28 = vld [vmem:[#allocation379_spill] sm:$0xff]  ;;  %v14773_v15 = vld [vmem:[#allocation432_spill] sm:$0xff]  ;;  %vm14774_vm11 = vmmov %vm14747_vm5  ;;  %v6287_v60 = vmax.f32 %v6223_v47, %v6255_v12  ;;  %v5905_v1 = vmax.f32 %v5841_v40, %v6254_v10 }
 0x9ec   : > { %v5449_v0 = vsel %vm14768_vm14, %v4008_v27, %v12081_v17  ;;  %7344 = vmatmul.msk.f32.gmra.mxu2 %vm285_vm1, %v6286_v4  ;;  %v3877_v21 = vsel %vm14770_vm3, %v3844_v8, %v14769_v28  ;;  %v6160_v26 = vmax.f32 %v6095_v2, %v6128_v56  ;;  %v6032_v51 = vmax.f32 %v5968_v57, %v6191_v34  ;;  %v14775_v49 = vld [vmem:[#allocation475_spill] sm:$0xff]  ;;  %v14776_v16 = vld [vmem:[#allocation510_spill] sm:$0xff]  ;;  %v6129_v18 = vld [vmem:[#allocation3 + $0xf0] sm:$0xff] }
 0x9ed   : > { %v3910_v36 = vsel %vm3888_vm6, %v3877_v21, %v14772_v59  ;;  %v6192_v48 = vld [vmem:[#allocation3 + $0xe1] sm:$0xff]  ;;  %v5969_v58 = vmax.f32 %v5905_v1, %v6128_v56  ;;  %v5842_v44 = vmax.f32 %v6127_v42, %v6191_v34  ;;  %vm14777_vm6 = vmmov %vm14740_vm0  ;;  %v6193_v20 = vld [vmem:[#allocation3 + $0xf1] sm:$0xff]  ;;  %v12437_v53 = vpop.f32.mrf.mxu2 }
 0x9ee   : > { %v3943_v17 = vsel %vm14774_vm11, %v3910_v36, %v14773_v15  ;;  %v5606_v5 = vpop.f32.mrf.mxu1  ;;  %v6224_v9 = vmax.f32 %v6160_v26, %v6192_v48  ;;  %v6096_v22 = vmax.f32 %v6032_v51, %v6255_v12  ;;  %v6256_v23 = vld [vmem:[#allocation3 + $0xe2] sm:$0xff]  ;;  %v5843_v14 = vmax.f32 %v6128_v56, %v6192_v48  ;;  %v6257_v37 = vld [vmem:[#allocation3 + $0xf2] sm:$0xff]  ;;  %v6258_v35 = vld [vmem:[#allocation3 + $0xfa] sm:$0xff] }
 0x9ef   : > { %v3976_v30 = vsel %vm3954_vm8, %v3943_v17, %v14775_v49  ;;  %6560 = vrot.lane.b32.xlu1 %v5606_v5, %s7486_s8  ;;  %v6033_v11 = vmax.f32 %v5969_v58, %v6192_v48  ;;  %v5906_v54 = vmax.f32 %v5842_v44, %v6255_v12  ;;  %v6130_v42 = vld [vmem:[#allocation3 + $0xf8] sm:$0xff]  ;;  %v6131_v31 = vld [vmem:[#allocation3 + $0x108] sm:$0xff]  ;;  %v5844_v19 = vmax.f32 %v6129_v18, %v6193_v20  ;;  %v12449_v21 = vld [vmem:[#allocation3 + $0x110] sm:$0xff] }
 0x9f0   : > { %v4009_v43 = vsel %vm3987_vm7, %v3976_v30, %v14776_v16  ;;  %v6288_v29 = vmax.f32 %v6224_v9, %v6256_v23  ;;  %v6161_v61 = vmax.f32 %v6096_v22, %v6129_v18  ;;  %v5907_v32 = vmax.f32 %v5843_v14, %v6256_v23  ;;  %v6194_v55 = vld [vmem:[#allocation3 + $0xf9] sm:$0xff]  ;;  %v6195_v46 = vld [vmem:[#allocation3 + $0x109] sm:$0xff]  ;;  %v12456_v17 = vld [vmem:[#allocation3 + $0x141] sm:$0xff] }
 0x9f1   : > { %v5450_v62 = vsel %vm14734_vm12, %v4009_v43, %v12148_v63  ;;  %v6097_v3 = vmax.f32 %v6033_v11, %v6256_v23  ;;  %v5970_v10 = vmax.f32 %v5906_v54, %v6129_v18  ;;  %v5908_v13 = vmax.f32 %v5844_v19, %v6257_v37  ;;  %v12440_v8 = vld [vmem:[#allocation3 + $0x128] sm:$0xff]  ;;  %v12451_v12 = vld [vmem:[#allocation3 + $0x140] sm:$0xff]  ;;  %v6196_v1 = vld [vmem:[#allocation3 + $0x111] sm:$0xff] }
 0x9f2   : > { %7318 = vmatmul.msk.f32.gmra.mxu1 %vm14771_vm10, %v5449_v0  ;;  %v6225_v63 = vmax.f32 %v6161_v61, %v6193_v20  ;;  %v5971_v38 = vmax.f32 %v5907_v32, %v6130_v42  ;;  %v5845_v24 = vmax.f32 %v6130_v42, %v6194_v55  ;;  %v12442_v0 = vld [vmem:[#allocation3 + $0x129] sm:$0xff]  ;;  %v12463_v16 = vld [vmem:[#allocation3 + $0x158] sm:$0xff]  ;;  %v12474_v44 = vld [vmem:[#allocation3 + $0x120] sm:$0xff]  ;;  %v5846_v18 = vmax.f32 %v6131_v31, %v6195_v46 }
 0x9f3   : > { %v6162_v25 = vmax.f32 %v6097_v3, %v6130_v42  ;;  %v6034_v6 = vmax.f32 %v5970_v10, %v6193_v20  ;;  %v5972_v52 = vmax.f32 %v5908_v13, %v6131_v31  ;;  %v12444_v47 = vld [vmem:[#allocation3 + $0x12a] sm:$0xff]  ;;  %v5849_v40 = vmax.f32 %v12440_v8, %v12442_v0  ;;  %v12460_v49 = vld [vmem:[#allocation3 + $0x142] sm:$0xff]  ;;  %v12469_v9 = vld [vmem:[#allocation3 + $0x139] sm:$0xff] }
 0x9f4   : > { %7345 = vmatmul.msk.f32.gmra.mxu2 %vm285_vm1, %v6287_v60  ;;  %v6289_v50 = vmax.f32 %v6225_v63, %v6257_v37  ;;  %v6035_v45 = vmax.f32 %v5971_v38, %v6194_v55  ;;  %v6259_v28 = vld [vmem:[#allocation3 + $0x10a] sm:$0xff]  ;;  %v5909_v15 = vmax.f32 %v5845_v24, %v6258_v35  ;;  %v12471_v22 = vld [vmem:[#allocation3 + $0x13a] sm:$0xff]  ;;  %v6260_v61 = vld [vmem:[#allocation3 + $0x112] sm:$0xff]  ;;  %vm6774_vm7 = vcmask 15360  }
 0x9f5   : > { %v6226_v4 = vmax.f32 %v6162_v25, %v6194_v55  ;;  %v6098_v39 = vmax.f32 %v6034_v6, %v6257_v37  ;;  %v5913_v56 = vmax.f32 %v5849_v40, %v12444_v47  ;;  %v6036_v36 = vmax.f32 %v5972_v52, %v6195_v46  ;;  %v12479_v11 = vld [vmem:[#allocation3 + $0x159] sm:$0xff]  ;;  %v12481_v54 = vld [vmem:[#allocation3 + $0x150] sm:$0xff]  ;;  %v6261_v19 = vld [vmem:[#allocation3 + $0x122] sm:$0xff] }
 0x9f6   : > { %v5609_v41 = vpop.f32.mrf.mxu1  ;;  %v6099_v57 = vmax.f32 %v6035_v45, %v6258_v35  ;;  %v5973_v5 = vmax.f32 %v5909_v15, %v12449_v21  ;;  %v12488_v14 = vld [vmem:[#allocation3 + $0x15a] sm:$0xff]  ;;  %v12490_v37 = vld [vmem:[#allocation3 + $0x151] sm:$0xff]  ;;  %v5910_v6 = vmax.f32 %v5846_v18, %v6259_v28  ;;  %v12505_v45 = vld [vmem:[#allocation3 + $0x169] sm:$0xff] }
 0x9f7   : > { %6562 = vrot.lane.b32.xlu2 %v5609_v41, %s7486_s8  ;;  %v6290_v33 = vmax.f32 %v6226_v4, %v6258_v35  ;;  %v6163_v34 = vmax.f32 %v6098_v39, %v6131_v31  ;;  %v5977_v51 = vmax.f32 %v5913_v56, %v12451_v12  ;;  %v6100_v43 = vmax.f32 %v6036_v36, %v6259_v28  ;;  %v12494_v55 = vld [vmem:[#allocation3 + $0x152] sm:$0xff]  ;;  %v12499_v31 = vld [vmem:[#allocation3 + $0x168] sm:$0xff] }
 0x9f8   : > { %v6164_v26 = vmax.f32 %v6099_v57, %v12449_v21  ;;  %v6037_v10 = vmax.f32 %v5973_v5, %v6196_v1  ;;  %v12514_v57 = vld [vmem:[#allocation3 + $0x16a] sm:$0xff] }
 0x9f9   : > { %v6227_v2 = vmax.f32 %v6163_v34, %v6195_v46  ;;  %v6041_v48 = vmax.f32 %v5977_v51, %v12456_v17  ;;  %v6165_v3 = vmax.f32 %v6100_v43, %v12474_v44  ;;  %v5847_v46 = vmax.f32 %v12449_v21, %v6196_v1  ;;  %v12533_v18 = vld [vmem:[#allocation3 + $0x171] sm:$0xff] }
 0x9fa   : > { %7319 = vmatmul.msk.f32.gmra.mxu1 %vm14777_vm6, %v5450_v62  ;;  %v12467_v62 = vld [vmem:[#allocation3 + $0x138] sm:$0xff]  ;;  %v6228_v58 = vmax.f32 %v6164_v26, %v6196_v1  ;;  %v6101_v35 = vmax.f32 %v6037_v10, %v6260_v61  ;;  %v12543_v10 = vpop.f32.mrf.mxu3 }
 0x9fb   : > { %v12454_v59 = vpop.f32.mrf.mxu2  ;;  %v6291_v60 = vmax.f32 %v6227_v2, %v6259_v28  ;;  %v6105_v23 = vmax.f32 %v6041_v48, %v12460_v49  ;;  %v5911_v56 = vmax.f32 %v5847_v46, %v6260_v61  ;;  %v12526_v48 = vld [vmem:[#allocation3 + $0x170] sm:$0xff] }
 0x9fc   : > { %7346 = vmatmul.msk.f32.gmra.mxu2 %vm285_vm1, %v6288_v29  ;;  %v5850_v29 = vmax.f32 %v12467_v62, %v12469_v9  ;;  %v6292_v42 = vmax.f32 %v6228_v58, %v6260_v61  ;;  %v6166_v2 = vmax.f32 %v6101_v35, %v12440_v8 }
 0x9fd   : > { %v6170_v20 = vmax.f32 %v6105_v23, %v12463_v16  ;;  %v5975_v1 = vmax.f32 %v5911_v56, %v12440_v8 }
 0x9fe   : > { %v5612_v7 = vpop.f32.mrf.mxu1  ;;  %v5914_v41 = vmax.f32 %v5850_v29, %v12471_v22  ;;  %v6230_v26 = vmax.f32 %v6166_v2, %v12442_v0  ;;  %v5852_v29 = vmax.f32 %v12481_v54, %v12490_v37  ;;  %v6269_v2 = vld [vmem:[#allocation3 + $0x182] sm:$0xff] }
 0x9ff   : > { %6564 = vrot.lane.b32.xlu0 %v5612_v7, %s7486_s8  ;;  %v6234_v25 = vmax.f32 %v6170_v20, %v12479_v11  ;;  %v6039_v8 = vmax.f32 %v5975_v1, %v12442_v0 }
 0xa00   : > { %v5978_v32 = vmax.f32 %v5914_v41, %v12481_v54  ;;  %v6294_v23 = vmax.f32 %v6230_v26, %v12444_v47 }
 0xa01   : > { %v6298_v4 = vmax.f32 %v6234_v25, %v12488_v14 }
 0xa02   : > { %v6042_v39 = vmax.f32 %v5978_v32, %v12490_v37 }
 0xa03   : > { %v12485_v63 = vpop.f32.mrf.mxu2  ;;  %7356 = vmatmul.msk.f32.vlgmr.msra.gmra.mxu3 %vm285_vm1, %v6298_v4 }
 0xa04   : > { %7347 = vmatmul.msk.f32.gmra.mxu2 %vm285_vm1, %v6289_v50  ;;  %v6197_v50 = vld [vmem:[#allocation3 + $0x121] sm:$0xff]  ;;  %v6106_v34 = vmax.f32 %v6042_v39, %v12494_v55 }
 0xa05   : > { %v6229_v38 = vmax.f32 %v6165_v3, %v6197_v50  ;;  %v5848_v5 = vmax.f32 %v12474_v44, %v6197_v50  ;;  %v12540_v3 = vld [vmem:[#allocation3 + $0x172] sm:$0xff]  ;;  %v6141_v39 = vld [vmem:[#allocation3 + $0x180] sm:$0xff] }
 0xa06   : > { %v5615_v27 = vpop.f32.mrf.mxu1  ;;  %v6171_v13 = vmax.f32 %v6106_v34, %v12499_v31 }
 0xa07   : > { %6566 = vrot.lane.b32.xlu1 %v5615_v27, %s7486_s8  ;;  %v5851_v27 = vmax.f32 %v12451_v12, %v12456_v17  ;;  %v6293_v24 = vmax.f32 %v6229_v38, %v6261_v19  ;;  %v5912_v41 = vmax.f32 %v5848_v5, %v6261_v19  ;;  %v5853_v38 = vmax.f32 %v12463_v16, %v12479_v11 }
 0xa08   : > { %v6235_v28 = vmax.f32 %v6171_v13, %v12505_v45  ;;  %v6205_v13 = vld [vmem:[#allocation3 + $0x181] sm:$0xff] }
 0xa09   : > { %v5915_v36 = vmax.f32 %v5851_v27, %v12460_v49 }
 0xa0b   : > { %v12511_v52 = vpop.f32.mrf.mxu2  ;;  %v5979_v21 = vmax.f32 %v5915_v36, %v12463_v16  ;;  %v12564_v27 = vpop.f32.mrf.mxu3  ;;  %v5854_v36 = vmax.f32 %v12499_v31, %v12505_v45 }
 0xa0c   : > { %7348 = vmatmul.msk.f32.gmra.mxu2 %vm285_vm1, %v6290_v33  ;;  %v5974_v33 = vmax.f32 %v5910_v6, %v12474_v44  ;;  %v5916_v44 = vmax.f32 %v5852_v29, %v12494_v55  ;;  %v6103_v6 = vmax.f32 %v6039_v8, %v12444_v47  ;;  %v6143_v29 = vld [vmem:[#allocation3 + $0x198] sm:$0xff] }
 0xa0e   : > { %v5618_v30 = vpop.f32.mrf.mxu1  ;;  %v6038_v40 = vmax.f32 %v5974_v33, %v6197_v50  ;;  %v5980_v25 = vmax.f32 %v5916_v44, %v12499_v31  ;;  %v6168_v47 = vmax.f32 %v6103_v6, %v12451_v12  ;;  %v6271_v44 = vld [vmem:[#allocation3 + $0x19a] sm:$0xff] }
 0xa0f   : > { %6568 = vrot.lane.b32.xlu2 %v5618_v30, %s7486_s8  ;;  %v6043_v30 = vmax.f32 %v5979_v21, %v12479_v11 }
 0xa10   : > { %v6102_v51 = vmax.f32 %v6038_v40, %v6261_v19  ;;  %v6044_v4 = vmax.f32 %v5980_v25, %v12505_v45  ;;  %v6232_v40 = vmax.f32 %v6168_v47, %v12456_v17 }
 0xa11   : > { %v6107_v43 = vmax.f32 %v6043_v30, %v12488_v14 }
 0xa12   : > { %v6167_v61 = vmax.f32 %v6102_v51, %v12467_v62  ;;  %v6108_v19 = vmax.f32 %v6044_v4, %v12514_v57  ;;  %v6296_v21 = vmax.f32 %v6232_v40, %v12460_v49  ;;  %v6270_v51 = vld [vmem:[#allocation3 + $0x18a] sm:$0xff]  ;;  %v6272_v4 = vld [vmem:[#allocation3 + $0x1a2] sm:$0xff] }
 0xa13   : > { %v6172_v20 = vmax.f32 %v6107_v43, %v12526_v48 }
 0xa14   : > { %7349 = vmatmul.msk.f32.gmra.mxu2 %vm285_vm1, %v6291_v60  ;;  %v6299_v60 = vmax.f32 %v6235_v28, %v12514_v57  ;;  %v6231_v0 = vmax.f32 %v6167_v61, %v12469_v9  ;;  %v6173_v46 = vmax.f32 %v6108_v19, %v6141_v39 }
 0xa15   : > { %v12530_v58 = vpop.f32.mrf.mxu2  ;;  %v6236_v50 = vmax.f32 %v6172_v20, %v12533_v18 }
 0xa16   : > { %v5621_v7 = vpop.f32.mrf.mxu1  ;;  %7357 = vmatmul.msk.f32.gmra.mxu3 %vm285_vm1, %v6299_v60  ;;  %v6295_v33 = vmax.f32 %v6231_v0, %v12471_v22  ;;  %v6237_v11 = vmax.f32 %v6173_v46, %v6205_v13  ;;  %v6206_v60 = vld [vmem:[#allocation3 + $0x189] sm:$0xff]  ;;  %v5663_v5 = vpop.f32.mrf.mxu3 }
 0xa17   : > { %6570 = vrot.lane.b32.xlu0 %v5621_v7, %s7486_s8  ;;  %v6300_v32 = vmax.f32 %v6236_v50, %v12540_v3  ;;  %v5976_v7 = vmax.f32 %v5912_v41, %v12467_v62  ;;  %v5917_v62 = vmax.f32 %v5853_v38, %v12488_v14  ;;  %v6142_v14 = vld [vmem:[#allocation3 + $0x188] sm:$0xff] }
 0xa18   : > { %v6301_v28 = vmax.f32 %v6237_v11, %v6269_v2 }
 0xa19   : > { %v6040_v34 = vmax.f32 %v5976_v7, %v12469_v9  ;;  %v5981_v16 = vmax.f32 %v5917_v62, %v12526_v48 }
 0xa1b   : > { %v6104_v12 = vmax.f32 %v6040_v34, %v12471_v22  ;;  %v6045_v9 = vmax.f32 %v5981_v16, %v12533_v18  ;;  %v5918_v22 = vmax.f32 %v5854_v36, %v12514_v57  ;;  %v6207_v57 = vld [vmem:[#allocation3 + $0x199] sm:$0xff] }
 0xa1c   : > { %7350 = vmatmul.msk.f32.gmra.mxu2 %vm285_vm1, %v6292_v42 }
 0xa1d   : > { %v6109_v56 = vmax.f32 %v6045_v9, %v12540_v3  ;;  %v6169_v17 = vmax.f32 %v6104_v12, %v12481_v54  ;;  %v5982_v43 = vmax.f32 %v5918_v22, %v6141_v39  ;;  %v5855_v54 = vmax.f32 %v12526_v48, %v12533_v18  ;;  %v6144_v18 = vld [vmem:[#allocation3 + $0x1a0] sm:$0xff] }
 0xa1e   : > { %v5624_v15 = vpop.f32.mrf.mxu1  ;;  %7358 = vmatmul.msk.f32.gmra.mxu3 %vm285_vm1, %v6300_v32 }
 0xa1f   : > { %6572 = vrot.lane.b32.xlu1 %v5624_v15, %s7486_s8  ;;  %v6174_v26 = vmax.f32 %v6109_v56, %v6142_v14  ;;  %v6233_v31 = vmax.f32 %v6169_v17, %v12490_v37  ;;  %v5919_v41 = vmax.f32 %v5855_v54, %v12540_v3 }
 0xa20   : > { %v12557_v35 = vpop.f32.mrf.mxu2  ;;  %v5666_v0 = vpop.f32.mrf.mxu3 }
 0xa21   : > { %v6238_v30 = vmax.f32 %v6174_v26, %v6206_v60  ;;  %v6297_v8 = vmax.f32 %v6233_v31, %v12494_v55  ;;  %v5983_v50 = vmax.f32 %v5919_v41, %v6142_v14  ;;  %v6208_v55 = vld [vmem:[#allocation3 + $0x1a1] sm:$0xff] }
 0xa23   : > { %v6302_v45 = vmax.f32 %v6238_v30, %v6270_v51  ;;  %v6047_v48 = vmax.f32 %v5983_v50, %v6206_v60  ;;  %v12623_v60 = vpop.permute.xlu2 %6550 }
 0xa24   : > { %7351 = vmatmul.msk.f32.gmra.mxu2 %vm285_vm1, %v6293_v24 }
 0xa25   : > { %v6111_v6 = vmax.f32 %v6047_v48, %v6270_v51 }
 0xa26   : > { %v5627_v42 = vpop.f32.mrf.mxu1  ;;  %7359 = vmatmul.msk.f32.gmra.mxu3 %vm285_vm1, %v6301_v28 }
 0xa27   : > { %6574 = vrot.lane.b32.xlu2 %v5627_v42, %s7486_s8  ;;  %v6176_v7 = vmax.f32 %v6111_v6, %v6144_v18 }
 0xa29   : > { %v12575_v15 = vpop.f32.mrf.mxu2  ;;  %v6240_v39 = vmax.f32 %v6176_v7, %v6208_v55 }
 0xa2b   : > { %v6304_v38 = vmax.f32 %v6240_v39, %v6272_v4  ;;  %v14779_v4 = vld [vmem:[#allocation10_spill] sm:$0xff] }
 0xa2c   : > { %7352 = vmatmul.msk.f32.gmra.mxu2 %vm285_vm1, %v6294_v23  ;;  %v6046_v23 = vmax.f32 %v5982_v43, %v6205_v13 }
 0xa2e   : > { %v5630_v24 = vpop.f32.mrf.mxu1  ;;  %v6110_v49 = vmax.f32 %v6046_v23, %v6269_v2  ;;  %7360 = vmatmul.msk.f32.gmra.mxu3 %vm285_vm1, %v6302_v45 }
 0xa2f   : > { %6576 = vrot.lane.b32.xlu0 %v5630_v24, %s7486_s8 }
 0xa30   : > { %v6175_v20 = vmax.f32 %v6110_v49, %v6143_v29 }
 0xa32   : > { %v6239_v37 = vmax.f32 %v6175_v20, %v6207_v57 }
 0xa34   : > { %7353 = vmatmul.msk.f32.gmra.mxu2 %vm285_vm1, %v6295_v33  ;;  %v6303_v25 = vmax.f32 %v6239_v37, %v6271_v44  ;;  %v5669_v33 = vpop.f32.mrf.mxu3 }
 0xa35   : > { %v12586_v61 = vpop.f32.mrf.mxu2 }
 0xa36   : > { %7361 = vmatmul.msk.f32.gmra.mxu3 %vm285_vm1, %v6303_v25 }
 0xa37   : > { %v5633_v1 = vpop.f32.mrf.mxu1 }
 0xa38   : > { %6578 = vrot.lane.b32.xlu1 %v5633_v1, %s7486_s8 }
 0xa3c   : > { %7354 = vmatmul.msk.f32.gmra.mxu2 %vm285_vm1, %v6296_v21  ;;  %v5672_v13 = vpop.f32.mrf.mxu3 }
 0xa3e   : > { %7362 = vmatmul.msk.f32.gmra.mxu3 %vm285_vm1, %v6304_v38 }
 0xa3f   : > { %v6446_v32 = vpop.f32.mrf.mxu2 }
 0xa42   : > { %v5636_v42 = vpop.f32.mrf.mxu1 }
 0xa43   : > { %6580 = vrot.lane.b32.xlu2 %v5636_v42, %s7486_s8 }
 0xa44   : > { %7355 = vmatmul.msk.f32.gmra.mxu2 %vm285_vm1, %v6297_v8  ;;  %v5675_v2 = vpop.f32.mrf.mxu3  ;;  %vm6807_vm1 = vcmask 48128  }
 0xa4a   : > { %v6449_v19 = vpop.f32.mrf.mxu2 }
 0xa4c   : > { %v5639_v3 = vpop.f32.mrf.mxu1  ;;  %v5678_v40 = vpop.f32.mrf.mxu3 }
 0xa4d   : > { %6582 = vrot.lane.b32.xlu0 %v5639_v3, %s7486_s8  ;;  %v14780_v3 = vld [vmem:[#allocation6_spill] sm:$0xff] }
 0xa54   : > { %v5681_v14 = vpop.f32.mrf.mxu3 }
 0xa55   : > { %v6452_v34 = vpop.f32.mrf.mxu2 }
 0xa57   : > { %v5642_v47 = vpop.f32.mrf.mxu1 }
 0xa58   : > { %6584 = vrot.lane.b32.xlu1 %v5642_v47, %s7486_s8  ;;  %v14782_v47 = vld [vmem:[#allocation12_spill] sm:$0xff] }
 0xa5d   : > { %v5684_v56 = vpop.f32.mrf.mxu3 }
 0xa5f   : > { %v5645_v62 = vpop.f32.mrf.mxu1  ;;  %v6455_v46 = vpop.f32.mrf.mxu2 }
 0xa60   : > { %6586 = vrot.lane.b32.xlu2 %v5645_v62, %s7486_s8 }
 0xa67   : > { %v5648_v24 = vpop.f32.mrf.mxu1  ;;  %v6458_v16 = vpop.f32.mrf.mxu2 }
 0xa68   : > { %6588 = vrot.lane.b32.xlu0 %v5648_v24, %s7486_s8 }
 0xa6f   : > { %v5651_v11 = vpop.f32.mrf.mxu1  ;;  %v6461_v12 = vpop.f32.mrf.mxu2 }
 0xa70   : > { %6594 = vrot.lane.b32.xlu0 %v12543_v10, %s7486_s8  ;;  %6590 = vrot.lane.b32.xlu1 %v5651_v11, %s7486_s8  ;;  %v14785_v11 = vld [vmem:[#allocation20_spill] sm:$0xff] }
 0xa77   : > { %v5654_v9 = vpop.f32.mrf.mxu1  ;;  %v6464_v28 = vpop.f32.mrf.mxu2 }
 0xa78   : > { %6600 = vrot.lane.b32.xlu0 %v5666_v0, %s7486_s8  ;;  %6596 = vrot.lane.b32.xlu1 %v12564_v27, %s7486_s8  ;;  %v14778_v0 = vld [vmem:[#allocation4_spill] sm:$0xff] }
 0xa79   : > { %6592 = vrot.lane.b32.xlu2 %v5654_v9, %s7486_s8 }
 0xa7f   : > { %v6467_v10 = vpop.f32.mrf.mxu2 }
 0xa80   : > { %6606 = vrot.lane.b32.xlu0 %v5675_v2, %s7486_s8  ;;  %6602 = vrot.lane.b32.xlu1 %v5669_v33, %s7486_s8  ;;  %v14781_v33 = vld [vmem:[#allocation17_spill] sm:$0xff] }
 0xa81   : > { %6598 = vrot.lane.b32.xlu2 %v5663_v5, %s7486_s8 }
 0xa87   : > { %v6470_v36 = vpop.f32.mrf.mxu2 }
 0xa88   : > { %6608 = vrot.lane.b32.xlu1 %v5678_v40, %s7486_s8  ;;  %6612 = vrot.lane.b32.xlu0 %v5684_v56, %s7486_s8  ;;  %v14786_v40 = vld [vmem:[#allocation14_spill] sm:$0xff]  ;;  %v14787_v56 = vld [vmem:[#allocation36_spill] sm:$0xff] }
 0xa89   : > { %6604 = vrot.lane.b32.xlu2 %v5672_v13, %s7486_s8 }
 0xa8f   : > { %v6473_v27 = vpop.f32.mrf.mxu2 }
 0xa90   : > { %6678 = vrot.lane.b32.xlu1 %v12437_v53, %s7487_s9  ;;  %6682 = vrot.lane.b32.xlu0 %v12485_v63, %s7487_s9  ;;  %v12630_v53 = vpop.permute.xlu2 %6556 }
 0xa91   : > { %6610 = vrot.lane.b32.xlu2 %v5681_v14, %s7486_s8 }
 0xa97   : > { %v6476_v21 = vpop.f32.mrf.mxu2 }
 0xa98   : > { %6684 = vrot.lane.b32.xlu1 %v12511_v52, %s7487_s9  ;;  %6688 = vrot.lane.b32.xlu0 %v12557_v35, %s7487_s9  ;;  %v6497_v52 = vpop.f32.mrf.mxu3  ;;  %v12638_v35 = vpop.permute.xlu2 %6562 }
 0xa99   : > { %6680 = vrot.lane.b32.xlu2 %v12454_v59, %s7487_s9  ;;  %v12636_v59 = vpop.permute.xlu0 %6552 }
 0xa9f   : > { %v6479_v63 = vpop.f32.mrf.mxu2 }
 0xaa0   : > { %6690 = vrot.lane.b32.xlu1 %v12575_v15, %s7487_s9  ;;  %6694 = vrot.lane.b32.xlu0 %v6446_v32, %s7487_s9  ;;  %v12647_v26 = vpop.permute.xlu2 %6568  ;;  %v6500_v51 = vpop.f32.mrf.mxu3 }
 0xaa1   : > { %6686 = vrot.lane.b32.xlu2 %v12530_v58, %s7487_s9  ;;  %v12642_v58 = vpop.permute.xlu1 %6554  ;;  %v12645_v17 = vpop.permute.xlu0 %6558 }
 0xaa7   : > { %v6482_v15 = vpop.f32.mrf.mxu2 }
 0xaa8   : > { %6696 = vrot.lane.b32.xlu1 %v6449_v19, %s7487_s9  ;;  %6700 = vrot.lane.b32.xlu0 %v6455_v46, %s7487_s9  ;;  %v12656_v43 = vpop.permute.xlu2 %6574  ;;  %v6503_v31 = vpop.f32.mrf.mxu3  ;;  %v6776_v46 = vsel %vm6774_vm7, %v14780_v3, %v12636_v59 }
 0xaa9   : > { %6692 = vrot.lane.b32.xlu2 %v12586_v61, %s7487_s9  ;;  %v12651_v1 = vpop.permute.xlu1 %6560  ;;  %v12654_v30 = vpop.permute.xlu0 %6564 }
 0xaaf   : > { %v6485_v22 = vpop.f32.mrf.mxu2 }
 0xab0   : > { %6702 = vrot.lane.b32.xlu1 %v6458_v16, %s7487_s9  ;;  %6706 = vrot.lane.b32.xlu0 %v6464_v28, %s7487_s9  ;;  %v12665_v29 = vpop.permute.xlu2 %6580  ;;  %v6506_v54 = vpop.f32.mrf.mxu3  ;;  %v14784_v16 = vld [vmem:[#allocation26_spill] sm:$0xff]  ;;  %v6779_v28 = vsel %vm6774_vm7, %v14782_v47, %v12645_v17 }
 0xab1   : > { %6698 = vrot.lane.b32.xlu2 %v6452_v34, %s7487_s9  ;;  %v12660_v45 = vpop.permute.xlu1 %6566  ;;  %v12663_v23 = vpop.permute.xlu0 %6570  ;;  %v14783_v34 = vld [vmem:[#allocation8_spill] sm:$0xff] }
 0xab7   : > { %v6488_v5 = vpop.f32.mrf.mxu2 }
 0xab8   : > { %6708 = vrot.lane.b32.xlu1 %v6467_v10, %s7487_s9  ;;  %6712 = vrot.lane.b32.xlu0 %v6473_v27, %s7487_s9  ;;  %v6509_v42 = vpop.f32.mrf.mxu3  ;;  %v14789_v27 = vld [vmem:[#allocation22_spill] sm:$0xff] }
 0xab9   : > { %6704 = vrot.lane.b32.xlu2 %v6461_v12, %s7487_s9  ;;  %v12669_v61 = vpop.permute.xlu1 %6572  ;;  %v12672_v57 = vpop.permute.xlu0 %6576 }
 0xaba   : > { %v12674_v8 = vpop.permute.xlu2 %6586 }
 0xabf   : > { %v6491_v49 = vpop.f32.mrf.mxu2 }
 0xac0   : > { %6714 = vrot.lane.b32.xlu1 %v6476_v21, %s7487_s9  ;;  %6718 = vrot.lane.b32.xlu0 %v6482_v15, %s7487_s9  ;;  %v6512_v18 = vpop.f32.mrf.mxu3  ;;  %v6775_v21 = vsel %vm6774_vm7, %v14778_v0, %v12623_v60  ;;  %v6782_v15 = vsel %vm6774_vm7, %v14785_v11, %v12654_v30  ;;  %v14790_v60 = vld [vmem:[#allocation44_spill] sm:$0xff]  ;;  %v6778_v30 = vsel %vm6774_vm7, %v14779_v4, %v12630_v53  ;;  %v14793_v53 = vld [vmem:[#allocation47_spill] sm:$0xff] }
 0xac1   : > { %6710 = vrot.lane.b32.xlu2 %v6470_v36, %s7487_s9  ;;  %v12678_v41 = vpop.permute.xlu1 %6578  ;;  %v12681_v44 = vpop.permute.xlu0 %6582  ;;  %v14788_v36 = vld [vmem:[#allocation30_spill] sm:$0xff] }
 0xac7   : > { %v6494_v20 = vpop.f32.mrf.mxu2 }
 0xac8   : > { %6720 = vrot.lane.b32.xlu1 %v6485_v22, %s7487_s9  ;;  %6724 = vrot.lane.b32.xlu0 %v6491_v49, %s7487_s9  ;;  %v6515_v7 = vpop.f32.mrf.mxu3  ;;  %v6780_v49 = vsel %vm6774_vm7, %v14786_v40, %v12651_v1  ;;  %v14794_v1 = vld [vmem:[#allocation45_spill] sm:$0xff] }
 0xac9   : > { %6716 = vrot.lane.b32.xlu2 %v6479_v63, %s7487_s9  ;;  %v6777_v63 = vsel %vm6774_vm7, %v14783_v34, %v12642_v58  ;;  %v14791_v58 = vld [vmem:[#allocation39_spill] sm:$0xff] }
 0xaca   : > { %v12688_v50 = vpop.permute.xlu1 %6584 }
 0xad0   : > { %6726 = vrot.lane.b32.xlu1 %v6494_v20, %s7487_s9  ;;  %6730 = vrot.lane.b32.xlu0 %v6500_v51, %s7487_s9 }
 0xad1   : > { %6722 = vrot.lane.b32.xlu2 %v6488_v5, %s7487_s9 }
 0xad3   : > { %v12683_v37 = vpop.permute.xlu2 %6592 }
 0xad8   : > { %6732 = vrot.lane.b32.xlu1 %v6503_v31, %s7487_s9  ;;  %6736 = vrot.lane.b32.xlu0 %v6509_v42, %s7487_s9  ;;  %v14792_v31 = vld [vmem:[#allocation32_spill] sm:$0xff]  ;;  %v6785_v42 = vsel %vm6774_vm7, %v14788_v36, %v12663_v23  ;;  %v6781_v23 = vsel %vm6774_vm7, %v14781_v33, %v12638_v35  ;;  %v14796_v35 = vld [vmem:[#allocation53_spill] sm:$0xff] }
 0xad9   : > { %6728 = vrot.lane.b32.xlu2 %v6497_v52, %s7487_s9 }
 0xada   : > { %v12690_v25 = vpop.permute.xlu0 %6588 }
 0xadb   : > { %v12692_v48 = vpop.permute.xlu2 %6598 }
 0xae0   : > { %7040 = vrot.lane.b32.xlu0 %v14778_v0, %s7488_s10  ;;  %6738 = vrot.lane.b32.xlu1 %v6512_v18, %s7487_s9 }
 0xae1   : > { %6734 = vrot.lane.b32.xlu2 %v6506_v54, %s7487_s9 }
 0xae2   : > { %v12698_v6 = vpop.permute.xlu1 %6590  ;;  %v12700_v32 = vpop.permute.xlu0 %6594 }
 0xae3   : > { %v12702_v55 = vpop.permute.xlu2 %6604 }
 0xae8   : > { %7046 = vrot.lane.b32.xlu0 %v14779_v4, %s7488_s10  ;;  %7042 = vrot.lane.b32.xlu1 %v14780_v3, %s7488_s10  ;;  %v14795_v4 = vld [vmem:[#allocation42_spill] sm:$0xff] }
 0xae9   : > { %6740 = vrot.lane.b32.xlu2 %v6515_v7, %s7487_s9 }
 0xaea   : > { %v12709_v39 = vpop.permute.xlu1 %6596  ;;  %v12711_v38 = vpop.permute.xlu0 %6600 }
 0xaeb   : > { %v12713_v19 = vpop.permute.xlu2 %6610 }
 0xaf0   : > { %7052 = vrot.lane.b32.xlu0 %v14781_v33, %s7488_s10  ;;  %7048 = vrot.lane.b32.xlu1 %v14782_v47, %s7488_s10  ;;  %v6783_v47 = vsel %vm6774_vm7, %v14789_v27, %v12660_v45  ;;  %v14797_v45 = vld [vmem:[#allocation48_spill] sm:$0xff]  ;;  %v14798_v33 = vld [vmem:[#allocation46_spill] sm:$0xff] }
 0xaf1   : > { %7044 = vrot.lane.b32.xlu2 %v14783_v34, %s7488_s10 }
 0xaf2   : > { %v12721_v13 = vpop.permute.xlu1 %6602  ;;  %v12723_v62 = vpop.permute.xlu0 %6606 }
 0xaf3   : > { %v6681_v24 = vpop.permute.xlu2 %6680 }
 0xaf4   : > { %v12729_v2 = vsel %vm6807_vm1, %v6776_v46, %v6681_v24  ;;  %v6788_v24 = vsel %vm6774_vm7, %v14791_v58, %v12672_v57  ;;  %v6784_v57 = vsel %vm6774_vm7, %v14784_v16, %v12647_v26  ;;  %v14799_v26 = vld [vmem:[#allocation70_spill] sm:$0xff] }
 0xaf8   : > { %7058 = vrot.lane.b32.xlu0 %v14784_v16, %s7488_s10  ;;  %7054 = vrot.lane.b32.xlu1 %v14785_v11, %s7488_s10  ;;  %v14801_v16 = vld [vmem:[#allocation49_spill] sm:$0xff] }
 0xaf9   : > { %7050 = vrot.lane.b32.xlu2 %v14786_v40, %s7488_s10 }
 0xafa   : > { %v12737_v12 = vpop.permute.xlu1 %6608  ;;  %v12739_v9 = vpop.permute.xlu0 %6612 }
 0xafb   : > { %v6687_v14 = vpop.permute.xlu2 %6686 }
 0xafc   : > { %v12745_v10 = vsel %vm6807_vm1, %v6779_v28, %v6687_v14 }
 0xb00   : > { %7064 = vrot.lane.b32.xlu0 %v14787_v56, %s7488_s10  ;;  %7060 = vrot.lane.b32.xlu1 %v14788_v36, %s7488_s10  ;;  %v6786_v36 = vsel %vm6774_vm7, %v14792_v31, %v12669_v61  ;;  %v14800_v61 = vld [vmem:[#allocation54_spill] sm:$0xff] }
 0xb01   : > { %7056 = vrot.lane.b32.xlu2 %v14789_v27, %s7488_s10 }
 0xb02   : > { %v6679_v59 = vpop.permute.xlu1 %6678  ;;  %v6683_v52 = vpop.permute.xlu0 %6682 }
 0xb03   : > { %v12763_v17 = vsel %vm6807_vm1, %v6775_v21, %v6679_v59  ;;  %v6693_v22 = vpop.permute.xlu2 %6692  ;;  %v12766_v51 = vsel %vm6807_vm1, %v6777_v63, %v6683_v52  ;;  %v6791_v63 = vsel %vm6774_vm7, %v14794_v1, %v12681_v44  ;;  %v6787_v44 = vsel %vm6774_vm7, %v14787_v56, %v12656_v43  ;;  %v14802_v43 = vld [vmem:[#allocation9_spill] sm:$0xff]  ;;  %v14804_v56 = vld [vmem:[#allocation60_spill] sm:$0xff] }
 0xb04   : > { %v12769_v5 = vsel %vm6807_vm1, %v6782_v15, %v6693_v22 }
 0xb08   : > { %7070 = vrot.lane.b32.xlu0 %v14790_v60, %s7488_s10  ;;  %7066 = vrot.lane.b32.xlu1 %v14791_v58, %s7488_s10  ;;  %v6789_v58 = vsel %vm6774_vm7, %v14795_v4, %v12678_v41  ;;  %v14803_v41 = vld [vmem:[#allocation5_spill] sm:$0xff] }
 0xb09   : > { %7062 = vrot.lane.b32.xlu2 %v14792_v31, %s7488_s10 }
 0xb0a   : > { %v6685_v54 = vpop.permute.xlu1 %6684  ;;  %v6689_v20 = vpop.permute.xlu0 %6688 }
 0xb0b   : > { %v12787_v18 = vsel %vm6807_vm1, %v6778_v30, %v6685_v54  ;;  %v6699_v0 = vpop.permute.xlu2 %6698  ;;  %v12790_v7 = vsel %vm6807_vm1, %v6780_v49, %v6689_v20  ;;  %v6794_v49 = vsel %vm6774_vm7, %v14797_v45, %v12690_v25  ;;  %v6790_v25 = vsel %vm6774_vm7, %v14790_v60, %v12665_v29  ;;  %v14805_v29 = vld [vmem:[#allocation16_spill] sm:$0xff]  ;;  %v14807_v60 = vld [vmem:[#allocation7_spill] sm:$0xff] }
 0xb0c   : > { %v12793_v3 = vsel %vm6807_vm1, %v6785_v42, %v6699_v0 }
 0xb10   : > { %7076 = vrot.lane.b32.xlu0 %v14793_v53, %s7488_s10  ;;  %7072 = vrot.lane.b32.xlu1 %v14794_v1, %s7488_s10  ;;  %v6792_v1 = vsel %vm6774_vm7, %v14798_v33, %v12688_v50  ;;  %v14806_v50 = vld [vmem:[#allocation11_spill] sm:$0xff] }
 0xb11   : > { %7068 = vrot.lane.b32.xlu2 %v14795_v4, %s7488_s10 }
 0xb12   : > { %v6691_v34 = vpop.permute.xlu1 %6690  ;;  %v6695_v46 = vpop.permute.xlu0 %6694 }
 0xb13   : > { %v12811_v11 = vsel %vm6807_vm1, %v6781_v23, %v6691_v34  ;;  %v6705_v40 = vpop.permute.xlu2 %6704  ;;  %v12814_v28 = vsel %vm6807_vm1, %v6783_v47, %v6695_v46  ;;  %v6797_v47 = vsel %vm6774_vm7, %v14800_v61, %v12700_v32  ;;  %v6793_v32 = vsel %vm6774_vm7, %v14793_v53, %v12674_v8  ;;  %v14808_v8 = vld [vmem:[#allocation19_spill] sm:$0xff] }
 0xb14   : > { %v12817_v14 = vsel %vm6807_vm1, %v6788_v24, %v6705_v40  ;;  %v6798_v53 = vsel %vm6774_vm7, %v14804_v56, %v12709_v39 }
 0xb18   : > { %7082 = vrot.lane.b32.xlu0 %v14796_v35, %s7488_s10  ;;  %7078 = vrot.lane.b32.xlu1 %v14797_v45, %s7488_s10  ;;  %v6795_v45 = vsel %vm6774_vm7, %v14801_v16, %v12698_v6  ;;  %v14809_v6 = vld [vmem:[#allocation13_spill] sm:$0xff] }
 0xb19   : > { %7074 = vrot.lane.b32.xlu2 %v14798_v33, %s7488_s10 }
 0xb1a   : > { %v6697_v27 = vpop.permute.xlu1 %6696  ;;  %v6701_v21 = vpop.permute.xlu0 %6700 }
 0xb1b   : > { %v12835_v59 = vsel %vm6807_vm1, %v6784_v57, %v6697_v27  ;;  %v6711_v52 = vpop.permute.xlu2 %6710  ;;  %v12838_v15 = vsel %vm6807_vm1, %v6786_v36, %v6701_v21  ;;  %v6800_v36 = vsel %vm6774_vm7, %v14803_v41, %v12711_v38  ;;  %v6796_v38 = vsel %vm6774_vm7, %v14796_v35, %v12683_v37  ;;  %v12940_v37 = vld [vmem:[%s13157_s4] ss:$0 sm:$0xff] }
 0xb1c   : > { %v12841_v22 = vsel %vm6807_vm1, %v6791_v63, %v6711_v52  ;;  %v6846_v39 = vmul.f32 %v12940_v37, %v12766_v51  ;;  %v6799_v35 = vsel %vm6774_vm7, %v14799_v26, %v12692_v48  ;;  %v6806_v51 = vsel %vm6774_vm7, %v14808_v8, %v12739_v9 }
 0xb1d   : > { %v6802_v9 = vsel %vm6774_vm7, %v14802_v43, %v12702_v55 }
 0xb20   : > { %7088 = vrot.lane.b32.xlu0 %v14799_v26, %s7488_s10  ;;  %7084 = vrot.lane.b32.xlu1 %v14800_v61, %s7488_s10  ;;  %v6849_v26 = vmul.f32 %v12940_v37, %v12790_v7 }
 0xb21   : > { %7080 = vrot.lane.b32.xlu2 %v14801_v16, %s7488_s10 }
 0xb22   : > { %v6703_v31 = vpop.permute.xlu1 %6702  ;;  %v6707_v30 = vpop.permute.xlu0 %6706 }
 0xb23   : > { %v12859_v54 = vsel %vm6807_vm1, %v6787_v44, %v6703_v31  ;;  %v6717_v20 = vpop.permute.xlu2 %6716  ;;  %v12862_v42 = vsel %vm6807_vm1, %v6789_v58, %v6707_v30  ;;  %v6803_v44 = vsel %vm6774_vm7, %v14806_v50, %v12723_v62  ;;  %v12947_v62 = vld [vmem:[%s13158_s5] ss:$0 sm:$0xff] }
 0xb24   : > { %v12865_v0 = vsel %vm6807_vm1, %v6794_v49, %v6717_v20  ;;  %v6801_v20 = vsel %vm6774_vm7, %v14807_v60, %v12721_v13  ;;  %v6844_v13 = vmul.f32 %v12940_v37, %v12763_v17  ;;  %v6885_v17 = vadd.f32 %v12947_v62, %v6849_v26 }
 0xb26   : > { %vm6917_vm4 = vcmp.ge.f32.partialorder %v6885_v17, 0.0 }
 0xb28   : > { %7094 = vrot.lane.b32.xlu0 %v14802_v43, %s7488_s10  ;;  %7090 = vrot.lane.b32.xlu1 %v14803_v41, %s7488_s10 }
 0xb29   : > { %7086 = vrot.lane.b32.xlu2 %v14804_v56, %s7488_s10 }
 0xb2a   : > { %v6709_v4 = vpop.permute.xlu1 %6708  ;;  %v6713_v23 = vpop.permute.xlu0 %6712 }
 0xb2b   : > { %v12883_v34 = vsel %vm6807_vm1, %v6790_v25, %v6709_v4  ;;  %v6723_v46 = vpop.permute.xlu2 %6722  ;;  %v12886_v24 = vsel %vm6807_vm1, %v6792_v1, %v6713_v23  ;;  %v6882_v25 = vadd.f32 %v12947_v62, %v6846_v39 }
 0xb2c   : > { %v12889_v40 = vsel %vm6807_vm1, %v6797_v47, %v6723_v46  ;;  %v6804_v46 = vsel %vm6774_vm7, %v14809_v6, %v12737_v12 }
 0xb2d   : > { %v6946_v47 = vmul.f32 0.01, %v6882_v25  ;;  %vm6914_vm8 = vcmp.ge.f32.partialorder %v6882_v25, 0.0 }
 0xb2f   : > { %v6978_v43 = vsel %vm6914_vm8, %v6882_v25, %v6946_v47 }
 0xb30   : > { %7100 = vrot.lane.b32.xlu0 %v14805_v29, %s7488_s10  ;;  %7096 = vrot.lane.b32.xlu1 %v14806_v50, %s7488_s10  ;;  %v6880_v50 = vadd.f32 %v12947_v62, %v6844_v13 }
 0xb31   : > { %7092 = vrot.lane.b32.xlu2 %v14807_v60, %s7488_s10 }
 0xb32   : > { %v6715_v33 = vpop.permute.xlu1 %6714  ;;  %v6719_v57 = vpop.permute.xlu0 %6718  ;;  %vm6912_vm2 = vcmp.ge.f32.partialorder %v6880_v50, 0.0 }
 0xb33   : > { %v12907_v27 = vsel %vm6807_vm1, %v6793_v32, %v6715_v33  ;;  %v6729_v21 = vpop.permute.xlu2 %6728  ;;  %v12910_v63 = vsel %vm6807_vm1, %v6795_v45, %v6719_v57  ;;  %v6845_v33 = vmul.f32 %v12940_v37, %v12729_v2  ;;  %v6847_v57 = vmul.f32 %v12940_v37, %v12787_v18 }
 0xb34   : > { %v12913_v52 = vsel %vm6807_vm1, %v6800_v36, %v6729_v21  ;;  %v6944_v36 = vmul.f32 0.01, %v6880_v50  ;;  %v6852_v21 = vmul.f32 %v12940_v37, %v12814_v28 }
 0xb35   : > { %v6881_v2 = vadd.f32 %v12947_v62, %v6845_v33 }
 0xb37   : > { %vm6913_vm0 = vcmp.ge.f32.partialorder %v6881_v2, 0.0 }
 0xb38   : > { %7102 = vrot.lane.b32.xlu1 %v14808_v8, %s7488_s10  ;;  %v6949_v8 = vmul.f32 0.01, %v6885_v17 }
 0xb39   : > { %7098 = vrot.lane.b32.xlu2 %v14809_v6, %s7488_s10  ;;  %v6805_v6 = vsel %vm6774_vm7, %v14805_v29, %v12713_v19  ;;  %v6848_v19 = vmul.f32 %v12940_v37, %v12745_v10  ;;  %v6850_v29 = vmul.f32 %v12940_v37, %v12811_v11 }
 0xb3a   : > { %v6721_v61 = vpop.permute.xlu1 %6720  ;;  %v6725_v16 = vpop.permute.xlu0 %6724 }
 0xb3b   : > { %v12929_v58 = vsel %vm6807_vm1, %v6796_v38, %v6721_v61  ;;  %v6735_v31 = vpop.permute.xlu2 %6734  ;;  %v12932_v30 = vsel %vm6807_vm1, %v6798_v53, %v6725_v16  ;;  %v6883_v38 = vadd.f32 %v12947_v62, %v6847_v57  ;;  %v6976_v53 = vsel %vm6912_vm2, %v6880_v50, %v6944_v36 }
 0xb3c   : > { %v12935_v49 = vsel %vm6807_vm1, %v6803_v44, %v6735_v31  ;;  %v6888_v16 = vadd.f32 %v12947_v62, %v6852_v21  ;;  %v6981_v31 = vsel %vm6917_vm4, %v6885_v17, %v6949_v8  ;;  %v6884_v25 = vadd.f32 %v12947_v62, %v6848_v19 }
 0xb3d   : > { %vm6915_vm5 = vcmp.ge.f32.partialorder %v6883_v38, 0.0  ;;  %v6886_v10 = vadd.f32 %v12947_v62, %v6850_v29  ;;  %v6853_v17 = vmul.f32 %v12940_v37, %v12835_v59 }
 0xb3e   : > { %vm6920_vm15 = vcmp.ge.f32.partialorder %v6888_v16, 0.0  ;;  %vm6916_vm13 = vcmp.ge.f32.partialorder %v6884_v25, 0.0 }
 0xb3f   : > { %vm6918_vm14 = vcmp.ge.f32.partialorder %v6886_v10, 0.0  ;;  %v6889_v57 = vadd.f32 %v12947_v62, %v6853_v17 }
 0xb41   : > { %vm6921_vm11 = vcmp.ge.f32.partialorder %v6889_v57, 0.0 }
 0xb42   : > { %v6727_v41 = vpop.permute.xlu1 %6726  ;;  %v6731_v56 = vpop.permute.xlu0 %6730 }
 0xb43   : > { %v12960_v1 = vsel %vm6807_vm1, %v6799_v35, %v6727_v41  ;;  %v6741_v4 = vpop.permute.xlu2 %6740  ;;  %v12963_v23 = vsel %vm6807_vm1, %v6801_v20, %v6731_v56  ;;  %v6945_v20 = vmul.f32 0.01, %v6881_v2  ;;  %v6947_v41 = vmul.f32 0.01, %v6883_v38 }
 0xb44   : > { %v12966_v48 = vsel %vm6807_vm1, %v6806_v51, %v6741_v4  ;;  %v6855_v56 = vmul.f32 %v12940_v37, %v12838_v15  ;;  %v6952_v51 = vmul.f32 0.01, %v6888_v16 }
 0xb45   : > { %v6977_v13 = vsel %vm6913_vm0, %v6881_v2, %v6945_v20  ;;  %v6979_v11 = vsel %vm6915_vm5, %v6883_v38, %v6947_v41 }
 0xb46   : > { %v6891_v47 = vadd.f32 %v12947_v62, %v6855_v56  ;;  %v6984_v15 = vsel %vm6920_vm15, %v6888_v16, %v6952_v51  ;;  %v6856_v16 = vmul.f32 %v12940_v37, %v12859_v54 }
 0xb48   : > { %v6955_v33 = vmul.f32 0.01, %v6891_v47  ;;  %vm6923_vm3 = vcmp.ge.f32.partialorder %v6891_v47, 0.0  ;;  %v6892_v19 = vadd.f32 %v12947_v62, %v6856_v16 }
 0xb4a   : > { %v6733_v60 = vpop.permute.xlu1 %6732  ;;  %v6737_v32 = vpop.permute.xlu0 %6736  ;;  %v6987_v38 = vsel %vm6923_vm3, %v6891_v47, %v6955_v33  ;;  %v6956_v47 = vmul.f32 0.01, %v6892_v19 }
 0xb4b   : > { %v12988_v7 = vsel %vm6807_vm1, %v6802_v9, %v6733_v60  ;;  %v7045_v55 = vpop.permute.xlu2 %7044  ;;  %v12991_v12 = vsel %vm6807_vm1, %v6804_v46, %v6737_v32  ;;  %v6851_v32 = vmul.f32 %v12940_v37, %v12769_v5 }
 0xb4c   : > { %v7138_v45 = vadd.f32 %v7045_v55, %v6978_v43  ;;  %v6948_v55 = vmul.f32 0.01, %v6884_v25  ;;  %v6950_v43 = vmul.f32 0.01, %v6886_v10 }
 0xb4d   : > { %v6887_v5 = vadd.f32 %v12947_v62, %v6851_v32 }
 0xb4e   : > { %7170 = vst.msk [vmem:[%s12984_s17 + $0x10] sm:$0xff] %vm3558_vm9, %v7138_v45  ;;  %v6858_v45 = vmul.f32 %v12940_v37, %v12862_v42  ;;  %v6980_v36 = vsel %vm6916_vm13, %v6884_v25, %v6948_v55  ;;  %v6982_v21 = vsel %vm6918_vm14, %v6886_v10, %v6950_v43 }
 0xb4f   : > { %vm6919_vm10 = vcmp.ge.f32.partialorder %v6887_v5, 0.0 }
 0xb52   : > { %v6739_v18 = vpop.permute.xlu1 %6738  ;;  %v7041_v61 = vpop.permute.xlu0 %7040 }
 0xb53   : > { %v13008_v28 = vsel %vm6807_vm1, %v6805_v6, %v6739_v18  ;;  %v7051_v44 = vpop.permute.xlu2 %7050  ;;  %v7136_v39 = vadd.f32 %v7041_v61, %v6976_v53  ;;  %v6894_v6 = vadd.f32 %v12947_v62, %v6858_v45  ;;  %v6854_v61 = vmul.f32 %v12940_v37, %v12793_v3 }
 0xb54   : > { %v7141_v35 = vadd.f32 %v7051_v44, %v6981_v31  ;;  %v6951_v44 = vmul.f32 0.01, %v6887_v5  ;;  %v6953_v31 = vmul.f32 0.01, %v6889_v57  ;;  %vm6924_vm1 = vcmp.ge.f32.partialorder %v6892_v19, 0.0 }
 0xb55   : > { %7168 = vst.msk [vmem:[%s12984_s17] sm:$0xff] %vm3558_vm9, %v7136_v39  ;;  %v6861_v39 = vmul.f32 %v12940_v37, %v12886_v24  ;;  %vm6926_vm12 = vcmp.ge.f32.partialorder %v6894_v6, 0.0  ;;  %v6890_v3 = vadd.f32 %v12947_v62, %v6854_v61 }
 0xb56   : > { %7173 = vst.msk [vmem:[%s12984_s17 + $0x28] sm:$0xff] %vm3558_vm9, %v7141_v35  ;;  %v6958_v35 = vmul.f32 0.01, %v6894_v6  ;;  %v6983_v29 = vsel %vm6919_vm10, %v6887_v5, %v6951_v44  ;;  %v6985_v20 = vsel %vm6921_vm11, %v6889_v57, %v6953_v31  ;;  %v6860_v5 = vmul.f32 %v12940_v37, %v12841_v22 }
 0xb57   : > { %v6897_v56 = vadd.f32 %v12947_v62, %v6861_v39  ;;  %vm6922_vm6 = vcmp.ge.f32.partialorder %v6890_v3, 0.0  ;;  %v6862_v57 = vmul.f32 %v12940_v37, %v12907_v27  ;;  %v6863_v31 = vmul.f32 %v12940_v37, %v12865_v0 }
 0xb58   : > { %v6990_v25 = vsel %vm6926_vm12, %v6894_v6, %v6958_v35  ;;  %v6896_v22 = vadd.f32 %v12947_v62, %v6860_v5  ;;  %v6865_v39 = vmul.f32 %v12940_v37, %v12929_v58 }
 0xb59   : > { %vm6929_vm7 = vcmp.ge.f32.partialorder %v6897_v56, 0.0  ;;  %v6898_v6 = vadd.f32 %v12947_v62, %v6862_v57  ;;  %v6899_v0 = vadd.f32 %v12947_v62, %v6863_v31 }
 0xb5a   : > { %v7043_v4 = vpop.permute.xlu1 %7042  ;;  %v7047_v26 = vpop.permute.xlu0 %7046  ;;  %v6960_v35 = vmul.f32 0.01, %v6896_v22  ;;  %vm6928_vm0 = vcmp.ge.f32.partialorder %v6896_v22, 0.0 }
 0xb5b   : > { %v7137_v9 = vadd.f32 %v7043_v4, %v6977_v13  ;;  %v7057_v46 = vpop.permute.xlu2 %7056  ;;  %v7139_v50 = vadd.f32 %v7047_v26, %v6979_v11  ;;  %v6857_v13 = vmul.f32 %v12940_v37, %v12817_v14  ;;  %v6859_v11 = vmul.f32 %v12940_v37, %v12883_v34 }
 0xb5c   : > { %v7144_v60 = vadd.f32 %v7057_v46, %v6984_v15  ;;  %v6954_v26 = vmul.f32 0.01, %v6890_v3  ;;  %v6961_v46 = vmul.f32 0.01, %v6897_v56  ;;  %vm6930_vm5 = vcmp.ge.f32.partialorder %v6898_v6, 0.0 }
 0xb5d   : > { %7169 = vst.msk [vmem:[%s12984_s17 + $0x8] sm:$0xff] %vm3558_vm9, %v7137_v9  ;;  %v6864_v9 = vmul.f32 %v12940_v37, %v12910_v63  ;;  %v6893_v14 = vadd.f32 %v12947_v62, %v6857_v13  ;;  %v6895_v15 = vadd.f32 %v12947_v62, %v6859_v11  ;;  %v6866_v13 = vmul.f32 %v12940_v37, %v12889_v40 }
 0xb5e   : > { %7176 = vst.msk [vmem:[%s12984_s17 + $0x40] sm:$0xff] %vm3558_vm9, %v7144_v60  ;;  %v6988_v60 = vsel %vm6924_vm1, %v6892_v19, %v6956_v47  ;;  %v6993_v43 = vsel %vm6929_vm7, %v6897_v56, %v6961_v46  ;;  %v6870_v19 = vmul.f32 %v12940_v37, %v12963_v23  ;;  %v6868_v11 = vmul.f32 %v12940_v37, %v12960_v1 }
 0xb5f   : > { %7171 = vst.msk [vmem:[%s12984_s17 + $0x18] sm:$0xff] %vm3558_vm9, %v7139_v50  ;;  %v6986_v50 = vsel %vm6922_vm6, %v6890_v3, %v6954_v26  ;;  %v6900_v17 = vadd.f32 %v12947_v62, %v6864_v9  ;;  %vm6925_vm8 = vcmp.ge.f32.partialorder %v6893_v14, 0.0  ;;  %vm6927_vm2 = vcmp.ge.f32.partialorder %v6895_v15, 0.0 }
 0xb60   : > { %v6962_v3 = vmul.f32 0.01, %v6898_v6  ;;  %v6963_v26 = vmul.f32 0.01, %v6899_v0  ;;  %v6873_v9 = vmul.f32 %v12940_v37, %v12991_v12  ;;  %vm6931_vm13 = vcmp.ge.f32.partialorder %v6899_v0, 0.0 }
 0xb61   : > { %vm6932_vm4 = vcmp.ge.f32.partialorder %v6900_v17, 0.0  ;;  %v6902_v40 = vadd.f32 %v12947_v62, %v6866_v13 }
 0xb62   : > { %v7049_v59 = vpop.permute.xlu1 %7048  ;;  %v7053_v8 = vpop.permute.xlu0 %7052 }
 0xb63   : > { %v7140_v42 = vadd.f32 %v7049_v59, %v6980_v36  ;;  %v7063_v2 = vpop.permute.xlu2 %7062  ;;  %v7142_v18 = vadd.f32 %v7053_v8, %v6982_v21  ;;  %v6957_v59 = vmul.f32 0.01, %v6893_v14  ;;  %v6959_v36 = vmul.f32 0.01, %v6895_v15 }
 0xb64   : > { %v7147_v53 = vadd.f32 %v7063_v2, %v6987_v38  ;;  %v6867_v21 = vmul.f32 %v12940_v37, %v12932_v30  ;;  %v6964_v8 = vmul.f32 0.01, %v6900_v17  ;;  %vm6934_vm10 = vcmp.ge.f32.partialorder %v6902_v40, 0.0 }
 0xb65   : > { %7172 = vst.msk [vmem:[%s12984_s17 + $0x20] sm:$0xff] %vm3558_vm9, %v7140_v42  ;;  %v6989_v42 = vsel %vm6925_vm8, %v6893_v14, %v6957_v59  ;;  %v6991_v2 = vsel %vm6927_vm2, %v6895_v15, %v6959_v36  ;;  %v6904_v14 = vadd.f32 %v12947_v62, %v6868_v11  ;;  %v6995_v15 = vsel %vm6931_vm13, %v6899_v0, %v6963_v26 }
 0xb66   : > { %7179 = vst.msk [vmem:[%s12984_s17 + $0x58] sm:$0xff] %vm3558_vm9, %v7147_v53  ;;  %v6996_v61 = vsel %vm6932_vm4, %v6900_v17, %v6964_v8 }
 0xb67   : > { %7174 = vst.msk [vmem:[%s12984_s17 + $0x30] sm:$0xff] %vm3558_vm9, %v7142_v18  ;;  %v6903_v18 = vadd.f32 %v12947_v62, %v6867_v21  ;;  %v6968_v5 = vmul.f32 0.01, %v6904_v14  ;;  %vm6936_vm11 = vcmp.ge.f32.partialorder %v6904_v14, 0.0 }
 0xb69   : > { %vm6935_vm15 = vcmp.ge.f32.partialorder %v6903_v18, 0.0 }
 0xb6a   : > { %v7055_v54 = vpop.permute.xlu1 %7054  ;;  %v7059_v41 = vpop.permute.xlu0 %7058 }
 0xb6b   : > { %v7143_v24 = vadd.f32 %v7055_v54, %v6983_v29  ;;  %v7069_v51 = vpop.permute.xlu2 %7068  ;;  %v7145_v10 = vadd.f32 %v7059_v41, %v6985_v20  ;;  %v6967_v54 = vmul.f32 0.01, %v6903_v18  ;;  %v6901_v29 = vadd.f32 %v12947_v62, %v6865_v39 }
 0xb6c   : > { %v7150_v4 = vadd.f32 %v7069_v51, %v6990_v25  ;;  %v6992_v20 = vsel %vm6928_vm0, %v6896_v22, %v6960_v35  ;;  %v6994_v41 = vsel %vm6930_vm5, %v6898_v6, %v6962_v3  ;;  %v6875_v3 = vmul.f32 %v12940_v37, %v12966_v48 }
 0xb6d   : > { %7175 = vst.msk [vmem:[%s12984_s17 + $0x38] sm:$0xff] %vm3558_vm9, %v7143_v24  ;;  %v6906_v24 = vadd.f32 %v12947_v62, %v6870_v19  ;;  %v6999_v25 = vsel %vm6935_vm15, %v6903_v18, %v6967_v54  ;;  %v6965_v47 = vmul.f32 0.01, %v6901_v29  ;;  %vm6933_vm14 = vcmp.ge.f32.partialorder %v6901_v29, 0.0 }
 0xb6e   : > { %7182 = vst.msk [vmem:[%s12984_s17 + $0x70] sm:$0xff] %vm3558_vm9, %v7150_v4  ;;  %v6874_v18 = vmul.f32 %v12940_v37, %v13008_v28  ;;  %v6911_v0 = vadd.f32 %v12947_v62, %v6875_v3 }
 0xb6f   : > { %7177 = vst.msk [vmem:[%s12984_s17 + $0x48] sm:$0xff] %vm3558_vm9, %v7145_v10  ;;  %v6970_v46 = vmul.f32 0.01, %v6906_v24  ;;  %vm6938_vm3 = vcmp.ge.f32.partialorder %v6906_v24, 0.0 }
 0xb70   : > { %vm6943_vm2 = vcmp.ge.f32.partialorder %v6911_v0, 0.0 }
 0xb71   : > { %v7002_v17 = vsel %vm6938_vm3, %v6906_v24, %v6970_v46 }
 0xb72   : > { %v7061_v34 = vpop.permute.xlu1 %7060  ;;  %v7065_v32 = vpop.permute.xlu0 %7064 }
 0xb73   : > { %v7146_v63 = vadd.f32 %v7061_v34, %v6986_v50  ;;  %v7075_v55 = vpop.permute.xlu2 %7074  ;;  %v7148_v45 = vadd.f32 %v7065_v32, %v6988_v60  ;;  %v6997_v34 = vsel %vm6933_vm14, %v6901_v29, %v6965_v47  ;;  %v6909_v60 = vadd.f32 %v12947_v62, %v6873_v9 }
 0xb74   : > { %v7153_v33 = vadd.f32 %v7075_v55, %v6993_v43  ;;  %v6869_v43 = vmul.f32 %v12940_v37, %v12913_v52 }
 0xb75   : > { %7178 = vst.msk [vmem:[%s12984_s17 + $0x50] sm:$0xff] %vm3558_vm9, %v7146_v63  ;;  %v6973_v57 = vmul.f32 0.01, %v6909_v60  ;;  %vm6941_vm12 = vcmp.ge.f32.partialorder %v6909_v60, 0.0 }
 0xb76   : > { %7185 = vst.msk [vmem:[%s12984_s17 + $0x88] sm:$0xff] %vm3558_vm9, %v7153_v33  ;;  %v6966_v33 = vmul.f32 0.01, %v6902_v40  ;;  %v6905_v59 = vadd.f32 %v12947_v62, %v6869_v43 }
 0xb77   : > { %7180 = vst.msk [vmem:[%s12984_s17 + $0x60] sm:$0xff] %vm3558_vm9, %v7148_v45  ;;  %v6871_v45 = vmul.f32 %v12940_v37, %v12988_v7  ;;  %v7000_v7 = vsel %vm6936_vm11, %v6904_v14, %v6968_v5 }
 0xb78   : > { %v6998_v21 = vsel %vm6934_vm10, %v6902_v40, %v6966_v33  ;;  %vm6937_vm6 = vcmp.ge.f32.partialorder %v6905_v59, 0.0 }
 0xb79   : > { %v6907_v36 = vadd.f32 %v12947_v62, %v6871_v45 }
 0xb7a   : > { %v7067_v27 = vpop.permute.xlu1 %7066  ;;  %v7071_v38 = vpop.permute.xlu0 %7070 }
 0xb7b   : > { %v7149_v30 = vadd.f32 %v7067_v27, %v6989_v42  ;;  %v7081_v53 = vpop.permute.xlu2 %7080  ;;  %v7151_v16 = vadd.f32 %v7071_v38, %v6991_v2  ;;  %v7005_v27 = vsel %vm6941_vm12, %v6909_v60, %v6973_v57  ;;  %v6872_v38 = vmul.f32 %v12940_v37, %v12935_v49 }
 0xb7c   : > { %v7156_v44 = vadd.f32 %v7081_v53, %v6996_v61  ;;  %v6971_v53 = vmul.f32 0.01, %v6907_v36  ;;  %vm6939_vm1 = vcmp.ge.f32.partialorder %v6907_v36, 0.0  ;;  %v6975_v37 = vmul.f32 0.01, %v6911_v0 }
 0xb7d   : > { %7181 = vst.msk [vmem:[%s12984_s17 + $0x68] sm:$0xff] %vm3558_vm9, %v7149_v30  ;;  %v6969_v30 = vmul.f32 0.01, %v6905_v59  ;;  %v6908_v61 = vadd.f32 %v12947_v62, %v6872_v38 }
 0xb7e   : > { %7188 = vst.msk [vmem:[%s12984_s17 + $0xa0] sm:$0xff] %vm3558_vm9, %v7156_v44  ;;  %v7003_v49 = vsel %vm6939_vm1, %v6907_v36, %v6971_v53 }
 0xb7f   : > { %7183 = vst.msk [vmem:[%s12984_s17 + $0x78] sm:$0xff] %vm3558_vm9, %v7151_v16  ;;  %v6910_v16 = vadd.f32 %v12947_v62, %v6874_v18  ;;  %v7001_v31 = vsel %vm6937_vm6, %v6905_v59, %v6969_v30  ;;  %v6972_v19 = vmul.f32 0.01, %v6908_v61  ;;  %vm6940_vm7 = vcmp.ge.f32.partialorder %v6908_v61, 0.0 }
 0xb81   : > { %v6974_v54 = vmul.f32 0.01, %v6910_v16  ;;  %vm6942_vm8 = vcmp.ge.f32.partialorder %v6910_v16, 0.0 }
 0xb82   : > { %v7073_v58 = vpop.permute.xlu1 %7072  ;;  %v7077_v56 = vpop.permute.xlu0 %7076 }
 0xb83   : > { %v7152_v23 = vadd.f32 %v7073_v58, %v6992_v20  ;;  %v7087_v51 = vpop.permute.xlu2 %7086  ;;  %v7154_v10 = vadd.f32 %v7077_v56, %v6994_v41  ;;  %v7004_v58 = vsel %vm6940_vm7, %v6908_v61, %v6972_v19  ;;  %v7006_v20 = vsel %vm6942_vm8, %v6910_v16, %v6974_v54 }
 0xb84   : > { %v7159_v4 = vadd.f32 %v7087_v51, %v6999_v25 }
 0xb85   : > { %7184 = vst.msk [vmem:[%s12984_s17 + $0x80] sm:$0xff] %vm3558_vm9, %v7152_v23  ;;  %v7007_v23 = vsel %vm6943_vm2, %v6911_v0, %v6975_v37 }
 0xb86   : > { %7191 = vst.msk [vmem:[%s12984_s17 + $0xb8] sm:$0xff] %vm3558_vm9, %v7159_v4 }
 0xb87   : > { %7186 = vst.msk [vmem:[%s12984_s17 + $0x90] sm:$0xff] %vm3558_vm9, %v7154_v10 }
 0xb8a   : > { %v7079_v1 = vpop.permute.xlu1 %7078  ;;  %v7083_v50 = vpop.permute.xlu0 %7082 }
 0xb8b   : > { %v7155_v12 = vadd.f32 %v7079_v1, %v6995_v15  ;;  %v7093_v32 = vpop.permute.xlu2 %7092  ;;  %v7157_v63 = vadd.f32 %v7083_v50, %v6997_v34 }
 0xb8c   : > { %v7162_v55 = vadd.f32 %v7093_v32, %v7002_v17 }
 0xb8d   : > { %7187 = vst.msk [vmem:[%s12984_s17 + $0x98] sm:$0xff] %vm3558_vm9, %v7155_v12 }
 0xb8e   : > { %7194 = vst.msk [vmem:[%s12984_s17 + $0xd0] sm:$0xff] %vm3558_vm9, %v7162_v55 }
 0xb8f   : > { %7189 = vst.msk [vmem:[%s12984_s17 + $0xa8] sm:$0xff] %vm3558_vm9, %v7157_v63 }
 0xb92   : > { %v7085_v52 = vpop.permute.xlu1 %7084  ;;  %v7089_v8 = vpop.permute.xlu0 %7088 }
 0xb93   : > { %v7158_v22 = vadd.f32 %v7085_v52, %v6998_v21  ;;  %v7099_v6 = vpop.permute.xlu2 %7098  ;;  %v7160_v42 = vadd.f32 %v7089_v8, %v7000_v7 }
 0xb94   : > { %v7165_v2 = vadd.f32 %v7099_v6, %v7005_v27 }
 0xb95   : > { %7190 = vst.msk [vmem:[%s12984_s17 + $0xb0] sm:$0xff] %vm3558_vm9, %v7158_v22 }
 0xb96   : > { %7197 = vst.msk [vmem:[%s12984_s17 + $0xe8] sm:$0xff] %vm3558_vm9, %v7165_v2 }
 0xb97   : > { %7192 = vst.msk [vmem:[%s12984_s17 + $0xc0] sm:$0xff] %vm3558_vm9, %v7160_v42 }
 0xb9a   : > { %v7091_v44 = vpop.permute.xlu1 %7090  ;;  %v7095_v39 = vpop.permute.xlu0 %7094 }
 0xb9b   : > { %v7161_v35 = vadd.f32 %v7091_v44, %v7001_v31  ;;  %v7163_v28 = vadd.f32 %v7095_v39, %v7003_v49 }
 0xb9d   : > { %7193 = vst.msk [vmem:[%s12984_s17 + $0xc8] sm:$0xff] %vm3558_vm9, %v7161_v35 }
 0xb9e   : > { %7195 = vst.msk [vmem:[%s12984_s17 + $0xd8] sm:$0xff] %vm3558_vm9, %v7163_v28 }
 0xba2   : > { %v7097_v29 = vpop.permute.xlu1 %7096  ;;  %v7101_v41 = vpop.permute.xlu0 %7100 }
 0xba3   : > { %v7164_v56 = vadd.f32 %v7097_v29, %v7004_v58  ;;  %v7166_v24 = vadd.f32 %v7101_v41, %v7006_v20 }
 0xba5   : > { %7196 = vst.msk [vmem:[%s12984_s17 + $0xe0] sm:$0xff] %vm3558_vm9, %v7164_v56 }
 0xba6   : > { %7198 = vst.msk [vmem:[%s12984_s17 + $0xf0] sm:$0xff] %vm3558_vm9, %v7166_v24 }
 0xbaa   : > { %v7103_v48 = vpop.permute.xlu1 %7102 }
 0xbab   : > { %v7167_v51 = vadd.f32 %v7103_v48, %v7007_v23 }
 0xbad   : > { %7199 = vst.msk [vmem:[%s12984_s17 + $0xf8] sm:$0xff] %vm3558_vm9, %v7167_v51 }
 0xbae PF: > { %s16_s21 = sadd.s32 1, %s7465_s21  }
 0xbaf   : > { %p13_p4 = scmp.ge.s32.totalorder %s16_s21, 4  }
 0xbb1   :  { %15 = sbr.rel (!%p13_p4) target bundleno = 1 (0x1), region = 82 }

</bundles_post_ra>
